<compile_context>
chip_gen: v7x
topology: tpu7x:2x2x1
jax: 0.10.0
libtpu: 0.0.40
codegen_flags: <defaults>
</compile_context>

<pallas_src>
import functools

import jax
import jax.numpy as jnp
from jax.experimental import pallas as pl
from jax.experimental.pallas import tpu as pltpu

# --- small, runnable configuration (structure identical to the module) ---
LATENT_DIM = 100
IMG_SHAPE = (3, 16, 16)                                 # small spatial size for the demo
N_OUT = IMG_SHAPE[0] * IMG_SHAPE[1] * IMG_SHAPE[2]      # 768 (multiple of 128 -> lane dense)
HIDDEN = (256, 512, 1024, 2048)
LEAKY_SLOPE = 0.2

LATENT_PAD = 128     # pad latent dim 100 -> 128 (zeros) for lane alignment
ROW_ALIGN = 16       # bf16 sublane packing for the x tile
TM_MAX = 512         # large-batch tile (amortizes per-step + MXU fill/drain overhead)


def _round_up(n, m):
    return ((n + m - 1) // m) * m


def _leaky_relu(x, slope):
    return jnp.where(x > 0, x, slope * x)


def generator_kernel(x_ref,
                     w1_ref, b1_ref,
                     w2_ref, b2_ref,
                     w3_ref, b3_ref,
                     w4_ref, b4_ref,
                     w5_ref, b5_ref,
                     out_ref):
    """Fused 5-layer MLP: 4x (matmul + bias + LeakyReLU) then matmul + bias + tanh.

    Weights arrive as bf16 blocks (single-buffered, VMEM-resident across the
    batch grid); x arrives already in bf16. Intermediate activations are cast
    to bf16 right before each dot so the MXU runs bf16 x bf16 with f32
    accumulation. Biases / activations stay f32.
    """
    h = x_ref[...]                                     # bf16 already

    h = jnp.dot(h, w1_ref[...],
                preferred_element_type=jnp.float32) + b1_ref[...]
    h = _leaky_relu(h, LEAKY_SLOPE)

    h = jnp.dot(h.astype(jnp.bfloat16), w2_ref[...],
                preferred_element_type=jnp.float32) + b2_ref[...]
    h = _leaky_relu(h, LEAKY_SLOPE)

    h = jnp.dot(h.astype(jnp.bfloat16), w3_ref[...],
                preferred_element_type=jnp.float32) + b3_ref[...]
    h = _leaky_relu(h, LEAKY_SLOPE)

    h = jnp.dot(h.astype(jnp.bfloat16), w4_ref[...],
                preferred_element_type=jnp.float32) + b4_ref[...]
    h = _leaky_relu(h, LEAKY_SLOPE)

    h = jnp.dot(h.astype(jnp.bfloat16), w5_ref[...],
                preferred_element_type=jnp.float32) + b5_ref[...]
    out_ref[...] = jnp.tanh(h)


def init_params(key):
    """Deterministic f32 params mimicking nn.Linear default init (U[-1/sqrt(fan_in), +]).

    Weights are (in, out); the first-layer weight is zero-padded along K
    (100 -> 128) here, ONCE. Biases are (1, out) f32.
    """
    dims = (LATENT_DIM,) + HIDDEN + (N_OUT,)
    params = []
    for i in range(len(dims) - 1):
        fan_in, fan_out = dims[i], dims[i + 1]
        key, kw, kb = jax.random.split(key, 3)
        bound = 1.0 / (fan_in ** 0.5)
        w = jax.random.uniform(kw, (fan_in, fan_out), jnp.float32, -bound, bound)
        b = jax.random.uniform(kb, (1, fan_out), jnp.float32, -bound, bound)
        if i == 0:
            # pad K (latent) once; padded rows are zero so they contribute nothing
            w = jnp.pad(w, ((0, LATENT_PAD - LATENT_DIM), (0, 0)))
        params.append((w, b))
    return params


def prepare_params(params_f32):
    """One-time cast of weights to bf16 for the kernel (biases stay f32)."""
    return [(w.astype(jnp.bfloat16), b) for (w, b) in params_f32]


def _batch_tiling(B):
    """Pick (TM, n_tiles) so padding waste is small and rows stay 16-aligned."""
    if B <= TM_MAX:
        return _round_up(max(B, 1), ROW_ALIGN), 1
    n_tiles = -(-B // TM_MAX)                     # ceil(B / TM_MAX)
    tm = _round_up(-(-B // n_tiles), ROW_ALIGN)   # near-equal split, row-aligned
    return tm, n_tiles


@functools.partial(jax.jit, static_argnames=("img_shape",))
def vanilla_gan_generator(x, params, img_shape=IMG_SHAPE):
    """x: (B, LATENT_DIM) latent vectors. Returns (B, C, H, W) f32 images."""
    B = x.shape[0]

    TM, n_tiles = _batch_tiling(B)
    b_pad = TM * n_tiles
    grid = (n_tiles,)

    # single pad op on the already-bf16 input: batch rows -> b_pad (zeros),
    # latent 100 -> 128 (zeros)
    x_p = jnp.pad(x.astype(jnp.bfloat16),
                  ((0, b_pad - B), (0, LATENT_PAD - LATENT_DIM)))

    (w1, b1), (w2, b2), (w3, b3), (w4, b4), (w5, b5) = params

    def resident_spec(a):
        # full-array block, constant index_map -> stays VMEM-resident over the
        # grid; Buffered(1) because a grid-invariant block never needs a second
        # (prefetch) buffer -> halves weight VMEM.
        return pl.BlockSpec(a.shape, lambda i: (0, 0),
                            pipeline_mode=pl.Buffered(1))

    in_specs = [pl.BlockSpec((TM, LATENT_PAD), lambda i: (i, 0))]
    for w, b in params:
        in_specs.append(resident_spec(w))
        in_specs.append(resident_spec(b))

    out_flat = pl.pallas_call(
        generator_kernel,
        out_shape=jax.ShapeDtypeStruct((b_pad, N_OUT), jnp.float32),
        grid=grid,
        in_specs=in_specs,
        out_specs=pl.BlockSpec((TM, N_OUT), lambda i: (i, 0)),
        compiler_params=pltpu.CompilerParams(
            dimension_semantics=("parallel",),
            # single-buffered bf16 weights (~8.3 MiB) + TM=512 activations
            # (~6 MiB) + double-buffered x/out tiles (~3.5 MiB) << 40 MiB;
            # fits v7x's 64 MiB physical VMEM with headroom, trivial on v5e/v6e.
            vmem_limit_bytes=40 << 20,
        ),
    )(x_p, w1, b1, w2, b2, w3, b3, w4, b4, w5, b5)

    out_flat = out_flat[:B]                        # drop batch padding
    return out_flat.reshape(B, *img_shape)         # NCHW, like torch .view()


def reference_bf16(x, params):
    """Pure-JAX reference mirroring the kernel's bf16-weight / f32-accum math."""
    h = jnp.pad(x.astype(jnp.bfloat16), ((0, 0), (0, LATENT_PAD - LATENT_DIM)))
    for i, (w, b) in enumerate(params):
        h = jnp.dot(h, w, preferred_element_type=jnp.float32) + b
        if i < len(params) - 1:
            h = jnp.where(h > 0, h, LEAKY_SLOPE * h)
            h = h.astype(jnp.bfloat16)
        else:
            h = jnp.tanh(h)
    return h.reshape(x.shape[0], *IMG_SHAPE)


def reference_f32(x, params_f32):
    """Pure-f32 reference matching the PyTorch module's math."""
    h = x.astype(jnp.float32)
    for i, (w, b) in enumerate(params_f32):
        w_eff = w[:LATENT_DIM] if i == 0 else w    # undo the latent zero-padding
        h = jnp.dot(h, w_eff, preferred_element_type=jnp.float32) + b
        if i < len(params_f32) - 1:
            h = jnp.where(h > 0, h, LEAKY_SLOPE * h)
        else:
            h = jnp.tanh(h)
    return h.reshape(x.shape[0], *IMG_SHAPE)


if __name__ == "__main__":
    key = jax.random.PRNGKey(0)
    k_param, k_x = jax.random.split(key)

    params_f32 = init_params(k_param)
    params = prepare_params(params_f32)            # bf16 weight cast, done once

    batch = 2
    x = jax.random.normal(k_x, (batch, LATENT_DIM), jnp.float32)

    out = vanilla_gan_generator(x, params)
    out = jax.block_until_ready(out)
    assert out.shape == (batch, *IMG_SHAPE), out.shape

    # (1) tight check against a reference mirroring the kernel's own bf16 math
    ref_b = reference_bf16(x, params)
    assert jnp.allclose(out, ref_b, atol=1e-2, rtol=1e-2), "mismatch vs bf16-mirror reference"

    # (2) accuracy vs the pure-f32 PyTorch-style math (bounds bf16 rounding error)
    ref_f = reference_f32(x, params_f32)
    err = float(jnp.max(jnp.abs(out - ref_f)))
    print(f"max |kernel - f32 reference| = {err:.3e}")
    assert err < 5e-2, "kernel drifted too far from the f32 reference"

    print("KERNEL_OK")
</pallas_src>

<mosaic_0001>
module attributes {stable_mosaic.version = 11 : i64} {
  func.func @generator_kernel(%arg0: i32, %arg1: memref<16x128xbf16, #tpu.memory_space<vmem>>, %arg2: memref<128x256xbf16, #tpu.memory_space<vmem>>, %arg3: memref<1x256xf32, #tpu.memory_space<vmem>>, %arg4: memref<256x512xbf16, #tpu.memory_space<vmem>>, %arg5: memref<1x512xf32, #tpu.memory_space<vmem>>, %arg6: memref<512x1024xbf16, #tpu.memory_space<vmem>>, %arg7: memref<1x1024xf32, #tpu.memory_space<vmem>>, %arg8: memref<1024x2048xbf16, #tpu.memory_space<vmem>>, %arg9: memref<1x2048xf32, #tpu.memory_space<vmem>>, %arg10: memref<2048x768xbf16, #tpu.memory_space<vmem>>, %arg11: memref<1x768xf32, #tpu.memory_space<vmem>>, %arg12: memref<16x768xf32, #tpu.memory_space<vmem>>) attributes {dimension_semantics = [#tpu.dimension_semantics<parallel>], iteration_bounds = array<i64: 1>, scalar_prefetch = 0 : i64, scratch_operands = 0 : i64, tpu.core_type = #tpu.core_type<tc>, window_params = [{transform_indices = @transform_0, window_bounds = array<i64: 16, 128>}, {pipeline_mode = #tpu.pipeline_mode<synchronous>, transform_indices = @transform_1, window_bounds = array<i64: 128, 256>}, {pipeline_mode = #tpu.pipeline_mode<synchronous>, transform_indices = @transform_2, window_bounds = array<i64: 1, 256>}, {pipeline_mode = #tpu.pipeline_mode<synchronous>, transform_indices = @transform_3, window_bounds = array<i64: 256, 512>}, {pipeline_mode = #tpu.pipeline_mode<synchronous>, transform_indices = @transform_4, window_bounds = array<i64: 1, 512>}, {pipeline_mode = #tpu.pipeline_mode<synchronous>, transform_indices = @transform_5, window_bounds = array<i64: 512, 1024>}, {pipeline_mode = #tpu.pipeline_mode<synchronous>, transform_indices = @transform_6, window_bounds = array<i64: 1, 1024>}, {pipeline_mode = #tpu.pipeline_mode<synchronous>, transform_indices = @transform_7, window_bounds = array<i64: 1024, 2048>}, {pipeline_mode = #tpu.pipeline_mode<synchronous>, transform_indices = @transform_8, window_bounds = array<i64: 1, 2048>}, {pipeline_mode = #tpu.pipeline_mode<synchronous>, transform_indices = @transform_9, window_bounds = array<i64: 2048, 768>}, {pipeline_mode = #tpu.pipeline_mode<synchronous>, transform_indices = @transform_10, window_bounds = array<i64: 1, 768>}, {transform_indices = @transform_11, window_bounds = array<i64: 16, 768>}]} {
    %c0 = arith.constant 0 : index
    %c0_0 = arith.constant 0 : index
    %0 = vector.load %arg1[%c0, %c0_0] : memref<16x128xbf16, #tpu.memory_space<vmem>>, vector<16x128xbf16>
    %c0_1 = arith.constant 0 : index
    %c0_2 = arith.constant 0 : index
    %1 = vector.load %arg2[%c0_1, %c0_2] : memref<128x256xbf16, #tpu.memory_space<vmem>>, vector<128x256xbf16>
    %cst = arith.constant dense<0.000000e+00> : vector<16x256xf32>
    %2 = tpu.matmul %0, %1, %cst {dimension_numbers = #tpu.dot_dimension_numbers<[1], [0], [0], [1], [0, 0, 1, 1], [], []>} : vector<16x128xbf16>, vector<128x256xbf16>, vector<16x256xf32> -> vector<16x256xf32>
    %c0_3 = arith.constant 0 : index
    %c0_4 = arith.constant 0 : index
    %3 = vector.load %arg3[%c0_3, %c0_4] : memref<1x256xf32, #tpu.memory_space<vmem>>, vector<1x256xf32>
    %4 = vector.broadcast %3 : vector<1x256xf32> to vector<16x256xf32>
    %5 = arith.addf %2, %4 : vector<16x256xf32>
    %cst_5 = arith.constant 0.000000e+00 : f32
    %6 = vector.broadcast %cst_5 : f32 to vector<16x256xf32>
    %7 = arith.cmpf ogt, %5, %6 : vector<16x256xf32>
    %cst_6 = arith.constant 2.000000e-01 : f32
    %8 = vector.broadcast %cst_6 : f32 to vector<16x256xf32>
    %9 = arith.mulf %8, %5 : vector<16x256xf32>
    %10 = arith.select %7, %5, %9 : vector<16x256xi1>, vector<16x256xf32>
    %11 = arith.truncf %10 : vector<16x256xf32> to vector<16x256xbf16>
    %c0_7 = arith.constant 0 : index
    %c0_8 = arith.constant 0 : index
    %12 = vector.load %arg4[%c0_7, %c0_8] : memref<256x512xbf16, #tpu.memory_space<vmem>>, vector<256x512xbf16>
    %cst_9 = arith.constant dense<0.000000e+00> : vector<16x512xf32>
    %13 = tpu.matmul %11, %12, %cst_9 {dimension_numbers = #tpu.dot_dimension_numbers<[1], [0], [0], [1], [0, 0, 1, 1], [], []>} : vector<16x256xbf16>, vector<256x512xbf16>, vector<16x512xf32> -> vector<16x512xf32>
    %c0_10 = arith.constant 0 : index
    %c0_11 = arith.constant 0 : index
    %14 = vector.load %arg5[%c0_10, %c0_11] : memref<1x512xf32, #tpu.memory_space<vmem>>, vector<1x512xf32>
    %15 = vector.broadcast %14 : vector<1x512xf32> to vector<16x512xf32>
    %16 = arith.addf %13, %15 : vector<16x512xf32>
    %cst_12 = arith.constant 0.000000e+00 : f32
    %17 = vector.broadcast %cst_12 : f32 to vector<16x512xf32>
    %18 = arith.cmpf ogt, %16, %17 : vector<16x512xf32>
    %cst_13 = arith.constant 2.000000e-01 : f32
    %19 = vector.broadcast %cst_13 : f32 to vector<16x512xf32>
    %20 = arith.mulf %19, %16 : vector<16x512xf32>
    %21 = arith.select %18, %16, %20 : vector<16x512xi1>, vector<16x512xf32>
    %22 = arith.truncf %21 : vector<16x512xf32> to vector<16x512xbf16>
    %c0_14 = arith.constant 0 : index
    %c0_15 = arith.constant 0 : index
    %23 = vector.load %arg6[%c0_14, %c0_15] : memref<512x1024xbf16, #tpu.memory_space<vmem>>, vector<512x1024xbf16>
    %cst_16 = arith.constant dense<0.000000e+00> : vector<16x1024xf32>
    %24 = tpu.matmul %22, %23, %cst_16 {dimension_numbers = #tpu.dot_dimension_numbers<[1], [0], [0], [1], [0, 0, 1, 1], [], []>} : vector<16x512xbf16>, vector<512x1024xbf16>, vector<16x1024xf32> -> vector<16x1024xf32>
    %c0_17 = arith.constant 0 : index
    %c0_18 = arith.constant 0 : index
    %25 = vector.load %arg7[%c0_17, %c0_18] : memref<1x1024xf32, #tpu.memory_space<vmem>>, vector<1x1024xf32>
    %26 = vector.broadcast %25 : vector<1x1024xf32> to vector<16x1024xf32>
    %27 = arith.addf %24, %26 : vector<16x1024xf32>
    %cst_19 = arith.constant 0.000000e+00 : f32
    %28 = vector.broadcast %cst_19 : f32 to vector<16x1024xf32>
    %29 = arith.cmpf ogt, %27, %28 : vector<16x1024xf32>
    %cst_20 = arith.constant 2.000000e-01 : f32
    %30 = vector.broadcast %cst_20 : f32 to vector<16x1024xf32>
    %31 = arith.mulf %30, %27 : vector<16x1024xf32>
    %32 = arith.select %29, %27, %31 : vector<16x1024xi1>, vector<16x1024xf32>
    %33 = arith.truncf %32 : vector<16x1024xf32> to vector<16x1024xbf16>
    %c0_21 = arith.constant 0 : index
    %c0_22 = arith.constant 0 : index
    %34 = vector.load %arg8[%c0_21, %c0_22] : memref<1024x2048xbf16, #tpu.memory_space<vmem>>, vector<1024x2048xbf16>
    %cst_23 = arith.constant dense<0.000000e+00> : vector<16x2048xf32>
    %35 = tpu.matmul %33, %34, %cst_23 {dimension_numbers = #tpu.dot_dimension_numbers<[1], [0], [0], [1], [0, 0, 1, 1], [], []>} : vector<16x1024xbf16>, vector<1024x2048xbf16>, vector<16x2048xf32> -> vector<16x2048xf32>
    %c0_24 = arith.constant 0 : index
    %c0_25 = arith.constant 0 : index
    %36 = vector.load %arg9[%c0_24, %c0_25] : memref<1x2048xf32, #tpu.memory_space<vmem>>, vector<1x2048xf32>
    %37 = vector.broadcast %36 : vector<1x2048xf32> to vector<16x2048xf32>
    %38 = arith.addf %35, %37 : vector<16x2048xf32>
    %cst_26 = arith.constant 0.000000e+00 : f32
    %39 = vector.broadcast %cst_26 : f32 to vector<16x2048xf32>
    %40 = arith.cmpf ogt, %38, %39 : vector<16x2048xf32>
    %cst_27 = arith.constant 2.000000e-01 : f32
    %41 = vector.broadcast %cst_27 : f32 to vector<16x2048xf32>
    %42 = arith.mulf %41, %38 : vector<16x2048xf32>
    %43 = arith.select %40, %38, %42 : vector<16x2048xi1>, vector<16x2048xf32>
    %44 = arith.truncf %43 : vector<16x2048xf32> to vector<16x2048xbf16>
    %c0_28 = arith.constant 0 : index
    %c0_29 = arith.constant 0 : index
    %45 = vector.load %arg10[%c0_28, %c0_29] : memref<2048x768xbf16, #tpu.memory_space<vmem>>, vector<2048x768xbf16>
    %cst_30 = arith.constant dense<0.000000e+00> : vector<16x768xf32>
    %46 = tpu.matmul %44, %45, %cst_30 {dimension_numbers = #tpu.dot_dimension_numbers<[1], [0], [0], [1], [0, 0, 1, 1], [], []>} : vector<16x2048xbf16>, vector<2048x768xbf16>, vector<16x768xf32> -> vector<16x768xf32>
    %c0_31 = arith.constant 0 : index
    %c0_32 = arith.constant 0 : index
    %47 = vector.load %arg11[%c0_31, %c0_32] : memref<1x768xf32, #tpu.memory_space<vmem>>, vector<1x768xf32>
    %48 = vector.broadcast %47 : vector<1x768xf32> to vector<16x768xf32>
    %49 = arith.addf %46, %48 : vector<16x768xf32>
    %50 = math.tanh %49 : vector<16x768xf32>
    %c0_33 = arith.constant 0 : index
    %c0_34 = arith.constant 0 : index
    %51 = vector.load %arg12[%c0_33, %c0_34] : memref<16x768xf32, #tpu.memory_space<vmem>>, vector<16x768xf32>
    tpu.vector_store %arg12[%c0_33, %c0_34], %50 {strides = array<i32>} : memref<16x768xf32, #tpu.memory_space<vmem>>, vector<16x768xf32>,
    return
  }
  func.func @transform_0(%arg0: i32) -> (i32, i32) {
    %c0_i32 = arith.constant 0 : i32
    %c0_i32_0 = arith.constant 0 : i32
    return %arg0, %c0_i32 : i32, i32
  }
  func.func @transform_1(%arg0: i32) -> (i32, i32) {
    %c0_i32 = arith.constant 0 : i32
    %c0_i32_0 = arith.constant 0 : i32
    %c0_i32_1 = arith.constant 0 : i32
    return %c0_i32, %c0_i32_0 : i32, i32
  }
  func.func @transform_2(%arg0: i32) -> (i32, i32) {
    %c0_i32 = arith.constant 0 : i32
    %c0_i32_0 = arith.constant 0 : i32
    %c0_i32_1 = arith.constant 0 : i32
    return %c0_i32, %c0_i32_0 : i32, i32
  }
  func.func @transform_3(%arg0: i32) -> (i32, i32) {
    %c0_i32 = arith.constant 0 : i32
    %c0_i32_0 = arith.constant 0 : i32
    %c0_i32_1 = arith.constant 0 : i32
    return %c0_i32, %c0_i32_0 : i32, i32
  }
  func.func @transform_4(%arg0: i32) -> (i32, i32) {
    %c0_i32 = arith.constant 0 : i32
    %c0_i32_0 = arith.constant 0 : i32
    %c0_i32_1 = arith.constant 0 : i32
    return %c0_i32, %c0_i32_0 : i32, i32
  }
  func.func @transform_5(%arg0: i32) -> (i32, i32) {
    %c0_i32 = arith.constant 0 : i32
    %c0_i32_0 = arith.constant 0 : i32
    %c0_i32_1 = arith.constant 0 : i32
    return %c0_i32, %c0_i32_0 : i32, i32
  }
  func.func @transform_6(%arg0: i32) -> (i32, i32) {
    %c0_i32 = arith.constant 0 : i32
    %c0_i32_0 = arith.constant 0 : i32
    %c0_i32_1 = arith.constant 0 : i32
    return %c0_i32, %c0_i32_0 : i32, i32
  }
  func.func @transform_7(%arg0: i32) -> (i32, i32) {
    %c0_i32 = arith.constant 0 : i32
    %c0_i32_0 = arith.constant 0 : i32
    %c0_i32_1 = arith.constant 0 : i32
    return %c0_i32, %c0_i32_0 : i32, i32
  }
  func.func @transform_8(%arg0: i32) -> (i32, i32) {
    %c0_i32 = arith.constant 0 : i32
    %c0_i32_0 = arith.constant 0 : i32
    %c0_i32_1 = arith.constant 0 : i32
    return %c0_i32, %c0_i32_0 : i32, i32
  }
  func.func @transform_9(%arg0: i32) -> (i32, i32) {
    %c0_i32 = arith.constant 0 : i32
    %c0_i32_0 = arith.constant 0 : i32
    %c0_i32_1 = arith.constant 0 : i32
    return %c0_i32, %c0_i32_0 : i32, i32
  }
  func.func @transform_10(%arg0: i32) -> (i32, i32) {
    %c0_i32 = arith.constant 0 : i32
    %c0_i32_0 = arith.constant 0 : i32
    %c0_i32_1 = arith.constant 0 : i32
    return %c0_i32, %c0_i32_0 : i32, i32
  }
  func.func @transform_11(%arg0: i32) -> (i32, i32) {
    %c0_i32 = arith.constant 0 : i32
    %c0_i32_0 = arith.constant 0 : i32
    return %arg0, %c0_i32 : i32, i32
  }
}

</mosaic_0001>

<bundles_post_ra>
// kernel: vanilla_gan_generator.1
= control target key start
LH: loop header
LB: loop body
LE: loop exit
PB: predicated region body
PF: predicated region fallthrough
CT: control target
= control target key end

     0   :  { %16 = vsyncpa [#allocation3], 0  ;;  %s20809_s0 = inlined_call_operand.vmem [shape: bf16[16,128], index: 0, kind: input, shape index: {}]   ;;  %s20810_s1 = inlined_call_operand.hbm [shape: bf16[128,256], index: 1, kind: input, shape index: {}]   ;;  %s20811_s2 = inlined_call_operand.hbm [shape: f32[1,256], index: 2, kind: input, shape index: {}]   ;;  %s20812_s3 = inlined_call_operand.hbm [shape: bf16[256,512], index: 3, kind: input, shape index: {}]   ;;  %s20813_s4 = inlined_call_operand.hbm [shape: f32[1,512], index: 4, kind: input, shape index: {}]   ;;  %s20814_s5 = inlined_call_operand.hbm [shape: bf16[512,1024], index: 5, kind: input, shape index: {}]   ;;  %s20815_s6 = inlined_call_operand.hbm [shape: f32[1,1024], index: 6, kind: input, shape index: {}]   ;;  %s20816_s7 = inlined_call_operand.hbm [shape: bf16[1024,2048], index: 7, kind: input, shape index: {}]   ;;  %s20817_s8 = inlined_call_operand.hbm [shape: f32[1,2048], index: 8, kind: input, shape index: {}]   ;;  %s20818_s9 = inlined_call_operand.hbm [shape: bf16[2048,768], index: 9, kind: input, shape index: {}]   ;;  %s20819_s10 = inlined_call_operand.hbm [shape: f32[1,768], index: 10, kind: input, shape index: {}]   ;;  %s20820_s11 = inlined_call_operand.vmem [shape: f32[16,768], index: 11, kind: output, shape index: {}]  }
   0x1   :  { %17 = vsyncpa [#allocation5], 0 }
   0x2   :  { %18 = vsyncpa [#allocation8], 0 }
   0x3   :  { %19 = vsyncpa [#allocation11], 0 }
   0x4   :  { %20 = vsyncpa [#allocation14], 0 }
   0x5   :  { %21 = vsyncpa [#allocation17], 0  ;;  %s20196_s17 = smov [#allocation4]   ;;  %s20197_s19 = smov [#allocation7]  }
   0x6   :  { %s42_s18 = sshll.u32 %s20196_s17, 4  ;;  %s64_s20 = sshll.u32 %s20197_s19, 4  ;;  %s43_s18 = int_to_ptr.vmem [resolvable:$true] %s42_s18  ;;  %s65_s20 = int_to_ptr.vmem [resolvable:$true] %s64_s20 }
   0x7   :  { %s19964_s23 = scalar_lea.hbm %s20811_s2, 32 }
   0x8   :  { %p19965_p0 = scmp.ne.s32.totalorder %s20811_s2, %s19964_s23  ;;  %p19968_p1 = scmp.lt.u32.totalorder %s19964_s23, %s20811_s2 }
   0xa   :  { %p19970_p2 = pnand %p19968_p1, %p19965_p0 }
   0xc   :  { %19973 = shalt.err (!%p19970_p2)
}
   0xd   :  { %s19974_s28 = scalar_lea.vmem %s43_s18, 32  ;;  %p19979_p4 = scmp.lt.s32.totalorder %s43_s18, %s43_s18 }
   0xe   :  { %p19975_p3 = scmp.ne.s32.totalorder %s43_s18, %s19974_s28  ;;  %p19980_p5 = scmp.lt.s32.totalorder %s19974_s28, %s19974_s28 }
  0x10   :  { %p19981_p6 = por %p19980_p5, %p19979_p4 }
  0x12   :  { %p19982_p7 = pnand %p19981_p6, %p19975_p3 }
  0x14   :  { %19985 = shalt.err (!%p19982_p7)
}
  0x15   :  { %45 = dma.hbm_to_vmem [thread:$0]  %s20811_s2, 32, %s43_s18, [#allocation5]  }
  0x16   :  { %s19986_s14 = scalar_lea.hbm %s20813_s4, 64 }
  0x17   :  { %p19987_p8 = scmp.ne.s32.totalorder %s20813_s4, %s19986_s14  ;;  %p19990_p9 = scmp.lt.u32.totalorder %s19986_s14, %s20813_s4 }
  0x19   :  { %p19992_p10 = pnand %p19990_p9, %p19987_p8 }
  0x1b   :  { %19995 = shalt.err (!%p19992_p10)
}
  0x1c   :  { %s19996_s21 = scalar_lea.vmem %s65_s20, 64  ;;  %p20001_p12 = scmp.lt.s32.totalorder %s65_s20, %s65_s20 }
  0x1d   :  { %p19997_p11 = scmp.ne.s32.totalorder %s65_s20, %s19996_s21  ;;  %p20002_p13 = scmp.lt.s32.totalorder %s19996_s21, %s19996_s21 }
  0x1f   :  { %p20003_p0 = por %p20002_p13, %p20001_p12 }
  0x21   :  { %p20004_p1 = pnand %p20003_p0, %p19997_p11 }
  0x23   :  { %20007 = shalt.err (!%p20004_p1)
}
  0x24   :  { %67 = dma.hbm_to_vmem [thread:$0]  %s20813_s4, 64, %s65_s20, [#allocation8]  }
  0x25   :  { %s20198_s22 = smov [#allocation10]   ;;  %s20199_s24 = smov [#allocation13]  }
  0x26   :  { %s86_s23 = sshll.u32 %s20198_s22, 4  ;;  %s108_s25 = sshll.u32 %s20199_s24, 4  ;;  %s87_s23 = int_to_ptr.vmem [resolvable:$true] %s86_s23  ;;  %s109_s25 = int_to_ptr.vmem [resolvable:$true] %s108_s25 }
  0x27   :  { %s20008_s28 = scalar_lea.hbm %s20815_s6, 128 }
  0x28   :  { %p20009_p2 = scmp.ne.s32.totalorder %s20815_s6, %s20008_s28  ;;  %p20012_p3 = scmp.lt.u32.totalorder %s20008_s28, %s20815_s6 }
  0x2a   :  { %p20014_p4 = pnand %p20012_p3, %p20009_p2 }
  0x2c   :  { %20017 = shalt.err (!%p20014_p4)
}
  0x2d   :  { %s20018_s4 = scalar_lea.vmem %s87_s23, 128  ;;  %p20023_p6 = scmp.lt.s32.totalorder %s87_s23, %s87_s23 }
  0x2e   :  { %p20019_p5 = scmp.ne.s32.totalorder %s87_s23, %s20018_s4  ;;  %p20024_p7 = scmp.lt.s32.totalorder %s20018_s4, %s20018_s4 }
  0x30   :  { %p20025_p8 = por %p20024_p7, %p20023_p6 }
  0x32   :  { %p20026_p9 = pnand %p20025_p8, %p20019_p5 }
  0x34   :  { %20029 = shalt.err (!%p20026_p9)
}
  0x35   :  { %89 = dma.hbm_to_vmem [thread:$0]  %s20815_s6, 128, %s87_s23, [#allocation11]  }
  0x36   :  { %s20030_s17 = scalar_lea.hbm %s20817_s8, 256 }
  0x37   :  { %p20031_p10 = scmp.ne.s32.totalorder %s20817_s8, %s20030_s17  ;;  %p20034_p11 = scmp.lt.u32.totalorder %s20030_s17, %s20817_s8 }
  0x39   :  { %p20036_p12 = pnand %p20034_p11, %p20031_p10 }
  0x3b   :  { %20039 = shalt.err (!%p20036_p12)
}
  0x3c   :  { %s20040_s22 = scalar_lea.vmem %s109_s25, 256  ;;  %p20045_p0 = scmp.lt.s32.totalorder %s109_s25, %s109_s25 }
  0x3d   :  { %p20041_p13 = scmp.ne.s32.totalorder %s109_s25, %s20040_s22  ;;  %p20046_p1 = scmp.lt.s32.totalorder %s20040_s22, %s20040_s22 }
  0x3f   :  { %p20047_p2 = por %p20046_p1, %p20045_p0 }
  0x41   :  { %p20048_p3 = pnand %p20047_p2, %p20041_p13 }
  0x43   :  { %20051 = shalt.err (!%p20048_p3)
}
  0x44   :  { %111 = dma.hbm_to_vmem [thread:$0]  %s20817_s8, 256, %s109_s25, [#allocation14]  }
  0x45   :  { %s20200_s24 = smov [#allocation2]   ;;  %s20052_s29 = scalar_lea.hbm %s20810_s1, 2048 }
  0x46   :  { %s29_s26 = sshll.u32 %s20200_s24, 4  ;;  %p20053_p4 = scmp.ne.s32.totalorder %s20810_s1, %s20052_s29  ;;  %s30_s26 = int_to_ptr.vmem [resolvable:$true] %s29_s26 }
  0x47   :  { %p20056_p5 = scmp.lt.u32.totalorder %s20052_s29, %s20810_s1 }
  0x49   :  { %p20058_p6 = pnand %p20056_p5, %p20053_p4 }
  0x4b   :  { %20061 = shalt.err (!%p20058_p6)
}
  0x4c   :  { %s20062_s20 = scalar_lea.vmem %s30_s26, 2048  ;;  %p20067_p8 = scmp.lt.s32.totalorder %s30_s26, %s30_s26 }
  0x4d   :  { %p20063_p7 = scmp.ne.s32.totalorder %s30_s26, %s20062_s20  ;;  %p20068_p9 = scmp.lt.s32.totalorder %s20062_s20, %s20062_s20 }
  0x4f   :  { %p20069_p10 = por %p20068_p9, %p20067_p8 }
  0x51   :  { %p20070_p11 = pnand %p20069_p10, %p20063_p7 }
  0x53   :  { %20073 = shalt.err (!%p20070_p11)
}
  0x54   :  { %s20201_s8 = smov 128   ;;  %s20202_s25 = smov 8  }
  0x55   :  { %35 = dma.hbm_to_vmem [thread:$0]  %s20810_s1, 2048, %s30_s26, [#allocation3], %s20201_s8, %s20201_s8, %s20202_s25  }
  0x56   :  { %s20203_s16 = smov [#allocation6]   ;;  %s20074_s2 = scalar_lea.hbm %s20812_s3, 8192 }
  0x57   :  { %s51_s17 = sshll.u32 %s20203_s16, 4  ;;  %p20075_p12 = scmp.ne.s32.totalorder %s20812_s3, %s20074_s2  ;;  %s52_s17 = int_to_ptr.vmem [resolvable:$true] %s51_s17 }
  0x58   :  { %p20078_p13 = scmp.lt.u32.totalorder %s20074_s2, %s20812_s3 }
  0x5a   :  { %p20080_p0 = pnand %p20078_p13, %p20075_p12 }
  0x5c   :  { %20083 = shalt.err (!%p20080_p0)
}
  0x5d   :  { %s20084_s24 = scalar_lea.vmem %s52_s17, 8192  ;;  %p20089_p2 = scmp.lt.s32.totalorder %s52_s17, %s52_s17 }
  0x5e   :  { %p20085_p1 = scmp.ne.s32.totalorder %s52_s17, %s20084_s24  ;;  %p20090_p3 = scmp.lt.s32.totalorder %s20084_s24, %s20084_s24 }
  0x60   :  { %p20091_p4 = por %p20090_p3, %p20089_p2 }
  0x62   :  { %p20092_p5 = pnand %p20091_p4, %p20085_p1 }
  0x64   :  { %20095 = shalt.err (!%p20092_p5)
}
  0x65   :  { %s20204_s1 = smov 256   ;;  %s20205_s26 = smov 16  }
  0x66   :  { %57 = dma.hbm_to_vmem [thread:$0]  %s20812_s3, 8192, %s52_s17, [#allocation5], %s20204_s1, %s20204_s1, %s20205_s26  }
  0x67   :  { %s20206_s29 = smov [#allocation9]   ;;  %s20096_s4 = scalar_lea.hbm %s20814_s5, 32768 }
  0x68   :  { %s73_s30 = sshll.u32 %s20206_s29, 4  ;;  %p20097_p6 = scmp.ne.s32.totalorder %s20814_s5, %s20096_s4  ;;  %s74_s30 = int_to_ptr.vmem [resolvable:$true] %s73_s30 }
  0x69   :  { %p20100_p7 = scmp.lt.u32.totalorder %s20096_s4, %s20814_s5 }
  0x6b   :  { %p20102_p8 = pnand %p20100_p7, %p20097_p6 }
  0x6d   :  { %20105 = shalt.err (!%p20102_p8)
}
  0x6e   :  { %s20106_s15 = scalar_lea.vmem %s74_s30, 32768  ;;  %p20111_p10 = scmp.lt.s32.totalorder %s74_s30, %s74_s30 }
  0x6f   :  { %p20107_p9 = scmp.ne.s32.totalorder %s74_s30, %s20106_s15  ;;  %p20112_p11 = scmp.lt.s32.totalorder %s20106_s15, %s20106_s15 }
  0x71   :  { %p20113_p12 = por %p20112_p11, %p20111_p10 }
  0x73   :  { %p20114_p13 = pnand %p20113_p12, %p20107_p9 }
  0x75   :  { %20117 = shalt.err (!%p20114_p13)
}
  0x76   :  { %s20207_s3 = smov 512   ;;  %s20208_s16 = smov 32  }
  0x77   :  { %79 = dma.hbm_to_vmem [thread:$0]  %s20814_s5, 32768, %s74_s30, [#allocation8], %s20207_s3, %s20207_s3, %s20208_s16  }
  0x78   :  { %s20209_s21 = smov [#allocation12]   ;;  %s20118_s6 = scalar_lea.hbm %s20816_s7, 131072 }
  0x79   :  { %s95_s2 = sshll.u32 %s20209_s21, 4  ;;  %p20119_p0 = scmp.ne.s32.totalorder %s20816_s7, %s20118_s6  ;;  %s96_s2 = int_to_ptr.vmem [resolvable:$true] %s95_s2 }
  0x7a   :  { %p20122_p1 = scmp.lt.u32.totalorder %s20118_s6, %s20816_s7 }
  0x7c   :  { %p20124_p2 = pnand %p20122_p1, %p20119_p0 }
  0x7e   :  { %20127 = shalt.err (!%p20124_p2)
}
  0x7f   :  { %s20128_s27 = scalar_lea.vmem %s96_s2, 131072  ;;  %p20133_p4 = scmp.lt.s32.totalorder %s96_s2, %s96_s2 }
  0x80   :  { %p20129_p3 = scmp.ne.s32.totalorder %s96_s2, %s20128_s27  ;;  %p20134_p5 = scmp.lt.s32.totalorder %s20128_s27, %s20128_s27 }
  0x82   :  { %p20135_p6 = por %p20134_p5, %p20133_p4 }
  0x84   :  { %p20136_p7 = pnand %p20135_p6, %p20129_p3 }
  0x86   :  { %20139 = shalt.err (!%p20136_p7)
}
  0x87   :  { %s20210_s5 = smov 1024   ;;  %s20211_s28 = smov 64  }
  0x88   :  { %101 = dma.hbm_to_vmem [thread:$0]  %s20816_s7, 131072, %s96_s2, [#allocation11], %s20210_s5, %s20210_s5, %s20211_s28  }
  0x89   :  { %s20212_s12 = smov [#allocation15]   ;;  %s20140_s8 = scalar_lea.hbm %s20818_s9, 98304 }
  0x8a   :  { %s117_s13 = sshll.u32 %s20212_s12, 4  ;;  %p20141_p8 = scmp.ne.s32.totalorder %s20818_s9, %s20140_s8  ;;  %s118_s13 = int_to_ptr.vmem [resolvable:$true] %s117_s13 }
  0x8b   :  { %p20144_p9 = scmp.lt.u32.totalorder %s20140_s8, %s20818_s9 }
  0x8d   :  { %p20146_p10 = pnand %p20144_p9, %p20141_p8 }
  0x8f   :  { %20149 = shalt.err (!%p20146_p10)
}
  0x90   :  { %s20150_s16 = scalar_lea.vmem %s118_s13, 98304  ;;  %p20155_p12 = scmp.lt.s32.totalorder %s118_s13, %s118_s13 }
  0x91   :  { %p20151_p11 = scmp.ne.s32.totalorder %s118_s13, %s20150_s16  ;;  %p20156_p13 = scmp.lt.s32.totalorder %s20150_s16, %s20150_s16 }
  0x93   :  { %p20157_p0 = por %p20156_p13, %p20155_p12 }
  0x95   :  { %p20158_p1 = pnand %p20157_p0, %p20151_p11 }
  0x97   :  { %20161 = shalt.err (!%p20158_p1)
}
  0x98   :  { %s20213_s7 = smov 384   ;;  %s20214_s17 = smov 24  }
  0x99   :  { %123 = dma.hbm_to_vmem [thread:$0]  %s20818_s9, 98304, %s118_s13, [#allocation14], %s20213_s7, %s20213_s7, %s20214_s17  }
  0x9a   :  { %s20215_s2 = smov [#allocation16]   ;;  %s20162_s23 = scalar_lea.hbm %s20819_s10, 96 }
  0x9b   :  { %s130_s18 = sshll.u32 %s20215_s2, 4  ;;  %p20163_p2 = scmp.ne.s32.totalorder %s20819_s10, %s20162_s23  ;;  %s131_s18 = int_to_ptr.vmem [resolvable:$true] %s130_s18 }
  0x9c   :  { %p20166_p3 = scmp.lt.u32.totalorder %s20162_s23, %s20819_s10 }
  0x9e   :  { %p20168_p4 = pnand %p20166_p3, %p20163_p2 }
  0xa0   :  { %20171 = shalt.err (!%p20168_p4)
}
  0xa1   :  { %s20172_s5 = scalar_lea.vmem %s131_s18, 96  ;;  %p20177_p6 = scmp.lt.s32.totalorder %s131_s18, %s131_s18 }
  0xa2   :  { %p20173_p5 = scmp.ne.s32.totalorder %s131_s18, %s20172_s5  ;;  %p20178_p7 = scmp.lt.s32.totalorder %s20172_s5, %s20172_s5 }
  0xa4   :  { %p20179_p8 = por %p20178_p7, %p20177_p6 }
  0xa6   :  { %p20180_p9 = pnand %p20179_p8, %p20173_p5 }
  0xa8   :  { %20183 = shalt.err (!%p20180_p9)
}
  0xa9   :  { %133 = dma.hbm_to_vmem [thread:$0]  %s20819_s10, 96, %s131_s18, [#allocation17]  }
  0xaa   :  { %20184 = dma.done.wait [#allocation3], 2048  }
  0xab   :  { %20185 = vsyncadd [#allocation3], 4294965248 }
  0xac   :  { %20186 = dma.done.wait [#allocation5], 8224  }
  0xad   :  { %20187 = vsyncadd [#allocation5], 4294959072 }
  0xae   :  { %20188 = dma.done.wait [#allocation8], 32832  }
  0xaf   :  { %20189 = vsyncadd [#allocation8], 4294934464 }
  0xb0   :  { %20190 = dma.done.wait [#allocation11], 131200  }
  0xb1   :  { %20191 = vsyncadd [#allocation11], 4294836096 }
  0xb2   :  { %20192 = dma.done.wait [#allocation14], 98560  }
  0xb3   :  { %20193 = vsyncadd [#allocation14], 4294868736 }
  0xb4   :  { %20194 = dma.done.wait [#allocation17], 96  }
  0xb5   :  { %20195 = vsyncadd [#allocation17], 4294967200  ;;  %v20216_v0 = vmov 0   ;;  %v18664_v1 = vld [vmem:[#allocation2 + $0x4] ss:$8 sps:$4 sm:$0xff]   ;;  %v185_v51 = vlaneseq }
  0xb6   :  { %313 = vmatprep.mubr.bf16.mxu0 %v20216_v0  ;;  %v18666_v2 = vld [vmem:[#allocation2] ss:$8 sps:$4 sm:$0xff]   ;;  %281 = vmatprep.subr.bf16.mxu0 %v18664_v1  ;;  %v18667_v3 = vld [vmem:[#allocation2 + $0x14] ss:$8 sps:$4 sm:$0xff]   ;;  %v18669_v4 = vld [vmem:[#allocation2 + $0x10] ss:$8 sps:$4 sm:$0xff]  }
  0xb7   :  { %282 = vmatpush1.bf16.msra.mxu0 %v18666_v2  ;;  %v18670_v5 = vld [vmem:[#allocation2 + $0x24] ss:$8 sps:$4 sm:$0xff]   ;;  %v18672_v6 = vld [vmem:[#allocation2 + $0x20] ss:$8 sps:$4 sm:$0xff]   ;;  %v18673_v7 = vld [vmem:[#allocation2 + $0x34] ss:$8 sps:$4 sm:$0xff]  }
  0xb8   :  { %283 = vmatprep.subr.bf16.mxu0 %v18667_v3  ;;  %v18675_v8 = vld [vmem:[#allocation2 + $0x30] ss:$8 sps:$4 sm:$0xff]   ;;  %v18676_v9 = vld [vmem:[#allocation2 + $0x44] ss:$8 sps:$4 sm:$0xff]   ;;  %v18678_v10 = vld [vmem:[#allocation2 + $0x40] ss:$8 sps:$4 sm:$0xff]  }
  0xb9   :  { %v18679_v11 = vld [vmem:[#allocation2 + $0x54] ss:$8 sps:$4 sm:$0xff]   ;;  %v18681_v12 = vld [vmem:[#allocation2 + $0x50] ss:$8 sps:$4 sm:$0xff]   ;;  %v18682_v13 = vld [vmem:[#allocation2 + $0x64] ss:$8 sps:$4 sm:$0xff]  }
  0xba   :  { %v18684_v14 = vld [vmem:[#allocation2 + $0x60] ss:$8 sps:$4 sm:$0xff]   ;;  %v18685_v15 = vld [vmem:[#allocation2 + $0x74] ss:$8 sps:$4 sm:$0xff]   ;;  %v18687_v16 = vld [vmem:[#allocation2 + $0x70] ss:$8 sps:$4 sm:$0xff]  }
  0xbb   :  { %284 = vmatpush1.bf16.msra.mxu0 %v18669_v4  ;;  %v18691_v17 = vld [vmem:[#allocation6 + $0x4] ss:$16 sps:$4 sm:$0xff]   ;;  %v18689_v19 = vld [vmem:[#allocation6] ss:$16 sps:$4 sm:$0xff]   ;;  %v18739_v50 = vld [vmem:[#allocation6 + $0xc] ss:$16 sps:$4 sm:$0xff]  }
  0xbc   :  { %285 = vmatprep.subr.bf16.mxu0 %v18670_v5  ;;  %v18688_v18 = vld [vmem:[%s20809_s0] sm:$0xff]   ;;  %v20400_v52 = vshrl.u32 %v185_v51, 7 }
  0xbd   :  { %v18694_v20 = vld [vmem:[#allocation6 + $0x24] ss:$16 sps:$4 sm:$0xff]   ;;  %v18692_v21 = vld [vmem:[#allocation6 + $0x20] ss:$16 sps:$4 sm:$0xff]   ;;  %v183_v53 = vld [vmem:[#allocation4] sm:$0x3] }
  0xbe   :  { %v18697_v22 = vld [vmem:[#allocation6 + $0x44] ss:$16 sps:$4 sm:$0xff]   ;;  %v18695_v23 = vld [vmem:[#allocation6 + $0x40] ss:$16 sps:$4 sm:$0xff]   ;;  %v20403_v54 = vsub.s32 0, %v20400_v52  ;;  %v20406_v55 = vsub.s32 1, %v20400_v52 }
  0xbf   :  { %286 = vmatpush1.bf16.msra.mxu0 %v18672_v6  ;;  %v18700_v24 = vld [vmem:[#allocation6 + $0x64] ss:$16 sps:$4 sm:$0xff]   ;;  %v18698_v25 = vld [vmem:[#allocation6 + $0x60] ss:$16 sps:$4 sm:$0xff]  }
  0xc0   :  { %287 = vmatprep.subr.bf16.mxu0 %v18673_v7  ;;  %v18703_v26 = vld [vmem:[#allocation6 + $0x84] ss:$16 sps:$4 sm:$0xff]   ;;  %v18701_v27 = vld [vmem:[#allocation6 + $0x80] ss:$16 sps:$4 sm:$0xff]   ;;  %v188_v56 = vrot.slane %v183_v53, %v20403_v54  ;;  %v192_v57 = vrot.slane %v183_v53, %v20406_v55 }
  0xc1   :  { %v18706_v28 = vld [vmem:[#allocation6 + $0xa4] ss:$16 sps:$4 sm:$0xff]   ;;  %v18704_v29 = vld [vmem:[#allocation6 + $0xa0] ss:$16 sps:$4 sm:$0xff]  }
  0xc2   :  { %v18709_v30 = vld [vmem:[#allocation6 + $0xc4] ss:$16 sps:$4 sm:$0xff]   ;;  %v18707_v31 = vld [vmem:[#allocation6 + $0xc0] ss:$16 sps:$4 sm:$0xff]  }
  0xc3   :  { %288 = vmatpush1.bf16.msra.mxu0 %v18675_v8  ;;  %v18712_v32 = vld [vmem:[#allocation6 + $0xe4] ss:$16 sps:$4 sm:$0xff]   ;;  %v18710_v33 = vld [vmem:[#allocation6 + $0xe0] ss:$16 sps:$4 sm:$0xff]   ;;  %v18737_v8 = vld [vmem:[#allocation6 + $0x8] ss:$16 sps:$4 sm:$0xff]  }
  0xc4   :  { %289 = vmatprep.subr.bf16.mxu0 %v18676_v9  ;;  %v18715_v34 = vld [vmem:[#allocation6 + $0x104] ss:$16 sps:$4 sm:$0xff]   ;;  %v18713_v35 = vld [vmem:[#allocation6 + $0x100] ss:$16 sps:$4 sm:$0xff]  }
  0xc5   :  { %v18718_v36 = vld [vmem:[#allocation6 + $0x124] ss:$16 sps:$4 sm:$0xff]   ;;  %v18716_v37 = vld [vmem:[#allocation6 + $0x120] ss:$16 sps:$4 sm:$0xff]  }
  0xc6   :  { %v18721_v38 = vld [vmem:[#allocation6 + $0x144] ss:$16 sps:$4 sm:$0xff]   ;;  %v18719_v39 = vld [vmem:[#allocation6 + $0x140] ss:$16 sps:$4 sm:$0xff]  }
  0xc7   :  { %290 = vmatpush1.bf16.msra.mxu0 %v18678_v10  ;;  %v18724_v40 = vld [vmem:[#allocation6 + $0x164] ss:$16 sps:$4 sm:$0xff]   ;;  %v18722_v41 = vld [vmem:[#allocation6 + $0x160] ss:$16 sps:$4 sm:$0xff]  }
  0xc8   :  { %291 = vmatprep.subr.bf16.mxu0 %v18679_v11  ;;  %v18727_v42 = vld [vmem:[#allocation6 + $0x184] ss:$16 sps:$4 sm:$0xff]   ;;  %v18725_v43 = vld [vmem:[#allocation6 + $0x180] ss:$16 sps:$4 sm:$0xff]  }
  0xc9   :  { %v18730_v44 = vld [vmem:[#allocation6 + $0x1a4] ss:$16 sps:$4 sm:$0xff]   ;;  %v18728_v45 = vld [vmem:[#allocation6 + $0x1a0] ss:$16 sps:$4 sm:$0xff]  }
  0xca   :  { %v18733_v46 = vld [vmem:[#allocation6 + $0x1c4] ss:$16 sps:$4 sm:$0xff]   ;;  %v18731_v47 = vld [vmem:[#allocation6 + $0x1c0] ss:$16 sps:$4 sm:$0xff]  }
  0xcb   :  { %292 = vmatpush1.bf16.msra.mxu0 %v18681_v12  ;;  %v18736_v48 = vld [vmem:[#allocation6 + $0x1e4] ss:$16 sps:$4 sm:$0xff]   ;;  %v18734_v49 = vld [vmem:[#allocation6 + $0x1e0] ss:$16 sps:$4 sm:$0xff]   ;;  %v18742_v12 = vld [vmem:[#allocation6 + $0x2c] ss:$16 sps:$4 sm:$0xff]  }
  0xcc   :  { %293 = vmatprep.subr.bf16.mxu0 %v18682_v13  ;;  %v878_v51 = vld [vmem:[#allocation9 + $0xa0] sm:$0xff] }
  0xcf   :  { %294 = vmatpush1.bf16.msra.mxu0 %v18684_v14  ;;  %v18740_v14 = vld [vmem:[#allocation6 + $0x28] ss:$16 sps:$4 sm:$0xff]  }
  0xd0   :  { %295 = vmatprep.subr.bf16.mxu0 %v18685_v15  ;;  %v18745_v15 = vld [vmem:[#allocation6 + $0x4c] ss:$16 sps:$4 sm:$0xff]  }
  0xd3   :  { %296 = vmatpush1.bf16.msra.mxu0 %v18687_v16  ;;  %v18743_v16 = vld [vmem:[#allocation6 + $0x48] ss:$16 sps:$4 sm:$0xff]  }
  0xd4   :  { %744 = vmatprep.subr.bf16.mxu0 %v18691_v17  ;;  %v18748_v17 = vld [vmem:[#allocation6 + $0x6c] ss:$16 sps:$4 sm:$0xff]  }
  0xd6   :  { %314 = vmatmul.mubr.bf16.vlgmr.msra.gmra.mrb[0].mxu0 %v18688_v18  ;;  %v18746_v18 = vld [vmem:[#allocation6 + $0x68] ss:$16 sps:$4 sm:$0xff]  }
  0xd7   :  { %745 = vmatpush1.bf16.msra.mxu0 %v18689_v19  ;;  %v18751_v19 = vld [vmem:[#allocation6 + $0x8c] ss:$16 sps:$4 sm:$0xff]  }
  0xd8   :  { %746 = vmatprep.subr.bf16.mxu0 %v18694_v20  ;;  %v18749_v20 = vld [vmem:[#allocation6 + $0x88] ss:$16 sps:$4 sm:$0xff]  }
  0xdb   :  { %747 = vmatpush1.bf16.msra.mxu0 %v18692_v21  ;;  %v18754_v21 = vld [vmem:[#allocation6 + $0xac] ss:$16 sps:$4 sm:$0xff]  }
  0xdc   :  { %748 = vmatprep.subr.bf16.mxu0 %v18697_v22  ;;  %v18752_v22 = vld [vmem:[#allocation6 + $0xa8] ss:$16 sps:$4 sm:$0xff]  }
  0xdf   :  { %749 = vmatpush1.bf16.msra.mxu0 %v18695_v23  ;;  %v18757_v23 = vld [vmem:[#allocation6 + $0xcc] ss:$16 sps:$4 sm:$0xff]  }
  0xe0   :  { %750 = vmatprep.subr.bf16.mxu0 %v18700_v24  ;;  %v18755_v24 = vld [vmem:[#allocation6 + $0xc8] ss:$16 sps:$4 sm:$0xff]  }
  0xe3   :  { %751 = vmatpush1.bf16.msra.mxu0 %v18698_v25  ;;  %v18760_v25 = vld [vmem:[#allocation6 + $0xec] ss:$16 sps:$4 sm:$0xff]  }
  0xe4   :  { %752 = vmatprep.subr.bf16.mxu0 %v18703_v26  ;;  %v18758_v26 = vld [vmem:[#allocation6 + $0xe8] ss:$16 sps:$4 sm:$0xff]  }
  0xe7   :  { %753 = vmatpush1.bf16.msra.mxu0 %v18701_v27  ;;  %v18763_v27 = vld [vmem:[#allocation6 + $0x10c] ss:$16 sps:$4 sm:$0xff]  }
  0xe8   :  { %754 = vmatprep.subr.bf16.mxu0 %v18706_v28  ;;  %v18761_v28 = vld [vmem:[#allocation6 + $0x108] ss:$16 sps:$4 sm:$0xff]  }
  0xeb   :  { %755 = vmatpush1.bf16.msra.mxu0 %v18704_v29  ;;  %v18766_v29 = vld [vmem:[#allocation6 + $0x12c] ss:$16 sps:$4 sm:$0xff]  }
  0xec   :  { %756 = vmatprep.subr.bf16.mxu0 %v18709_v30  ;;  %v18764_v30 = vld [vmem:[#allocation6 + $0x128] ss:$16 sps:$4 sm:$0xff]  }
  0xef   :  { %757 = vmatpush1.bf16.msra.mxu0 %v18707_v31  ;;  %v18769_v31 = vld [vmem:[#allocation6 + $0x14c] ss:$16 sps:$4 sm:$0xff]  }
  0xf0   :  { %758 = vmatprep.subr.bf16.mxu0 %v18712_v32  ;;  %v18767_v32 = vld [vmem:[#allocation6 + $0x148] ss:$16 sps:$4 sm:$0xff]  }
  0xf3   :  { %759 = vmatpush1.bf16.msra.mxu0 %v18710_v33  ;;  %v18772_v33 = vld [vmem:[#allocation6 + $0x16c] ss:$16 sps:$4 sm:$0xff]  }
  0xf4   :  { %760 = vmatprep.subr.bf16.mxu0 %v18715_v34  ;;  %v18770_v34 = vld [vmem:[#allocation6 + $0x168] ss:$16 sps:$4 sm:$0xff]  }
  0xf7   :  { %761 = vmatpush1.bf16.msra.mxu0 %v18713_v35  ;;  %v18775_v35 = vld [vmem:[#allocation6 + $0x18c] ss:$16 sps:$4 sm:$0xff]  }
  0xf8   :  { %762 = vmatprep.subr.bf16.mxu0 %v18718_v36  ;;  %v18773_v36 = vld [vmem:[#allocation6 + $0x188] ss:$16 sps:$4 sm:$0xff]  }
  0xfb   :  { %763 = vmatpush1.bf16.msra.mxu0 %v18716_v37  ;;  %v18778_v37 = vld [vmem:[#allocation6 + $0x1ac] ss:$16 sps:$4 sm:$0xff]  }
  0xfc   :  { %764 = vmatprep.subr.bf16.mxu0 %v18721_v38  ;;  %v18776_v38 = vld [vmem:[#allocation6 + $0x1a8] ss:$16 sps:$4 sm:$0xff]  }
  0xff   :  { %765 = vmatpush1.bf16.msra.mxu0 %v18719_v39  ;;  %v18781_v39 = vld [vmem:[#allocation6 + $0x1cc] ss:$16 sps:$4 sm:$0xff]  }
 0x100   :  { %766 = vmatprep.subr.bf16.mxu0 %v18724_v40  ;;  %v18779_v40 = vld [vmem:[#allocation6 + $0x1c8] ss:$16 sps:$4 sm:$0xff]  }
 0x103   :  { %767 = vmatpush1.bf16.msra.mxu0 %v18722_v41  ;;  %v18784_v41 = vld [vmem:[#allocation6 + $0x1ec] ss:$16 sps:$4 sm:$0xff]  }
 0x104   :  { %768 = vmatprep.subr.bf16.mxu0 %v18727_v42  ;;  %v858_v42 = vld [vmem:[#allocation9] sm:$0xff] }
 0x107   :  { %769 = vmatpush1.bf16.msra.mxu0 %v18725_v43  ;;  %v862_v43 = vld [vmem:[#allocation9 + $0x20] sm:$0xff] }
 0x108   :  { %770 = vmatprep.subr.bf16.mxu0 %v18730_v44  ;;  %v18782_v44 = vld [vmem:[#allocation6 + $0x1e8] ss:$16 sps:$4 sm:$0xff]  }
 0x10b   :  { %771 = vmatpush1.bf16.msra.mxu0 %v18728_v45  ;;  %v866_v45 = vld [vmem:[#allocation9 + $0x40] sm:$0xff] }
 0x10c   :  { %772 = vmatprep.subr.bf16.mxu0 %v18733_v46  ;;  %v870_v46 = vld [vmem:[#allocation9 + $0x60] sm:$0xff] }
 0x10d   :  { %v16347_v53 = vcombine.low %v866_v45, %v870_v46 }
 0x10f   :  { %773 = vmatpush1.bf16.msra.mxu0 %v18731_v47  ;;  %v16340_v47 = vcombine.high %v858_v42, %v862_v43 }
 0x110   :  { %774 = vmatprep.subr.bf16.mxu0 %v18736_v48  ;;  %v16339_v48 = vcombine.low %v858_v42, %v862_v43 }
 0x113   :  { %775 = vmatpush1.bf16.msra.mxu0 %v18734_v49  ;;  %v874_v49 = vld [vmem:[#allocation9 + $0x80] sm:$0xff] }
 0x114   :  { %787 = vmatprep.subr.bf16.mxu0 %v18739_v50  ;;  %v16348_v50 = vcombine.high %v866_v45, %v870_v46  ;;  %v958_v45 = vld [vmem:[#allocation9 + $0x320] sm:$0xff]  ;;  %v1012_v46 = vld [vmem:[#allocation9 + $0x4d0] sm:$0xff] }
 0x1a9   :  { %v315_v58 = vpop.f32.mrb[0].mxu0 }
 0x1aa   :  { %v316_v59 = vadd.f32 %v315_v58, %v188_v56  ;;  %v317_v60 = vpop.f32.mrb[1].mxu0  ;;  %v886_v58 = vld [vmem:[#allocation9 + $0xe0] sm:$0xff] }
 0x1ab   :  { %v318_v61 = vadd.f32 %v317_v60, %v192_v57  ;;  %v319_v62 = vpop.f32.mrb[2].mxu0 }
 0x1ac   :  { %vm324_vm0 = vcmp.gt.f32.partialorder %v316_v59, 0.0  ;;  %v328_v63 = vmul.f32 0.2, %v316_v59  ;;  %v320_v0 = vadd.f32 %v319_v62, %v188_v56  ;;  %v321_v1 = vpop.f32.mrb[3].mxu0  ;;  %v16356_v56 = vcombine.high %v874_v49, %v878_v51  ;;  %v894_v62 = vld [vmem:[#allocation9 + $0x120] sm:$0xff] }
 0x1ad   :  { %vm325_vm1 = vcmp.gt.f32.partialorder %v318_v61, 0.0  ;;  %v329_v2 = vmul.f32 0.2, %v318_v61  ;;  %v322_v3 = vadd.f32 %v321_v1, %v192_v57  ;;  %v882_v57 = vld [vmem:[#allocation9 + $0xc0] sm:$0xff] }
 0x1ae   :  { %vm326_vm2 = vcmp.gt.f32.partialorder %v320_v0, 0.0  ;;  %v330_v4 = vmul.f32 0.2, %v320_v0  ;;  %v332_v6 = vsel %vm324_vm0, %v316_v59, %v328_v63  ;;  %v16355_v59 = vcombine.low %v874_v49, %v878_v51  ;;  %v898_v1 = vld [vmem:[#allocation9 + $0x140] sm:$0xff] }
 0x1af   :  { %vm327_vm3 = vcmp.gt.f32.partialorder %v322_v3, 0.0  ;;  %v331_v5 = vmul.f32 0.2, %v322_v3  ;;  %v333_v10 = vsel %vm325_vm1, %v318_v61, %v329_v2  ;;  %v16364_v60 = vcombine.high %v882_v57, %v886_v58  ;;  %v890_v61 = vld [vmem:[#allocation9 + $0x100] sm:$0xff] }
 0x1b0   :  { %v334_v7 = vsel %vm326_vm2, %v320_v0, %v330_v4  ;;  %v16363_v63 = vcombine.low %v882_v57, %v886_v58  ;;  %v16372_v0 = vcombine.high %v890_v61, %v894_v62  ;;  %v902_v2 = vld [vmem:[#allocation9 + $0x160] sm:$0xff]  ;;  %v1020_v57 = vld [vmem:[#allocation9 + $0x510] sm:$0xff] }
 0x1b1   :  { %v20410_v9 = vpack.c.bf16 %v334_v7, %v332_v6  ;;  %v335_v11 = vsel %vm327_vm3, %v322_v3, %v331_v5  ;;  %v16371_v3 = vcombine.low %v890_v61, %v894_v62  ;;  %v16380_v4 = vcombine.high %v898_v1, %v902_v2  ;;  %v906_v5 = vld [vmem:[#allocation9 + $0x180] sm:$0xff] }
 0x1b2   :  { %v337_v13 = vpack.c.bf16 %v335_v11, %v333_v10  ;;  %v910_v6 = vld [vmem:[#allocation9 + $0x1a0] sm:$0xff]  ;;  %v16379_v7 = vcombine.low %v898_v1, %v902_v2  ;;  %v1028_v1 = vld [vmem:[#allocation9 + $0x550] sm:$0xff] }
 0x1b3   :  { %v918_v10 = vld [vmem:[#allocation9 + $0x1e0] sm:$0xff]  ;;  %v16387_v11 = vcombine.low %v906_v5, %v910_v6 }
 0x1b4   :  { %776 = vmatprep.mubr.bf16.mxu0 %v337_v13 }
 0x1b5   :  { %777 = vmatmul.mubr.bf16.vlgmr.msra.gmra.mrb[4].mxu0 %v20410_v9 }
 0x1b6   :  { %788 = vmatpush1.bf16.msra.mxu0 %v18737_v8  ;;  %819 = vmatprep.mubr.bf16.mxu0 %v337_v13  ;;  %v16388_v8 = vcombine.high %v906_v5, %v910_v6  ;;  %v922_v13 = vld [vmem:[#allocation9 + $0x200] sm:$0xff] }
 0x1b7   :  { %789 = vmatprep.subr.bf16.mxu0 %v18742_v12 }
 0x1ba   :  { %790 = vmatpush1.bf16.msra.mxu0 %v18740_v14  ;;  %v926_v14 = vld [vmem:[#allocation9 + $0x220] sm:$0xff] }
 0x1bb   :  { %791 = vmatprep.subr.bf16.mxu0 %v18745_v15 }
 0x1be   :  { %792 = vmatpush1.bf16.msra.mxu0 %v18743_v16  ;;  %v16404_v16 = vcombine.high %v922_v13, %v926_v14 }
 0x1bf   :  { %793 = vmatprep.subr.bf16.mxu0 %v18748_v17  ;;  %v930_v17 = vld [vmem:[#allocation9 + $0x240] sm:$0xff] }
 0x1c2   :  { %794 = vmatpush1.bf16.msra.mxu0 %v18746_v18  ;;  %v934_v18 = vld [vmem:[#allocation9 + $0x260] sm:$0xff] }
 0x1c3   :  { %795 = vmatprep.subr.bf16.mxu0 %v18751_v19  ;;  %v20414_v19 = vld [vmem:[#allocation9 + $0x400] sm:$0xff] }
 0x1c6   :  { %796 = vmatpush1.bf16.msra.mxu0 %v18749_v20  ;;  %v20416_v20 = vld [vmem:[#allocation9 + $0x420] sm:$0xff] }
 0x1c7   :  { %797 = vmatprep.subr.bf16.mxu0 %v18754_v21  ;;  %v988_v21 = vld [vmem:[#allocation9 + $0x410] sm:$0xff] }
 0x1ca   :  { %798 = vmatpush1.bf16.msra.mxu0 %v18752_v22  ;;  %v16403_v22 = vcombine.low %v922_v13, %v926_v14 }
 0x1cb   :  { %799 = vmatprep.subr.bf16.mxu0 %v18757_v23  ;;  %v992_v23 = vld [vmem:[#allocation9 + $0x430] sm:$0xff] }
 0x1ce   :  { %800 = vmatpush1.bf16.msra.mxu0 %v18755_v24  ;;  %v16412_v24 = vcombine.high %v930_v17, %v934_v18 }
 0x1cf   :  { %801 = vmatprep.subr.bf16.mxu0 %v18760_v25  ;;  %v16467_v25 = vcombine.low %v20414_v19, %v20416_v20 }
 0x1d2   :  { %802 = vmatpush1.bf16.msra.mxu0 %v18758_v26  ;;  %v16472_v26 = vcombine.high %v988_v21, %v992_v23 }
 0x1d3   :  { %803 = vmatprep.subr.bf16.mxu0 %v18763_v27  ;;  %v16471_v27 = vcombine.low %v988_v21, %v992_v23  ;;  %v1052_v23 = vld [vmem:[#allocation9 + $0x610] sm:$0xff] }
 0x1d4   :  { %2651 = vmatprep.subr.bf16.mxu1 %v16472_v26 }
 0x1d5   :  { %2652 = vmatpush1.bf16.msra.mxu1 %v16471_v27 }
 0x1d6   :  { %804 = vmatpush1.bf16.msra.mxu0 %v18761_v28  ;;  %v938_v28 = vld [vmem:[#allocation9 + $0x280] sm:$0xff] }
 0x1d7   :  { %805 = vmatprep.subr.bf16.mxu0 %v18766_v29  ;;  %v942_v29 = vld [vmem:[#allocation9 + $0x2a0] sm:$0xff] }
 0x1da   :  { %806 = vmatpush1.bf16.msra.mxu0 %v18764_v30  ;;  %v996_v30 = vld [vmem:[#allocation9 + $0x450] sm:$0xff] }
 0x1db   :  { %807 = vmatprep.subr.bf16.mxu0 %v18769_v31  ;;  %v16411_v31 = vcombine.low %v930_v17, %v934_v18  ;;  %v1048_v17 = vld [vmem:[#allocation9 + $0x5f0] sm:$0xff]  ;;  %v16468_v18 = vcombine.high %v20414_v19, %v20416_v20 }
 0x1de   :  { %808 = vmatpush1.bf16.msra.mxu0 %v18767_v32  ;;  %v1000_v32 = vld [vmem:[#allocation9 + $0x470] sm:$0xff] }
 0x1df   :  { %809 = vmatprep.subr.bf16.mxu0 %v18772_v33  ;;  %v16420_v33 = vcombine.high %v938_v28, %v942_v29 }
 0x1e2   :  { %810 = vmatpush1.bf16.msra.mxu0 %v18770_v34  ;;  %v16480_v34 = vcombine.high %v996_v30, %v1000_v32 }
 0x1e3   :  { %811 = vmatprep.subr.bf16.mxu0 %v18775_v35  ;;  %v16479_v35 = vcombine.low %v996_v30, %v1000_v32  ;;  %v1068_v32 = vld [vmem:[#allocation9 + $0x690] sm:$0xff] }
 0x1e4   :  { %2653 = vmatprep.subr.bf16.mxu1 %v16480_v34 }
 0x1e5   :  { %2654 = vmatpush1.bf16.msra.mxu1 %v16479_v35 }
 0x1e6   :  { %812 = vmatpush1.bf16.msra.mxu0 %v18773_v36  ;;  %v946_v36 = vld [vmem:[#allocation9 + $0x2c0] sm:$0xff] }
 0x1e7   :  { %813 = vmatprep.subr.bf16.mxu0 %v18778_v37  ;;  %v950_v37 = vld [vmem:[#allocation9 + $0x2e0] sm:$0xff] }
 0x1ea   :  { %814 = vmatpush1.bf16.msra.mxu0 %v18776_v38  ;;  %v1004_v38 = vld [vmem:[#allocation9 + $0x490] sm:$0xff] }
 0x1eb   :  { %815 = vmatprep.subr.bf16.mxu0 %v18781_v39  ;;  %v16419_v39 = vcombine.low %v938_v28, %v942_v29  ;;  %v1060_v28 = vld [vmem:[#allocation9 + $0x650] sm:$0xff] }
 0x1ec   :  { %v1064_v29 = vld [vmem:[#allocation9 + $0x670] sm:$0xff] }
 0x1ed   :  { %v16544_v30 = vcombine.high %v1060_v28, %v1064_v29 }
 0x1ee   :  { %816 = vmatpush1.bf16.msra.mxu0 %v18779_v40  ;;  %v1008_v40 = vld [vmem:[#allocation9 + $0x4b0] sm:$0xff] }
 0x1ef   :  { %817 = vmatprep.subr.bf16.mxu0 %v18784_v41  ;;  %v16428_v41 = vcombine.high %v946_v36, %v950_v37  ;;  %v16488_v42 = vcombine.high %v1004_v38, %v1008_v40  ;;  %v16487_v43 = vcombine.low %v1004_v38, %v1008_v40  ;;  %v1084_v40 = vld [vmem:[#allocation9 + $0x710] sm:$0xff] }
 0x1f1   :  { %2655 = vmatprep.subr.bf16.mxu1 %v16488_v42 }
 0x1f2   :  { %818 = vmatpush1.bf16.msra.mxu0 %v18782_v44  ;;  %v954_v44 = vld [vmem:[#allocation9 + $0x300] sm:$0xff]  ;;  %2656 = vmatpush1.bf16.msra.mxu1 %v16487_v43 }
 0x1f3   :  { %2436 = vmatprep.subr.bf16.mxu0 %v16340_v47  ;;  %v16427_v47 = vcombine.low %v946_v36, %v950_v37  ;;  %v16436_v49 = vcombine.high %v954_v44, %v958_v45  ;;  %v16435_v58 = vcombine.low %v954_v44, %v958_v45  ;;  %v1076_v36 = vld [vmem:[#allocation9 + $0x6d0] sm:$0xff] }
 0x1f4   :  { %v1080_v37 = vld [vmem:[#allocation9 + $0x6f0] sm:$0xff] }
 0x1f5   :  { %820 = vmatmul.mubr.bf16.vlgmr.msra.gmra.mrb[8].mxu0 %v20410_v9  ;;  %v914_v9 = vld [vmem:[#allocation9 + $0x1c0] sm:$0xff]  ;;  %v16560_v38 = vcombine.high %v1076_v36, %v1080_v37  ;;  %v1092_v44 = vld [vmem:[#allocation9 + $0x750] sm:$0xff] }
 0x1f6   :  { %2437 = vmatpush1.bf16.msra.mxu0 %v16339_v48  ;;  %v16396_v12 = vcombine.high %v914_v9, %v918_v10  ;;  %v16395_v15 = vcombine.low %v914_v9, %v918_v10  ;;  %v1016_v48 = vld [vmem:[#allocation9 + $0x4f0] sm:$0xff] }
 0x1f7   :  { %2438 = vmatprep.subr.bf16.mxu0 %v16348_v50  ;;  %v16496_v50 = vcombine.high %v1012_v46, %v1016_v48  ;;  %v16495_v51 = vcombine.low %v1012_v46, %v1016_v48  ;;  %v1036_v9 = vld [vmem:[#allocation9 + $0x590] sm:$0xff] }
 0x1f8   :  { %v1096_v45 = vld [vmem:[#allocation9 + $0x770] sm:$0xff] }
 0x1f9   :  { %2657 = vmatprep.subr.bf16.mxu1 %v16496_v50  ;;  %v16576_v46 = vcombine.high %v1092_v44, %v1096_v45  ;;  %v1100_v48 = vld [vmem:[#allocation9 + $0x790] sm:$0xff] }
 0x1fa   :  { %2439 = vmatpush1.bf16.msra.mxu0 %v16347_v53  ;;  %v962_v53 = vld [vmem:[#allocation9 + $0x340] sm:$0xff]  ;;  %2658 = vmatpush1.bf16.msra.mxu1 %v16495_v51 }
 0x1fb   :  { %2440 = vmatprep.subr.bf16.mxu0 %v16356_v56  ;;  %v966_v56 = vld [vmem:[#allocation9 + $0x360] sm:$0xff] }
 0x1fc   :  { %v16443_v2 = vcombine.low %v962_v53, %v966_v56 }
 0x1fe   :  { %2441 = vmatpush1.bf16.msra.mxu0 %v16355_v59  ;;  %v1024_v59 = vld [vmem:[#allocation9 + $0x530] sm:$0xff] }
 0x1ff   :  { %2442 = vmatprep.subr.bf16.mxu0 %v16364_v60  ;;  %v16444_v60 = vcombine.high %v962_v53, %v966_v56  ;;  %v16504_v61 = vcombine.high %v1020_v57, %v1024_v59  ;;  %v16503_v62 = vcombine.low %v1020_v57, %v1024_v59  ;;  %v1108_v53 = vld [vmem:[#allocation9 + $0x7d0] sm:$0xff]  ;;  %v20422_v59 = vld [vmem:[#allocation7] sm:$0xf] }
 0x200   :  { %v1112_v56 = vld [vmem:[#allocation9 + $0x7f0] sm:$0xff] }
 0x201   :  { %2659 = vmatprep.subr.bf16.mxu1 %v16504_v61  ;;  %v16592_v57 = vcombine.high %v1108_v53, %v1112_v56  ;;  %v411_v61 = vrot.slane %v20422_v59, %v20406_v55 }
 0x202   :  { %2443 = vmatpush1.bf16.msra.mxu0 %v16363_v63  ;;  %v970_v63 = vld [vmem:[#allocation9 + $0x380] sm:$0xff]  ;;  %2660 = vmatpush1.bf16.msra.mxu1 %v16503_v62 }
 0x203   :  { %2444 = vmatprep.subr.bf16.mxu0 %v16372_v0  ;;  %v974_v0 = vld [vmem:[#allocation9 + $0x3a0] sm:$0xff] }
 0x204   :  { %v16451_v10 = vcombine.low %v970_v63, %v974_v0 }
 0x206   :  { %2445 = vmatpush1.bf16.msra.mxu0 %v16371_v3  ;;  %v1032_v3 = vld [vmem:[#allocation9 + $0x570] sm:$0xff] }
 0x207   :  { %2446 = vmatprep.subr.bf16.mxu0 %v16380_v4  ;;  %v16452_v4 = vcombine.high %v970_v63, %v974_v0  ;;  %v16512_v5 = vcombine.high %v1028_v1, %v1032_v3  ;;  %v16511_v6 = vcombine.low %v1028_v1, %v1032_v3 }
 0x209   :  { %2661 = vmatprep.subr.bf16.mxu1 %v16512_v5 }
 0x20a   :  { %2447 = vmatpush1.bf16.msra.mxu0 %v16379_v7  ;;  %v978_v7 = vld [vmem:[#allocation9 + $0x3c0] sm:$0xff]  ;;  %2662 = vmatpush1.bf16.msra.mxu1 %v16511_v6 }
 0x20b   :  { %2448 = vmatprep.subr.bf16.mxu0 %v16388_v8  ;;  %v982_v8 = vld [vmem:[#allocation9 + $0x3e0] sm:$0xff] }
 0x20e   :  { %2449 = vmatpush1.bf16.msra.mxu0 %v16387_v11  ;;  %v1040_v11 = vld [vmem:[#allocation9 + $0x5b0] sm:$0xff] }
 0x20f   :  { %2450 = vmatprep.subr.bf16.mxu0 %v16396_v12  ;;  %v16460_v12 = vcombine.high %v978_v7, %v982_v8  ;;  %v16520_v13 = vcombine.high %v1036_v9, %v1040_v11  ;;  %v16519_v14 = vcombine.low %v1036_v9, %v1040_v11 }
 0x211   :  { %2663 = vmatprep.subr.bf16.mxu1 %v16520_v13  ;;  %v998_v13 = vld [vmem:[#allocation9 + $0x460] sm:$0xff] }
 0x212   :  { %2451 = vmatpush1.bf16.msra.mxu0 %v16395_v15  ;;  %v1044_v15 = vld [vmem:[#allocation9 + $0x5d0] sm:$0xff]  ;;  %2664 = vmatpush1.bf16.msra.mxu1 %v16519_v14 }
 0x213   :  { %2452 = vmatprep.subr.bf16.mxu0 %v16404_v16  ;;  %v16459_v16 = vcombine.low %v978_v7, %v982_v8  ;;  %v16528_v21 = vcombine.high %v1044_v15, %v1048_v17 }
 0x215   :  { %2665 = vmatprep.subr.bf16.mxu1 %v16528_v21  ;;  %v1002_v21 = vld [vmem:[#allocation9 + $0x480] sm:$0xff] }
 0x216   :  { %2453 = vmatpush1.bf16.msra.mxu0 %v16403_v22  ;;  %v16527_v22 = vcombine.low %v1044_v15, %v1048_v17 }
 0x217   :  { %2454 = vmatprep.subr.bf16.mxu0 %v16412_v24  ;;  %v1056_v24 = vld [vmem:[#allocation9 + $0x630] sm:$0xff] }
 0x218   :  { %2666 = vmatpush1.bf16.msra.mxu1 %v16527_v22  ;;  %v16536_v26 = vcombine.high %v1052_v23, %v1056_v24  ;;  %v16535_v27 = vcombine.low %v1052_v23, %v1056_v24  ;;  %v1006_v22 = vld [vmem:[#allocation9 + $0x4a0] sm:$0xff] }
 0x219   :  { %v16484_v24 = vcombine.high %v1002_v21, %v1006_v22 }
 0x21a   :  { %2455 = vmatpush1.bf16.msra.mxu0 %v16411_v31  ;;  %2667 = vmatprep.subr.bf16.mxu1 %v16536_v26  ;;  %v16543_v31 = vcombine.low %v1060_v28, %v1064_v29  ;;  %v1010_v26 = vld [vmem:[#allocation9 + $0x4c0] sm:$0xff]  ;;  %v16483_v28 = vcombine.low %v1002_v21, %v1006_v22 }
 0x21b   :  { %2456 = vmatprep.subr.bf16.mxu0 %v16420_v33  ;;  %v1072_v33 = vld [vmem:[#allocation9 + $0x6b0] sm:$0xff] }
 0x21c   :  { %2668 = vmatpush1.bf16.msra.mxu1 %v16535_v27  ;;  %v16552_v34 = vcombine.high %v1068_v32, %v1072_v33  ;;  %v16551_v35 = vcombine.low %v1068_v32, %v1072_v33  ;;  %v1014_v27 = vld [vmem:[#allocation9 + $0x4e0] sm:$0xff] }
 0x21d   :  { %2669 = vmatprep.subr.bf16.mxu1 %v16544_v30  ;;  %v16492_v29 = vcombine.high %v1010_v26, %v1014_v27  ;;  %v1018_v30 = vld [vmem:[#allocation9 + $0x500] sm:$0xff]  ;;  %v16491_v32 = vcombine.low %v1010_v26, %v1014_v27 }
 0x21e   :  { %2457 = vmatpush1.bf16.msra.mxu0 %v16419_v39  ;;  %v16559_v39 = vcombine.low %v1076_v36, %v1080_v37  ;;  %v1038_v36 = vld [vmem:[#allocation9 + $0x5a0] sm:$0xff] }
 0x21f   :  { %2458 = vmatprep.subr.bf16.mxu0 %v16428_v41  ;;  %v1088_v41 = vld [vmem:[#allocation9 + $0x730] sm:$0xff] }
 0x220   :  { %2670 = vmatpush1.bf16.msra.mxu1 %v16543_v31  ;;  %v16568_v42 = vcombine.high %v1084_v40, %v1088_v41  ;;  %v16567_v43 = vcombine.low %v1084_v40, %v1088_v41  ;;  %v1022_v31 = vld [vmem:[#allocation9 + $0x520] sm:$0xff] }
 0x221   :  { %2671 = vmatprep.subr.bf16.mxu1 %v16552_v34  ;;  %v16500_v33 = vcombine.high %v1018_v30, %v1022_v31  ;;  %v1026_v34 = vld [vmem:[#allocation9 + $0x540] sm:$0xff]  ;;  %v16499_v19 = vcombine.low %v1018_v30, %v1022_v31 }
 0x222   :  { %2459 = vmatpush1.bf16.msra.mxu0 %v16427_v47  ;;  %v16575_v47 = vcombine.low %v1092_v44, %v1096_v45  ;;  %v1046_v40 = vld [vmem:[#allocation9 + $0x5e0] sm:$0xff] }
 0x223   :  { %2460 = vmatprep.subr.bf16.mxu0 %v16436_v49  ;;  %v1104_v49 = vld [vmem:[#allocation9 + $0x7b0] sm:$0xff]  ;;  %v1054_v44 = vld [vmem:[#allocation9 + $0x620] sm:$0xff] }
 0x224   :  { %2672 = vmatpush1.bf16.msra.mxu1 %v16551_v35  ;;  %v16584_v50 = vcombine.high %v1100_v48, %v1104_v49  ;;  %v16583_v51 = vcombine.low %v1100_v48, %v1104_v49  ;;  %v1030_v35 = vld [vmem:[#allocation9 + $0x560] sm:$0xff] }
 0x225   :  { %2673 = vmatprep.subr.bf16.mxu1 %v16560_v38  ;;  %v16508_v20 = vcombine.high %v1026_v34, %v1030_v35  ;;  %v16507_v37 = vcombine.low %v1026_v34, %v1030_v35  ;;  %v1062_v48 = vld [vmem:[#allocation9 + $0x660] sm:$0xff] }
 0x226   :  { %2461 = vmatpush1.bf16.msra.mxu0 %v16435_v58  ;;  %v16591_v58 = vcombine.low %v1108_v53, %v1112_v56  ;;  %v1070_v53 = vld [vmem:[#allocation9 + $0x6a0] sm:$0xff] }
 0x227   :  { %2462 = vmatprep.subr.bf16.mxu0 %v16444_v60  ;;  %v407_v60 = vrot.slane %v20422_v59, %v20403_v54 }
 0x228   :  { %2674 = vmatpush1.bf16.msra.mxu1 %v16559_v39  ;;  %v1042_v39 = vld [vmem:[#allocation9 + $0x5c0] sm:$0xff] }
 0x229   :  { %2675 = vmatprep.subr.bf16.mxu1 %v16568_v42  ;;  %v16524_v42 = vcombine.high %v1042_v39, %v1046_v40  ;;  %v16523_v45 = vcombine.low %v1042_v39, %v1046_v40  ;;  %v871_v39 = vld [vmem:[#allocation9 + $0x68] sm:$0xff] }
 0x22a   :  { %2463 = vmatpush1.bf16.msra.mxu0 %v16443_v2 }
 0x22b   :  { %2464 = vmatprep.subr.bf16.mxu0 %v16452_v4 }
 0x22c   :  { %2676 = vmatpush1.bf16.msra.mxu1 %v16567_v43  ;;  %v1050_v43 = vld [vmem:[#allocation9 + $0x600] sm:$0xff] }
 0x22d   :  { %2677 = vmatprep.subr.bf16.mxu1 %v16576_v46  ;;  %v16532_v46 = vcombine.high %v1050_v43, %v1054_v44  ;;  %v16531_v49 = vcombine.low %v1050_v43, %v1054_v44 }
 0x22e   :  { %2465 = vmatpush1.bf16.msra.mxu0 %v16451_v10 }
 0x22f   :  { %2466 = vmatprep.subr.bf16.mxu0 %v16460_v12  ;;  %v994_v12 = vld [vmem:[#allocation9 + $0x440] sm:$0xff] }
 0x230   :  { %2678 = vmatpush1.bf16.msra.mxu1 %v16575_v47  ;;  %v16475_v23 = vcombine.low %v994_v12, %v998_v13  ;;  %v1058_v47 = vld [vmem:[#allocation9 + $0x640] sm:$0xff] }
 0x231   :  { %2679 = vmatprep.subr.bf16.mxu1 %v16584_v50  ;;  %v16540_v50 = vcombine.high %v1058_v47, %v1062_v48  ;;  %v16539_v56 = vcombine.low %v1058_v47, %v1062_v48  ;;  %v879_v47 = vld [vmem:[#allocation9 + $0xa8] sm:$0xff] }
 0x232   :  { %2467 = vmatpush1.bf16.msra.mxu0 %v16459_v16 }
 0x233   :  { %2479 = vmatprep.subr.bf16.mxu0 %v16468_v18  ;;  %v16476_v18 = vcombine.high %v994_v12, %v998_v13 }
 0x234   :  { %2680 = vmatpush1.bf16.msra.mxu1 %v16583_v51  ;;  %v1066_v51 = vld [vmem:[#allocation9 + $0x680] sm:$0xff] }
 0x235   :  { %2681 = vmatprep.subr.bf16.mxu1 %v16592_v57  ;;  %v16548_v57 = vcombine.high %v1066_v51, %v1070_v53 }
 0x238   :  { %2682 = vmatpush1.bf16.msra.mxu1 %v16591_v58  ;;  %v1074_v58 = vld [vmem:[#allocation9 + $0x6c0] sm:$0xff] }
 0x288   :  { %v778_v62 = vpop.f32.mrb[4].mxu0 }
 0x289   :  { %v779_v63 = vadd.f32 %v778_v62, %v407_v60  ;;  %v780_v0 = vpop.f32.mrb[5].mxu0 }
 0x28a   :  { %v781_v1 = vadd.f32 %v780_v0, %v411_v61  ;;  %v782_v2 = vpop.f32.mrb[6].mxu0  ;;  %v1086_v0 = vld [vmem:[#allocation9 + $0x720] sm:$0xff] }
 0x28b   :  { %v838_v3 = vmul.f32 0.2, %v779_v63  ;;  %v783_v4 = vadd.f32 %v782_v2, %v407_v60  ;;  %v784_v5 = vpop.f32.mrb[7].mxu0  ;;  %vm830_vm4 = vcmp.gt.f32.partialorder %v779_v63, 0.0  ;;  %v1078_v60 = vld [vmem:[#allocation9 + $0x6e0] sm:$0xff] }
 0x28c   :  { %v839_v6 = vmul.f32 0.2, %v781_v1  ;;  %v785_v7 = vadd.f32 %v784_v5, %v411_v61  ;;  %vm831_vm5 = vcmp.gt.f32.partialorder %v781_v1, 0.0  ;;  %v16547_v61 = vcombine.low %v1066_v51, %v1070_v53  ;;  %v887_v51 = vld [vmem:[#allocation9 + $0xe8] sm:$0xff] }
 0x28d   :  { %vm834_vm6 = vcmp.gt.f32.partialorder %v783_v4, 0.0  ;;  %v842_v8 = vmul.f32 0.2, %v783_v4  ;;  %v846_v10 = vsel %vm830_vm4, %v779_v63, %v838_v3  ;;  %v16556_v62 = vcombine.high %v1074_v58, %v1078_v60  ;;  %v1082_v63 = vld [vmem:[#allocation9 + $0x700] sm:$0xff] }
 0x28e   :  { %vm835_vm7 = vcmp.gt.f32.partialorder %v785_v7, 0.0  ;;  %v843_v9 = vmul.f32 0.2, %v785_v7  ;;  %v847_v14 = vsel %vm831_vm5, %v781_v1, %v839_v6  ;;  %v16555_v1 = vcombine.low %v1074_v58, %v1078_v60  ;;  %v1090_v3 = vld [vmem:[#allocation9 + $0x740] sm:$0xff]  ;;  %v895_v58 = vld [vmem:[#allocation9 + $0x128] sm:$0xff] }
 0x28f   :  { %v850_v11 = vsel %vm834_vm6, %v783_v4, %v842_v8  ;;  %v16564_v2 = vcombine.high %v1082_v63, %v1086_v0  ;;  %v1094_v4 = vld [vmem:[#allocation9 + $0x760] sm:$0xff]  ;;  %v16563_v5 = vcombine.low %v1082_v63, %v1086_v0  ;;  %v20438_v6 = vsub.s32 2, %v20400_v52  ;;  %v903_v63 = vld [vmem:[#allocation9 + $0x168] sm:$0xff] }
 0x290   :  { %v20428_v15 = vpack.c.bf16 %v850_v11, %v846_v10  ;;  %v851_v16 = vsel %vm835_vm7, %v785_v7, %v843_v9  ;;  %v16572_v7 = vcombine.high %v1090_v3, %v1094_v4  ;;  %v20441_v8 = vsub.s32 3, %v20400_v52  ;;  %v1098_v9 = vld [vmem:[#allocation9 + $0x780] sm:$0xff] }
 0x291   :  { %v20430_v17 = vpack.c.bf16 %v851_v16, %v847_v14  ;;  %v1102_v10 = vld [vmem:[#allocation9 + $0x7a0] sm:$0xff]  ;;  %v415_v11 = vrot.slane %v20422_v59, %v20438_v6  ;;  %v16571_v12 = vcombine.low %v1090_v3, %v1094_v4  ;;  %v911_v3 = vld [vmem:[#allocation9 + $0x1a8] sm:$0xff] }
 0x292   :  { %v419_v13 = vrot.slane %v20422_v59, %v20441_v8  ;;  %v16580_v14 = vcombine.high %v1098_v9, %v1102_v10  ;;  %v1106_v16 = vld [vmem:[#allocation9 + $0x7c0] sm:$0xff] }
 0x293   :  { %2468 = vmatprep.mubr.bf16.mxu0 %v20430_v17 }
 0x294   :  { %2469 = vmatmul.mubr.bf16.vlgmr.msra.gmra.mrb[12].mxu0 %v20428_v15 }
 0x295   :  { %2480 = vmatpush1.bf16.msra.mxu0 %v16467_v25  ;;  %v1034_v25 = vld [vmem:[#allocation9 + $0x580] sm:$0xff] }
 0x296   :  { %2481 = vmatprep.subr.bf16.mxu0 %v16476_v18  ;;  %v16516_v38 = vcombine.high %v1034_v25, %v1038_v36  ;;  %v16515_v41 = vcombine.low %v1034_v25, %v1038_v36  ;;  %v1110_v18 = vld [vmem:[#allocation9 + $0x7e0] sm:$0xff] }
 0x299   :  { %2482 = vmatpush1.bf16.msra.mxu0 %v16475_v23 }
 0x29a   :  { %2483 = vmatprep.subr.bf16.mxu0 %v16484_v24  ;;  %v16579_v24 = vcombine.low %v1098_v9, %v1102_v10  ;;  %v919_v9 = vld [vmem:[#allocation9 + $0x1e8] sm:$0xff] }
 0x29d   :  { %2484 = vmatpush1.bf16.msra.mxu0 %v16483_v28  ;;  %v16588_v28 = vcombine.high %v1106_v16, %v1110_v18 }
 0x29e   :  { %2485 = vmatprep.subr.bf16.mxu0 %v16492_v29 }
 0x2a1   :  { %2486 = vmatpush1.bf16.msra.mxu0 %v16491_v32  ;;  %v859_v32 = vld [vmem:[#allocation9 + $0x8] sm:$0xff] }
 0x2a2   :  { %2487 = vmatprep.subr.bf16.mxu0 %v16500_v33  ;;  %v863_v33 = vld [vmem:[#allocation9 + $0x28] sm:$0xff] }
 0x2a3   :  { %v16342_v25 = vcombine.high %v859_v32, %v863_v33  ;;  %v16341_v44 = vcombine.low %v859_v32, %v863_v33  ;;  %v2860_v32 = vld [vmem:[#allocation12 + $0xc0] sm:$0xff] }
 0x2a5   :  { %2488 = vmatpush1.bf16.msra.mxu0 %v16499_v19  ;;  %v16587_v19 = vcombine.low %v1106_v16, %v1110_v18  ;;  %v931_v18 = vld [vmem:[#allocation9 + $0x248] sm:$0xff] }
 0x2a6   :  { %2489 = vmatprep.subr.bf16.mxu0 %v16508_v20 }
 0x2a9   :  { %2490 = vmatpush1.bf16.msra.mxu0 %v16507_v37 }
 0x2aa   :  { %2491 = vmatprep.subr.bf16.mxu0 %v16516_v38  ;;  %v867_v38 = vld [vmem:[#allocation9 + $0x48] sm:$0xff] }
 0x2ab   :  { %v16349_v48 = vcombine.low %v867_v38, %v871_v39 }
 0x2ad   :  { %2492 = vmatpush1.bf16.msra.mxu0 %v16515_v41 }
 0x2ae   :  { %2493 = vmatprep.subr.bf16.mxu0 %v16524_v42 }
 0x2b1   :  { %2494 = vmatpush1.bf16.msra.mxu0 %v16523_v45  ;;  %v16350_v45 = vcombine.high %v867_v38, %v871_v39 }
 0x2b2   :  { %2495 = vmatprep.subr.bf16.mxu0 %v16532_v46  ;;  %v875_v46 = vld [vmem:[#allocation9 + $0x88] sm:$0xff] }
 0x2b3   :  { %v16357_v53 = vcombine.low %v875_v46, %v879_v47 }
 0x2b5   :  { %2496 = vmatpush1.bf16.msra.mxu0 %v16531_v49  ;;  %v16358_v49 = vcombine.high %v875_v46, %v879_v47  ;;  %v2892_v46 = vld [vmem:[#allocation12 + $0x1c0] sm:$0xff] }
 0x2b6   :  { %2497 = vmatprep.subr.bf16.mxu0 %v16540_v50  ;;  %v883_v50 = vld [vmem:[#allocation9 + $0xc8] sm:$0xff] }
 0x2b7   :  { %v16365_v60 = vcombine.low %v883_v50, %v887_v51 }
 0x2b9   :  { %2498 = vmatpush1.bf16.msra.mxu0 %v16539_v56  ;;  %v16366_v56 = vcombine.high %v883_v50, %v887_v51  ;;  %v963_v51 = vld [vmem:[#allocation9 + $0x348] sm:$0xff] }
 0x2ba   :  { %2499 = vmatprep.subr.bf16.mxu0 %v16548_v57  ;;  %v891_v57 = vld [vmem:[#allocation9 + $0x108] sm:$0xff] }
 0x2bb   :  { %v16373_v0 = vcombine.low %v891_v57, %v895_v58 }
 0x2bd   :  { %2500 = vmatpush1.bf16.msra.mxu0 %v16547_v61  ;;  %v16374_v61 = vcombine.high %v891_v57, %v895_v58  ;;  %v2908_v57 = vld [vmem:[#allocation12 + $0x240] sm:$0xff] }
 0x2be   :  { %2501 = vmatprep.subr.bf16.mxu0 %v16556_v62  ;;  %v899_v62 = vld [vmem:[#allocation9 + $0x148] sm:$0xff] }
 0x2bf   :  { %v16381_v4 = vcombine.low %v899_v62, %v903_v63 }
 0x2c1   :  { %2502 = vmatpush1.bf16.msra.mxu0 %v16555_v1  ;;  %v16382_v1 = vcombine.high %v899_v62, %v903_v63  ;;  %v971_v63 = vld [vmem:[#allocation9 + $0x388] sm:$0xff] }
 0x2c2   :  { %2503 = vmatprep.subr.bf16.mxu0 %v16564_v2  ;;  %v907_v2 = vld [vmem:[#allocation9 + $0x188] sm:$0xff] }
 0x2c3   :  { %v16389_v10 = vcombine.low %v907_v2, %v911_v3 }
 0x2c5   :  { %2504 = vmatpush1.bf16.msra.mxu0 %v16563_v5  ;;  %v16390_v5 = vcombine.high %v907_v2, %v911_v3  ;;  %v2924_v2 = vld [vmem:[#allocation12 + $0x2c0] sm:$0xff] }
 0x2c6   :  { %2505 = vmatprep.subr.bf16.mxu0 %v16572_v7  ;;  %v915_v7 = vld [vmem:[#allocation9 + $0x1c8] sm:$0xff] }
 0x2c8   :  { %v821_v21 = vpop.f32.mrb[8].mxu0 }
 0x2c9   :  { %v822_v22 = vadd.f32 %v821_v21, %v415_v11  ;;  %v823_v23 = vpop.f32.mrb[9].mxu0  ;;  %2506 = vmatpush1.bf16.msra.mxu0 %v16571_v12  ;;  %v923_v12 = vld [vmem:[#allocation9 + $0x208] sm:$0xff] }
 0x2ca   :  { %v824_v26 = vadd.f32 %v823_v23, %v419_v13  ;;  %v825_v27 = vpop.f32.mrb[10].mxu0  ;;  %2507 = vmatprep.subr.bf16.mxu0 %v16580_v14  ;;  %v16397_v14 = vcombine.low %v915_v7, %v919_v9  ;;  %v935_v21 = vld [vmem:[#allocation9 + $0x268] sm:$0xff] }
 0x2cb   :  { %v840_v29 = vmul.f32 0.2, %v822_v22  ;;  %v826_v30 = vadd.f32 %v825_v27, %v415_v11  ;;  %v827_v31 = vpop.f32.mrb[11].mxu0  ;;  %vm832_vm8 = vcmp.gt.f32.partialorder %v822_v22, 0.0  ;;  %v16398_v11 = vcombine.high %v915_v7, %v919_v9  ;;  %v2844_v23 = vld [vmem:[#allocation12 + $0x40] sm:$0xff] }
 0x2cc   :  { %v841_v34 = vmul.f32 0.2, %v824_v26  ;;  %v828_v59 = vadd.f32 %v827_v31, %v419_v13  ;;  %vm833_vm9 = vcmp.gt.f32.partialorder %v824_v26, 0.0  ;;  %v927_v13 = vld [vmem:[#allocation9 + $0x228] sm:$0xff]  ;;  %v16413_v33 = vcombine.low %v931_v18, %v935_v21 }
 0x2cd   :  { %vm836_vm10 = vcmp.gt.f32.partialorder %v826_v30, 0.0  ;;  %v844_v35 = vmul.f32 0.2, %v826_v30  ;;  %2508 = vmatpush1.bf16.msra.mxu0 %v16579_v24  ;;  %v848_v36 = vsel %vm832_vm8, %v822_v22, %v840_v29  ;;  %v16406_v16 = vcombine.high %v923_v12, %v927_v13  ;;  %v2836_v22 = vld [vmem:[#allocation12] sm:$0xff] }
 0x2ce   :  { %vm837_vm11 = vcmp.gt.f32.partialorder %v828_v59, 0.0  ;;  %v845_v20 = vmul.f32 0.2, %v828_v59  ;;  %2509 = vmatprep.subr.bf16.mxu0 %v16588_v28  ;;  %v849_v40 = vsel %vm833_vm9, %v824_v26, %v841_v34  ;;  %v16405_v24 = vcombine.low %v923_v12, %v927_v13  ;;  %v939_v29 = vld [vmem:[#allocation9 + $0x288] sm:$0xff] }
 0x2cf   :  { %v852_v37 = vsel %vm836_vm10, %v826_v30, %v844_v35  ;;  %v16595_v26 = vcombine.low %v2836_v22, %v2844_v23  ;;  %v16596_v27 = vcombine.high %v2836_v22, %v2844_v23  ;;  %v16414_v28 = vcombine.high %v931_v18, %v935_v21  ;;  %v943_v30 = vld [vmem:[#allocation9 + $0x2a8] sm:$0xff] }
 0x2d0   :  { %v20447_v41 = vpack.c.bf16 %v852_v37, %v848_v36  ;;  %v853_v42 = vsel %vm837_vm11, %v828_v59, %v845_v20  ;;  %v2852_v31 = vld [vmem:[#allocation12 + $0x80] sm:$0xff]  ;;  %v16422_v35 = vcombine.high %v939_v29, %v943_v30  ;;  %v16421_v37 = vcombine.low %v939_v29, %v943_v30 }
 0x2d1   :  { %v20449_v43 = vpack.c.bf16 %v853_v42, %v849_v40  ;;  %2510 = vmatpush1.bf16.msra.mxu0 %v16587_v19  ;;  %9064 = vmatprep.subr.bf16.mxu1 %v16596_v27  ;;  %v16611_v34 = vcombine.low %v2852_v31, %v2860_v32  ;;  %v16612_v59 = vcombine.high %v2852_v31, %v2860_v32  ;;  %v947_v19 = vld [vmem:[#allocation9 + $0x2c8] sm:$0xff] }
 0x2d2   :  { %2522 = vmatprep.subr.bf16.mxu0 %v16342_v25  ;;  %v951_v20 = vld [vmem:[#allocation9 + $0x2e8] sm:$0xff] }
 0x2d3   :  { %2511 = vmatprep.mubr.bf16.mxu0 %v20449_v43  ;;  %2683 = vmatprep.mubr.bf16.mxu1 %v20449_v43  ;;  %v2868_v25 = vld [vmem:[#allocation12 + $0x100] sm:$0xff]  ;;  %v16430_v40 = vcombine.high %v947_v19, %v951_v20  ;;  %v16429_v47 = vcombine.low %v947_v19, %v951_v20 }
 0x2d4   :  { %2512 = vmatmul.mubr.bf16.vlgmr.msra.gmra.mrb[12].mxu0 %v20447_v41  ;;  %2684 = vmatmul.mubr.bf16.vlgmr.msra.gmra.mrb[0].mxu1 %v20447_v41  ;;  %v2876_v36 = vld [vmem:[#allocation12 + $0x140] sm:$0xff] }
 0x2d5   :  { %2523 = vmatpush1.bf16.msra.mxu0 %v16341_v44  ;;  %2554 = vmatprep.mubr.bf16.mxu0 %v20430_v17  ;;  %v16627_v38 = vcombine.low %v2868_v25, %v2876_v36  ;;  %v16628_v39 = vcombine.high %v2868_v25, %v2876_v36  ;;  %v955_v42 = vld [vmem:[#allocation9 + $0x308] sm:$0xff] }
 0x2d6   :  { %2524 = vmatprep.subr.bf16.mxu0 %v16350_v45  ;;  %9065 = vmatpush1.bf16.msra.mxu1 %v16595_v26  ;;  %v959_v44 = vld [vmem:[#allocation9 + $0x328] sm:$0xff] }
 0x2d7   :  { %9066 = vmatprep.subr.bf16.mxu1 %v16612_v59  ;;  %v2884_v45 = vld [vmem:[#allocation12 + $0x180] sm:$0xff]  ;;  %v16438_v50 = vcombine.high %v955_v42, %v959_v44  ;;  %v16437_v58 = vcombine.low %v955_v42, %v959_v44 }
 0x2d8   :  { %v979_v9 = vld [vmem:[#allocation9 + $0x3c8] sm:$0xff] }
 0x2d9   :  { %2525 = vmatpush1.bf16.msra.mxu0 %v16349_v48  ;;  %v16643_v48 = vcombine.low %v2884_v45, %v2892_v46  ;;  %v2940_v12 = vld [vmem:[#allocation12 + $0x340] sm:$0xff] }
 0x2da   :  { %2526 = vmatprep.subr.bf16.mxu0 %v16358_v49  ;;  %9067 = vmatpush1.bf16.msra.mxu1 %v16611_v34  ;;  %v16644_v49 = vcombine.high %v2884_v45, %v2892_v46  ;;  %v987_v21 = vld [vmem:[#allocation9 + $0x408] sm:$0xff] }
 0x2db   :  { %9068 = vmatprep.subr.bf16.mxu1 %v16628_v39  ;;  %v991_v22 = vld [vmem:[#allocation9 + $0x428] sm:$0xff] }
 0x2dc   :  { %v2948_v23 = vld [vmem:[#allocation12 + $0x380] sm:$0xff]  ;;  %v16470_v29 = vcombine.high %v987_v21, %v991_v22  ;;  %v16469_v34 = vcombine.low %v987_v21, %v991_v22 }
 0x2dd   :  { %2527 = vmatpush1.bf16.msra.mxu0 %v16357_v53  ;;  %v967_v53 = vld [vmem:[#allocation9 + $0x368] sm:$0xff] }
 0x2de   :  { %2528 = vmatprep.subr.bf16.mxu0 %v16366_v56  ;;  %9069 = vmatpush1.bf16.msra.mxu1 %v16627_v38  ;;  %v2900_v56 = vld [vmem:[#allocation12 + $0x200] sm:$0xff]  ;;  %v16446_v62 = vcombine.high %v963_v51, %v967_v53  ;;  %v16445_v3 = vcombine.low %v963_v51, %v967_v53 }
 0x2df   :  { %9070 = vmatprep.subr.bf16.mxu1 %v16644_v49  ;;  %v995_v30 = vld [vmem:[#allocation9 + $0x448] sm:$0xff] }
 0x2e0   :  { %v999_v31 = vld [vmem:[#allocation9 + $0x468] sm:$0xff] }
 0x2e1   :  { %2529 = vmatpush1.bf16.msra.mxu0 %v16365_v60  ;;  %v16659_v60 = vcombine.low %v2900_v56, %v2908_v57  ;;  %v2964_v32 = vld [vmem:[#allocation12 + $0x400] sm:$0xff]  ;;  %v16478_v19 = vcombine.high %v995_v30, %v999_v31  ;;  %v16477_v38 = vcombine.low %v995_v30, %v999_v31 }
 0x2e2   :  { %2530 = vmatprep.subr.bf16.mxu0 %v16374_v61  ;;  %9071 = vmatpush1.bf16.msra.mxu1 %v16643_v48  ;;  %v16660_v61 = vcombine.high %v2900_v56, %v2908_v57  ;;  %v1003_v20 = vld [vmem:[#allocation9 + $0x488] sm:$0xff] }
 0x2e3   :  { %v1007_v25 = vld [vmem:[#allocation9 + $0x4a8] sm:$0xff] }
 0x2e4   :  { %9072 = vmatprep.subr.bf16.mxu1 %v16660_v61  ;;  %v2980_v36 = vld [vmem:[#allocation12 + $0x480] sm:$0xff]  ;;  %v16486_v42 = vcombine.high %v1003_v20, %v1007_v25  ;;  %v16485_v48 = vcombine.low %v1003_v20, %v1007_v25 }
 0x2e5   :  { %2531 = vmatpush1.bf16.msra.mxu0 %v16373_v0  ;;  %v975_v0 = vld [vmem:[#allocation9 + $0x3a8] sm:$0xff] }
 0x2e6   :  { %2532 = vmatprep.subr.bf16.mxu0 %v16382_v1  ;;  %9073 = vmatpush1.bf16.msra.mxu1 %v16659_v60  ;;  %v2916_v1 = vld [vmem:[#allocation12 + $0x280] sm:$0xff]  ;;  %v16454_v7 = vcombine.high %v971_v63, %v975_v0  ;;  %v16453_v13 = vcombine.low %v971_v63, %v975_v0 }
 0x2e7   :  { %v1011_v44 = vld [vmem:[#allocation9 + $0x4c8] sm:$0xff] }
 0x2e8   :  { %v1015_v45 = vld [vmem:[#allocation9 + $0x4e8] sm:$0xff] }
 0x2e9   :  { %2533 = vmatpush1.bf16.msra.mxu0 %v16381_v4  ;;  %v16675_v4 = vcombine.low %v2916_v1, %v2924_v2  ;;  %v2996_v46 = vld [vmem:[#allocation12 + $0x500] sm:$0xff]  ;;  %v16494_v51 = vcombine.high %v1011_v44, %v1015_v45  ;;  %v16493_v60 = vcombine.low %v1011_v44, %v1015_v45 }
 0x2ea   :  { %2534 = vmatprep.subr.bf16.mxu0 %v16390_v5  ;;  %v16676_v5 = vcombine.high %v2916_v1, %v2924_v2  ;;  %v1019_v53 = vld [vmem:[#allocation9 + $0x508] sm:$0xff] }
 0x2eb   :  { %v1023_v56 = vld [vmem:[#allocation9 + $0x528] sm:$0xff] }
 0x2ec   :  { %9074 = vmatprep.subr.bf16.mxu1 %v16676_v5  ;;  %v3012_v57 = vld [vmem:[#allocation12 + $0x580] sm:$0xff]  ;;  %v16502_v63 = vcombine.high %v1019_v53, %v1023_v56 }
 0x2ed   :  { %2535 = vmatpush1.bf16.msra.mxu0 %v16389_v10  ;;  %v983_v10 = vld [vmem:[#allocation9 + $0x3e8] sm:$0xff]  ;;  %9075 = vmatpush1.bf16.msra.mxu1 %v16675_v4  ;;  %v16501_v4 = vcombine.low %v1019_v53, %v1023_v56 }
 0x2ee   :  { %2536 = vmatprep.subr.bf16.mxu0 %v16398_v11  ;;  %v2932_v11 = vld [vmem:[#allocation12 + $0x300] sm:$0xff]  ;;  %v16462_v18 = vcombine.high %v979_v9, %v983_v10  ;;  %v16461_v26 = vcombine.low %v979_v9, %v983_v10 }
 0x2ef   :  { %v1027_v0 = vld [vmem:[#allocation9 + $0x548] sm:$0xff] }
 0x2f0   :  { %v1031_v1 = vld [vmem:[#allocation9 + $0x568] sm:$0xff] }
 0x2f1   :  { %2537 = vmatpush1.bf16.msra.mxu0 %v16397_v14  ;;  %v16691_v14 = vcombine.low %v2932_v11, %v2940_v12  ;;  %v3028_v2 = vld [vmem:[#allocation12 + $0x600] sm:$0xff]  ;;  %v16510_v9 = vcombine.high %v1027_v0, %v1031_v1 }
 0x2f2   :  { %2538 = vmatprep.subr.bf16.mxu0 %v16406_v16  ;;  %v16692_v16 = vcombine.high %v2932_v11, %v2940_v12  ;;  %v1035_v10 = vld [vmem:[#allocation9 + $0x588] sm:$0xff] }
 0x2f3   :  { %v1039_v11 = vld [vmem:[#allocation9 + $0x5a8] sm:$0xff] }
 0x2f4   :  { %9076 = vmatprep.subr.bf16.mxu1 %v16692_v16  ;;  %v3044_v12 = vld [vmem:[#allocation12 + $0x680] sm:$0xff] }
 0x2f5   :  { %2539 = vmatpush1.bf16.msra.mxu0 %v16405_v24  ;;  %9077 = vmatpush1.bf16.msra.mxu1 %v16691_v14  ;;  %v2956_v24 = vld [vmem:[#allocation12 + $0x3c0] sm:$0xff]  ;;  %v16509_v14 = vcombine.low %v1027_v0, %v1031_v1 }
 0x2f6   :  { %2540 = vmatprep.subr.bf16.mxu0 %v16414_v28  ;;  %v16707_v27 = vcombine.low %v2948_v23, %v2956_v24  ;;  %v16708_v28 = vcombine.high %v2948_v23, %v2956_v24  ;;  %v1043_v22 = vld [vmem:[#allocation9 + $0x5c8] sm:$0xff] }
 0x2f7   :  { %v1047_v23 = vld [vmem:[#allocation9 + $0x5e8] sm:$0xff] }
 0x2f8   :  { %9078 = vmatprep.subr.bf16.mxu1 %v16708_v28  ;;  %v3060_v24 = vld [vmem:[#allocation12 + $0x700] sm:$0xff] }
 0x2f9   :  { %2541 = vmatpush1.bf16.msra.mxu0 %v16413_v33  ;;  %9079 = vmatpush1.bf16.msra.mxu1 %v16707_v27  ;;  %v2972_v33 = vld [vmem:[#allocation12 + $0x440] sm:$0xff]  ;;  %v16517_v27 = vcombine.low %v1035_v10, %v1039_v11 }
 0x2fa   :  { %2542 = vmatprep.subr.bf16.mxu0 %v16422_v35  ;;  %v16723_v59 = vcombine.low %v2964_v32, %v2972_v33  ;;  %v16724_v35 = vcombine.high %v2964_v32, %v2972_v33  ;;  %v1051_v31 = vld [vmem:[#allocation9 + $0x608] sm:$0xff] }
 0x2fb   :  { %v1055_v32 = vld [vmem:[#allocation9 + $0x628] sm:$0xff] }
 0x2fc   :  { %9080 = vmatprep.subr.bf16.mxu1 %v16724_v35  ;;  %v3076_v33 = vld [vmem:[#allocation12 + $0x780] sm:$0xff] }
 0x2fd   :  { %2543 = vmatpush1.bf16.msra.mxu0 %v16421_v37  ;;  %9081 = vmatpush1.bf16.msra.mxu1 %v16723_v59  ;;  %v2988_v37 = vld [vmem:[#allocation12 + $0x4c0] sm:$0xff]  ;;  %v16525_v59 = vcombine.low %v1043_v22, %v1047_v23 }
 0x2fe   :  { %2544 = vmatprep.subr.bf16.mxu0 %v16430_v40  ;;  %v16739_v39 = vcombine.low %v2980_v36, %v2988_v37  ;;  %v16740_v40 = vcombine.high %v2980_v36, %v2988_v37  ;;  %v1059_v25 = vld [vmem:[#allocation9 + $0x648] sm:$0xff]  ;;  %v16533_v37 = vcombine.low %v1051_v31, %v1055_v32 }
 0x2ff   :  { %v1063_v36 = vld [vmem:[#allocation9 + $0x668] sm:$0xff] }
 0x300   :  { %9082 = vmatprep.subr.bf16.mxu1 %v16740_v40  ;;  %v1071_v40 = vld [vmem:[#allocation9 + $0x6a8] sm:$0xff] }
 0x301   :  { %2545 = vmatpush1.bf16.msra.mxu0 %v16429_v47  ;;  %9083 = vmatpush1.bf16.msra.mxu1 %v16739_v39  ;;  %v3004_v47 = vld [vmem:[#allocation12 + $0x540] sm:$0xff] }
 0x302   :  { %2546 = vmatprep.subr.bf16.mxu0 %v16438_v50  ;;  %v16755_v49 = vcombine.low %v2996_v46, %v3004_v47  ;;  %v16756_v50 = vcombine.high %v2996_v46, %v3004_v47  ;;  %v1067_v39 = vld [vmem:[#allocation9 + $0x688] sm:$0xff] }
 0x303   :  { %v16550_v44 = vcombine.high %v1067_v39, %v1071_v40  ;;  %v1075_v45 = vld [vmem:[#allocation9 + $0x6c8] sm:$0xff]  ;;  %v16549_v47 = vcombine.low %v1067_v39, %v1071_v40  ;;  %v924_v40 = vld [vmem:[#allocation9 + $0x210] sm:$0xff] }
 0x304   :  { %9084 = vmatprep.subr.bf16.mxu1 %v16756_v50  ;;  %v1079_v46 = vld [vmem:[#allocation9 + $0x6e8] sm:$0xff] }
 0x305   :  { %2547 = vmatpush1.bf16.msra.mxu0 %v16437_v58  ;;  %9085 = vmatpush1.bf16.msra.mxu1 %v16755_v49  ;;  %v3020_v58 = vld [vmem:[#allocation12 + $0x5c0] sm:$0xff] }
 0x306   :  { %2548 = vmatprep.subr.bf16.mxu0 %v16446_v62  ;;  %v16771_v61 = vcombine.low %v3012_v57, %v3020_v58  ;;  %v16772_v62 = vcombine.high %v3012_v57, %v3020_v58  ;;  %v1083_v49 = vld [vmem:[#allocation9 + $0x708] sm:$0xff] }
 0x307   :  { %v1087_v50 = vld [vmem:[#allocation9 + $0x728] sm:$0xff] }
 0x308   :  { %9086 = vmatprep.subr.bf16.mxu1 %v16772_v62  ;;  %v16566_v53 = vcombine.high %v1083_v49, %v1087_v50  ;;  %v1091_v56 = vld [vmem:[#allocation9 + $0x748] sm:$0xff]  ;;  %v16565_v58 = vcombine.low %v1083_v49, %v1087_v50 }
 0x309   :  { %2549 = vmatpush1.bf16.msra.mxu0 %v16445_v3  ;;  %9087 = vmatpush1.bf16.msra.mxu1 %v16771_v61  ;;  %v3036_v3 = vld [vmem:[#allocation12 + $0x640] sm:$0xff] }
 0x30a   :  { %2550 = vmatprep.subr.bf16.mxu0 %v16454_v7  ;;  %v16787_v5 = vcombine.low %v3028_v2, %v3036_v3  ;;  %v16788_v7 = vcombine.high %v3028_v2, %v3036_v3  ;;  %v1095_v57 = vld [vmem:[#allocation9 + $0x768] sm:$0xff] }
 0x30b   :  { %v1099_v61 = vld [vmem:[#allocation9 + $0x788] sm:$0xff] }
 0x30c   :  { %9088 = vmatprep.subr.bf16.mxu1 %v16788_v7  ;;  %v1103_v62 = vld [vmem:[#allocation9 + $0x7a8] sm:$0xff]  ;;  %v864_v7 = vld [vmem:[#allocation9 + $0x30] sm:$0xff] }
 0x30d   :  { %2551 = vmatpush1.bf16.msra.mxu0 %v16453_v13  ;;  %9089 = vmatpush1.bf16.msra.mxu1 %v16787_v5  ;;  %v3052_v13 = vld [vmem:[#allocation12 + $0x6c0] sm:$0xff]  ;;  %v16582_v0 = vcombine.high %v1099_v61, %v1103_v62  ;;  %v16581_v3 = vcombine.low %v1099_v61, %v1103_v62  ;;  %v860_v5 = vld [vmem:[#allocation9 + $0x10] sm:$0xff] }
 0x30e   :  { %2552 = vmatprep.subr.bf16.mxu0 %v16462_v18  ;;  %v16804_v16 = vcombine.high %v3044_v12, %v3052_v13  ;;  %v16518_v18 = vcombine.high %v1035_v10, %v1039_v11  ;;  %v16803_v21 = vcombine.low %v3044_v12, %v3052_v13  ;;  %v1107_v1 = vld [vmem:[#allocation9 + $0x7c8] sm:$0xff]  ;;  %v16344_v10 = vcombine.high %v860_v5, %v864_v7  ;;  %v868_v11 = vld [vmem:[#allocation9 + $0x50] sm:$0xff] }
 0x30f   :  { %v1111_v2 = vld [vmem:[#allocation9 + $0x7e8] sm:$0xff]  ;;  %v872_v12 = vld [vmem:[#allocation9 + $0x70] sm:$0xff]  ;;  %v16343_v13 = vcombine.low %v860_v5, %v864_v7 }
 0x310   :  { %9090 = vmatprep.subr.bf16.mxu1 %v16804_v16  ;;  %v876_v16 = vld [vmem:[#allocation9 + $0x90] sm:$0xff]  ;;  %v20462_v49 = vld [vmem:[#allocation12 + $0x840] sm:$0xff] }
 0x311   :  { %2553 = vmatpush1.bf16.msra.mxu0 %v16461_v26  ;;  %9091 = vmatpush1.bf16.msra.mxu1 %v16803_v21  ;;  %v3068_v26 = vld [vmem:[#allocation12 + $0x740] sm:$0xff]  ;;  %v16351_v21 = vcombine.low %v868_v11, %v872_v12  ;;  %v948_v62 = vld [vmem:[#allocation9 + $0x2d0] sm:$0xff] }
 0x312   :  { %2565 = vmatprep.subr.bf16.mxu0 %v16470_v29  ;;  %v16820_v28 = vcombine.high %v3060_v24, %v3068_v26  ;;  %v16526_v29 = vcombine.high %v1043_v22, %v1047_v23  ;;  %v16819_v30 = vcombine.low %v3060_v24, %v3068_v26  ;;  %v884_v23 = vld [vmem:[#allocation9 + $0xd0] sm:$0xff] }
 0x313   :  { %v888_v24 = vld [vmem:[#allocation9 + $0xf0] sm:$0xff] }
 0x314   :  { %2555 = vmatmul.mubr.bf16.vlgmr.msra.gmra.mrb[16].mxu0 %v20428_v15  ;;  %9092 = vmatprep.subr.bf16.mxu1 %v16820_v28  ;;  %v892_v28 = vld [vmem:[#allocation9 + $0x110] sm:$0xff] }
 0x315   :  { %2566 = vmatpush1.bf16.msra.mxu0 %v16469_v34  ;;  %2597 = vmatprep.mubr.bf16.mxu0 %v20449_v43  ;;  %v3084_v34 = vld [vmem:[#allocation12 + $0x7c0] sm:$0xff]  ;;  %v964_v7 = vld [vmem:[#allocation9 + $0x350] sm:$0xff] }
 0x316   :  { %2567 = vmatprep.subr.bf16.mxu0 %v16478_v19  ;;  %9093 = vmatpush1.bf16.msra.mxu1 %v16819_v30  ;;  %v16836_v35 = vcombine.high %v3076_v33, %v3084_v34  ;;  %v16534_v19 = vcombine.high %v1051_v31, %v1055_v32  ;;  %v16835_v20 = vcombine.low %v3076_v33, %v3084_v34  ;;  %v900_v32 = vld [vmem:[#allocation9 + $0x150] sm:$0xff] }
 0x317   :  { %v16367_v30 = vcombine.low %v884_v23, %v888_v24  ;;  %v904_v33 = vld [vmem:[#allocation9 + $0x170] sm:$0xff] }
 0x318   :  { %9094 = vmatprep.subr.bf16.mxu1 %v16836_v35  ;;  %v908_v35 = vld [vmem:[#allocation9 + $0x190] sm:$0xff] }
 0x319   :  { %2568 = vmatpush1.bf16.msra.mxu0 %v16477_v38  ;;  %v16542_v38 = vcombine.high %v1059_v25, %v1063_v36 }
 0x31a   :  { %2569 = vmatprep.subr.bf16.mxu0 %v16486_v42  ;;  %9095 = vmatpush1.bf16.msra.mxu1 %v16835_v20  ;;  %v16541_v42 = vcombine.low %v1059_v25, %v1063_v36  ;;  %v16383_v20 = vcombine.low %v900_v32, %v904_v33  ;;  %v916_v36 = vld [vmem:[#allocation9 + $0x1d0] sm:$0xff] }
 0x31d   :  { %2570 = vmatpush1.bf16.msra.mxu0 %v16485_v48  ;;  %v16558_v48 = vcombine.high %v1075_v45, %v1079_v46 }
 0x31e   :  { %2571 = vmatprep.subr.bf16.mxu0 %v16494_v51  ;;  %v16557_v51 = vcombine.low %v1075_v45, %v1079_v46  ;;  %v932_v46 = vld [vmem:[#allocation9 + $0x250] sm:$0xff] }
 0x321   :  { %2572 = vmatpush1.bf16.msra.mxu0 %v16493_v60  ;;  %v16574_v60 = vcombine.high %v1091_v56, %v1095_v57 }
 0x322   :  { %2573 = vmatprep.subr.bf16.mxu0 %v16502_v63  ;;  %v16573_v63 = vcombine.low %v1091_v56, %v1095_v57  ;;  %v940_v57 = vld [vmem:[#allocation9 + $0x290] sm:$0xff] }
 0x325   :  { %2574 = vmatpush1.bf16.msra.mxu0 %v16501_v4  ;;  %v16590_v4 = vcombine.high %v1107_v1, %v1111_v2 }
 0x326   :  { %2575 = vmatprep.subr.bf16.mxu0 %v16510_v9  ;;  %v16589_v9 = vcombine.low %v1107_v1, %v1111_v2  ;;  %v956_v2 = vld [vmem:[#allocation9 + $0x310] sm:$0xff] }
 0x329   :  { %2576 = vmatpush1.bf16.msra.mxu0 %v16509_v14  ;;  %v16352_v14 = vcombine.high %v868_v11, %v872_v12  ;;  %v972_v12 = vld [vmem:[#allocation9 + $0x390] sm:$0xff] }
 0x32a   :  { %2577 = vmatprep.subr.bf16.mxu0 %v16518_v18  ;;  %v880_v18 = vld [vmem:[#allocation9 + $0xb0] sm:$0xff] }
 0x32b   :  { %v16360_v22 = vcombine.high %v876_v16, %v880_v18  ;;  %v16359_v26 = vcombine.low %v876_v16, %v880_v18  ;;  %v980_v18 = vld [vmem:[#allocation9 + $0x3d0] sm:$0xff] }
 0x32d   :  { %2578 = vmatpush1.bf16.msra.mxu0 %v16517_v27  ;;  %v16368_v27 = vcombine.high %v884_v23, %v888_v24  ;;  %v861_v24 = vld [vmem:[#allocation9 + $0x18] sm:$0xff] }
 0x32e   :  { %2579 = vmatprep.subr.bf16.mxu0 %v16526_v29  ;;  %v896_v29 = vld [vmem:[#allocation9 + $0x130] sm:$0xff] }
 0x32f   :  { %v16376_v31 = vcombine.high %v892_v28, %v896_v29  ;;  %v16375_v34 = vcombine.low %v892_v28, %v896_v29  ;;  %v869_v29 = vld [vmem:[#allocation9 + $0x58] sm:$0xff] }
 0x331   :  { %2580 = vmatpush1.bf16.msra.mxu0 %v16525_v59  ;;  %v16384_v59 = vcombine.high %v900_v32, %v904_v33  ;;  %v877_v33 = vld [vmem:[#allocation9 + $0x98] sm:$0xff] }
 0x332   :  { %2581 = vmatprep.subr.bf16.mxu0 %v16534_v19  ;;  %v912_v19 = vld [vmem:[#allocation9 + $0x1b0] sm:$0xff] }
 0x333   :  { %v16392_v25 = vcombine.high %v908_v35, %v912_v19 }
 0x335   :  { %2582 = vmatpush1.bf16.msra.mxu0 %v16533_v37  ;;  %v920_v37 = vld [vmem:[#allocation9 + $0x1f0] sm:$0xff] }
 0x336   :  { %2583 = vmatprep.subr.bf16.mxu0 %v16542_v38  ;;  %v16391_v38 = vcombine.low %v908_v35, %v912_v19  ;;  %v16400_v39 = vcombine.high %v916_v36, %v920_v37  ;;  %v885_v19 = vld [vmem:[#allocation9 + $0xd8] sm:$0xff] }
 0x339   :  { %2584 = vmatpush1.bf16.msra.mxu0 %v16541_v42  ;;  %v928_v42 = vld [vmem:[#allocation9 + $0x230] sm:$0xff] }
 0x33a   :  { %2585 = vmatprep.subr.bf16.mxu0 %v16550_v44  ;;  %v16399_v44 = vcombine.low %v916_v36, %v920_v37  ;;  %v16408_v45 = vcombine.high %v924_v40, %v928_v42  ;;  %v16407_v50 = vcombine.low %v924_v40, %v928_v42  ;;  %v893_v37 = vld [vmem:[#allocation9 + $0x118] sm:$0xff] }
 0x33b   :  { %v901_v42 = vld [vmem:[#allocation9 + $0x158] sm:$0xff] }
 0x33d   :  { %2586 = vmatpush1.bf16.msra.mxu0 %v16549_v47  ;;  %v936_v47 = vld [vmem:[#allocation9 + $0x270] sm:$0xff] }
 0x33e   :  { %2587 = vmatprep.subr.bf16.mxu0 %v16558_v48  ;;  %v20460_v48 = vld [vmem:[#allocation12 + $0x800] sm:$0xff]  ;;  %v16416_v56 = vcombine.high %v932_v46, %v936_v47 }
 0x341   :  { %2588 = vmatpush1.bf16.msra.mxu0 %v16557_v51  ;;  %v16851_v51 = vcombine.low %v20460_v48, %v20462_v49 }
 0x342   :  { %2589 = vmatprep.subr.bf16.mxu0 %v16566_v53  ;;  %v16852_v53 = vcombine.high %v20460_v48, %v20462_v49  ;;  %v3156_v49 = vld [vmem:[#allocation12 + $0xa00] sm:$0xff] }
 0x344   :  { %9107 = vmatprep.subr.bf16.mxu1 %v16852_v53 }
 0x345   :  { %2590 = vmatpush1.bf16.msra.mxu0 %v16565_v58  ;;  %v944_v58 = vld [vmem:[#allocation9 + $0x2b0] sm:$0xff] }
 0x346   :  { %2591 = vmatprep.subr.bf16.mxu0 %v16574_v60  ;;  %v16415_v60 = vcombine.low %v932_v46, %v936_v47  ;;  %v16424_v61 = vcombine.high %v940_v57, %v944_v58  ;;  %v909_v47 = vld [vmem:[#allocation9 + $0x198] sm:$0xff] }
 0x349   :  { %2592 = vmatpush1.bf16.msra.mxu0 %v16573_v63  ;;  %v952_v63 = vld [vmem:[#allocation9 + $0x2f0] sm:$0xff] }
 0x34a   :  { %2593 = vmatprep.subr.bf16.mxu0 %v16582_v0  ;;  %v16423_v0 = vcombine.low %v940_v57, %v944_v58  ;;  %v16432_v1 = vcombine.high %v948_v62, %v952_v63 }
 0x34d   :  { %2594 = vmatpush1.bf16.msra.mxu0 %v16581_v3  ;;  %v960_v3 = vld [vmem:[#allocation9 + $0x330] sm:$0xff] }
 0x34e   :  { %2595 = vmatprep.subr.bf16.mxu0 %v16590_v4  ;;  %v16431_v4 = vcombine.low %v948_v62, %v952_v63  ;;  %v16440_v5 = vcombine.high %v956_v2, %v960_v3  ;;  %v917_v62 = vld [vmem:[#allocation9 + $0x1d8] sm:$0xff] }
 0x34f   :  { %v921_v63 = vld [vmem:[#allocation9 + $0x1f8] sm:$0xff] }
 0x351   :  { %2596 = vmatpush1.bf16.msra.mxu0 %v16589_v9  ;;  %v968_v9 = vld [vmem:[#allocation9 + $0x370] sm:$0xff] }
 0x352   :  { %2608 = vmatprep.subr.bf16.mxu0 %v16344_v10  ;;  %v16439_v10 = vcombine.low %v956_v2, %v960_v3  ;;  %v16448_v11 = vcombine.high %v964_v7, %v968_v9 }
 0x354   :  { %2598 = vmatmul.mubr.bf16.vlgmr.msra.gmra.mrb[16].mxu0 %v20447_v41 }
 0x355   :  { %2609 = vmatpush1.bf16.msra.mxu0 %v16343_v13  ;;  %2640 = vmatprep.mubr.bf16.mxu0 %v20430_v17  ;;  %v976_v13 = vld [vmem:[#allocation9 + $0x3b0] sm:$0xff] }
 0x356   :  { %2610 = vmatprep.subr.bf16.mxu0 %v16352_v14  ;;  %v16447_v14 = vcombine.low %v964_v7, %v968_v9  ;;  %v16456_v16 = vcombine.high %v972_v12, %v976_v13 }
 0x359   :  { %2611 = vmatpush1.bf16.msra.mxu0 %v16351_v21  ;;  %v984_v21 = vld [vmem:[#allocation9 + $0x3f0] sm:$0xff] }
 0x35a   :  { %2612 = vmatprep.subr.bf16.mxu0 %v16360_v22  ;;  %v16455_v22 = vcombine.low %v972_v12, %v976_v13  ;;  %v16464_v23 = vcombine.high %v980_v18, %v984_v21  ;;  %v16402_v13 = vcombine.high %v917_v62, %v921_v63 }
 0x35d   :  { %2613 = vmatpush1.bf16.msra.mxu0 %v16359_v26  ;;  %v865_v26 = vld [vmem:[#allocation9 + $0x38] sm:$0xff] }
 0x35e   :  { %2614 = vmatprep.subr.bf16.mxu0 %v16368_v27  ;;  %v16463_v27 = vcombine.low %v980_v18, %v984_v21  ;;  %v16346_v28 = vcombine.high %v861_v24, %v865_v26  ;;  %v925_v18 = vld [vmem:[#allocation9 + $0x218] sm:$0xff] }
 0x35f   :  { %v929_v21 = vld [vmem:[#allocation9 + $0x238] sm:$0xff] }
 0x361   :  { %2615 = vmatpush1.bf16.msra.mxu0 %v16367_v30  ;;  %v873_v30 = vld [vmem:[#allocation9 + $0x78] sm:$0xff] }
 0x362   :  { %2616 = vmatprep.subr.bf16.mxu0 %v16376_v31  ;;  %v16345_v31 = vcombine.low %v861_v24, %v865_v26  ;;  %v16354_v32 = vcombine.high %v869_v29, %v873_v30  ;;  %v16401_v24 = vcombine.low %v917_v62, %v921_v63 }
 0x365   :  { %2617 = vmatpush1.bf16.msra.mxu0 %v16375_v34  ;;  %v881_v34 = vld [vmem:[#allocation9 + $0xb8] sm:$0xff] }
 0x366   :  { %2618 = vmatprep.subr.bf16.mxu0 %v16384_v59  ;;  %v16353_v59 = vcombine.low %v869_v29, %v873_v30  ;;  %v16362_v35 = vcombine.high %v877_v33, %v881_v34  ;;  %v3108_v29 = vld [vmem:[#allocation12 + $0x880] sm:$0xff] }
 0x367   :  { %v3116_v30 = vld [vmem:[#allocation12 + $0x8c0] sm:$0xff] }
 0x369   :  { %2619 = vmatpush1.bf16.msra.mxu0 %v16383_v20  ;;  %v889_v20 = vld [vmem:[#allocation9 + $0xf8] sm:$0xff] }
 0x36a   :  { %2620 = vmatprep.subr.bf16.mxu0 %v16392_v25  ;;  %v16361_v25 = vcombine.low %v877_v33, %v881_v34  ;;  %v16370_v36 = vcombine.high %v885_v19, %v889_v20  ;;  %v933_v34 = vld [vmem:[#allocation9 + $0x258] sm:$0xff] }
 0x36d   :  { %2621 = vmatpush1.bf16.msra.mxu0 %v16391_v38  ;;  %v897_v38 = vld [vmem:[#allocation9 + $0x138] sm:$0xff] }
 0x36e   :  { %2622 = vmatprep.subr.bf16.mxu0 %v16400_v39  ;;  %v16369_v39 = vcombine.low %v885_v19, %v889_v20  ;;  %v16378_v40 = vcombine.high %v893_v37, %v897_v38  ;;  %v16409_v19 = vcombine.low %v925_v18, %v929_v21  ;;  %v16868_v20 = vcombine.high %v3108_v29, %v3116_v30 }
 0x371   :  { %2623 = vmatpush1.bf16.msra.mxu0 %v16399_v44  ;;  %v905_v44 = vld [vmem:[#allocation9 + $0x178] sm:$0xff] }
 0x372   :  { %2624 = vmatprep.subr.bf16.mxu0 %v16408_v45  ;;  %v16377_v45 = vcombine.low %v893_v37, %v897_v38  ;;  %v16386_v46 = vcombine.high %v901_v42, %v905_v44  ;;  %v16385_v57 = vcombine.low %v901_v42, %v905_v44  ;;  %v3132_v37 = vld [vmem:[#allocation12 + $0x940] sm:$0xff]  ;;  %v945_v42 = vld [vmem:[#allocation9 + $0x2b8] sm:$0xff] }
 0x373   :  { %v20489_v38 = vld [vmem:[#allocation12 + $0x1000] sm:$0xff] }
 0x375   :  { %2625 = vmatpush1.bf16.msra.mxu0 %v16407_v50  ;;  %v913_v50 = vld [vmem:[#allocation9 + $0x1b8] sm:$0xff] }
 0x376   :  { %2626 = vmatprep.subr.bf16.mxu0 %v16416_v56  ;;  %v16394_v58 = vcombine.high %v909_v47, %v913_v50  ;;  %v16393_v7 = vcombine.low %v909_v47, %v913_v50 }
 0x379   :  { %2627 = vmatpush1.bf16.msra.mxu0 %v16415_v60 }
 0x37a   :  { %2628 = vmatprep.subr.bf16.mxu0 %v16424_v61 }
 0x37d   :  { %2629 = vmatpush1.bf16.msra.mxu0 %v16423_v0 }
 0x37e   :  { %2630 = vmatprep.subr.bf16.mxu0 %v16432_v1 }
 0x381   :  { %2631 = vmatpush1.bf16.msra.mxu0 %v16431_v4 }
 0x382   :  { %2632 = vmatprep.subr.bf16.mxu0 %v16440_v5 }
 0x385   :  { %2633 = vmatpush1.bf16.msra.mxu0 %v16439_v10 }
 0x386   :  { %2634 = vmatprep.subr.bf16.mxu0 %v16448_v11 }
 0x389   :  { %2635 = vmatpush1.bf16.msra.mxu0 %v16447_v14 }
 0x38a   :  { %2636 = vmatprep.subr.bf16.mxu0 %v16456_v16 }
 0x38d   :  { %2637 = vmatpush1.bf16.msra.mxu0 %v16455_v22 }
 0x38e   :  { %2638 = vmatprep.subr.bf16.mxu0 %v16464_v23 }
 0x391   :  { %2639 = vmatpush1.bf16.msra.mxu0 %v16463_v27 }
 0x392   :  { %2694 = vmatprep.subr.bf16.mxu0 %v16346_v28  ;;  %v16410_v28 = vcombine.high %v925_v18, %v929_v21 }
 0x394   :  { %2641 = vmatmul.mubr.bf16.vlgmr.msra.gmra.mrb[20].mxu0 %v20428_v15 }
 0x395   :  { %2695 = vmatpush1.bf16.msra.mxu0 %v16345_v31  ;;  %2726 = vmatprep.mubr.bf16.mxu0 %v20430_v17  ;;  %v20470_v17 = vld [vmem:[#allocation10] sm:$0xff] }
 0x396   :  { %2696 = vmatprep.subr.bf16.mxu0 %v16354_v32  ;;  %v1119_v53 = vrot.slane %v20470_v17, %v20403_v54  ;;  %v1123_v56 = vrot.slane %v20470_v17, %v20406_v55 }
 0x399   :  { %2697 = vmatpush1.bf16.msra.mxu0 %v16353_v59  ;;  %v937_v59 = vld [vmem:[#allocation9 + $0x278] sm:$0xff] }
 0x39a   :  { %2698 = vmatprep.subr.bf16.mxu0 %v16362_v35 }
 0x39d   :  { %2699 = vmatpush1.bf16.msra.mxu0 %v16361_v25  ;;  %v3124_v25 = vld [vmem:[#allocation12 + $0x900] sm:$0xff] }
 0x39e   :  { %2700 = vmatprep.subr.bf16.mxu0 %v16370_v36  ;;  %v16418_v36 = vcombine.high %v933_v34, %v937_v59  ;;  %v16884_v47 = vcombine.high %v3124_v25, %v3132_v37 }
 0x3a1   :  { %2701 = vmatpush1.bf16.msra.mxu0 %v16369_v39  ;;  %v20491_v39 = vld [vmem:[#allocation12 + $0x1040] sm:$0xff] }
 0x3a2   :  { %2702 = vmatprep.subr.bf16.mxu0 %v16378_v40  ;;  %v941_v40 = vld [vmem:[#allocation9 + $0x298] sm:$0xff]  ;;  %v17107_v44 = vcombine.low %v20489_v38, %v20491_v39 }
 0x3a3   :  { %v16426_v50 = vcombine.high %v941_v40, %v945_v42  ;;  %v16425_v62 = vcombine.low %v941_v40, %v945_v42  ;;  %v3220_v40 = vld [vmem:[#allocation12 + $0xc00] sm:$0xff] }
 0x3a4   :  { %v3228_v42 = vld [vmem:[#allocation12 + $0xc40] sm:$0xff] }
 0x3a5   :  { %2703 = vmatpush1.bf16.msra.mxu0 %v16377_v45  ;;  %v16867_v45 = vcombine.low %v3108_v29, %v3116_v30 }
 0x3a6   :  { %2704 = vmatprep.subr.bf16.mxu0 %v16386_v46  ;;  %v16417_v46 = vcombine.low %v933_v34, %v937_v59  ;;  %v3212_v34 = vld [vmem:[#allocation12 + $0xbc0] sm:$0xff]  ;;  %v981_v59 = vld [vmem:[#allocation9 + $0x3d8] sm:$0xff] }
 0x3a7   :  { %v2513_v60 = vpop.f32.mrb[12].mxu0  ;;  %v20476_v61 = vpop.f32.mrb[0].mxu1 }
 0x3a8   :  { %v18387_v0 = vadd.f32 %v2513_v60, %v1119_v53  ;;  %v2515_v1 = vpop.f32.mrb[13].mxu0  ;;  %v20478_v2 = vpop.f32.mrb[1].mxu1  ;;  %v16883_v60 = vcombine.low %v3124_v25, %v3132_v37 }
 0x3a9   :  { %v18388_v3 = vadd.f32 %v2515_v1, %v1123_v56  ;;  %v2517_v4 = vpop.f32.mrb[14].mxu0  ;;  %v20480_v5 = vpop.f32.mrb[2].mxu1  ;;  %2705 = vmatpush1.bf16.msra.mxu0 %v16385_v57  ;;  %v949_v57 = vld [vmem:[#allocation9 + $0x2d8] sm:$0xff] }
 0x3aa   :  { %v2796_v9 = vmul.f32 0.2, %v18387_v0  ;;  %v18389_v10 = vadd.f32 %v2517_v4, %v1119_v53  ;;  %v2519_v11 = vpop.f32.mrb[15].mxu0  ;;  %v20482_v12 = vpop.f32.mrb[3].mxu1  ;;  %2706 = vmatprep.subr.bf16.mxu0 %v16394_v58  ;;  %vm2780_vm12 = vcmp.gt.f32.partialorder %v18387_v0, 0.0  ;;  %v3140_v53 = vld [vmem:[#allocation12 + $0x980] sm:$0xff] }
 0x3ab   :  { %v2797_v14 = vmul.f32 0.2, %v18388_v3  ;;  %v18390_v16 = vadd.f32 %v2519_v11, %v1123_v56  ;;  %vm2781_vm13 = vcmp.gt.f32.partialorder %v18388_v3, 0.0  ;;  %v3148_v56 = vld [vmem:[#allocation12 + $0x9c0] sm:$0xff]  ;;  %v953_v58 = vld [vmem:[#allocation9 + $0x2f8] sm:$0xff] }
 0x3ac   :  { %vm2788_vm14 = vcmp.gt.f32.partialorder %v18389_v10, 0.0  ;;  %v2804_v22 = vmul.f32 0.2, %v18389_v10  ;;  %v2812_v26 = vsel %vm2780_vm12, %v18387_v0, %v2796_v9  ;;  %v16900_v63 = vcombine.high %v3140_v53, %v3148_v56  ;;  %v957_v0 = vld [vmem:[#allocation9 + $0x318] sm:$0xff]  ;;  %v3180_v11 = vld [vmem:[#allocation12 + $0xac0] sm:$0xff] }
 0x3ad   :  { %vm2789_vm15 = vcmp.gt.f32.partialorder %v18390_v16, 0.0  ;;  %v2805_v23 = vmul.f32 0.2, %v18390_v16  ;;  %2707 = vmatpush1.bf16.msra.mxu0 %v16393_v7  ;;  %v2813_v31 = vsel %vm2781_vm13, %v18388_v3, %v2797_v14  ;;  %v16434_v48 = vcombine.high %v949_v57, %v953_v58  ;;  %v961_v1 = vld [vmem:[#allocation9 + $0x338] sm:$0xff] }
 0x3ae   :  { %v2820_v27 = vsel %vm2788_vm14, %v18389_v10, %v2804_v22  ;;  %2708 = vmatprep.subr.bf16.mxu0 %v16402_v13  ;;  %v16899_v3 = vcombine.low %v3140_v53, %v3148_v56  ;;  %v16433_v4 = vcombine.low %v949_v57, %v953_v58  ;;  %v16442_v9 = vcombine.high %v957_v0, %v961_v1  ;;  %v3172_v10 = vld [vmem:[#allocation12 + $0xa80] sm:$0xff]  ;;  %v965_v13 = vld [vmem:[#allocation9 + $0x358] sm:$0xff] }
 0x3af   :  { %v20484_v32 = vpack.c.bf16 %v2820_v27, %v2812_v26  ;;  %v2821_v33 = vsel %vm2789_vm15, %v18390_v16, %v2805_v23  ;;  %v969_v14 = vld [vmem:[#allocation9 + $0x378] sm:$0xff]  ;;  %v16441_v18 = vcombine.low %v957_v0, %v961_v1  ;;  %v16932_v21 = vcombine.high %v3172_v10, %v3180_v11  ;;  %v3188_v23 = vld [vmem:[#allocation12 + $0xb00] sm:$0xff] }
 0x3b0   :  { %v20486_v35 = vpack.c.bf16 %v2821_v33, %v2813_v31  ;;  %v16450_v22 = vcombine.high %v965_v13, %v969_v14  ;;  %v973_v26 = vld [vmem:[#allocation9 + $0x398] sm:$0xff]  ;;  %v16449_v29 = vcombine.low %v965_v13, %v969_v14  ;;  %v3204_v33 = vld [vmem:[#allocation12 + $0xb80] sm:$0xff]  ;;  %v16980_v53 = vcombine.high %v3220_v40, %v3228_v42 }
 0x3b1   :  { %2709 = vmatpush1.bf16.msra.mxu0 %v16401_v24  ;;  %v3196_v24 = vld [vmem:[#allocation12 + $0xb40] sm:$0xff]  ;;  %v977_v27 = vld [vmem:[#allocation9 + $0x3b8] sm:$0xff] }
 0x3b2   :  { %9096 = vmatprep.mubr.bf16.mxu1 %v20486_v35  ;;  %2710 = vmatprep.subr.bf16.mxu0 %v16410_v28  ;;  %v16931_v28 = vcombine.low %v3172_v10, %v3180_v11  ;;  %v16948_v30 = vcombine.high %v3188_v23, %v3196_v24  ;;  %v16458_v31 = vcombine.high %v973_v26, %v977_v27  ;;  %v997_v57 = vld [vmem:[#allocation9 + $0x458] sm:$0xff]  ;;  %v3252_v0 = vld [vmem:[#allocation12 + $0xd00] sm:$0xff] }
 0x3b3   :  { %9097 = vmatmul.mubr.bf16.vlgmr.msra.gmra.mrb[4].mxu1 %v20484_v32  ;;  %v16457_v25 = vcombine.low %v973_v26, %v977_v27  ;;  %v1001_v58 = vld [vmem:[#allocation9 + $0x478] sm:$0xff]  ;;  %v3260_v1 = vld [vmem:[#allocation12 + $0xd40] sm:$0xff] }
 0x3b4   :  { %9108 = vmatpush1.bf16.msra.mxu1 %v16851_v51  ;;  %v3164_v51 = vld [vmem:[#allocation12 + $0xa40] sm:$0xff]  ;;  %v17012_v10 = vcombine.high %v3252_v0, %v3260_v1  ;;  %v1025_v27 = vld [vmem:[#allocation9 + $0x538] sm:$0xff] }
 0x3b5   :  { %2711 = vmatpush1.bf16.msra.mxu0 %v16409_v19  ;;  %9109 = vmatprep.subr.bf16.mxu1 %v16868_v20  ;;  %v16916_v7 = vcombine.high %v3156_v49, %v3164_v51  ;;  %v16915_v16 = vcombine.low %v3156_v49, %v3164_v51  ;;  %v985_v19 = vld [vmem:[#allocation9 + $0x3f8] sm:$0xff]  ;;  %v16947_v20 = vcombine.low %v3188_v23, %v3196_v24  ;;  %v3268_v13 = vld [vmem:[#allocation12 + $0xd80] sm:$0xff] }
 0x3b6   :  { %2712 = vmatprep.subr.bf16.mxu0 %v16418_v36  ;;  %v16964_v36 = vcombine.high %v3204_v33, %v3212_v34  ;;  %v16466_v37 = vcombine.high %v981_v59, %v985_v19  ;;  %v16482_v49 = vcombine.high %v997_v57, %v1001_v58  ;;  %v3276_v14 = vld [vmem:[#allocation12 + $0xdc0] sm:$0xff] }
 0x3b7   :  { %v3284_v24 = vld [vmem:[#allocation12 + $0xe00] sm:$0xff] }
 0x3b8   :  { %9110 = vmatpush1.bf16.msra.mxu1 %v16867_v45  ;;  %v989_v45 = vld [vmem:[#allocation9 + $0x418] sm:$0xff]  ;;  %v3292_v26 = vld [vmem:[#allocation12 + $0xe40] sm:$0xff] }
 0x3b9   :  { %2713 = vmatpush1.bf16.msra.mxu0 %v16417_v46  ;;  %9111 = vmatprep.subr.bf16.mxu1 %v16884_v47  ;;  %v993_v46 = vld [vmem:[#allocation9 + $0x438] sm:$0xff]  ;;  %v16963_v47 = vcombine.low %v3204_v33, %v3212_v34  ;;  %v3300_v33 = vld [vmem:[#allocation12 + $0xe80] sm:$0xff] }
 0x3ba   :  { %2714 = vmatprep.subr.bf16.mxu0 %v16426_v50  ;;  %v16465_v50 = vcombine.low %v981_v59, %v985_v19  ;;  %v16474_v56 = vcombine.high %v989_v45, %v993_v46  ;;  %v3308_v34 = vld [vmem:[#allocation12 + $0xec0] sm:$0xff]  ;;  %v1029_v59 = vld [vmem:[#allocation9 + $0x558] sm:$0xff] }
 0x3bb   :  { %v1033_v19 = vld [vmem:[#allocation9 + $0x578] sm:$0xff] }
 0x3bc   :  { %9112 = vmatpush1.bf16.msra.mxu1 %v16883_v60  ;;  %v3236_v60 = vld [vmem:[#allocation12 + $0xc80] sm:$0xff] }
 0x3bd   :  { %2715 = vmatpush1.bf16.msra.mxu0 %v16425_v62  ;;  %9113 = vmatprep.subr.bf16.mxu1 %v16900_v63  ;;  %v3244_v62 = vld [vmem:[#allocation12 + $0xcc0] sm:$0xff]  ;;  %v16979_v63 = vcombine.low %v3220_v40, %v3228_v42 }
 0x3be   :  { %2716 = vmatprep.subr.bf16.mxu0 %v16434_v48  ;;  %v16473_v48 = vcombine.low %v989_v45, %v993_v46  ;;  %v16996_v51 = vcombine.high %v3236_v60, %v3244_v62  ;;  %v3316_v40 = vld [vmem:[#allocation12 + $0xf00] sm:$0xff]  ;;  %v1037_v45 = vld [vmem:[#allocation9 + $0x598] sm:$0xff] }
 0x3bf   :  { %v3324_v42 = vld [vmem:[#allocation12 + $0xf40] sm:$0xff]  ;;  %v1041_v46 = vld [vmem:[#allocation9 + $0x5b8] sm:$0xff] }
 0x3c0   :  { %9114 = vmatpush1.bf16.msra.mxu1 %v16899_v3  ;;  %v1005_v3 = vld [vmem:[#allocation9 + $0x498] sm:$0xff] }
 0x3c1   :  { %2717 = vmatpush1.bf16.msra.mxu0 %v16433_v4  ;;  %9115 = vmatprep.subr.bf16.mxu1 %v16916_v7  ;;  %v1009_v4 = vld [vmem:[#allocation9 + $0x4b8] sm:$0xff]  ;;  %v16995_v7 = vcombine.low %v3236_v60, %v3244_v62 }
 0x3c2   :  { %2718 = vmatprep.subr.bf16.mxu0 %v16442_v9  ;;  %v16481_v9 = vcombine.low %v997_v57, %v1001_v58  ;;  %v16490_v11 = vcombine.high %v1005_v3, %v1009_v4  ;;  %v3332_v57 = vld [vmem:[#allocation12 + $0xf80] sm:$0xff]  ;;  %v1045_v60 = vld [vmem:[#allocation9 + $0x5d8] sm:$0xff] }
 0x3c3   :  { %v3340_v58 = vld [vmem:[#allocation12 + $0xfc0] sm:$0xff]  ;;  %v1049_v62 = vld [vmem:[#allocation9 + $0x5f8] sm:$0xff] }
 0x3c4   :  { %9116 = vmatpush1.bf16.msra.mxu1 %v16915_v16  ;;  %v1013_v16 = vld [vmem:[#allocation9 + $0x4d8] sm:$0xff] }
 0x3c5   :  { %2719 = vmatpush1.bf16.msra.mxu0 %v16441_v18  ;;  %9117 = vmatprep.subr.bf16.mxu1 %v16932_v21  ;;  %v1017_v18 = vld [vmem:[#allocation9 + $0x4f8] sm:$0xff]  ;;  %v17011_v21 = vcombine.low %v3252_v0, %v3260_v1 }
 0x3c6   :  { %2720 = vmatprep.subr.bf16.mxu0 %v16450_v22  ;;  %v16489_v22 = vcombine.low %v1005_v3, %v1009_v4  ;;  %v16498_v23 = vcombine.high %v1013_v16, %v1017_v18  ;;  %v1053_v0 = vld [vmem:[#allocation9 + $0x618] sm:$0xff]  ;;  %v17091_v3 = vcombine.low %v3332_v57, %v3340_v58  ;;  %v16529_v4 = vcombine.low %v1045_v60, %v1049_v62 }
 0x3c7   :  { %v1057_v1 = vld [vmem:[#allocation9 + $0x638] sm:$0xff] }
 0x3c8   :  { %9118 = vmatpush1.bf16.msra.mxu1 %v16931_v28  ;;  %v17027_v28 = vcombine.low %v3268_v13, %v3276_v14 }
 0x3c9   :  { %2721 = vmatpush1.bf16.msra.mxu0 %v16449_v29  ;;  %9119 = vmatprep.subr.bf16.mxu1 %v16948_v30  ;;  %v16497_v29 = vcombine.low %v1013_v16, %v1017_v18  ;;  %v17044_v30 = vcombine.high %v3284_v24, %v3292_v26  ;;  %v1069_v16 = vld [vmem:[#allocation9 + $0x698] sm:$0xff] }
 0x3ca   :  { %2722 = vmatprep.subr.bf16.mxu0 %v16458_v31  ;;  %v1073_v18 = vld [vmem:[#allocation9 + $0x6b8] sm:$0xff] }
 0x3cc   :  { %9120 = vmatpush1.bf16.msra.mxu1 %v16947_v20  ;;  %v17043_v20 = vcombine.low %v3284_v24, %v3292_v26  ;;  %v16553_v24 = vcombine.low %v1069_v16, %v1073_v18 }
 0x3cd   :  { %2723 = vmatpush1.bf16.msra.mxu0 %v16457_v25  ;;  %9121 = vmatprep.subr.bf16.mxu1 %v16964_v36  ;;  %v17060_v36 = vcombine.high %v3300_v33, %v3308_v34 }
 0x3ce   :  { %2724 = vmatprep.subr.bf16.mxu0 %v16466_v37  ;;  %v16514_v37 = vcombine.high %v1029_v59, %v1033_v19 }
 0x3d0   :  { %9122 = vmatpush1.bf16.msra.mxu1 %v16963_v47  ;;  %v17059_v47 = vcombine.low %v3300_v33, %v3308_v34 }
 0x3d1   :  { %2725 = vmatpush1.bf16.msra.mxu0 %v16465_v50  ;;  %9123 = vmatprep.subr.bf16.mxu1 %v16980_v53  ;;  %v16513_v50 = vcombine.low %v1029_v59, %v1033_v19  ;;  %v17076_v53 = vcombine.high %v3316_v40, %v3324_v42  ;;  %v1101_v59 = vld [vmem:[#allocation9 + $0x798] sm:$0xff] }
 0x3d2   :  { %2737 = vmatprep.subr.bf16.mxu0 %v16474_v56  ;;  %v16522_v56 = vcombine.high %v1037_v45, %v1041_v46  ;;  %v1105_v19 = vld [vmem:[#allocation9 + $0x7b8] sm:$0xff] }
 0x3d4   :  { %2727 = vmatmul.mubr.bf16.vlgmr.msra.gmra.mrb[24].mxu0 %v20428_v15  ;;  %9124 = vmatpush1.bf16.msra.mxu1 %v16979_v63  ;;  %v17028_v15 = vcombine.high %v3268_v13, %v3276_v14  ;;  %v17075_v63 = vcombine.low %v3316_v40, %v3324_v42  ;;  %v16537_v13 = vcombine.low %v1053_v0, %v1057_v1 }
 0x3d5   :  { %2738 = vmatpush1.bf16.msra.mxu0 %v16473_v48  ;;  %2769 = vmatprep.mubr.bf16.mxu0 %v20449_v43  ;;  %v1021_v43 = vld [vmem:[#allocation9 + $0x518] sm:$0xff]  ;;  %v16521_v48 = vcombine.low %v1037_v45, %v1041_v46  ;;  %v16585_v40 = vcombine.low %v1101_v59, %v1105_v19  ;;  %v2837_v45 = vld [vmem:[#allocation12 + $0x8] sm:$0xff] }
 0x3d6   :  { %2739 = vmatprep.subr.bf16.mxu0 %v16482_v49  ;;  %9125 = vmatprep.subr.bf16.mxu1 %v16996_v51  ;;  %v16506_v31 = vcombine.high %v1021_v43, %v1025_v27  ;;  %v16505_v25 = vcombine.low %v1021_v43, %v1025_v27  ;;  %v17092_v49 = vcombine.high %v3332_v57, %v3340_v58  ;;  %v1085_v43 = vld [vmem:[#allocation9 + $0x718] sm:$0xff]  ;;  %v2845_v46 = vld [vmem:[#allocation12 + $0x48] sm:$0xff] }
 0x3d7   :  { %v16530_v51 = vcombine.high %v1045_v60, %v1049_v62  ;;  %v1089_v27 = vld [vmem:[#allocation9 + $0x738] sm:$0xff]  ;;  %v16597_v57 = vcombine.low %v2837_v45, %v2845_v46  ;;  %v2869_v60 = vld [vmem:[#allocation12 + $0x108] sm:$0xff] }
 0x3d8   :  { %9126 = vmatpush1.bf16.msra.mxu1 %v16995_v7  ;;  %v17108_v7 = vcombine.high %v20489_v38, %v20491_v39  ;;  %v16569_v33 = vcombine.low %v1085_v43, %v1089_v27  ;;  %v2877_v62 = vld [vmem:[#allocation12 + $0x148] sm:$0xff]  ;;  %v3412_v39 = vld [vmem:[#allocation12 + $0x1200] sm:$0xff] }
 0x3d9   :  { %2740 = vmatpush1.bf16.msra.mxu0 %v16481_v9  ;;  %9127 = vmatprep.subr.bf16.mxu1 %v17012_v10  ;;  %v16538_v9 = vcombine.high %v1053_v0, %v1057_v1  ;;  %v1061_v10 = vld [vmem:[#allocation9 + $0x658] sm:$0xff]  ;;  %v16629_v0 = vcombine.low %v2869_v60, %v2877_v62 }
 0x3da   :  { %2741 = vmatprep.subr.bf16.mxu0 %v16490_v11  ;;  %v1065_v11 = vld [vmem:[#allocation9 + $0x678] sm:$0xff] }
 0x3db   :  { %v16546_v14 = vcombine.high %v1061_v10, %v1065_v11 }
 0x3dc   :  { %9128 = vmatpush1.bf16.msra.mxu1 %v17011_v21  ;;  %v16545_v21 = vcombine.low %v1061_v10, %v1065_v11  ;;  %v2917_v10 = vld [vmem:[#allocation12 + $0x288] sm:$0xff] }
 0x3dd   :  { %2742 = vmatpush1.bf16.msra.mxu0 %v16489_v22  ;;  %9129 = vmatprep.subr.bf16.mxu1 %v17028_v15  ;;  %v16554_v22 = vcombine.high %v1069_v16, %v1073_v18  ;;  %v1077_v15 = vld [vmem:[#allocation9 + $0x6d8] sm:$0xff]  ;;  %v2941_v16 = vld [vmem:[#allocation12 + $0x348] sm:$0xff]  ;;  %v1127_v18 = vrot.slane %v20470_v17, %v20438_v6 }
 0x3de   :  { %2743 = vmatprep.subr.bf16.mxu0 %v16498_v23  ;;  %v1081_v23 = vld [vmem:[#allocation9 + $0x6f8] sm:$0xff] }
 0x3df   :  { %v16562_v26 = vcombine.high %v1077_v15, %v1081_v23 }
 0x3e0   :  { %9130 = vmatpush1.bf16.msra.mxu1 %v17027_v28  ;;  %v16561_v28 = vcombine.low %v1077_v15, %v1081_v23 }
 0x3e1   :  { %2744 = vmatpush1.bf16.msra.mxu0 %v16497_v29  ;;  %9131 = vmatprep.subr.bf16.mxu1 %v17044_v30  ;;  %v16570_v29 = vcombine.high %v1085_v43, %v1089_v27  ;;  %v1093_v30 = vld [vmem:[#allocation9 + $0x758] sm:$0xff] }
 0x3e2   :  { %2745 = vmatprep.subr.bf16.mxu0 %v16506_v31  ;;  %v1097_v31 = vld [vmem:[#allocation9 + $0x778] sm:$0xff] }
 0x3e3   :  { %v16578_v34 = vcombine.high %v1093_v30, %v1097_v31 }
 0x3e4   :  { %9132 = vmatpush1.bf16.msra.mxu1 %v17043_v20  ;;  %v16577_v20 = vcombine.low %v1093_v30, %v1097_v31 }
 0x3e5   :  { %2746 = vmatpush1.bf16.msra.mxu0 %v16505_v25  ;;  %9133 = vmatprep.subr.bf16.mxu1 %v17060_v36  ;;  %v16586_v25 = vcombine.high %v1101_v59, %v1105_v19  ;;  %v1109_v36 = vld [vmem:[#allocation9 + $0x7d8] sm:$0xff] }
 0x3e6   :  { %2747 = vmatprep.subr.bf16.mxu0 %v16514_v37  ;;  %v1113_v37 = vld [vmem:[#allocation9 + $0x7f8] sm:$0xff] }
 0x3e7   :  { %v16594_v42 = vcombine.high %v1109_v36, %v1113_v37 }
 0x3e8   :  { %9134 = vmatpush1.bf16.msra.mxu1 %v17059_v47  ;;  %v16593_v47 = vcombine.low %v1109_v36, %v1113_v37 }
 0x3e9   :  { %2748 = vmatpush1.bf16.msra.mxu0 %v16513_v50  ;;  %9135 = vmatprep.subr.bf16.mxu1 %v17076_v53  ;;  %v16598_v50 = vcombine.high %v2837_v45, %v2845_v46  ;;  %v2853_v53 = vld [vmem:[#allocation12 + $0x88] sm:$0xff] }
 0x3ea   :  { %2749 = vmatprep.subr.bf16.mxu0 %v16522_v56  ;;  %v2861_v56 = vld [vmem:[#allocation12 + $0xc8] sm:$0xff] }
 0x3eb   :  { %v16614_v58 = vcombine.high %v2853_v53, %v2861_v56 }
 0x3ec   :  { %9136 = vmatpush1.bf16.msra.mxu1 %v17075_v63  ;;  %v16613_v63 = vcombine.low %v2853_v53, %v2861_v56 }
 0x3ed   :  { %2750 = vmatpush1.bf16.msra.mxu0 %v16521_v48  ;;  %9137 = vmatprep.subr.bf16.mxu1 %v17092_v49  ;;  %v16630_v48 = vcombine.high %v2869_v60, %v2877_v62  ;;  %v2885_v49 = vld [vmem:[#allocation12 + $0x188] sm:$0xff] }
 0x3ee   :  { %2751 = vmatprep.subr.bf16.mxu0 %v16530_v51  ;;  %v2893_v51 = vld [vmem:[#allocation12 + $0x1c8] sm:$0xff] }
 0x3ef   :  { %v16646_v1 = vcombine.high %v2885_v49, %v2893_v51  ;;  %v2989_v60 = vld [vmem:[#allocation12 + $0x4c8] sm:$0xff] }
 0x3f0   :  { %9138 = vmatpush1.bf16.msra.mxu1 %v17091_v3  ;;  %v2901_v3 = vld [vmem:[#allocation12 + $0x208] sm:$0xff] }
 0x3f1   :  { %2752 = vmatpush1.bf16.msra.mxu0 %v16529_v4  ;;  %9150 = vmatprep.subr.bf16.mxu1 %v17108_v7  ;;  %v2909_v4 = vld [vmem:[#allocation12 + $0x248] sm:$0xff]  ;;  %v16645_v7 = vcombine.low %v2885_v49, %v2893_v51  ;;  %v3380_v51 = vld [vmem:[#allocation12 + $0x1100] sm:$0xff] }
 0x3f2   :  { %2753 = vmatprep.subr.bf16.mxu0 %v16538_v9  ;;  %v16662_v9 = vcombine.high %v2901_v3, %v2909_v4  ;;  %v16661_v11 = vcombine.low %v2901_v3, %v2909_v4  ;;  %v3005_v3 = vld [vmem:[#allocation12 + $0x548] sm:$0xff] }
 0x3f5   :  { %2754 = vmatpush1.bf16.msra.mxu0 %v16537_v13 }
 0x3f6   :  { %2755 = vmatprep.subr.bf16.mxu0 %v16546_v14  ;;  %v2933_v14 = vld [vmem:[#allocation12 + $0x308] sm:$0xff] }
 0x3f7   :  { %v16694_v15 = vcombine.high %v2933_v14, %v2941_v16  ;;  %v16693_v30 = vcombine.low %v2933_v14, %v2941_v16  ;;  %v3021_v14 = vld [vmem:[#allocation12 + $0x5c8] sm:$0xff] }
 0x3f9   :  { %2756 = vmatpush1.bf16.msra.mxu0 %v16545_v21  ;;  %v1131_v21 = vrot.slane %v20470_v17, %v20441_v8 }
 0x3fa   :  { %2757 = vmatprep.subr.bf16.mxu0 %v16554_v22 }
 0x3fd   :  { %2758 = vmatpush1.bf16.msra.mxu0 %v16553_v24  ;;  %v2949_v24 = vld [vmem:[#allocation12 + $0x388] sm:$0xff] }
 0x3fe   :  { %2759 = vmatprep.subr.bf16.mxu0 %v16562_v26  ;;  %v2957_v26 = vld [vmem:[#allocation12 + $0x3c8] sm:$0xff] }
 0x3ff   :  { %v16710_v59 = vcombine.high %v2949_v24, %v2957_v26 }
 0x401   :  { %2760 = vmatpush1.bf16.msra.mxu0 %v16561_v28 }
 0x402   :  { %2761 = vmatprep.subr.bf16.mxu0 %v16570_v29 }
 0x405   :  { %2762 = vmatpush1.bf16.msra.mxu0 %v16569_v33 }
 0x406   :  { %2763 = vmatprep.subr.bf16.mxu0 %v16578_v34 }
 0x409   :  { %2764 = vmatpush1.bf16.msra.mxu0 %v16577_v20  ;;  %v2965_v20 = vld [vmem:[#allocation12 + $0x408] sm:$0xff] }
 0x40a   :  { %2765 = vmatprep.subr.bf16.mxu0 %v16586_v25  ;;  %v2973_v25 = vld [vmem:[#allocation12 + $0x448] sm:$0xff] }
 0x40b   :  { %v16726_v46 = vcombine.high %v2965_v20, %v2973_v25 }
 0x40d   :  { %2766 = vmatpush1.bf16.msra.mxu0 %v16585_v40  ;;  %v16709_v40 = vcombine.low %v2949_v24, %v2957_v26 }
 0x40e   :  { %2767 = vmatprep.subr.bf16.mxu0 %v16594_v42 }
 0x411   :  { %2768 = vmatpush1.bf16.msra.mxu0 %v16593_v47  ;;  %v3364_v47 = vld [vmem:[#allocation12 + $0x1080] sm:$0xff] }
 0x412   :  { %9236 = vmatprep.subr.bf16.mxu0 %v16598_v50  ;;  %v3372_v50 = vld [vmem:[#allocation12 + $0x10c0] sm:$0xff] }
 0x413   :  { %v17123_v4 = vcombine.low %v3364_v47, %v3372_v50 }
 0x414   :  { %2770 = vmatmul.mubr.bf16.vlgmr.msra.gmra.mrb[24].mxu0 %v20447_v41  ;;  %v2925_v41 = vld [vmem:[#allocation12 + $0x2c8] sm:$0xff] }
 0x415   :  { %9237 = vmatpush1.bf16.msra.mxu0 %v16597_v57  ;;  %9268 = vmatprep.mubr.bf16.mxu0 %v20486_v35  ;;  %v16678_v13 = vcombine.high %v2917_v10, %v2925_v41  ;;  %v16677_v22 = vcombine.low %v2917_v10, %v2925_v41  ;;  %v3396_v41 = vld [vmem:[#allocation12 + $0x1180] sm:$0xff] }
 0x416   :  { %9238 = vmatprep.subr.bf16.mxu0 %v16614_v58  ;;  %v2981_v58 = vld [vmem:[#allocation12 + $0x488] sm:$0xff] }
 0x417   :  { %v16742_v49 = vcombine.high %v2981_v58, %v2989_v60 }
 0x419   :  { %9239 = vmatpush1.bf16.msra.mxu0 %v16613_v63  ;;  %v16725_v63 = vcombine.low %v2965_v20, %v2973_v25  ;;  %v3061_v20 = vld [vmem:[#allocation12 + $0x708] sm:$0xff] }
 0x41a   :  { %9240 = vmatprep.subr.bf16.mxu0 %v16630_v48  ;;  %v17124_v48 = vcombine.high %v3364_v47, %v3372_v50  ;;  %v3069_v25 = vld [vmem:[#allocation12 + $0x748] sm:$0xff] }
 0x41b   :  { %v3077_v47 = vld [vmem:[#allocation12 + $0x788] sm:$0xff] }
 0x41c   :  { %v3085_v50 = vld [vmem:[#allocation12 + $0x7c8] sm:$0xff] }
 0x41d   :  { %9241 = vmatpush1.bf16.msra.mxu0 %v16629_v0  ;;  %v3388_v0 = vld [vmem:[#allocation12 + $0x1140] sm:$0xff] }
 0x41e   :  { %9242 = vmatprep.subr.bf16.mxu0 %v16646_v1  ;;  %v2997_v1 = vld [vmem:[#allocation12 + $0x508] sm:$0xff]  ;;  %v17139_v16 = vcombine.low %v3380_v51, %v3388_v0 }
 0x41f   :  { %v16758_v10 = vcombine.high %v2997_v1, %v3005_v3 }
 0x421   :  { %9243 = vmatpush1.bf16.msra.mxu0 %v16645_v7  ;;  %v16741_v7 = vcombine.low %v2981_v58, %v2989_v60  ;;  %v16838_v60 = vcombine.high %v3077_v47, %v3085_v50 }
 0x422   :  { %9244 = vmatprep.subr.bf16.mxu0 %v16662_v9  ;;  %v17140_v9 = vcombine.high %v3380_v51, %v3388_v0  ;;  %v3101_v51 = vld [vmem:[#allocation12 + $0x848] sm:$0xff] }
 0x425   :  { %9245 = vmatpush1.bf16.msra.mxu0 %v16661_v11  ;;  %v3404_v11 = vld [vmem:[#allocation12 + $0x11c0] sm:$0xff] }
 0x426   :  { %9246 = vmatprep.subr.bf16.mxu0 %v16678_v13  ;;  %v3013_v13 = vld [vmem:[#allocation12 + $0x588] sm:$0xff] }
 0x427   :  { %v2599_v23 = vpop.f32.mrb[16].mxu0  ;;  %v16774_v38 = vcombine.high %v3013_v13, %v3021_v14  ;;  %v16773_v24 = vcombine.low %v3013_v13, %v3021_v14 }
 0x428   :  { %v18391_v43 = vadd.f32 %v2599_v23, %v1127_v18  ;;  %v2601_v27 = vpop.f32.mrb[17].mxu0  ;;  %v17155_v23 = vcombine.low %v3396_v41, %v3404_v11 }
 0x429   :  { %v18392_v28 = vadd.f32 %v2601_v27, %v1131_v21  ;;  %v2603_v29 = vpop.f32.mrb[18].mxu0  ;;  %9247 = vmatpush1.bf16.msra.mxu0 %v16677_v22  ;;  %v3029_v22 = vld [vmem:[#allocation12 + $0x608] sm:$0xff]  ;;  %v3428_v27 = vld [vmem:[#allocation12 + $0x1280] sm:$0xff] }
 0x42a   :  { %v2798_v31 = vmul.f32 0.2, %v18391_v43  ;;  %v18393_v33 = vadd.f32 %v2603_v29, %v1127_v18  ;;  %v2605_v34 = vpop.f32.mrb[19].mxu0  ;;  %9248 = vmatprep.subr.bf16.mxu0 %v16694_v15  ;;  %vm2782_vm0 = vcmp.gt.f32.partialorder %v18391_v43, 0.0  ;;  %v16757_v18 = vcombine.low %v2997_v1, %v3005_v3  ;;  %v3037_v15 = vld [vmem:[#allocation12 + $0x648] sm:$0xff] }
 0x42b   :  { %v2799_v19 = vmul.f32 0.2, %v18392_v28  ;;  %v18394_v17 = vadd.f32 %v2605_v34, %v1131_v21  ;;  %vm2783_vm1 = vcmp.gt.f32.partialorder %v18392_v28, 0.0  ;;  %v17156_v21 = vcombine.high %v3396_v41, %v3404_v11  ;;  %v3045_v29 = vld [vmem:[#allocation12 + $0x688] sm:$0xff]  ;;  %v3500_v41 = vld [vmem:[#allocation12 + $0x14c0] sm:$0xff] }
 0x42c   :  { %vm2790_vm2 = vcmp.gt.f32.partialorder %v18393_v33, 0.0  ;;  %v2806_v36 = vmul.f32 0.2, %v18393_v33  ;;  %v2814_v42 = vsel %vm2782_vm0, %v18391_v43, %v2798_v31  ;;  %v16790_v43 = vcombine.high %v3029_v22, %v3037_v15 }
 0x42d   :  { %vm2791_vm3 = vcmp.gt.f32.partialorder %v18394_v17, 0.0  ;;  %v2807_v37 = vmul.f32 0.2, %v18394_v17  ;;  %9249 = vmatpush1.bf16.msra.mxu0 %v16693_v30  ;;  %v2815_v53 = vsel %vm2783_vm1, %v18392_v28, %v2799_v19  ;;  %v3436_v28 = vld [vmem:[#allocation12 + $0x12c0] sm:$0xff]  ;;  %v3053_v30 = vld [vmem:[#allocation12 + $0x6c8] sm:$0xff]  ;;  %v16837_v1 = vcombine.low %v3077_v47, %v3085_v50 }
 0x42e   :  { %v2822_v45 = vsel %vm2790_vm2, %v18393_v33, %v2806_v36  ;;  %9250 = vmatprep.subr.bf16.mxu0 %v16710_v59  ;;  %v16789_v33 = vcombine.low %v3029_v22, %v3037_v15  ;;  %v17188_v34 = vcombine.high %v3428_v27, %v3436_v28  ;;  %v16806_v59 = vcombine.high %v3045_v29, %v3053_v30  ;;  %v3444_v19 = vld [vmem:[#allocation12 + $0x1300] sm:$0xff] }
 0x42f   :  { %v20509_v56 = vpack.c.bf16 %v2822_v45, %v2814_v42  ;;  %v2823_v57 = vsel %vm2791_vm3, %v18394_v17, %v2807_v37  ;;  %v3452_v17 = vld [vmem:[#allocation12 + $0x1340] sm:$0xff]  ;;  %v17187_v36 = vcombine.low %v3428_v27, %v3436_v28  ;;  %v16805_v37 = vcombine.low %v3045_v29, %v3053_v30  ;;  %v3149_v27 = vld [vmem:[#allocation12 + $0x9c8] sm:$0xff] }
 0x430   :  { %v20511_v62 = vpack.c.bf16 %v2823_v57, %v2815_v53  ;;  %v16822_v42 = vcombine.high %v3061_v20, %v3069_v25  ;;  %v3460_v45 = vld [vmem:[#allocation12 + $0x1380] sm:$0xff]  ;;  %v17203_v53 = vcombine.low %v3444_v19, %v3452_v17  ;;  %v16821_v57 = vcombine.low %v3061_v20, %v3069_v25 }
 0x431   :  { %9251 = vmatpush1.bf16.msra.mxu0 %v16709_v40  ;;  %v17204_v40 = vcombine.high %v3444_v19, %v3452_v17  ;;  %v3165_v19 = vld [vmem:[#allocation12 + $0xa48] sm:$0xff]  ;;  %v20521_v47 = vsub.s32 4, %v20400_v52 }
 0x432   :  { %9139 = vmatprep.mubr.bf16.mxu1 %v20511_v62  ;;  %9252 = vmatprep.subr.bf16.mxu0 %v16726_v46  ;;  %v3468_v46 = vld [vmem:[#allocation12 + $0x13c0] sm:$0xff] }
 0x433   :  { %9140 = vmatmul.mubr.bf16.vlgmr.msra.gmra.mrb[4].mxu1 %v20509_v56  ;;  %v17220_v58 = vcombine.high %v3460_v45, %v3468_v46  ;;  %v17219_v0 = vcombine.low %v3460_v45, %v3468_v46  ;;  %v3181_v45 = vld [vmem:[#allocation12 + $0xac8] sm:$0xff] }
 0x434   :  { %9151 = vmatpush1.bf16.msra.mxu1 %v17107_v44  ;;  %v3420_v44 = vld [vmem:[#allocation12 + $0x1240] sm:$0xff] }
 0x435   :  { %9253 = vmatpush1.bf16.msra.mxu0 %v16725_v63  ;;  %9152 = vmatprep.subr.bf16.mxu1 %v17124_v48  ;;  %v17172_v26 = vcombine.high %v3412_v39, %v3420_v44  ;;  %v17171_v31 = vcombine.low %v3412_v39, %v3420_v44  ;;  %v3476_v63 = vld [vmem:[#allocation12 + $0x1400] sm:$0xff]  ;;  %v3133_v39 = vld [vmem:[#allocation12 + $0x948] sm:$0xff] }
 0x436   :  { %9254 = vmatprep.subr.bf16.mxu0 %v16742_v49  ;;  %v3484_v48 = vld [vmem:[#allocation12 + $0x1440] sm:$0xff]  ;;  %v3093_v49 = vld [vmem:[#allocation12 + $0x808] sm:$0xff] }
 0x437   :  { %v17236_v3 = vcombine.high %v3476_v63, %v3484_v48  ;;  %v17235_v11 = vcombine.low %v3476_v63, %v3484_v48  ;;  %v16853_v13 = vcombine.low %v3093_v49, %v3101_v51  ;;  %v3580_v63 = vld [vmem:[#allocation12 + $0x1740] sm:$0xff]  ;;  %v3189_v48 = vld [vmem:[#allocation12 + $0xb08] sm:$0xff] }
 0x438   :  { %9153 = vmatpush1.bf16.msra.mxu1 %v17123_v4  ;;  %v16854_v4 = vcombine.high %v3093_v49, %v3101_v51  ;;  %v3197_v49 = vld [vmem:[#allocation12 + $0xb48] sm:$0xff]  ;;  %v20526_v51 = vld [vmem:[#allocation10] sm:$0xff] }
 0x439   :  { %9255 = vmatpush1.bf16.msra.mxu0 %v16741_v7  ;;  %9154 = vmatprep.subr.bf16.mxu1 %v17140_v9  ;;  %v3109_v7 = vld [vmem:[#allocation12 + $0x888] sm:$0xff] }
 0x43a   :  { %9256 = vmatprep.subr.bf16.mxu0 %v16758_v10  ;;  %v3117_v9 = vld [vmem:[#allocation12 + $0x8c8] sm:$0xff]  ;;  %v3492_v10 = vld [vmem:[#allocation12 + $0x1480] sm:$0xff] }
 0x43b   :  { %v16870_v14 = vcombine.high %v3109_v7, %v3117_v9  ;;  %v17251_v44 = vcombine.low %v3492_v10, %v3500_v41  ;;  %v16869_v22 = vcombine.low %v3109_v7, %v3117_v9  ;;  %v16950_v9 = vcombine.high %v3189_v48, %v3197_v49 }
 0x43c   :  { %9155 = vmatpush1.bf16.msra.mxu1 %v17139_v16  ;;  %v17252_v16 = vcombine.high %v3492_v10, %v3500_v41  ;;  %v3588_v10 = vld [vmem:[#allocation12 + $0x1780] sm:$0xff] }
 0x43d   :  { %9257 = vmatpush1.bf16.msra.mxu0 %v16757_v18  ;;  %9156 = vmatprep.subr.bf16.mxu1 %v17156_v21  ;;  %v3508_v18 = vld [vmem:[#allocation12 + $0x1500] sm:$0xff] }
 0x43e   :  { %9258 = vmatprep.subr.bf16.mxu0 %v16774_v38  ;;  %v3516_v21 = vld [vmem:[#allocation12 + $0x1540] sm:$0xff]  ;;  %v3125_v38 = vld [vmem:[#allocation12 + $0x908] sm:$0xff] }
 0x43f   :  { %v17268_v15 = vcombine.high %v3508_v18, %v3516_v21  ;;  %v17267_v28 = vcombine.low %v3508_v18, %v3516_v21  ;;  %v16885_v29 = vcombine.low %v3125_v38, %v3133_v39  ;;  %v3596_v41 = vld [vmem:[#allocation12 + $0x17c0] sm:$0xff] }
 0x440   :  { %9157 = vmatpush1.bf16.msra.mxu1 %v17155_v23  ;;  %v16886_v23 = vcombine.high %v3125_v38, %v3133_v39 }
 0x441   :  { %9259 = vmatpush1.bf16.msra.mxu0 %v16773_v24  ;;  %9158 = vmatprep.subr.bf16.mxu1 %v17172_v26  ;;  %v3524_v24 = vld [vmem:[#allocation12 + $0x1580] sm:$0xff] }
 0x442   :  { %9260 = vmatprep.subr.bf16.mxu0 %v16790_v43  ;;  %v3532_v26 = vld [vmem:[#allocation12 + $0x15c0] sm:$0xff]  ;;  %v3141_v43 = vld [vmem:[#allocation12 + $0x988] sm:$0xff] }
 0x443   :  { %v17284_v30 = vcombine.high %v3524_v24, %v3532_v26  ;;  %v17283_v17 = vcombine.low %v3524_v24, %v3532_v26  ;;  %v16901_v20 = vcombine.low %v3141_v43, %v3149_v27 }
 0x444   :  { %9159 = vmatpush1.bf16.msra.mxu1 %v17171_v31  ;;  %v16902_v31 = vcombine.high %v3141_v43, %v3149_v27 }
 0x445   :  { %9261 = vmatpush1.bf16.msra.mxu0 %v16789_v33  ;;  %9160 = vmatprep.subr.bf16.mxu1 %v17188_v34  ;;  %v3540_v33 = vld [vmem:[#allocation12 + $0x1600] sm:$0xff] }
 0x446   :  { %9262 = vmatprep.subr.bf16.mxu0 %v16806_v59  ;;  %v3548_v34 = vld [vmem:[#allocation12 + $0x1640] sm:$0xff]  ;;  %v3157_v59 = vld [vmem:[#allocation12 + $0xa08] sm:$0xff] }
 0x447   :  { %v17300_v25 = vcombine.high %v3540_v33, %v3548_v34  ;;  %v17299_v46 = vcombine.low %v3540_v33, %v3548_v34  ;;  %v16917_v50 = vcombine.low %v3157_v59, %v3165_v19  ;;  %v3229_v33 = vld [vmem:[#allocation12 + $0xc48] sm:$0xff] }
 0x448   :  { %9161 = vmatpush1.bf16.msra.mxu1 %v17187_v36  ;;  %v16918_v36 = vcombine.high %v3157_v59, %v3165_v19  ;;  %v17347_v19 = vcombine.low %v3588_v10, %v3596_v41 }
 0x449   :  { %9263 = vmatpush1.bf16.msra.mxu0 %v16805_v37  ;;  %9162 = vmatprep.subr.bf16.mxu1 %v17204_v40  ;;  %v3556_v37 = vld [vmem:[#allocation12 + $0x1680] sm:$0xff] }
 0x44a   :  { %9264 = vmatprep.subr.bf16.mxu0 %v16822_v42  ;;  %v3564_v40 = vld [vmem:[#allocation12 + $0x16c0] sm:$0xff]  ;;  %v3173_v42 = vld [vmem:[#allocation12 + $0xa88] sm:$0xff] }
 0x44c   :  { %9163 = vmatpush1.bf16.msra.mxu1 %v17203_v53  ;;  %v20524_v53 = vsub.s32 5, %v20400_v52 }
 0x44d   :  { %9265 = vmatpush1.bf16.msra.mxu0 %v16821_v57  ;;  %9164 = vmatprep.subr.bf16.mxu1 %v17220_v58  ;;  %v17316_v57 = vcombine.high %v3556_v37, %v3564_v40  ;;  %v16934_v58 = vcombine.high %v3173_v42, %v3181_v45 }
 0x44e   :  { %9266 = vmatprep.subr.bf16.mxu0 %v16838_v60  ;;  %v3572_v60 = vld [vmem:[#allocation12 + $0x1700] sm:$0xff] }
 0x44f   :  { %v17332_v7 = vcombine.high %v3572_v60, %v3580_v63  ;;  %v17331_v21 = vcombine.low %v3572_v60, %v3580_v63 }
 0x450   :  { %9165 = vmatpush1.bf16.msra.mxu1 %v17219_v0  ;;  %v1135_v0 = vrot.slane %v20526_v51, %v20521_v47 }
 0x451   :  { %9267 = vmatpush1.bf16.msra.mxu0 %v16837_v1  ;;  %9166 = vmatprep.subr.bf16.mxu1 %v17236_v3  ;;  %v17315_v1 = vcombine.low %v3556_v37, %v3564_v40  ;;  %v1139_v3 = vrot.slane %v20526_v51, %v20524_v53  ;;  %v3245_v40 = vld [vmem:[#allocation12 + $0xcc8] sm:$0xff] }
 0x452   :  { %9279 = vmatprep.subr.bf16.mxu0 %v16854_v4  ;;  %v16933_v4 = vcombine.low %v3173_v42, %v3181_v45  ;;  %v20536_v42 = vld [vmem:[#allocation12 + $0x10] sm:$0xff] }
 0x454   :  { %9269 = vmatmul.mubr.bf16.vlgmr.msra.gmra.mrb[28].mxu0 %v20484_v32  ;;  %9167 = vmatpush1.bf16.msra.mxu1 %v17235_v11 }
 0x455   :  { %9280 = vmatpush1.bf16.msra.mxu0 %v16853_v13  ;;  %9311 = vmatprep.mubr.bf16.mxu0 %v20511_v62  ;;  %v3205_v13 = vld [vmem:[#allocation12 + $0xb88] sm:$0xff] }
 0x456   :  { %9281 = vmatprep.subr.bf16.mxu0 %v16870_v14  ;;  %9168 = vmatprep.subr.bf16.mxu1 %v17252_v16  ;;  %v3213_v14 = vld [vmem:[#allocation12 + $0xbc8] sm:$0xff] }
 0x457   :  { %v16966_v27 = vcombine.high %v3205_v13, %v3213_v14 }
 0x458   :  { %9169 = vmatpush1.bf16.msra.mxu1 %v17251_v44  ;;  %v16949_v44 = vcombine.low %v3189_v48, %v3197_v49 }
 0x459   :  { %9282 = vmatpush1.bf16.msra.mxu0 %v16869_v22  ;;  %9170 = vmatprep.subr.bf16.mxu1 %v17268_v15  ;;  %v17348_v22 = vcombine.high %v3588_v10, %v3596_v41  ;;  %v3604_v15 = vld [vmem:[#allocation12 + $0x1800] sm:$0xff] }
 0x45a   :  { %9283 = vmatprep.subr.bf16.mxu0 %v16886_v23  ;;  %v3612_v23 = vld [vmem:[#allocation12 + $0x1840] sm:$0xff] }
 0x45b   :  { %v3644_v10 = vld [vmem:[#allocation12 + $0x1940] sm:$0xff] }
 0x45c   :  { %9171 = vmatpush1.bf16.msra.mxu1 %v17267_v28 }
 0x45d   :  { %9284 = vmatpush1.bf16.msra.mxu0 %v16885_v29  ;;  %9172 = vmatprep.subr.bf16.mxu1 %v17284_v30  ;;  %v16965_v30 = vcombine.low %v3205_v13, %v3213_v14  ;;  %v3269_v14 = vld [vmem:[#allocation12 + $0xd88] sm:$0xff] }
 0x45e   :  { %9285 = vmatprep.subr.bf16.mxu0 %v16902_v31  ;;  %v3221_v31 = vld [vmem:[#allocation12 + $0xc08] sm:$0xff] }
 0x460   :  { %9173 = vmatpush1.bf16.msra.mxu1 %v17283_v17  ;;  %v17364_v17 = vcombine.high %v3604_v15, %v3612_v23 }
 0x461   :  { %9286 = vmatpush1.bf16.msra.mxu0 %v16901_v20  ;;  %9174 = vmatprep.subr.bf16.mxu1 %v17300_v25 }
 0x462   :  { %9287 = vmatprep.subr.bf16.mxu0 %v16918_v36  ;;  %v3237_v36 = vld [vmem:[#allocation12 + $0xc88] sm:$0xff] }
 0x463   :  { %v16997_v41 = vcombine.low %v3237_v36, %v3245_v40 }
 0x464   :  { %9175 = vmatpush1.bf16.msra.mxu1 %v17299_v46 }
 0x465   :  { %9288 = vmatpush1.bf16.msra.mxu0 %v16917_v50  ;;  %9176 = vmatprep.subr.bf16.mxu1 %v17316_v57  ;;  %v3620_v57 = vld [vmem:[#allocation12 + $0x1880] sm:$0xff] }
 0x466   :  { %9289 = vmatprep.subr.bf16.mxu0 %v16934_v58  ;;  %v3628_v58 = vld [vmem:[#allocation12 + $0x18c0] sm:$0xff] }
 0x467   :  { %v2642_v11 = vpop.f32.mrb[20].mxu0  ;;  %v17379_v13 = vcombine.low %v3620_v57, %v3628_v58 }
 0x468   :  { %v2643_v16 = vadd.f32 %v2642_v11, %v1135_v0  ;;  %v2644_v18 = vpop.f32.mrb[21].mxu0  ;;  %9177 = vmatpush1.bf16.msra.mxu1 %v17315_v1  ;;  %v17363_v1 = vcombine.low %v3604_v15, %v3612_v23  ;;  %v3285_v15 = vld [vmem:[#allocation12 + $0xe08] sm:$0xff] }
 0x469   :  { %v2645_v38 = vadd.f32 %v2644_v18, %v1139_v3  ;;  %v2646_v39 = vpop.f32.mrb[22].mxu0  ;;  %9290 = vmatpush1.bf16.msra.mxu0 %v16933_v4  ;;  %9178 = vmatprep.subr.bf16.mxu1 %v17332_v7  ;;  %v3261_v4 = vld [vmem:[#allocation12 + $0xd48] sm:$0xff]  ;;  %v17380_v7 = vcombine.high %v3620_v57, %v3628_v58  ;;  %v3716_v58 = vld [vmem:[#allocation12 + $0x1b80] sm:$0xff] }
 0x46a   :  { %v2686_v24 = vadd.f32 %v20476_v61, %v2643_v16  ;;  %v2647_v26 = vadd.f32 %v2646_v39, %v1135_v0  ;;  %v2648_v43 = vpop.f32.mrb[23].mxu0  ;;  %9291 = vmatprep.subr.bf16.mxu0 %v16950_v9  ;;  %v16998_v0 = vcombine.high %v3237_v36, %v3245_v40  ;;  %v3636_v9 = vld [vmem:[#allocation12 + $0x1900] sm:$0xff]  ;;  %v3277_v16 = vld [vmem:[#allocation12 + $0xdc8] sm:$0xff] }
 0x46b   :  { %v2688_v28 = vadd.f32 %v20478_v2, %v2645_v38  ;;  %v2649_v29 = vadd.f32 %v2648_v43, %v1139_v3  ;;  %v16982_v2 = vcombine.high %v3221_v31, %v3229_v33  ;;  %v3253_v3 = vld [vmem:[#allocation12 + $0xd08] sm:$0xff]  ;;  %v17396_v18 = vcombine.high %v3636_v9, %v3644_v10  ;;  %v3660_v38 = vld [vmem:[#allocation12 + $0x19c0] sm:$0xff] }
 0x46c   :  { %v2800_v34 = vmul.f32 0.2, %v2686_v24  ;;  %v2690_v59 = vadd.f32 %v20480_v5, %v2647_v26  ;;  %9179 = vmatpush1.bf16.msra.mxu1 %v17331_v21  ;;  %vm2784_vm4 = vcmp.gt.f32.partialorder %v2686_v24, 0.0  ;;  %v20538_v5 = vld [vmem:[#allocation12 + $0x50] sm:$0xff]  ;;  %v17014_v11 = vcombine.high %v3253_v3, %v3261_v4  ;;  %v3652_v21 = vld [vmem:[#allocation12 + $0x1980] sm:$0xff]  ;;  %v3293_v23 = vld [vmem:[#allocation12 + $0xe48] sm:$0xff] }
 0x46d   :  { %vm2785_vm5 = vcmp.gt.f32.partialorder %v2688_v28, 0.0  ;;  %v2801_v20 = vmul.f32 0.2, %v2688_v28  ;;  %v2692_v61 = vadd.f32 %v20482_v12, %v2649_v29  ;;  %9292 = vmatpush1.bf16.msra.mxu0 %v16949_v44  ;;  %9180 = vmatprep.subr.bf16.mxu1 %v17348_v22  ;;  %v16981_v12 = vcombine.low %v3221_v31, %v3229_v33  ;;  %v3668_v26 = vld [vmem:[#allocation12 + $0x1a00] sm:$0xff]  ;;  %v3309_v31 = vld [vmem:[#allocation12 + $0xec8] sm:$0xff] }
 0x46e   :  { %vm2792_vm6 = vcmp.gt.f32.partialorder %v2690_v59, 0.0  ;;  %v2808_v25 = vmul.f32 0.2, %v2690_v59  ;;  %9293 = vmatprep.subr.bf16.mxu0 %v16966_v27  ;;  %v2816_v45 = vsel %vm2784_vm4, %v2686_v24, %v2800_v34  ;;  %v16599_v48 = vcombine.low %v20536_v42, %v20538_v5  ;;  %v3676_v43 = vld [vmem:[#allocation12 + $0x1a40] sm:$0xff] }
 0x46f   :  { %vm2793_vm7 = vcmp.gt.f32.partialorder %v2692_v61, 0.0  ;;  %v2809_v37 = vmul.f32 0.2, %v2692_v61  ;;  %v2817_v46 = vsel %vm2785_vm5, %v2688_v28, %v2801_v20  ;;  %v17013_v39 = vcombine.low %v3253_v3, %v3261_v4  ;;  %v3684_v34 = vld [vmem:[#allocation12 + $0x1a80] sm:$0xff]  ;;  %v3349_v4 = vld [vmem:[#allocation12 + $0x1008] sm:$0xff] }
 0x470   :  { %v2824_v50 = vsel %vm2792_vm6, %v2690_v59, %v2808_v25  ;;  %9181 = vmatpush1.bf16.msra.mxu1 %v17347_v19  ;;  %v17030_v44 = vcombine.high %v3269_v14, %v3277_v16  ;;  %v17395_v22 = vcombine.low %v3636_v9, %v3644_v10  ;;  %v17412_v24 = vcombine.high %v3652_v21, %v3660_v38  ;;  %v3692_v59 = vld [vmem:[#allocation12 + $0x1ac0] sm:$0xff]  ;;  %v3325_v25 = vld [vmem:[#allocation12 + $0xf48] sm:$0xff] }
 0x471   :  { %v20542_v60 = vpack.c.bf16 %v2824_v50, %v2816_v45  ;;  %v2825_v63 = vsel %vm2793_vm7, %v2692_v61, %v2809_v37  ;;  %9294 = vmatpush1.bf16.msra.mxu0 %v16965_v30  ;;  %9193 = vmatprep.subr.bf16.mxu1 %v17364_v17  ;;  %v17029_v27 = vcombine.low %v3269_v14, %v3277_v16  ;;  %v3301_v30 = vld [vmem:[#allocation12 + $0xe88] sm:$0xff]  ;;  %v3700_v36 = vld [vmem:[#allocation12 + $0x1b00] sm:$0xff] }
 0x472   :  { %v20546_v49 = vpack.c.bf16 %v2825_v63, %v2817_v46  ;;  %9295 = vmatprep.subr.bf16.mxu0 %v16982_v2  ;;  %v17046_v28 = vcombine.high %v3285_v15, %v3293_v23  ;;  %v17411_v29 = vcombine.low %v3652_v21, %v3660_v38  ;;  %v17428_v33 = vcombine.high %v3668_v26, %v3676_v43  ;;  %v3317_v61 = vld [vmem:[#allocation12 + $0xf08] sm:$0xff]  ;;  %v3708_v37 = vld [vmem:[#allocation12 + $0x1b40] sm:$0xff] }
 0x473   :  { %v17045_v19 = vcombine.low %v3285_v15, %v3293_v23  ;;  %v17062_v17 = vcombine.high %v3301_v30, %v3309_v31  ;;  %v17427_v20 = vcombine.low %v3668_v26, %v3676_v43  ;;  %v17444_v2 = vcombine.high %v3684_v34, %v3692_v59  ;;  %v3333_v50 = vld [vmem:[#allocation12 + $0xf88] sm:$0xff]  ;;  %v3724_v63 = vld [vmem:[#allocation12 + $0x1bc0] sm:$0xff] }
 0x474   :  { %9182 = vmatprep.mubr.bf16.mxu1 %v20546_v49  ;;  %v17061_v40 = vcombine.low %v3301_v30, %v3309_v31  ;;  %v17078_v45 = vcombine.high %v3317_v61, %v3325_v25  ;;  %v17443_v46 = vcombine.low %v3684_v34, %v3692_v59  ;;  %v17460_v57 = vcombine.high %v3700_v36, %v3708_v37  ;;  %v3732_v10 = vld [vmem:[#allocation12 + $0x1c00] sm:$0xff]  ;;  %v3365_v16 = vld [vmem:[#allocation12 + $0x1088] sm:$0xff] }
 0x475   :  { %9183 = vmatmul.mubr.bf16.vlgmr.msra.gmra.mrb[4].mxu1 %v20542_v60  ;;  %9296 = vmatpush1.bf16.msra.mxu0 %v16981_v12  ;;  %v3341_v12 = vld [vmem:[#allocation12 + $0xfc8] sm:$0xff]  ;;  %v17459_v3 = vcombine.low %v3700_v36, %v3708_v37  ;;  %v17476_v9 = vcombine.high %v3716_v58, %v3724_v63  ;;  %v17475_v14 = vcombine.low %v3716_v58, %v3724_v63  ;;  %v3748_v38 = vld [vmem:[#allocation12 + $0x1c80] sm:$0xff] }
 0x476   :  { %9297 = vmatprep.subr.bf16.mxu0 %v16998_v0  ;;  %9194 = vmatpush1.bf16.msra.mxu1 %v17363_v1  ;;  %v17077_v0 = vcombine.low %v3317_v61, %v3325_v25  ;;  %v17094_v1 = vcombine.high %v3333_v50, %v3341_v12  ;;  %v3381_v23 = vld [vmem:[#allocation12 + $0x1108] sm:$0xff]  ;;  %v3764_v43 = vld [vmem:[#allocation12 + $0x1d00] sm:$0xff] }
 0x477   :  { %9195 = vmatprep.subr.bf16.mxu1 %v17380_v7  ;;  %v3357_v7 = vld [vmem:[#allocation12 + $0x1048] sm:$0xff]  ;;  %v3780_v59 = vld [vmem:[#allocation12 + $0x1d80] sm:$0xff] }
 0x478   :  { %v3397_v31 = vld [vmem:[#allocation12 + $0x1188] sm:$0xff]  ;;  %v3796_v37 = vld [vmem:[#allocation12 + $0x1e00] sm:$0xff] }
 0x479   :  { %9298 = vmatpush1.bf16.msra.mxu0 %v16997_v41  ;;  %v3740_v41 = vld [vmem:[#allocation12 + $0x1c40] sm:$0xff]  ;;  %v3413_v25 = vld [vmem:[#allocation12 + $0x1208] sm:$0xff] }
 0x47a   :  { %9299 = vmatprep.subr.bf16.mxu0 %v17014_v11  ;;  %9196 = vmatpush1.bf16.msra.mxu1 %v17379_v13  ;;  %v17093_v11 = vcombine.low %v3333_v50, %v3341_v12  ;;  %v17110_v13 = vcombine.high %v3349_v4, %v3357_v7  ;;  %v17492_v21 = vcombine.high %v3732_v10, %v3740_v41  ;;  %v3429_v12 = vld [vmem:[#allocation12 + $0x1288] sm:$0xff]  ;;  %v3812_v63 = vld [vmem:[#allocation12 + $0x1e80] sm:$0xff] }
 0x47b   :  { %9197 = vmatprep.subr.bf16.mxu1 %v17396_v18  ;;  %v3373_v18 = vld [vmem:[#allocation12 + $0x10c8] sm:$0xff]  ;;  %v17491_v15 = vcombine.low %v3732_v10, %v3740_v41  ;;  %v3828_v41 = vld [vmem:[#allocation12 + $0x1f00] sm:$0xff] }
 0x47d   :  { %9300 = vmatpush1.bf16.msra.mxu0 %v17013_v39  ;;  %v3756_v39 = vld [vmem:[#allocation12 + $0x1cc0] sm:$0xff] }
 0x47e   :  { %9301 = vmatprep.subr.bf16.mxu0 %v17030_v44  ;;  %9198 = vmatpush1.bf16.msra.mxu1 %v17395_v22  ;;  %v17109_v44 = vcombine.low %v3349_v4, %v3357_v7  ;;  %v17126_v22 = vcombine.high %v3365_v16, %v3373_v18  ;;  %v17508_v26 = vcombine.high %v3748_v38, %v3756_v39  ;;  %v3445_v7 = vld [vmem:[#allocation12 + $0x1308] sm:$0xff] }
 0x47f   :  { %9199 = vmatprep.subr.bf16.mxu1 %v17412_v24  ;;  %v3389_v24 = vld [vmem:[#allocation12 + $0x1148] sm:$0xff]  ;;  %v17507_v30 = vcombine.low %v3748_v38, %v3756_v39  ;;  %v3844_v39 = vld [vmem:[#allocation12 + $0x1f80] sm:$0xff] }
 0x481   :  { %9302 = vmatpush1.bf16.msra.mxu0 %v17029_v27  ;;  %v3772_v27 = vld [vmem:[#allocation12 + $0x1d40] sm:$0xff] }
 0x482   :  { %9303 = vmatprep.subr.bf16.mxu0 %v17046_v28  ;;  %9200 = vmatpush1.bf16.msra.mxu1 %v17411_v29  ;;  %v17125_v28 = vcombine.low %v3365_v16, %v3373_v18  ;;  %v17142_v29 = vcombine.high %v3381_v23, %v3389_v24  ;;  %v17524_v34 = vcombine.high %v3764_v43, %v3772_v27  ;;  %v3461_v18 = vld [vmem:[#allocation12 + $0x1388] sm:$0xff] }
 0x483   :  { %9201 = vmatprep.subr.bf16.mxu1 %v17428_v33  ;;  %v3405_v33 = vld [vmem:[#allocation12 + $0x11c8] sm:$0xff]  ;;  %v17523_v61 = vcombine.low %v3764_v43, %v3772_v27 }
 0x485   :  { %9304 = vmatpush1.bf16.msra.mxu0 %v17045_v19  ;;  %v3788_v19 = vld [vmem:[#allocation12 + $0x1dc0] sm:$0xff] }
 0x486   :  { %9305 = vmatprep.subr.bf16.mxu0 %v17062_v17  ;;  %9202 = vmatpush1.bf16.msra.mxu1 %v17427_v20  ;;  %v17141_v17 = vcombine.low %v3381_v23, %v3389_v24  ;;  %v17158_v20 = vcombine.high %v3397_v31, %v3405_v33  ;;  %v17540_v36 = vcombine.high %v3780_v59, %v3788_v19  ;;  %v3477_v24 = vld [vmem:[#allocation12 + $0x1408] sm:$0xff] }
 0x487   :  { %9203 = vmatprep.subr.bf16.mxu1 %v17444_v2  ;;  %v3421_v2 = vld [vmem:[#allocation12 + $0x1248] sm:$0xff]  ;;  %v17539_v50 = vcombine.low %v3780_v59, %v3788_v19 }
 0x488   :  { %v3509_v19 = vld [vmem:[#allocation12 + $0x1508] sm:$0xff] }
 0x489   :  { %9306 = vmatpush1.bf16.msra.mxu0 %v17061_v40  ;;  %v3804_v40 = vld [vmem:[#allocation12 + $0x1e40] sm:$0xff] }
 0x48a   :  { %9307 = vmatprep.subr.bf16.mxu0 %v17078_v45  ;;  %9204 = vmatpush1.bf16.msra.mxu1 %v17443_v46  ;;  %v17157_v45 = vcombine.low %v3397_v31, %v3405_v33  ;;  %v17174_v46 = vcombine.high %v3413_v25, %v3421_v2  ;;  %v17556_v58 = vcombine.high %v3796_v37, %v3804_v40  ;;  %v3501_v31 = vld [vmem:[#allocation12 + $0x14c8] sm:$0xff] }
 0x48b   :  { %9205 = vmatprep.subr.bf16.mxu1 %v17460_v57  ;;  %v3437_v57 = vld [vmem:[#allocation12 + $0x12c8] sm:$0xff]  ;;  %v17555_v4 = vcombine.low %v3796_v37, %v3804_v40  ;;  %v16600_v33 = vcombine.high %v20536_v42, %v20538_v5 }
 0x48c   :  { %v3541_v40 = vld [vmem:[#allocation12 + $0x1608] sm:$0xff] }
 0x48d   :  { %9308 = vmatpush1.bf16.msra.mxu0 %v17077_v0  ;;  %v3820_v0 = vld [vmem:[#allocation12 + $0x1ec0] sm:$0xff] }
 0x48e   :  { %9309 = vmatprep.subr.bf16.mxu0 %v17094_v1  ;;  %9206 = vmatpush1.bf16.msra.mxu1 %v17459_v3  ;;  %v17173_v1 = vcombine.low %v3413_v25, %v3421_v2  ;;  %v17190_v3 = vcombine.high %v3429_v12, %v3437_v57  ;;  %v17572_v10 = vcombine.high %v3812_v63, %v3820_v0  ;;  %v3525_v25 = vld [vmem:[#allocation12 + $0x1588] sm:$0xff] }
 0x48f   :  { %9207 = vmatprep.subr.bf16.mxu1 %v17476_v9  ;;  %v3453_v9 = vld [vmem:[#allocation12 + $0x1348] sm:$0xff]  ;;  %v17571_v16 = vcombine.low %v3812_v63, %v3820_v0 }
 0x490   :  { %v3533_v2 = vld [vmem:[#allocation12 + $0x15c8] sm:$0xff] }
 0x491   :  { %9310 = vmatpush1.bf16.msra.mxu0 %v17093_v11  ;;  %v3836_v11 = vld [vmem:[#allocation12 + $0x1f40] sm:$0xff]  ;;  %v17286_v37 = vcombine.high %v3525_v25, %v3533_v2  ;;  %v3573_v0 = vld [vmem:[#allocation12 + $0x1708] sm:$0xff] }
 0x492   :  { %9322 = vmatprep.subr.bf16.mxu0 %v17110_v13  ;;  %9208 = vmatpush1.bf16.msra.mxu1 %v17475_v14  ;;  %v17189_v13 = vcombine.low %v3429_v12, %v3437_v57  ;;  %v17206_v14 = vcombine.high %v3445_v7, %v3453_v9  ;;  %v17588_v38 = vcombine.high %v3828_v41, %v3836_v11  ;;  %v3557_v12 = vld [vmem:[#allocation12 + $0x1688] sm:$0xff] }
 0x493   :  { %9209 = vmatprep.subr.bf16.mxu1 %v17492_v21  ;;  %v3469_v21 = vld [vmem:[#allocation12 + $0x13c8] sm:$0xff]  ;;  %v17587_v23 = vcombine.low %v3828_v41, %v3836_v11 }
 0x494   :  { %9312 = vmatmul.mubr.bf16.vlgmr.msra.gmra.mrb[28].mxu0 %v20509_v56  ;;  %v17221_v27 = vcombine.low %v3461_v18, %v3469_v21  ;;  %v3565_v57 = vld [vmem:[#allocation12 + $0x16c8] sm:$0xff] }
 0x495   :  { %9323 = vmatpush1.bf16.msra.mxu0 %v17109_v44  ;;  %9354 = vmatprep.mubr.bf16.mxu0 %v20546_v49  ;;  %v3852_v44 = vld [vmem:[#allocation12 + $0x1fc0] sm:$0xff]  ;;  %v17318_v63 = vcombine.high %v3557_v12, %v3565_v57  ;;  %v3605_v11 = vld [vmem:[#allocation12 + $0x1808] sm:$0xff] }
 0x496   :  { %9324 = vmatprep.subr.bf16.mxu0 %v17126_v22  ;;  %9210 = vmatpush1.bf16.msra.mxu1 %v17491_v15  ;;  %v17205_v22 = vcombine.low %v3445_v7, %v3453_v9  ;;  %v17222_v15 = vcombine.high %v3461_v18, %v3469_v21  ;;  %v17604_v43 = vcombine.high %v3844_v39, %v3852_v44  ;;  %v3589_v7 = vld [vmem:[#allocation12 + $0x1788] sm:$0xff] }
 0x497   :  { %9211 = vmatprep.subr.bf16.mxu1 %v17508_v26  ;;  %v3485_v26 = vld [vmem:[#allocation12 + $0x1448] sm:$0xff] }
 0x498   :  { %v3597_v9 = vld [vmem:[#allocation12 + $0x17c8] sm:$0xff] }
 0x499   :  { %9325 = vmatpush1.bf16.msra.mxu0 %v17125_v28  ;;  %v17238_v28 = vcombine.high %v3477_v24, %v3485_v26  ;;  %v17350_v41 = vcombine.high %v3589_v7, %v3597_v9  ;;  %v3621_v18 = vld [vmem:[#allocation12 + $0x1888] sm:$0xff] }
 0x49a   :  { %9326 = vmatprep.subr.bf16.mxu0 %v17142_v29  ;;  %9212 = vmatpush1.bf16.msra.mxu1 %v17507_v30  ;;  %v17603_v29 = vcombine.low %v3844_v39, %v3852_v44  ;;  %v3493_v30 = vld [vmem:[#allocation12 + $0x1488] sm:$0xff] }
 0x49b   :  { %9213 = vmatprep.subr.bf16.mxu1 %v17524_v34  ;;  %v17237_v34 = vcombine.low %v3477_v24, %v3485_v26  ;;  %v17254_v59 = vcombine.high %v3493_v30, %v3501_v31  ;;  %v3629_v21 = vld [vmem:[#allocation12 + $0x18c8] sm:$0xff] }
 0x49c   :  { %v17382_v39 = vcombine.high %v3621_v18, %v3629_v21  ;;  %v3637_v44 = vld [vmem:[#allocation12 + $0x1908] sm:$0xff] }
 0x49d   :  { %9327 = vmatpush1.bf16.msra.mxu0 %v17141_v17  ;;  %v3517_v17 = vld [vmem:[#allocation12 + $0x1548] sm:$0xff] }
 0x49e   :  { %9328 = vmatprep.subr.bf16.mxu0 %v17158_v20  ;;  %9214 = vmatpush1.bf16.msra.mxu1 %v17523_v61  ;;  %v17253_v20 = vcombine.low %v3493_v30, %v3501_v31  ;;  %v17270_v61 = vcombine.high %v3509_v19, %v3517_v17  ;;  %v3653_v24 = vld [vmem:[#allocation12 + $0x1988] sm:$0xff] }
 0x49f   :  { %9215 = vmatprep.subr.bf16.mxu1 %v17540_v36  ;;  %v17269_v36 = vcombine.low %v3509_v19, %v3517_v17  ;;  %v3661_v26 = vld [vmem:[#allocation12 + $0x19c8] sm:$0xff]  ;;  %v20559_v17 = vsub.s32 7, %v20400_v52 }
 0x4a0   :  { %v17413_v30 = vcombine.low %v3653_v24, %v3661_v26 }
 0x4a1   :  { %9329 = vmatpush1.bf16.msra.mxu0 %v17157_v45  ;;  %v3549_v45 = vld [vmem:[#allocation12 + $0x1648] sm:$0xff] }
 0x4a2   :  { %9330 = vmatprep.subr.bf16.mxu0 %v17174_v46  ;;  %9216 = vmatpush1.bf16.msra.mxu1 %v17539_v50  ;;  %v17285_v46 = vcombine.low %v3525_v25, %v3533_v2  ;;  %v17302_v50 = vcombine.high %v3541_v40, %v3549_v45  ;;  %v3709_v25 = vld [vmem:[#allocation12 + $0x1b48] sm:$0xff] }
 0x4a3   :  { %9217 = vmatprep.subr.bf16.mxu1 %v17556_v58  ;;  %v17301_v58 = vcombine.low %v3541_v40, %v3549_v45 }
 0x4a5   :  { %9331 = vmatpush1.bf16.msra.mxu0 %v17173_v1  ;;  %v3581_v1 = vld [vmem:[#allocation12 + $0x1748] sm:$0xff] }
 0x4a6   :  { %9332 = vmatprep.subr.bf16.mxu0 %v17190_v3  ;;  %9218 = vmatpush1.bf16.msra.mxu1 %v17555_v4  ;;  %v17317_v3 = vcombine.low %v3557_v12, %v3565_v57  ;;  %v17334_v4 = vcombine.high %v3573_v0, %v3581_v1 }
 0x4a7   :  { %9219 = vmatprep.subr.bf16.mxu1 %v17572_v10  ;;  %v17333_v10 = vcombine.low %v3573_v0, %v3581_v1 }
 0x4a9   :  { %9333 = vmatpush1.bf16.msra.mxu0 %v17189_v13  ;;  %v3613_v13 = vld [vmem:[#allocation12 + $0x1848] sm:$0xff] }
 0x4aa   :  { %9334 = vmatprep.subr.bf16.mxu0 %v17206_v14  ;;  %9220 = vmatpush1.bf16.msra.mxu1 %v17571_v16  ;;  %v17349_v14 = vcombine.low %v3589_v7, %v3597_v9  ;;  %v17366_v16 = vcombine.high %v3605_v11, %v3613_v13 }
 0x4ab   :  { %9221 = vmatprep.subr.bf16.mxu1 %v17588_v38  ;;  %v17365_v38 = vcombine.low %v3605_v11, %v3613_v13 }
 0x4ad   :  { %9335 = vmatpush1.bf16.msra.mxu0 %v17205_v22  ;;  %v3645_v22 = vld [vmem:[#allocation12 + $0x1948] sm:$0xff] }
 0x4ae   :  { %9336 = vmatprep.subr.bf16.mxu0 %v17222_v15  ;;  %9222 = vmatpush1.bf16.msra.mxu1 %v17587_v23  ;;  %v17381_v15 = vcombine.low %v3621_v18, %v3629_v21  ;;  %v17398_v23 = vcombine.high %v3637_v44, %v3645_v22  ;;  %v2854_v18 = vld [vmem:[#allocation12 + $0x90] sm:$0xff] }
 0x4af   :  { %9223 = vmatprep.subr.bf16.mxu1 %v17604_v43  ;;  %v17397_v43 = vcombine.low %v3637_v44, %v3645_v22  ;;  %v2862_v21 = vld [vmem:[#allocation12 + $0xd0] sm:$0xff] }
 0x4b1   :  { %9337 = vmatpush1.bf16.msra.mxu0 %v17221_v27  ;;  %v17414_v27 = vcombine.high %v3653_v24, %v3661_v26 }
 0x4b2   :  { %9338 = vmatprep.subr.bf16.mxu0 %v17238_v28  ;;  %9224 = vmatpush1.bf16.msra.mxu1 %v17603_v29  ;;  %v3669_v28 = vld [vmem:[#allocation12 + $0x1a08] sm:$0xff] }
 0x4b3   :  { %9408 = vmatprep.subr.bf16.mxu1 %v16600_v33  ;;  %v3677_v29 = vld [vmem:[#allocation12 + $0x1a48] sm:$0xff] }
 0x4b4   :  { %v17430_v31 = vcombine.high %v3669_v28, %v3677_v29  ;;  %v3685_v33 = vld [vmem:[#allocation12 + $0x1a88] sm:$0xff]  ;;  %v17429_v19 = vcombine.low %v3669_v28, %v3677_v29  ;;  %v2870_v28 = vld [vmem:[#allocation12 + $0x110] sm:$0xff] }
 0x4b5   :  { %9339 = vmatpush1.bf16.msra.mxu0 %v17237_v34  ;;  %v3693_v34 = vld [vmem:[#allocation12 + $0x1ac8] sm:$0xff]  ;;  %v2878_v29 = vld [vmem:[#allocation12 + $0x150] sm:$0xff] }
 0x4b6   :  { %9340 = vmatprep.subr.bf16.mxu0 %v17254_v59  ;;  %v20556_v59 = vsub.s32 6, %v20400_v52 }
 0x4b8   :  { %v1143_v2 = vrot.slane %v20526_v51, %v20556_v59 }
 0x4b9   :  { %9341 = vmatpush1.bf16.msra.mxu0 %v17253_v20  ;;  %v17446_v20 = vcombine.high %v3685_v33, %v3693_v34 }
 0x4ba   :  { %9342 = vmatprep.subr.bf16.mxu0 %v17270_v61  ;;  %v3701_v61 = vld [vmem:[#allocation12 + $0x1b08] sm:$0xff] }
 0x4bb   :  { %v17462_v40 = vcombine.high %v3701_v61, %v3709_v25 }
 0x4bd   :  { %9343 = vmatpush1.bf16.msra.mxu0 %v17269_v36  ;;  %v1147_v36 = vrot.slane %v20526_v51, %v20559_v17 }
 0x4be   :  { %9344 = vmatprep.subr.bf16.mxu0 %v17286_v37  ;;  %v17445_v37 = vcombine.low %v3685_v33, %v3693_v34  ;;  %v16615_v33 = vcombine.low %v2854_v18, %v2862_v21 }
 0x4c1   :  { %9345 = vmatpush1.bf16.msra.mxu0 %v17285_v46  ;;  %v3717_v46 = vld [vmem:[#allocation12 + $0x1b88] sm:$0xff] }
 0x4c2   :  { %9346 = vmatprep.subr.bf16.mxu0 %v17302_v50  ;;  %v3725_v50 = vld [vmem:[#allocation12 + $0x1bc8] sm:$0xff] }
 0x4c3   :  { %v17477_v13 = vcombine.low %v3717_v46, %v3725_v50 }
 0x4c5   :  { %9347 = vmatpush1.bf16.msra.mxu0 %v17301_v58 }
 0x4c6   :  { %9348 = vmatprep.subr.bf16.mxu0 %v17318_v63  ;;  %v17461_v63 = vcombine.low %v3701_v61, %v3709_v25  ;;  %v2886_v61 = vld [vmem:[#allocation12 + $0x190] sm:$0xff] }
 0x4c7   :  { %v2894_v25 = vld [vmem:[#allocation12 + $0x1d0] sm:$0xff] }
 0x4c8   :  { %v16648_v42 = vcombine.high %v2886_v61, %v2894_v25 }
 0x4c9   :  { %9349 = vmatpush1.bf16.msra.mxu0 %v17317_v3 }
 0x4ca   :  { %9350 = vmatprep.subr.bf16.mxu0 %v17334_v4  ;;  %v17478_v4 = vcombine.high %v3717_v46, %v3725_v50  ;;  %v3797_v46 = vld [vmem:[#allocation12 + $0x1e08] sm:$0xff] }
 0x4cb   :  { %v3805_v50 = vld [vmem:[#allocation12 + $0x1e48] sm:$0xff] }
 0x4cd   :  { %9351 = vmatpush1.bf16.msra.mxu0 %v17333_v10  ;;  %v3733_v10 = vld [vmem:[#allocation12 + $0x1c08] sm:$0xff] }
 0x4ce   :  { %9352 = vmatprep.subr.bf16.mxu0 %v17350_v41  ;;  %v3741_v41 = vld [vmem:[#allocation12 + $0x1c48] sm:$0xff] }
 0x4cf   :  { %v17494_v22 = vcombine.high %v3733_v10, %v3741_v41  ;;  %v17493_v26 = vcombine.low %v3733_v10, %v3741_v41  ;;  %v2934_v10 = vld [vmem:[#allocation12 + $0x310] sm:$0xff] }
 0x4d0   :  { %v2942_v41 = vld [vmem:[#allocation12 + $0x350] sm:$0xff] }
 0x4d1   :  { %9353 = vmatpush1.bf16.msra.mxu0 %v17349_v14 }
 0x4d2   :  { %9365 = vmatprep.subr.bf16.mxu0 %v17366_v16 }
 0x4d4   :  { %9355 = vmatmul.mubr.bf16.vlgmr.msra.gmra.mrb[28].mxu0 %v20542_v60 }
 0x4d5   :  { %9366 = vmatpush1.bf16.msra.mxu0 %v17365_v38 }
 0x4d6   :  { %9367 = vmatprep.subr.bf16.mxu0 %v17382_v39 }
 0x4d9   :  { %9368 = vmatpush1.bf16.msra.mxu0 %v17381_v15  ;;  %v3749_v15 = vld [vmem:[#allocation12 + $0x1c88] sm:$0xff] }
 0x4da   :  { %9369 = vmatprep.subr.bf16.mxu0 %v17398_v23  ;;  %v3757_v23 = vld [vmem:[#allocation12 + $0x1cc8] sm:$0xff] }
 0x4db   :  { %v17509_v34 = vcombine.low %v3749_v15, %v3757_v23 }
 0x4dd   :  { %9370 = vmatpush1.bf16.msra.mxu0 %v17397_v43  ;;  %v16616_v43 = vcombine.high %v2854_v18, %v2862_v21  ;;  %v16696_v18 = vcombine.high %v2934_v10, %v2942_v41 }
 0x4de   :  { %9371 = vmatprep.subr.bf16.mxu0 %v17414_v27  ;;  %v17510_v27 = vcombine.high %v3749_v15, %v3757_v23  ;;  %v3853_v15 = vld [vmem:[#allocation12 + $0x1fc8] sm:$0xff]  ;;  %v16695_v23 = vcombine.low %v2934_v10, %v2942_v41  ;;  %v3030_v10 = vld [vmem:[#allocation12 + $0x610] sm:$0xff] }
 0x4df   :  { %v3038_v41 = vld [vmem:[#allocation12 + $0x650] sm:$0xff] }
 0x4e1   :  { %9372 = vmatpush1.bf16.msra.mxu0 %v17413_v30  ;;  %v3765_v30 = vld [vmem:[#allocation12 + $0x1d08] sm:$0xff] }
 0x4e2   :  { %9373 = vmatprep.subr.bf16.mxu0 %v17430_v31  ;;  %v3773_v31 = vld [vmem:[#allocation12 + $0x1d48] sm:$0xff] }
 0x4e5   :  { %9374 = vmatpush1.bf16.msra.mxu0 %v17429_v19  ;;  %v16632_v19 = vcombine.high %v2870_v28, %v2878_v29 }
 0x4e6   :  { %9375 = vmatprep.subr.bf16.mxu0 %v17446_v20  ;;  %v17526_v20 = vcombine.high %v3765_v30, %v3773_v31 }
 0x4e7   :  { %v2771_v45 = vpop.f32.mrb[24].mxu0 }
 0x4e8   :  { %v18403_v12 = vadd.f32 %v2771_v45, %v1143_v2  ;;  %v2773_v52 = vpop.f32.mrb[25].mxu0  ;;  %v2910_v45 = vld [vmem:[#allocation12 + $0x250] sm:$0xff] }
 0x4e9   :  { %v18404_v57 = vadd.f32 %v2773_v52, %v1147_v36  ;;  %v2775_v58 = vpop.f32.mrb[26].mxu0  ;;  %9376 = vmatpush1.bf16.msra.mxu0 %v17445_v37  ;;  %v16631_v37 = vcombine.low %v2870_v28, %v2878_v29  ;;  %v2966_v28 = vld [vmem:[#allocation12 + $0x410] sm:$0xff] }
 0x4ea   :  { %v2802_v0 = vmul.f32 0.2, %v18403_v12  ;;  %v18405_v1 = vadd.f32 %v2775_v58, %v1143_v2  ;;  %v2777_v3 = vpop.f32.mrb[27].mxu0  ;;  %9377 = vmatprep.subr.bf16.mxu0 %v17462_v40  ;;  %vm2786_vm8 = vcmp.gt.f32.partialorder %v18403_v12, 0.0  ;;  %v3781_v2 = vld [vmem:[#allocation12 + $0x1d88] sm:$0xff]  ;;  %v17525_v40 = vcombine.low %v3765_v30, %v3773_v31  ;;  %v2974_v29 = vld [vmem:[#allocation12 + $0x450] sm:$0xff] }
 0x4eb   :  { %v2803_v7 = vmul.f32 0.2, %v18404_v57  ;;  %v18406_v51 = vadd.f32 %v2777_v3, %v1147_v36  ;;  %vm2787_vm9 = vcmp.gt.f32.partialorder %v18404_v57, 0.0  ;;  %v3789_v36 = vld [vmem:[#allocation12 + $0x1dc8] sm:$0xff]  ;;  %v17558_v58 = vcombine.high %v3797_v46, %v3805_v50  ;;  %v2839_v30 = vld [vmem:[#allocation12 + $0x18] sm:$0xff] }
 0x4ec   :  { %vm2794_vm10 = vcmp.gt.f32.partialorder %v18405_v1, 0.0  ;;  %v2810_v9 = vmul.f32 0.2, %v18405_v1  ;;  %v2818_v14 = vsel %vm2786_vm8, %v18403_v12, %v2802_v0  ;;  %v17542_v5 = vcombine.high %v3781_v2, %v3789_v36  ;;  %v2926_v0 = vld [vmem:[#allocation12 + $0x2d0] sm:$0xff]  ;;  %v3821_v3 = vld [vmem:[#allocation12 + $0x1ec8] sm:$0xff]  ;;  %v2847_v31 = vld [vmem:[#allocation12 + $0x58] sm:$0xff] }
 0x4ed   :  { %vm2795_vm11 = vcmp.gt.f32.partialorder %v18406_v51, 0.0  ;;  %v2811_v11 = vmul.f32 0.2, %v18406_v51  ;;  %9378 = vmatpush1.bf16.msra.mxu0 %v17461_v63  ;;  %v2819_v38 = vsel %vm2787_vm9, %v18404_v57, %v2803_v7  ;;  %v16647_v12 = vcombine.low %v2886_v61, %v2894_v25  ;;  %v2918_v63 = vld [vmem:[#allocation12 + $0x290] sm:$0xff] }
 0x4ee   :  { %v2826_v16 = vsel %vm2794_vm10, %v18405_v1, %v2810_v9  ;;  %9379 = vmatprep.subr.bf16.mxu0 %v17478_v4  ;;  %v17541_v52 = vcombine.low %v3781_v2, %v3789_v36  ;;  %v3813_v1 = vld [vmem:[#allocation12 + $0x1e88] sm:$0xff]  ;;  %v17557_v7 = vcombine.low %v3797_v46, %v3805_v50  ;;  %v2982_v61 = vld [vmem:[#allocation12 + $0x490] sm:$0xff]  ;;  %v2855_v2 = vld [vmem:[#allocation12 + $0x98] sm:$0xff] }
 0x4ef   :  { %v20565_v39 = vpack.c.bf16 %v2826_v16, %v2818_v14  ;;  %v2827_v44 = vsel %vm2795_vm11, %v18406_v51, %v2811_v11  ;;  %v16680_v51 = vcombine.high %v2918_v63, %v2926_v0  ;;  %v17574_v9 = vcombine.high %v3813_v1, %v3821_v3  ;;  %v3829_v11 = vld [vmem:[#allocation12 + $0x1f08] sm:$0xff]  ;;  %v2990_v25 = vld [vmem:[#allocation12 + $0x4d0] sm:$0xff]  ;;  %v2863_v36 = vld [vmem:[#allocation12 + $0xd8] sm:$0xff] }
 0x4f0   :  { %v20567_v24 = vpack.c.bf16 %v2827_v44, %v2819_v38  ;;  %v16679_v14 = vcombine.low %v2918_v63, %v2926_v0  ;;  %v17573_v16 = vcombine.low %v3813_v1, %v3821_v3  ;;  %v2950_v38 = vld [vmem:[#allocation12 + $0x390] sm:$0xff]  ;;  %v2871_v46 = vld [vmem:[#allocation12 + $0x118] sm:$0xff] }
 0x4f1   :  { %9380 = vmatpush1.bf16.msra.mxu0 %v17477_v13  ;;  %v3837_v13 = vld [vmem:[#allocation12 + $0x1f48] sm:$0xff]  ;;  %v2958_v44 = vld [vmem:[#allocation12 + $0x3d0] sm:$0xff]  ;;  %v2879_v50 = vld [vmem:[#allocation12 + $0x158] sm:$0xff] }
 0x4f2   :  { %9225 = vmatprep.mubr.bf16.mxu1 %v20567_v24  ;;  %9397 = vmatprep.mubr.bf16.mxu0 %v20567_v24  ;;  %v17590_v21 = vcombine.high %v3829_v11, %v3837_v13  ;;  %v3014_v63 = vld [vmem:[#allocation12 + $0x590] sm:$0xff]  ;;  %v2887_v1 = vld [vmem:[#allocation12 + $0x198] sm:$0xff] }
 0x4f3   :  { %9226 = vmatmul.mubr.bf16.vlgmr.msra.gmra.mrb[4].mxu1 %v20565_v39  ;;  %9381 = vmatprep.subr.bf16.mxu0 %v17494_v22  ;;  %v3845_v22 = vld [vmem:[#allocation12 + $0x1f88] sm:$0xff]  ;;  %v3022_v0 = vld [vmem:[#allocation12 + $0x5d0] sm:$0xff]  ;;  %v2895_v3 = vld [vmem:[#allocation12 + $0x1d8] sm:$0xff] }
 0x4f4   :  { %9409 = vmatpush1.bf16.msra.mxu1 %v16599_v48  ;;  %9440 = vmatprep.mubr.bf16.mxu1 %v20486_v35  ;;  %v2902_v48 = vld [vmem:[#allocation12 + $0x210] sm:$0xff] }
 0x4f5   :  { %9382 = vmatpush1.bf16.msra.mxu0 %v17493_v26  ;;  %9410 = vmatprep.subr.bf16.mxu1 %v16616_v43  ;;  %v16664_v57 = vcombine.high %v2902_v48, %v2910_v45  ;;  %v16663_v4 = vcombine.low %v2902_v48, %v2910_v45  ;;  %v17589_v26 = vcombine.low %v3829_v11, %v3837_v13  ;;  %v2998_v48 = vld [vmem:[#allocation12 + $0x510] sm:$0xff]  ;;  %v2903_v11 = vld [vmem:[#allocation12 + $0x218] sm:$0xff] }
 0x4f6   :  { %9383 = vmatprep.subr.bf16.mxu0 %v17510_v27  ;;  %v16712_v43 = vcombine.high %v2950_v38, %v2958_v44  ;;  %v17606_v27 = vcombine.high %v3845_v22, %v3853_v15  ;;  %v3006_v45 = vld [vmem:[#allocation12 + $0x550] sm:$0xff]  ;;  %v2911_v13 = vld [vmem:[#allocation12 + $0x258] sm:$0xff] }
 0x4f8   :  { %9411 = vmatpush1.bf16.msra.mxu1 %v16615_v33  ;;  %v16711_v33 = vcombine.low %v2950_v38, %v2958_v44  ;;  %v3046_v38 = vld [vmem:[#allocation12 + $0x690] sm:$0xff] }
 0x4f9   :  { %9384 = vmatpush1.bf16.msra.mxu0 %v17509_v34  ;;  %9412 = vmatprep.subr.bf16.mxu1 %v16632_v19  ;;  %v17605_v34 = vcombine.low %v3845_v22, %v3853_v15  ;;  %v16728_v19 = vcombine.high %v2966_v28, %v2974_v29  ;;  %v3054_v44 = vld [vmem:[#allocation12 + $0x6d0] sm:$0xff]  ;;  %v2919_v22 = vld [vmem:[#allocation12 + $0x298] sm:$0xff] }
 0x4fa   :  { %9385 = vmatprep.subr.bf16.mxu0 %v17526_v20  ;;  %v16602_v20 = vcombine.high %v2839_v30, %v2847_v31  ;;  %v2927_v15 = vld [vmem:[#allocation12 + $0x2d8] sm:$0xff] }
 0x4fc   :  { %9413 = vmatpush1.bf16.msra.mxu1 %v16631_v37  ;;  %v16727_v37 = vcombine.low %v2966_v28, %v2974_v29  ;;  %v3062_v28 = vld [vmem:[#allocation12 + $0x710] sm:$0xff] }
 0x4fd   :  { %9386 = vmatpush1.bf16.msra.mxu0 %v17525_v40  ;;  %9414 = vmatprep.subr.bf16.mxu1 %v16648_v42  ;;  %v16601_v40 = vcombine.low %v2839_v30, %v2847_v31  ;;  %v16744_v42 = vcombine.high %v2982_v61, %v2990_v25  ;;  %v3070_v29 = vld [vmem:[#allocation12 + $0x750] sm:$0xff]  ;;  %v2935_v30 = vld [vmem:[#allocation12 + $0x318] sm:$0xff] }
 0x4fe   :  { %9387 = vmatprep.subr.bf16.mxu0 %v17542_v5  ;;  %v16618_v5 = vcombine.high %v2855_v2, %v2863_v36  ;;  %v2943_v31 = vld [vmem:[#allocation12 + $0x358] sm:$0xff] }
 0x500   :  { %9415 = vmatpush1.bf16.msra.mxu1 %v16647_v12  ;;  %v16743_v12 = vcombine.low %v2982_v61, %v2990_v25  ;;  %v3078_v61 = vld [vmem:[#allocation12 + $0x790] sm:$0xff] }
 0x501   :  { %9388 = vmatpush1.bf16.msra.mxu0 %v17541_v52  ;;  %9416 = vmatprep.subr.bf16.mxu1 %v16664_v57  ;;  %v16617_v52 = vcombine.low %v2855_v2, %v2863_v36  ;;  %v16760_v57 = vcombine.high %v2998_v48, %v3006_v45  ;;  %v3086_v25 = vld [vmem:[#allocation12 + $0x7d0] sm:$0xff]  ;;  %v2951_v2 = vld [vmem:[#allocation12 + $0x398] sm:$0xff] }
 0x502   :  { %9389 = vmatprep.subr.bf16.mxu0 %v17558_v58  ;;  %v16634_v58 = vcombine.high %v2871_v46, %v2879_v50  ;;  %v2959_v36 = vld [vmem:[#allocation12 + $0x3d8] sm:$0xff] }
 0x504   :  { %9417 = vmatpush1.bf16.msra.mxu1 %v16663_v4  ;;  %v16759_v4 = vcombine.low %v2998_v48, %v3006_v45  ;;  %v3094_v48 = vld [vmem:[#allocation12 + $0x810] sm:$0xff] }
 0x505   :  { %9390 = vmatpush1.bf16.msra.mxu0 %v17557_v7  ;;  %9418 = vmatprep.subr.bf16.mxu1 %v16680_v51  ;;  %v16633_v7 = vcombine.low %v2871_v46, %v2879_v50  ;;  %v16776_v51 = vcombine.high %v3014_v63, %v3022_v0  ;;  %v3102_v45 = vld [vmem:[#allocation12 + $0x850] sm:$0xff]  ;;  %v2967_v46 = vld [vmem:[#allocation12 + $0x418] sm:$0xff] }
 0x506   :  { %9391 = vmatprep.subr.bf16.mxu0 %v17574_v9  ;;  %v16650_v9 = vcombine.high %v2887_v1, %v2895_v3  ;;  %v2975_v50 = vld [vmem:[#allocation12 + $0x458] sm:$0xff] }
 0x508   :  { %9419 = vmatpush1.bf16.msra.mxu1 %v16679_v14  ;;  %v16775_v14 = vcombine.low %v3014_v63, %v3022_v0  ;;  %v3110_v63 = vld [vmem:[#allocation12 + $0x890] sm:$0xff] }
 0x509   :  { %9392 = vmatpush1.bf16.msra.mxu0 %v17573_v16  ;;  %9420 = vmatprep.subr.bf16.mxu1 %v16696_v18  ;;  %v16649_v16 = vcombine.low %v2887_v1, %v2895_v3  ;;  %v16792_v18 = vcombine.high %v3030_v10, %v3038_v41  ;;  %v3118_v0 = vld [vmem:[#allocation12 + $0x8d0] sm:$0xff]  ;;  %v2983_v1 = vld [vmem:[#allocation12 + $0x498] sm:$0xff] }
 0x50a   :  { %9393 = vmatprep.subr.bf16.mxu0 %v17590_v21  ;;  %v16666_v21 = vcombine.high %v2903_v11, %v2911_v13  ;;  %v2991_v3 = vld [vmem:[#allocation12 + $0x4d8] sm:$0xff] }
 0x50c   :  { %9421 = vmatpush1.bf16.msra.mxu1 %v16695_v23  ;;  %v16791_v23 = vcombine.low %v3030_v10, %v3038_v41  ;;  %v3126_v10 = vld [vmem:[#allocation12 + $0x910] sm:$0xff] }
 0x50d   :  { %9394 = vmatpush1.bf16.msra.mxu0 %v17589_v26  ;;  %9422 = vmatprep.subr.bf16.mxu1 %v16712_v43  ;;  %v16665_v26 = vcombine.low %v2903_v11, %v2911_v13  ;;  %v16808_v43 = vcombine.high %v3046_v38, %v3054_v44  ;;  %v3134_v41 = vld [vmem:[#allocation12 + $0x950] sm:$0xff]  ;;  %v2999_v11 = vld [vmem:[#allocation12 + $0x518] sm:$0xff] }
 0x50e   :  { %9395 = vmatprep.subr.bf16.mxu0 %v17606_v27  ;;  %v16682_v27 = vcombine.high %v2919_v22, %v2927_v15  ;;  %v3007_v13 = vld [vmem:[#allocation12 + $0x558] sm:$0xff] }
 0x510   :  { %9423 = vmatpush1.bf16.msra.mxu1 %v16711_v33  ;;  %v16807_v33 = vcombine.low %v3046_v38, %v3054_v44  ;;  %v3142_v38 = vld [vmem:[#allocation12 + $0x990] sm:$0xff] }
 0x511   :  { %9396 = vmatpush1.bf16.msra.mxu0 %v17605_v34  ;;  %9424 = vmatprep.subr.bf16.mxu1 %v16728_v19  ;;  %v16681_v34 = vcombine.low %v2919_v22, %v2927_v15  ;;  %v16824_v19 = vcombine.high %v3062_v28, %v3070_v29  ;;  %v3150_v44 = vld [vmem:[#allocation12 + $0x9d0] sm:$0xff]  ;;  %v3015_v22 = vld [vmem:[#allocation12 + $0x598] sm:$0xff] }
 0x512   :  { %9580 = vmatprep.subr.bf16.mxu0 %v16602_v20  ;;  %v16698_v20 = vcombine.high %v2935_v30, %v2943_v31  ;;  %v3023_v15 = vld [vmem:[#allocation12 + $0x5d8] sm:$0xff] }
 0x514   :  { %9425 = vmatpush1.bf16.msra.mxu1 %v16727_v37  ;;  %9398 = vmatmul.mubr.bf16.vlgmr.msra.gmra.mrb[28].mxu0 %v20565_v39  ;;  %v16823_v37 = vcombine.low %v3062_v28, %v3070_v29  ;;  %v3158_v28 = vld [vmem:[#allocation12 + $0xa10] sm:$0xff] }
 0x515   :  { %9581 = vmatpush1.bf16.msra.mxu0 %v16601_v40  ;;  %9612 = vmatprep.mubr.bf16.mxu0 %v20486_v35  ;;  %v16697_v40 = vcombine.low %v2935_v30, %v2943_v31  ;;  %v3166_v29 = vld [vmem:[#allocation12 + $0xa50] sm:$0xff]  ;;  %v3031_v30 = vld [vmem:[#allocation12 + $0x618] sm:$0xff] }
 0x516   :  { %9426 = vmatprep.subr.bf16.mxu1 %v16744_v42  ;;  %9582 = vmatprep.subr.bf16.mxu0 %v16618_v5  ;;  %v16840_v42 = vcombine.high %v3078_v61, %v3086_v25  ;;  %v16714_v5 = vcombine.high %v2951_v2, %v2959_v36  ;;  %v3039_v31 = vld [vmem:[#allocation12 + $0x658] sm:$0xff] }
 0x518   :  { %9427 = vmatpush1.bf16.msra.mxu1 %v16743_v12  ;;  %v16839_v12 = vcombine.low %v3078_v61, %v3086_v25  ;;  %v3174_v61 = vld [vmem:[#allocation12 + $0xa90] sm:$0xff] }
 0x519   :  { %9583 = vmatpush1.bf16.msra.mxu0 %v16617_v52  ;;  %9428 = vmatprep.subr.bf16.mxu1 %v16760_v57  ;;  %v16713_v52 = vcombine.low %v2951_v2, %v2959_v36  ;;  %v16856_v57 = vcombine.high %v3094_v48, %v3102_v45  ;;  %v3182_v25 = vld [vmem:[#allocation12 + $0xad0] sm:$0xff]  ;;  %v3047_v2 = vld [vmem:[#allocation12 + $0x698] sm:$0xff] }
 0x51a   :  { %9584 = vmatprep.subr.bf16.mxu0 %v16634_v58  ;;  %v16730_v58 = vcombine.high %v2967_v46, %v2975_v50  ;;  %v3055_v36 = vld [vmem:[#allocation12 + $0x6d8] sm:$0xff] }
 0x51c   :  { %9429 = vmatpush1.bf16.msra.mxu1 %v16759_v4  ;;  %v16855_v4 = vcombine.low %v3094_v48, %v3102_v45  ;;  %v3190_v48 = vld [vmem:[#allocation12 + $0xb10] sm:$0xff] }
 0x51d   :  { %9585 = vmatpush1.bf16.msra.mxu0 %v16633_v7  ;;  %9430 = vmatprep.subr.bf16.mxu1 %v16776_v51  ;;  %v16729_v7 = vcombine.low %v2967_v46, %v2975_v50  ;;  %v16872_v51 = vcombine.high %v3110_v63, %v3118_v0  ;;  %v3198_v45 = vld [vmem:[#allocation12 + $0xb50] sm:$0xff]  ;;  %v3063_v46 = vld [vmem:[#allocation12 + $0x718] sm:$0xff] }
 0x51e   :  { %9586 = vmatprep.subr.bf16.mxu0 %v16650_v9  ;;  %v16746_v9 = vcombine.high %v2983_v1, %v2991_v3  ;;  %v3071_v50 = vld [vmem:[#allocation12 + $0x758] sm:$0xff] }
 0x520   :  { %9431 = vmatpush1.bf16.msra.mxu1 %v16775_v14  ;;  %v16871_v14 = vcombine.low %v3110_v63, %v3118_v0  ;;  %v3206_v63 = vld [vmem:[#allocation12 + $0xb90] sm:$0xff] }
 0x521   :  { %9587 = vmatpush1.bf16.msra.mxu0 %v16649_v16  ;;  %9432 = vmatprep.subr.bf16.mxu1 %v16792_v18  ;;  %v16745_v16 = vcombine.low %v2983_v1, %v2991_v3  ;;  %v16888_v18 = vcombine.high %v3126_v10, %v3134_v41  ;;  %v3214_v0 = vld [vmem:[#allocation12 + $0xbd0] sm:$0xff]  ;;  %v3079_v1 = vld [vmem:[#allocation12 + $0x798] sm:$0xff] }
 0x522   :  { %9588 = vmatprep.subr.bf16.mxu0 %v16666_v21  ;;  %v16762_v21 = vcombine.high %v2999_v11, %v3007_v13  ;;  %v3087_v3 = vld [vmem:[#allocation12 + $0x7d8] sm:$0xff] }
 0x524   :  { %9433 = vmatpush1.bf16.msra.mxu1 %v16791_v23  ;;  %v16887_v23 = vcombine.low %v3126_v10, %v3134_v41  ;;  %v3222_v10 = vld [vmem:[#allocation12 + $0xc10] sm:$0xff] }
 0x525   :  { %9589 = vmatpush1.bf16.msra.mxu0 %v16665_v26  ;;  %9434 = vmatprep.subr.bf16.mxu1 %v16808_v43  ;;  %v16761_v26 = vcombine.low %v2999_v11, %v3007_v13  ;;  %v16904_v43 = vcombine.high %v3142_v38, %v3150_v44  ;;  %v3230_v41 = vld [vmem:[#allocation12 + $0xc50] sm:$0xff]  ;;  %v3095_v11 = vld [vmem:[#allocation12 + $0x818] sm:$0xff] }
 0x526   :  { %9590 = vmatprep.subr.bf16.mxu0 %v16682_v27  ;;  %v16778_v27 = vcombine.high %v3015_v22, %v3023_v15  ;;  %v3103_v13 = vld [vmem:[#allocation12 + $0x858] sm:$0xff] }
 0x528   :  { %9435 = vmatpush1.bf16.msra.mxu1 %v16807_v33  ;;  %v16903_v33 = vcombine.low %v3142_v38, %v3150_v44  ;;  %v3238_v38 = vld [vmem:[#allocation12 + $0xc90] sm:$0xff] }
 0x529   :  { %9591 = vmatpush1.bf16.msra.mxu0 %v16681_v34  ;;  %9436 = vmatprep.subr.bf16.mxu1 %v16824_v19  ;;  %v16777_v34 = vcombine.low %v3015_v22, %v3023_v15  ;;  %v16920_v19 = vcombine.high %v3158_v28, %v3166_v29  ;;  %v3246_v44 = vld [vmem:[#allocation12 + $0xcd0] sm:$0xff]  ;;  %v3111_v22 = vld [vmem:[#allocation12 + $0x898] sm:$0xff] }
 0x52a   :  { %9592 = vmatprep.subr.bf16.mxu0 %v16698_v20  ;;  %v16794_v20 = vcombine.high %v3031_v30, %v3039_v31  ;;  %v3119_v15 = vld [vmem:[#allocation12 + $0x8d8] sm:$0xff] }
 0x52c   :  { %9437 = vmatpush1.bf16.msra.mxu1 %v16823_v37  ;;  %v16919_v37 = vcombine.low %v3158_v28, %v3166_v29  ;;  %v3254_v28 = vld [vmem:[#allocation12 + $0xd10] sm:$0xff] }
 0x52d   :  { %9593 = vmatpush1.bf16.msra.mxu0 %v16697_v40  ;;  %9438 = vmatprep.subr.bf16.mxu1 %v16840_v42  ;;  %v16793_v40 = vcombine.low %v3031_v30, %v3039_v31  ;;  %v16936_v42 = vcombine.high %v3174_v61, %v3182_v25  ;;  %v3262_v29 = vld [vmem:[#allocation12 + $0xd50] sm:$0xff]  ;;  %v3127_v30 = vld [vmem:[#allocation12 + $0x918] sm:$0xff] }
 0x52e   :  { %9594 = vmatprep.subr.bf16.mxu0 %v16714_v5  ;;  %v16810_v5 = vcombine.high %v3047_v2, %v3055_v36  ;;  %v3135_v31 = vld [vmem:[#allocation12 + $0x958] sm:$0xff] }
 0x530   :  { %9439 = vmatpush1.bf16.msra.mxu1 %v16839_v12  ;;  %v16935_v12 = vcombine.low %v3174_v61, %v3182_v25  ;;  %v3270_v61 = vld [vmem:[#allocation12 + $0xd90] sm:$0xff] }
 0x531   :  { %9595 = vmatpush1.bf16.msra.mxu0 %v16713_v52  ;;  %9451 = vmatprep.subr.bf16.mxu1 %v16856_v57  ;;  %v16809_v52 = vcombine.low %v3047_v2, %v3055_v36  ;;  %v16952_v57 = vcombine.high %v3190_v48, %v3198_v45  ;;  %v3278_v25 = vld [vmem:[#allocation12 + $0xdd0] sm:$0xff]  ;;  %v3143_v2 = vld [vmem:[#allocation12 + $0x998] sm:$0xff] }
 0x532   :  { %9596 = vmatprep.subr.bf16.mxu0 %v16730_v58  ;;  %v16826_v58 = vcombine.high %v3063_v46, %v3071_v50  ;;  %v3151_v36 = vld [vmem:[#allocation12 + $0x9d8] sm:$0xff] }
 0x533   :  { %9441 = vmatmul.mubr.bf16.vlgmr.msra.gmra.mrb[8].mxu1 %v20484_v32 }
 0x534   :  { %9452 = vmatpush1.bf16.msra.mxu1 %v16855_v4  ;;  %9483 = vmatprep.mubr.bf16.mxu1 %v20511_v62  ;;  %v16951_v4 = vcombine.low %v3190_v48, %v3198_v45  ;;  %v3286_v48 = vld [vmem:[#allocation12 + $0xe10] sm:$0xff] }
 0x535   :  { %9597 = vmatpush1.bf16.msra.mxu0 %v16729_v7  ;;  %9453 = vmatprep.subr.bf16.mxu1 %v16872_v51  ;;  %v16825_v7 = vcombine.low %v3063_v46, %v3071_v50  ;;  %v16968_v51 = vcombine.high %v3206_v63, %v3214_v0  ;;  %v3294_v45 = vld [vmem:[#allocation12 + $0xe50] sm:$0xff]  ;;  %v3159_v46 = vld [vmem:[#allocation12 + $0xa18] sm:$0xff] }
 0x536   :  { %9598 = vmatprep.subr.bf16.mxu0 %v16746_v9  ;;  %v16842_v9 = vcombine.high %v3079_v1, %v3087_v3  ;;  %v3167_v50 = vld [vmem:[#allocation12 + $0xa58] sm:$0xff] }
 0x538   :  { %9454 = vmatpush1.bf16.msra.mxu1 %v16871_v14  ;;  %v16967_v14 = vcombine.low %v3206_v63, %v3214_v0  ;;  %v3302_v63 = vld [vmem:[#allocation12 + $0xe90] sm:$0xff] }
 0x539   :  { %9599 = vmatpush1.bf16.msra.mxu0 %v16745_v16  ;;  %9455 = vmatprep.subr.bf16.mxu1 %v16888_v18  ;;  %v16841_v16 = vcombine.low %v3079_v1, %v3087_v3  ;;  %v16984_v18 = vcombine.high %v3222_v10, %v3230_v41  ;;  %v3310_v0 = vld [vmem:[#allocation12 + $0xed0] sm:$0xff]  ;;  %v3175_v1 = vld [vmem:[#allocation12 + $0xa98] sm:$0xff] }
 0x53a   :  { %9600 = vmatprep.subr.bf16.mxu0 %v16762_v21  ;;  %v16858_v21 = vcombine.high %v3095_v11, %v3103_v13  ;;  %v3183_v3 = vld [vmem:[#allocation12 + $0xad8] sm:$0xff] }
 0x53c   :  { %9456 = vmatpush1.bf16.msra.mxu1 %v16887_v23  ;;  %v16983_v23 = vcombine.low %v3222_v10, %v3230_v41  ;;  %v3318_v10 = vld [vmem:[#allocation12 + $0xf10] sm:$0xff] }
 0x53d   :  { %9601 = vmatpush1.bf16.msra.mxu0 %v16761_v26  ;;  %9457 = vmatprep.subr.bf16.mxu1 %v16904_v43  ;;  %v16857_v26 = vcombine.low %v3095_v11, %v3103_v13  ;;  %v17000_v43 = vcombine.high %v3238_v38, %v3246_v44  ;;  %v3326_v41 = vld [vmem:[#allocation12 + $0xf50] sm:$0xff]  ;;  %v3191_v11 = vld [vmem:[#allocation12 + $0xb18] sm:$0xff] }
 0x53e   :  { %9602 = vmatprep.subr.bf16.mxu0 %v16778_v27  ;;  %v16874_v27 = vcombine.high %v3111_v22, %v3119_v15  ;;  %v3199_v13 = vld [vmem:[#allocation12 + $0xb58] sm:$0xff] }
 0x540   :  { %9458 = vmatpush1.bf16.msra.mxu1 %v16903_v33  ;;  %v16999_v33 = vcombine.low %v3238_v38, %v3246_v44  ;;  %v3334_v38 = vld [vmem:[#allocation12 + $0xf90] sm:$0xff] }
 0x541   :  { %9603 = vmatpush1.bf16.msra.mxu0 %v16777_v34  ;;  %9459 = vmatprep.subr.bf16.mxu1 %v16920_v19  ;;  %v16873_v34 = vcombine.low %v3111_v22, %v3119_v15  ;;  %v17016_v19 = vcombine.high %v3254_v28, %v3262_v29  ;;  %v3342_v44 = vld [vmem:[#allocation12 + $0xfd0] sm:$0xff]  ;;  %v3207_v22 = vld [vmem:[#allocation12 + $0xb98] sm:$0xff] }
 0x542   :  { %9604 = vmatprep.subr.bf16.mxu0 %v16794_v20  ;;  %v16890_v20 = vcombine.high %v3127_v30, %v3135_v31  ;;  %v3215_v15 = vld [vmem:[#allocation12 + $0xbd8] sm:$0xff] }
 0x544   :  { %9460 = vmatpush1.bf16.msra.mxu1 %v16919_v37  ;;  %v17015_v37 = vcombine.low %v3254_v28, %v3262_v29  ;;  %v3350_v28 = vld [vmem:[#allocation12 + $0x1010] sm:$0xff] }
 0x545   :  { %9605 = vmatpush1.bf16.msra.mxu0 %v16793_v40  ;;  %9461 = vmatprep.subr.bf16.mxu1 %v16936_v42  ;;  %v16889_v40 = vcombine.low %v3127_v30, %v3135_v31  ;;  %v17032_v42 = vcombine.high %v3270_v61, %v3278_v25  ;;  %v3358_v29 = vld [vmem:[#allocation12 + $0x1050] sm:$0xff]  ;;  %v3223_v30 = vld [vmem:[#allocation12 + $0xc18] sm:$0xff] }
 0x546   :  { %9606 = vmatprep.subr.bf16.mxu0 %v16810_v5  ;;  %v16906_v5 = vcombine.high %v3143_v2, %v3151_v36  ;;  %v3231_v31 = vld [vmem:[#allocation12 + $0xc58] sm:$0xff] }
 0x548   :  { %9462 = vmatpush1.bf16.msra.mxu1 %v16935_v12  ;;  %v17031_v12 = vcombine.low %v3270_v61, %v3278_v25  ;;  %v3366_v61 = vld [vmem:[#allocation12 + $0x1090] sm:$0xff] }
 0x549   :  { %9607 = vmatpush1.bf16.msra.mxu0 %v16809_v52  ;;  %9463 = vmatprep.subr.bf16.mxu1 %v16952_v57  ;;  %v16905_v52 = vcombine.low %v3143_v2, %v3151_v36  ;;  %v17048_v57 = vcombine.high %v3286_v48, %v3294_v45  ;;  %v3374_v25 = vld [vmem:[#allocation12 + $0x10d0] sm:$0xff]  ;;  %v3239_v2 = vld [vmem:[#allocation12 + $0xc98] sm:$0xff] }
 0x54a   :  { %9608 = vmatprep.subr.bf16.mxu0 %v16826_v58  ;;  %v16922_v58 = vcombine.high %v3159_v46, %v3167_v50  ;;  %v3247_v36 = vld [vmem:[#allocation12 + $0xcd8] sm:$0xff] }
 0x54c   :  { %9464 = vmatpush1.bf16.msra.mxu1 %v16951_v4  ;;  %v17047_v4 = vcombine.low %v3286_v48, %v3294_v45  ;;  %v3382_v48 = vld [vmem:[#allocation12 + $0x1110] sm:$0xff] }
 0x54d   :  { %9609 = vmatpush1.bf16.msra.mxu0 %v16825_v7  ;;  %9465 = vmatprep.subr.bf16.mxu1 %v16968_v51  ;;  %v16921_v7 = vcombine.low %v3159_v46, %v3167_v50  ;;  %v17064_v51 = vcombine.high %v3302_v63, %v3310_v0  ;;  %v3390_v45 = vld [vmem:[#allocation12 + $0x1150] sm:$0xff]  ;;  %v3255_v46 = vld [vmem:[#allocation12 + $0xd18] sm:$0xff] }
 0x54e   :  { %9610 = vmatprep.subr.bf16.mxu0 %v16842_v9  ;;  %v16938_v9 = vcombine.high %v3175_v1, %v3183_v3  ;;  %v3263_v50 = vld [vmem:[#allocation12 + $0xd58] sm:$0xff] }
 0x550   :  { %9466 = vmatpush1.bf16.msra.mxu1 %v16967_v14  ;;  %v17063_v14 = vcombine.low %v3302_v63, %v3310_v0  ;;  %v3398_v63 = vld [vmem:[#allocation12 + $0x1190] sm:$0xff] }
 0x551   :  { %9611 = vmatpush1.bf16.msra.mxu0 %v16841_v16  ;;  %9467 = vmatprep.subr.bf16.mxu1 %v16984_v18  ;;  %v16937_v16 = vcombine.low %v3175_v1, %v3183_v3  ;;  %v17080_v18 = vcombine.high %v3318_v10, %v3326_v41  ;;  %v3406_v0 = vld [vmem:[#allocation12 + $0x11d0] sm:$0xff]  ;;  %v3271_v1 = vld [vmem:[#allocation12 + $0xd98] sm:$0xff] }
 0x552   :  { %9623 = vmatprep.subr.bf16.mxu0 %v16858_v21  ;;  %v16954_v21 = vcombine.high %v3191_v11, %v3199_v13  ;;  %v3279_v3 = vld [vmem:[#allocation12 + $0xdd8] sm:$0xff] }
 0x554   :  { %9468 = vmatpush1.bf16.msra.mxu1 %v16983_v23  ;;  %9613 = vmatmul.mubr.bf16.vlgmr.msra.gmra.mrb[32].mxu0 %v20484_v32  ;;  %v17079_v23 = vcombine.low %v3318_v10, %v3326_v41  ;;  %v3414_v10 = vld [vmem:[#allocation12 + $0x1210] sm:$0xff] }
 0x555   :  { %9624 = vmatpush1.bf16.msra.mxu0 %v16857_v26  ;;  %9655 = vmatprep.mubr.bf16.mxu0 %v20511_v62  ;;  %v16953_v26 = vcombine.low %v3191_v11, %v3199_v13  ;;  %v3422_v41 = vld [vmem:[#allocation12 + $0x1250] sm:$0xff]  ;;  %v3287_v11 = vld [vmem:[#allocation12 + $0xe18] sm:$0xff] }
 0x556   :  { %9469 = vmatprep.subr.bf16.mxu1 %v17000_v43  ;;  %9625 = vmatprep.subr.bf16.mxu0 %v16874_v27  ;;  %v17096_v43 = vcombine.high %v3334_v38, %v3342_v44  ;;  %v16970_v27 = vcombine.high %v3207_v22, %v3215_v15  ;;  %v3295_v13 = vld [vmem:[#allocation12 + $0xe58] sm:$0xff] }
 0x558   :  { %9470 = vmatpush1.bf16.msra.mxu1 %v16999_v33  ;;  %v17095_v33 = vcombine.low %v3334_v38, %v3342_v44  ;;  %v3430_v38 = vld [vmem:[#allocation12 + $0x1290] sm:$0xff] }
 0x559   :  { %9626 = vmatpush1.bf16.msra.mxu0 %v16873_v34  ;;  %9471 = vmatprep.subr.bf16.mxu1 %v17016_v19  ;;  %v16969_v34 = vcombine.low %v3207_v22, %v3215_v15  ;;  %v17112_v19 = vcombine.high %v3350_v28, %v3358_v29  ;;  %v3438_v44 = vld [vmem:[#allocation12 + $0x12d0] sm:$0xff]  ;;  %v3303_v22 = vld [vmem:[#allocation12 + $0xe98] sm:$0xff] }
 0x55a   :  { %9627 = vmatprep.subr.bf16.mxu0 %v16890_v20  ;;  %v16986_v20 = vcombine.high %v3223_v30, %v3231_v31  ;;  %v3311_v15 = vld [vmem:[#allocation12 + $0xed8] sm:$0xff] }
 0x55c   :  { %9472 = vmatpush1.bf16.msra.mxu1 %v17015_v37  ;;  %v17111_v37 = vcombine.low %v3350_v28, %v3358_v29  ;;  %v3446_v28 = vld [vmem:[#allocation12 + $0x1310] sm:$0xff] }
 0x55d   :  { %9628 = vmatpush1.bf16.msra.mxu0 %v16889_v40  ;;  %9473 = vmatprep.subr.bf16.mxu1 %v17032_v42  ;;  %v16985_v40 = vcombine.low %v3223_v30, %v3231_v31  ;;  %v17128_v42 = vcombine.high %v3366_v61, %v3374_v25  ;;  %v3454_v29 = vld [vmem:[#allocation12 + $0x1350] sm:$0xff]  ;;  %v3319_v30 = vld [vmem:[#allocation12 + $0xf18] sm:$0xff] }
 0x55e   :  { %9629 = vmatprep.subr.bf16.mxu0 %v16906_v5  ;;  %v17002_v5 = vcombine.high %v3239_v2, %v3247_v36  ;;  %v3327_v31 = vld [vmem:[#allocation12 + $0xf58] sm:$0xff] }
 0x560   :  { %9474 = vmatpush1.bf16.msra.mxu1 %v17031_v12  ;;  %v17127_v12 = vcombine.low %v3366_v61, %v3374_v25  ;;  %v3462_v61 = vld [vmem:[#allocation12 + $0x1390] sm:$0xff] }
 0x561   :  { %9630 = vmatpush1.bf16.msra.mxu0 %v16905_v52  ;;  %9475 = vmatprep.subr.bf16.mxu1 %v17048_v57  ;;  %v17001_v52 = vcombine.low %v3239_v2, %v3247_v36  ;;  %v17144_v57 = vcombine.high %v3382_v48, %v3390_v45  ;;  %v3470_v25 = vld [vmem:[#allocation12 + $0x13d0] sm:$0xff]  ;;  %v3335_v2 = vld [vmem:[#allocation12 + $0xf98] sm:$0xff] }
 0x562   :  { %9631 = vmatprep.subr.bf16.mxu0 %v16922_v58  ;;  %v17018_v58 = vcombine.high %v3255_v46, %v3263_v50  ;;  %v3343_v36 = vld [vmem:[#allocation12 + $0xfd8] sm:$0xff] }
 0x564   :  { %9476 = vmatpush1.bf16.msra.mxu1 %v17047_v4  ;;  %v17143_v4 = vcombine.low %v3382_v48, %v3390_v45  ;;  %v3478_v48 = vld [vmem:[#allocation12 + $0x1410] sm:$0xff] }
 0x565   :  { %9632 = vmatpush1.bf16.msra.mxu0 %v16921_v7  ;;  %9477 = vmatprep.subr.bf16.mxu1 %v17064_v51  ;;  %v17017_v7 = vcombine.low %v3255_v46, %v3263_v50  ;;  %v17160_v51 = vcombine.high %v3398_v63, %v3406_v0  ;;  %v3486_v45 = vld [vmem:[#allocation12 + $0x1450] sm:$0xff]  ;;  %v3351_v46 = vld [vmem:[#allocation12 + $0x1018] sm:$0xff] }
 0x566   :  { %9633 = vmatprep.subr.bf16.mxu0 %v16938_v9  ;;  %v17034_v9 = vcombine.high %v3271_v1, %v3279_v3  ;;  %v3359_v50 = vld [vmem:[#allocation12 + $0x1058] sm:$0xff] }
 0x568   :  { %9478 = vmatpush1.bf16.msra.mxu1 %v17063_v14  ;;  %v17159_v14 = vcombine.low %v3398_v63, %v3406_v0  ;;  %v3494_v63 = vld [vmem:[#allocation12 + $0x1490] sm:$0xff] }
 0x569   :  { %9634 = vmatpush1.bf16.msra.mxu0 %v16937_v16  ;;  %9479 = vmatprep.subr.bf16.mxu1 %v17080_v18  ;;  %v17033_v16 = vcombine.low %v3271_v1, %v3279_v3  ;;  %v17176_v18 = vcombine.high %v3414_v10, %v3422_v41  ;;  %v3502_v0 = vld [vmem:[#allocation12 + $0x14d0] sm:$0xff]  ;;  %v3367_v1 = vld [vmem:[#allocation12 + $0x1098] sm:$0xff] }
 0x56a   :  { %9635 = vmatprep.subr.bf16.mxu0 %v16954_v21  ;;  %v17050_v21 = vcombine.high %v3287_v11, %v3295_v13  ;;  %v3375_v3 = vld [vmem:[#allocation12 + $0x10d8] sm:$0xff] }
 0x56c   :  { %9480 = vmatpush1.bf16.msra.mxu1 %v17079_v23  ;;  %v17175_v23 = vcombine.low %v3414_v10, %v3422_v41  ;;  %v3510_v10 = vld [vmem:[#allocation12 + $0x1510] sm:$0xff] }
 0x56d   :  { %9636 = vmatpush1.bf16.msra.mxu0 %v16953_v26  ;;  %9481 = vmatprep.subr.bf16.mxu1 %v17096_v43  ;;  %v17049_v26 = vcombine.low %v3287_v11, %v3295_v13  ;;  %v17192_v43 = vcombine.high %v3430_v38, %v3438_v44  ;;  %v3518_v41 = vld [vmem:[#allocation12 + $0x1550] sm:$0xff]  ;;  %v3383_v11 = vld [vmem:[#allocation12 + $0x1118] sm:$0xff] }
 0x56e   :  { %9637 = vmatprep.subr.bf16.mxu0 %v16970_v27  ;;  %v17066_v27 = vcombine.high %v3303_v22, %v3311_v15  ;;  %v3391_v13 = vld [vmem:[#allocation12 + $0x1158] sm:$0xff] }
 0x570   :  { %9482 = vmatpush1.bf16.msra.mxu1 %v17095_v33  ;;  %v17191_v33 = vcombine.low %v3430_v38, %v3438_v44  ;;  %v3526_v38 = vld [vmem:[#allocation12 + $0x1590] sm:$0xff] }
 0x571   :  { %9638 = vmatpush1.bf16.msra.mxu0 %v16969_v34  ;;  %9494 = vmatprep.subr.bf16.mxu1 %v17112_v19  ;;  %v17065_v34 = vcombine.low %v3303_v22, %v3311_v15  ;;  %v17208_v19 = vcombine.high %v3446_v28, %v3454_v29  ;;  %v3534_v44 = vld [vmem:[#allocation12 + $0x15d0] sm:$0xff]  ;;  %v3399_v22 = vld [vmem:[#allocation12 + $0x1198] sm:$0xff] }
 0x572   :  { %9639 = vmatprep.subr.bf16.mxu0 %v16986_v20  ;;  %v17082_v20 = vcombine.high %v3319_v30, %v3327_v31  ;;  %v3407_v15 = vld [vmem:[#allocation12 + $0x11d8] sm:$0xff] }
 0x573   :  { %9484 = vmatmul.mubr.bf16.vlgmr.msra.gmra.mrb[8].mxu1 %v20509_v56 }
 0x574   :  { %9495 = vmatpush1.bf16.msra.mxu1 %v17111_v37  ;;  %9526 = vmatprep.mubr.bf16.mxu1 %v20546_v49  ;;  %v17207_v37 = vcombine.low %v3446_v28, %v3454_v29  ;;  %v3542_v28 = vld [vmem:[#allocation12 + $0x1610] sm:$0xff] }
 0x575   :  { %9640 = vmatpush1.bf16.msra.mxu0 %v16985_v40  ;;  %9496 = vmatprep.subr.bf16.mxu1 %v17128_v42  ;;  %v17081_v40 = vcombine.low %v3319_v30, %v3327_v31  ;;  %v17224_v42 = vcombine.high %v3462_v61, %v3470_v25  ;;  %v3550_v29 = vld [vmem:[#allocation12 + $0x1650] sm:$0xff]  ;;  %v3415_v30 = vld [vmem:[#allocation12 + $0x1218] sm:$0xff] }
 0x576   :  { %9641 = vmatprep.subr.bf16.mxu0 %v17002_v5  ;;  %v17098_v5 = vcombine.high %v3335_v2, %v3343_v36  ;;  %v3423_v31 = vld [vmem:[#allocation12 + $0x1258] sm:$0xff] }
 0x578   :  { %9497 = vmatpush1.bf16.msra.mxu1 %v17127_v12  ;;  %v17223_v12 = vcombine.low %v3462_v61, %v3470_v25  ;;  %v3558_v61 = vld [vmem:[#allocation12 + $0x1690] sm:$0xff] }
 0x579   :  { %9642 = vmatpush1.bf16.msra.mxu0 %v17001_v52  ;;  %9498 = vmatprep.subr.bf16.mxu1 %v17144_v57  ;;  %v17097_v52 = vcombine.low %v3335_v2, %v3343_v36  ;;  %v17240_v57 = vcombine.high %v3478_v48, %v3486_v45  ;;  %v3566_v25 = vld [vmem:[#allocation12 + $0x16d0] sm:$0xff]  ;;  %v3431_v2 = vld [vmem:[#allocation12 + $0x1298] sm:$0xff] }
 0x57a   :  { %9643 = vmatprep.subr.bf16.mxu0 %v17018_v58  ;;  %v17114_v58 = vcombine.high %v3351_v46, %v3359_v50  ;;  %v3439_v36 = vld [vmem:[#allocation12 + $0x12d8] sm:$0xff] }
 0x57c   :  { %9499 = vmatpush1.bf16.msra.mxu1 %v17143_v4  ;;  %v17239_v4 = vcombine.low %v3478_v48, %v3486_v45  ;;  %v3574_v48 = vld [vmem:[#allocation12 + $0x1710] sm:$0xff] }
 0x57d   :  { %9644 = vmatpush1.bf16.msra.mxu0 %v17017_v7  ;;  %9500 = vmatprep.subr.bf16.mxu1 %v17160_v51  ;;  %v17113_v7 = vcombine.low %v3351_v46, %v3359_v50  ;;  %v17256_v51 = vcombine.high %v3494_v63, %v3502_v0  ;;  %v3582_v45 = vld [vmem:[#allocation12 + $0x1750] sm:$0xff]  ;;  %v3447_v46 = vld [vmem:[#allocation12 + $0x1318] sm:$0xff] }
 0x57e   :  { %9645 = vmatprep.subr.bf16.mxu0 %v17034_v9  ;;  %v17130_v9 = vcombine.high %v3367_v1, %v3375_v3  ;;  %v3455_v50 = vld [vmem:[#allocation12 + $0x1358] sm:$0xff] }
 0x580   :  { %9501 = vmatpush1.bf16.msra.mxu1 %v17159_v14  ;;  %v17255_v14 = vcombine.low %v3494_v63, %v3502_v0  ;;  %v3590_v63 = vld [vmem:[#allocation12 + $0x1790] sm:$0xff] }
 0x581   :  { %9646 = vmatpush1.bf16.msra.mxu0 %v17033_v16  ;;  %9502 = vmatprep.subr.bf16.mxu1 %v17176_v18  ;;  %v17129_v16 = vcombine.low %v3367_v1, %v3375_v3  ;;  %v17272_v18 = vcombine.high %v3510_v10, %v3518_v41  ;;  %v3598_v0 = vld [vmem:[#allocation12 + $0x17d0] sm:$0xff]  ;;  %v3463_v1 = vld [vmem:[#allocation12 + $0x1398] sm:$0xff] }
 0x582   :  { %9647 = vmatprep.subr.bf16.mxu0 %v17050_v21  ;;  %v17146_v21 = vcombine.high %v3383_v11, %v3391_v13  ;;  %v3471_v3 = vld [vmem:[#allocation12 + $0x13d8] sm:$0xff] }
 0x584   :  { %9503 = vmatpush1.bf16.msra.mxu1 %v17175_v23  ;;  %v17271_v23 = vcombine.low %v3510_v10, %v3518_v41  ;;  %v3606_v10 = vld [vmem:[#allocation12 + $0x1810] sm:$0xff] }
 0x585   :  { %9648 = vmatpush1.bf16.msra.mxu0 %v17049_v26  ;;  %9504 = vmatprep.subr.bf16.mxu1 %v17192_v43  ;;  %v17145_v26 = vcombine.low %v3383_v11, %v3391_v13  ;;  %v17288_v43 = vcombine.high %v3526_v38, %v3534_v44  ;;  %v3614_v41 = vld [vmem:[#allocation12 + $0x1850] sm:$0xff]  ;;  %v3479_v11 = vld [vmem:[#allocation12 + $0x1418] sm:$0xff] }
 0x586   :  { %9649 = vmatprep.subr.bf16.mxu0 %v17066_v27  ;;  %v17162_v27 = vcombine.high %v3399_v22, %v3407_v15  ;;  %v3487_v13 = vld [vmem:[#allocation12 + $0x1458] sm:$0xff] }
 0x588   :  { %9505 = vmatpush1.bf16.msra.mxu1 %v17191_v33  ;;  %v17287_v33 = vcombine.low %v3526_v38, %v3534_v44  ;;  %v3622_v38 = vld [vmem:[#allocation12 + $0x1890] sm:$0xff] }
 0x589   :  { %9650 = vmatpush1.bf16.msra.mxu0 %v17065_v34  ;;  %9506 = vmatprep.subr.bf16.mxu1 %v17208_v19  ;;  %v17161_v34 = vcombine.low %v3399_v22, %v3407_v15  ;;  %v17304_v19 = vcombine.high %v3542_v28, %v3550_v29  ;;  %v3630_v44 = vld [vmem:[#allocation12 + $0x18d0] sm:$0xff]  ;;  %v3495_v22 = vld [vmem:[#allocation12 + $0x1498] sm:$0xff] }
 0x58a   :  { %9651 = vmatprep.subr.bf16.mxu0 %v17082_v20  ;;  %v17178_v20 = vcombine.high %v3415_v30, %v3423_v31  ;;  %v3503_v15 = vld [vmem:[#allocation12 + $0x14d8] sm:$0xff] }
 0x58c   :  { %9507 = vmatpush1.bf16.msra.mxu1 %v17207_v37  ;;  %v17303_v37 = vcombine.low %v3542_v28, %v3550_v29  ;;  %v3638_v28 = vld [vmem:[#allocation12 + $0x1910] sm:$0xff] }
 0x58d   :  { %9652 = vmatpush1.bf16.msra.mxu0 %v17081_v40  ;;  %9508 = vmatprep.subr.bf16.mxu1 %v17224_v42  ;;  %v17177_v40 = vcombine.low %v3415_v30, %v3423_v31  ;;  %v17320_v42 = vcombine.high %v3558_v61, %v3566_v25  ;;  %v3646_v29 = vld [vmem:[#allocation12 + $0x1950] sm:$0xff]  ;;  %v3511_v30 = vld [vmem:[#allocation12 + $0x1518] sm:$0xff] }
 0x58e   :  { %9653 = vmatprep.subr.bf16.mxu0 %v17098_v5  ;;  %v17194_v5 = vcombine.high %v3431_v2, %v3439_v36  ;;  %v3519_v31 = vld [vmem:[#allocation12 + $0x1558] sm:$0xff] }
 0x590   :  { %9509 = vmatpush1.bf16.msra.mxu1 %v17223_v12  ;;  %v17319_v12 = vcombine.low %v3558_v61, %v3566_v25  ;;  %v3654_v61 = vld [vmem:[#allocation12 + $0x1990] sm:$0xff] }
 0x591   :  { %9654 = vmatpush1.bf16.msra.mxu0 %v17097_v52  ;;  %9510 = vmatprep.subr.bf16.mxu1 %v17240_v57  ;;  %v17193_v52 = vcombine.low %v3431_v2, %v3439_v36  ;;  %v17336_v57 = vcombine.high %v3574_v48, %v3582_v45  ;;  %v3662_v25 = vld [vmem:[#allocation12 + $0x19d0] sm:$0xff]  ;;  %v3527_v2 = vld [vmem:[#allocation12 + $0x1598] sm:$0xff] }
 0x592   :  { %9666 = vmatprep.subr.bf16.mxu0 %v17114_v58  ;;  %v17210_v58 = vcombine.high %v3447_v46, %v3455_v50  ;;  %v3535_v36 = vld [vmem:[#allocation12 + $0x15d8] sm:$0xff] }
 0x594   :  { %9511 = vmatpush1.bf16.msra.mxu1 %v17239_v4  ;;  %9656 = vmatmul.mubr.bf16.vlgmr.msra.gmra.mrb[32].mxu0 %v20509_v56  ;;  %v17335_v4 = vcombine.low %v3574_v48, %v3582_v45  ;;  %v3670_v48 = vld [vmem:[#allocation12 + $0x1a10] sm:$0xff] }
 0x595   :  { %9667 = vmatpush1.bf16.msra.mxu0 %v17113_v7  ;;  %9698 = vmatprep.mubr.bf16.mxu0 %v20546_v49  ;;  %v17209_v7 = vcombine.low %v3447_v46, %v3455_v50  ;;  %v3678_v45 = vld [vmem:[#allocation12 + $0x1a50] sm:$0xff]  ;;  %v3543_v46 = vld [vmem:[#allocation12 + $0x1618] sm:$0xff] }
 0x596   :  { %9512 = vmatprep.subr.bf16.mxu1 %v17256_v51  ;;  %9668 = vmatprep.subr.bf16.mxu0 %v17130_v9  ;;  %v17352_v51 = vcombine.high %v3590_v63, %v3598_v0  ;;  %v17226_v9 = vcombine.high %v3463_v1, %v3471_v3  ;;  %v3551_v50 = vld [vmem:[#allocation12 + $0x1658] sm:$0xff] }
 0x598   :  { %9513 = vmatpush1.bf16.msra.mxu1 %v17255_v14  ;;  %v17351_v14 = vcombine.low %v3590_v63, %v3598_v0  ;;  %v3686_v63 = vld [vmem:[#allocation12 + $0x1a90] sm:$0xff] }
 0x599   :  { %9669 = vmatpush1.bf16.msra.mxu0 %v17129_v16  ;;  %9514 = vmatprep.subr.bf16.mxu1 %v17272_v18  ;;  %v17225_v16 = vcombine.low %v3463_v1, %v3471_v3  ;;  %v17368_v18 = vcombine.high %v3606_v10, %v3614_v41  ;;  %v3694_v0 = vld [vmem:[#allocation12 + $0x1ad0] sm:$0xff]  ;;  %v3559_v1 = vld [vmem:[#allocation12 + $0x1698] sm:$0xff] }
 0x59a   :  { %9670 = vmatprep.subr.bf16.mxu0 %v17146_v21  ;;  %v17242_v21 = vcombine.high %v3479_v11, %v3487_v13  ;;  %v3567_v3 = vld [vmem:[#allocation12 + $0x16d8] sm:$0xff] }
 0x59c   :  { %9515 = vmatpush1.bf16.msra.mxu1 %v17271_v23  ;;  %v17367_v23 = vcombine.low %v3606_v10, %v3614_v41  ;;  %v17322_v10 = vcombine.high %v3559_v1, %v3567_v3  ;;  %v3702_v41 = vld [vmem:[#allocation12 + $0x1b10] sm:$0xff] }
 0x59d   :  { %9671 = vmatpush1.bf16.msra.mxu0 %v17145_v26  ;;  %9516 = vmatprep.subr.bf16.mxu1 %v17288_v43  ;;  %v17241_v26 = vcombine.low %v3479_v11, %v3487_v13  ;;  %v17384_v43 = vcombine.high %v3622_v38, %v3630_v44  ;;  %v3710_v11 = vld [vmem:[#allocation12 + $0x1b50] sm:$0xff] }
 0x59e   :  { %9672 = vmatprep.subr.bf16.mxu0 %v17162_v27  ;;  %v17258_v27 = vcombine.high %v3495_v22, %v3503_v15 }
 0x5a0   :  { %9517 = vmatpush1.bf16.msra.mxu1 %v17287_v33  ;;  %v17383_v33 = vcombine.low %v3622_v38, %v3630_v44  ;;  %v17321_v38 = vcombine.low %v3559_v1, %v3567_v3  ;;  %v17464_v44 = vcombine.high %v3702_v41, %v3710_v11  ;;  %v3750_v1 = vld [vmem:[#allocation12 + $0x1c90] sm:$0xff] }
 0x5a1   :  { %9673 = vmatpush1.bf16.msra.mxu0 %v17161_v34  ;;  %9518 = vmatprep.subr.bf16.mxu1 %v17304_v19  ;;  %v17257_v34 = vcombine.low %v3495_v22, %v3503_v15  ;;  %v17400_v19 = vcombine.high %v3638_v28, %v3646_v29 }
 0x5a2   :  { %9674 = vmatprep.subr.bf16.mxu0 %v17178_v20  ;;  %v17274_v20 = vcombine.high %v3511_v30, %v3519_v31 }
 0x5a4   :  { %9519 = vmatpush1.bf16.msra.mxu1 %v17303_v37  ;;  %v17399_v37 = vcombine.low %v3638_v28, %v3646_v29  ;;  %v3591_v28 = vld [vmem:[#allocation12 + $0x1798] sm:$0xff] }
 0x5a5   :  { %9675 = vmatpush1.bf16.msra.mxu0 %v17177_v40  ;;  %9520 = vmatprep.subr.bf16.mxu1 %v17320_v42  ;;  %v17273_v40 = vcombine.low %v3511_v30, %v3519_v31  ;;  %v17416_v42 = vcombine.high %v3654_v61, %v3662_v25  ;;  %v3599_v29 = vld [vmem:[#allocation12 + $0x17d8] sm:$0xff] }
 0x5a6   :  { %9676 = vmatprep.subr.bf16.mxu0 %v17194_v5  ;;  %v17290_v5 = vcombine.high %v3527_v2, %v3535_v36 }
 0x5a8   :  { %9521 = vmatpush1.bf16.msra.mxu1 %v17319_v12  ;;  %v17415_v12 = vcombine.low %v3654_v61, %v3662_v25 }
 0x5a9   :  { %9677 = vmatpush1.bf16.msra.mxu0 %v17193_v52  ;;  %9522 = vmatprep.subr.bf16.mxu1 %v17336_v57  ;;  %v17289_v52 = vcombine.low %v3527_v2, %v3535_v36  ;;  %v17432_v57 = vcombine.high %v3670_v48, %v3678_v45 }
 0x5aa   :  { %9678 = vmatprep.subr.bf16.mxu0 %v17210_v58  ;;  %v17306_v58 = vcombine.high %v3543_v46, %v3551_v50 }
 0x5ac   :  { %9523 = vmatpush1.bf16.msra.mxu1 %v17335_v4  ;;  %v17431_v4 = vcombine.low %v3670_v48, %v3678_v45  ;;  %v3607_v48 = vld [vmem:[#allocation12 + $0x1818] sm:$0xff] }
 0x5ad   :  { %9679 = vmatpush1.bf16.msra.mxu0 %v17209_v7  ;;  %9524 = vmatprep.subr.bf16.mxu1 %v17352_v51  ;;  %v20588_v7 = vld [vmem:[#allocation13] sm:$0xff]  ;;  %v17305_v51 = vcombine.low %v3543_v46, %v3551_v50  ;;  %v3615_v45 = vld [vmem:[#allocation12 + $0x1858] sm:$0xff] }
 0x5ae   :  { %9680 = vmatprep.subr.bf16.mxu0 %v17226_v9  ;;  %v17448_v9 = vcombine.high %v3686_v63, %v3694_v0  ;;  %v3867_v13 = vrot.slane %v20588_v7, %v20403_v54 }
 0x5b0   :  { %9525 = vmatpush1.bf16.msra.mxu1 %v17351_v14  ;;  %v3575_v14 = vld [vmem:[#allocation12 + $0x1718] sm:$0xff] }
 0x5b1   :  { %9681 = vmatpush1.bf16.msra.mxu0 %v17225_v16  ;;  %9537 = vmatprep.subr.bf16.mxu1 %v17368_v18  ;;  %v3583_v16 = vld [vmem:[#allocation12 + $0x1758] sm:$0xff]  ;;  %v17447_v18 = vcombine.low %v3686_v63, %v3694_v0  ;;  %v17370_v0 = vcombine.high %v3607_v48, %v3615_v45 }
 0x5b2   :  { %9682 = vmatprep.subr.bf16.mxu0 %v17242_v21  ;;  %v3871_v21 = vrot.slane %v20588_v7, %v20406_v55  ;;  %v17338_v15 = vcombine.high %v3575_v14, %v3583_v16  ;;  %v17337_v61 = vcombine.low %v3575_v14, %v3583_v16 }
 0x5b3   :  { %9527 = vmatmul.mubr.bf16.vlgmr.msra.gmra.mrb[8].mxu1 %v20542_v60 }
 0x5b4   :  { %9538 = vmatpush1.bf16.msra.mxu1 %v17367_v23  ;;  %9569 = vmatprep.mubr.bf16.mxu1 %v20567_v24  ;;  %v3718_v23 = vld [vmem:[#allocation12 + $0x1b90] sm:$0xff] }
 0x5b5   :  { %9683 = vmatpush1.bf16.msra.mxu0 %v17241_v26  ;;  %9539 = vmatprep.subr.bf16.mxu1 %v17384_v43  ;;  %v3726_v26 = vld [vmem:[#allocation12 + $0x1bd0] sm:$0xff] }
 0x5b6   :  { %9684 = vmatprep.subr.bf16.mxu0 %v17258_v27  ;;  %v17480_v25 = vcombine.high %v3718_v23, %v3726_v26  ;;  %v17479_v50 = vcombine.low %v3718_v23, %v3726_v26 }
 0x5b8   :  { %9540 = vmatpush1.bf16.msra.mxu1 %v17383_v33  ;;  %v17463_v33 = vcombine.low %v3702_v41, %v3710_v11 }
 0x5b9   :  { %9685 = vmatpush1.bf16.msra.mxu0 %v17257_v34  ;;  %9541 = vmatprep.subr.bf16.mxu1 %v17400_v19 }
 0x5ba   :  { %9686 = vmatprep.subr.bf16.mxu0 %v17274_v20 }
 0x5bc   :  { %9542 = vmatpush1.bf16.msra.mxu1 %v17399_v37  ;;  %v17354_v37 = vcombine.high %v3591_v28, %v3599_v29 }
 0x5bd   :  { %9687 = vmatpush1.bf16.msra.mxu0 %v17273_v40  ;;  %9543 = vmatprep.subr.bf16.mxu1 %v17416_v42  ;;  %v3734_v40 = vld [vmem:[#allocation12 + $0x1c10] sm:$0xff] }
 0x5be   :  { %9688 = vmatprep.subr.bf16.mxu0 %v17290_v5  ;;  %v3742_v42 = vld [vmem:[#allocation12 + $0x1c50] sm:$0xff] }
 0x5bf   :  { %v17495_v11 = vcombine.low %v3734_v40, %v3742_v42 }
 0x5c0   :  { %9544 = vmatpush1.bf16.msra.mxu1 %v17415_v12  ;;  %v17353_v12 = vcombine.low %v3591_v28, %v3599_v29  ;;  %v3655_v28 = vld [vmem:[#allocation12 + $0x1998] sm:$0xff] }
 0x5c1   :  { %9689 = vmatpush1.bf16.msra.mxu0 %v17289_v52  ;;  %9545 = vmatprep.subr.bf16.mxu1 %v17432_v57  ;;  %v3663_v29 = vld [vmem:[#allocation12 + $0x19d8] sm:$0xff] }
 0x5c2   :  { %9690 = vmatprep.subr.bf16.mxu0 %v17306_v58  ;;  %v17496_v58 = vcombine.high %v3734_v40, %v3742_v42  ;;  %v3814_v42 = vld [vmem:[#allocation12 + $0x1e90] sm:$0xff] }
 0x5c4   :  { %9546 = vmatpush1.bf16.msra.mxu1 %v17431_v4 }
 0x5c5   :  { %9691 = vmatpush1.bf16.msra.mxu0 %v17305_v51  ;;  %9547 = vmatprep.subr.bf16.mxu1 %v17448_v9  ;;  %v3758_v51 = vld [vmem:[#allocation12 + $0x1cd0] sm:$0xff]  ;;  %v3623_v9 = vld [vmem:[#allocation12 + $0x1898] sm:$0xff] }
 0x5c6   :  { %v9227_v22 = vpop.f32.mrb[4].mxu1  ;;  %9692 = vmatprep.subr.bf16.mxu0 %v17322_v10  ;;  %v3631_v10 = vld [vmem:[#allocation12 + $0x18d8] sm:$0xff]  ;;  %v17512_v14 = vcombine.high %v3750_v1, %v3758_v51 }
 0x5c7   :  { %v18407_v43 = vadd.f32 %v9227_v22, %v3867_v13  ;;  %v9229_v27 = vpop.f32.mrb[5].mxu1  ;;  %v17386_v16 = vcombine.high %v3623_v9, %v3631_v10  ;;  %v17511_v22 = vcombine.low %v3750_v1, %v3758_v51  ;;  %v3711_v1 = vld [vmem:[#allocation12 + $0x1b58] sm:$0xff]  ;;  %v3879_v51 = vrot.slane %v20588_v7, %v20441_v8 }
 0x5c8   :  { %v18408_v30 = vadd.f32 %v9229_v27, %v3871_v21  ;;  %9548 = vmatpush1.bf16.msra.mxu1 %v17447_v18  ;;  %v9231_v31 = vpop.f32.mrb[6].mxu1  ;;  %v3766_v18 = vld [vmem:[#allocation12 + $0x1d10] sm:$0xff] }
 0x5c9   :  { %v10472_v34 = vmul.f32 0.2, %v18407_v43  ;;  %v18409_v19 = vadd.f32 %v9231_v31, %v3867_v13  ;;  %v9233_v20 = vpop.f32.mrb[7].mxu1  ;;  %9693 = vmatpush1.bf16.msra.mxu0 %v17321_v38  ;;  %9549 = vmatprep.subr.bf16.mxu1 %v17464_v44  ;;  %vm10440_vm12 = vcmp.gt.f32.partialorder %v18407_v43, 0.0  ;;  %v17369_v13 = vcombine.low %v3607_v48, %v3615_v45  ;;  %v3639_v38 = vld [vmem:[#allocation12 + $0x1918] sm:$0xff]  ;;  %v3790_v27 = vld [vmem:[#allocation12 + $0x1dd0] sm:$0xff] }
 0x5ca   :  { %v10473_v2 = vmul.f32 0.2, %v18408_v30  ;;  %v18410_v36 = vadd.f32 %v9233_v20, %v3871_v21  ;;  %9694 = vmatprep.subr.bf16.mxu0 %v17338_v15  ;;  %vm10441_vm13 = vcmp.gt.f32.partialorder %v18408_v30, 0.0  ;;  %v3774_v21 = vld [vmem:[#allocation12 + $0x1d50] sm:$0xff]  ;;  %v3647_v44 = vld [vmem:[#allocation12 + $0x1958] sm:$0xff]  ;;  %v17385_v15 = vcombine.low %v3623_v9, %v3631_v10 }
 0x5cb   :  { %vm10456_vm14 = vcmp.gt.f32.partialorder %v18409_v19, 0.0  ;;  %v10488_v5 = vmul.f32 0.2, %v18409_v19  ;;  %v10504_v52 = vsel %vm10440_vm12, %v18407_v43, %v10472_v34  ;;  %v17528_v23 = vcombine.high %v3766_v18, %v3774_v21  ;;  %v3782_v43 = vld [vmem:[#allocation12 + $0x1d90] sm:$0xff]  ;;  %v3687_v48 = vld [vmem:[#allocation12 + $0x1a98] sm:$0xff] }
 0x5cc   :  { %vm10457_vm15 = vcmp.gt.f32.partialorder %v18410_v36, 0.0  ;;  %v10489_v46 = vmul.f32 0.2, %v18410_v36  ;;  %9550 = vmatpush1.bf16.msra.mxu1 %v17463_v33  ;;  %v10505_v3 = vsel %vm10441_vm13, %v18408_v30, %v10473_v2  ;;  %v17402_v26 = vcombine.high %v3639_v38, %v3647_v44  ;;  %v3806_v20 = vld [vmem:[#allocation12 + $0x1e50] sm:$0xff]  ;;  %v3695_v45 = vld [vmem:[#allocation12 + $0x1ad8] sm:$0xff] }
 0x5cd   :  { %v10520_v57 = vsel %vm10456_vm14, %v18409_v19, %v10488_v5  ;;  %9695 = vmatpush1.bf16.msra.mxu0 %v17337_v61  ;;  %9551 = vmatprep.subr.bf16.mxu1 %v17480_v25  ;;  %v17527_v30 = vcombine.low %v3766_v18, %v3774_v21  ;;  %v17401_v31 = vcombine.low %v3639_v38, %v3647_v44  ;;  %v3798_v19 = vld [vmem:[#allocation12 + $0x1e10] sm:$0xff]  ;;  %v3671_v61 = vld [vmem:[#allocation12 + $0x1a18] sm:$0xff] }
 0x5ce   :  { %v20595_v63 = vpack.c.bf16 %v10520_v57, %v10504_v52  ;;  %9696 = vmatprep.subr.bf16.mxu0 %v17354_v37  ;;  %v10521_v4 = vsel %vm10457_vm15, %v18410_v36, %v10489_v46  ;;  %v17544_v33 = vcombine.high %v3782_v43, %v3790_v27  ;;  %v17418_v34 = vcombine.high %v3655_v28, %v3663_v29  ;;  %v3679_v25 = vld [vmem:[#allocation12 + $0x1a58] sm:$0xff]  ;;  %v3822_v5 = vld [vmem:[#allocation12 + $0x1ed0] sm:$0xff] }
 0x5cf   :  { %v20598_v41 = vpack.c.bf16 %v10521_v4, %v10505_v3  ;;  %v17543_v2 = vcombine.low %v3782_v43, %v3790_v27  ;;  %v17417_v36 = vcombine.low %v3655_v28, %v3663_v29  ;;  %v17560_v37 = vcombine.high %v3798_v19, %v3806_v20  ;;  %v3830_v57 = vld [vmem:[#allocation12 + $0x1f10] sm:$0xff]  ;;  %v3719_v18 = vld [vmem:[#allocation12 + $0x1b98] sm:$0xff] }
 0x5d0   :  { %9552 = vmatpush1.bf16.msra.mxu1 %v17479_v50  ;;  %v17434_v40 = vcombine.high %v3671_v61, %v3679_v25  ;;  %v17559_v46 = vcombine.low %v3798_v19, %v3806_v20  ;;  %v17433_v50 = vcombine.low %v3671_v61, %v3679_v25  ;;  %v17450_v52 = vcombine.high %v3687_v48, %v3695_v45  ;;  %v3727_v21 = vld [vmem:[#allocation12 + $0x1bd8] sm:$0xff] }
 0x5d1   :  { %9697 = vmatpush1.bf16.msra.mxu0 %v17353_v12  ;;  %9553 = vmatprep.subr.bf16.mxu1 %v17496_v58  ;;  %v17576_v12 = vcombine.high %v3814_v42, %v3822_v5  ;;  %v3838_v58 = vld [vmem:[#allocation12 + $0x1f50] sm:$0xff]  ;;  %v17575_v3 = vcombine.low %v3814_v42, %v3822_v5  ;;  %v3875_v4 = vrot.slane %v20588_v7, %v20438_v6  ;;  %v3735_v19 = vld [vmem:[#allocation12 + $0x1c18] sm:$0xff] }
 0x5d2   :  { %9709 = vmatprep.subr.bf16.mxu0 %v17370_v0  ;;  %v3703_v0 = vld [vmem:[#allocation12 + $0x1b18] sm:$0xff]  ;;  %v17449_v9 = vcombine.low %v3687_v48, %v3695_v45  ;;  %v17592_v10 = vcombine.high %v3830_v57, %v3838_v58  ;;  %v17482_v29 = vcombine.high %v3719_v18, %v3727_v21  ;;  %v2856_v48 = vld [vmem:[#allocation12 + $0xa0] sm:$0xff] }
 0x5d3   :  { %v3743_v20 = vld [vmem:[#allocation12 + $0x1c58] sm:$0xff]  ;;  %v2864_v45 = vld [vmem:[#allocation12 + $0xe0] sm:$0xff] }
 0x5d4   :  { %9554 = vmatpush1.bf16.msra.mxu1 %v17495_v11  ;;  %9699 = vmatmul.mubr.bf16.vlgmr.msra.gmra.mrb[32].mxu0 %v20542_v60  ;;  %v17466_v11 = vcombine.high %v3703_v0, %v3711_v1  ;;  %v17498_v5 = vcombine.high %v3735_v19, %v3743_v20 }
 0x5d5   :  { %9710 = vmatpush1.bf16.msra.mxu0 %v17369_v13  ;;  %9741 = vmatprep.mubr.bf16.mxu0 %v20567_v24  ;;  %v3846_v13 = vld [vmem:[#allocation12 + $0x1f90] sm:$0xff] }
 0x5d6   :  { %9555 = vmatprep.subr.bf16.mxu1 %v17512_v14  ;;  %9711 = vmatprep.subr.bf16.mxu0 %v17386_v16  ;;  %v3854_v14 = vld [vmem:[#allocation12 + $0x1fd0] sm:$0xff] }
 0x5d7   :  { %v17608_v43 = vcombine.high %v3846_v13, %v3854_v14  ;;  %v17607_v25 = vcombine.low %v3846_v13, %v3854_v14  ;;  %v16619_v13 = vcombine.low %v2856_v48, %v2864_v45 }
 0x5d8   :  { %9556 = vmatpush1.bf16.msra.mxu1 %v17511_v22  ;;  %v17591_v22 = vcombine.low %v3830_v57, %v3838_v58 }
 0x5d9   :  { %9712 = vmatpush1.bf16.msra.mxu0 %v17385_v15  ;;  %9557 = vmatprep.subr.bf16.mxu1 %v17528_v23 }
 0x5da   :  { %9713 = vmatprep.subr.bf16.mxu0 %v17402_v26  ;;  %v17465_v26 = vcombine.low %v3703_v0, %v3711_v1  ;;  %v17497_v1 = vcombine.low %v3735_v19, %v3743_v20  ;;  %v2920_v19 = vld [vmem:[#allocation12 + $0x2a0] sm:$0xff] }
 0x5db   :  { %v2928_v20 = vld [vmem:[#allocation12 + $0x2e0] sm:$0xff] }
 0x5dc   :  { %9558 = vmatpush1.bf16.msra.mxu1 %v17527_v30  ;;  %v2840_v30 = vld [vmem:[#allocation12 + $0x20] sm:$0xff] }
 0x5dd   :  { %9714 = vmatpush1.bf16.msra.mxu0 %v17401_v31  ;;  %9559 = vmatprep.subr.bf16.mxu1 %v17544_v33  ;;  %v2848_v31 = vld [vmem:[#allocation12 + $0x60] sm:$0xff] }
 0x5de   :  { %9715 = vmatprep.subr.bf16.mxu0 %v17418_v34  ;;  %v16603_v58 = vcombine.low %v2840_v30, %v2848_v31 }
 0x5e0   :  { %9560 = vmatpush1.bf16.msra.mxu1 %v17543_v2 }
 0x5e1   :  { %9716 = vmatpush1.bf16.msra.mxu0 %v17417_v36  ;;  %9561 = vmatprep.subr.bf16.mxu1 %v17560_v37  ;;  %v17481_v36 = vcombine.low %v3719_v18, %v3727_v21  ;;  %v16604_v37 = vcombine.high %v2840_v30, %v2848_v31  ;;  %v2888_v21 = vld [vmem:[#allocation12 + $0x1a0] sm:$0xff] }
 0x5e2   :  { %9717 = vmatprep.subr.bf16.mxu0 %v17434_v40 }
 0x5e4   :  { %9562 = vmatpush1.bf16.msra.mxu1 %v17559_v46 }
 0x5e5   :  { %9718 = vmatpush1.bf16.msra.mxu0 %v17433_v50  ;;  %9563 = vmatprep.subr.bf16.mxu1 %v17576_v12  ;;  %v3751_v50 = vld [vmem:[#allocation12 + $0x1c98] sm:$0xff] }
 0x5e6   :  { %9719 = vmatprep.subr.bf16.mxu0 %v17450_v52  ;;  %v3759_v12 = vld [vmem:[#allocation12 + $0x1cd8] sm:$0xff] }
 0x5e7   :  { %v9399_v16 = vpop.f32.mrb[28].mxu0  ;;  %v17513_v14 = vcombine.low %v3751_v50, %v3759_v12 }
 0x5e8   :  { %v18411_v38 = vadd.f32 %v9399_v16, %v3875_v4  ;;  %9564 = vmatpush1.bf16.msra.mxu1 %v17575_v3  ;;  %v9401_v44 = vpop.f32.mrb[29].mxu0  ;;  %v16620_v3 = vcombine.high %v2856_v48, %v2864_v45  ;;  %v3831_v48 = vld [vmem:[#allocation12 + $0x1f18] sm:$0xff] }
 0x5e9   :  { %v18412_v15 = vadd.f32 %v9401_v44, %v3879_v51  ;;  %v9403_v23 = vpop.f32.mrb[30].mxu0  ;;  %9720 = vmatpush1.bf16.msra.mxu0 %v17449_v9  ;;  %9565 = vmatprep.subr.bf16.mxu1 %v17592_v10  ;;  %v2880_v9 = vld [vmem:[#allocation12 + $0x160] sm:$0xff]  ;;  %v3767_v10 = vld [vmem:[#allocation12 + $0x1d18] sm:$0xff] }
 0x5ea   :  { %v10474_v7 = vmul.f32 0.2, %v18411_v38  ;;  %v18413_v27 = vadd.f32 %v9403_v23, %v3875_v4  ;;  %v9405_v28 = vpop.f32.mrb[31].mxu0  ;;  %9721 = vmatprep.subr.bf16.mxu0 %v17466_v11  ;;  %vm10442_vm0 = vcmp.gt.f32.partialorder %v18411_v38, 0.0  ;;  %v17514_v4 = vcombine.high %v3751_v50, %v3759_v12  ;;  %v3775_v11 = vld [vmem:[#allocation12 + $0x1d58] sm:$0xff] }
 0x5eb   :  { %v10475_v33 = vmul.f32 0.2, %v18412_v15  ;;  %v18414_v34 = vadd.f32 %v9405_v28, %v3879_v51  ;;  %vm10443_vm1 = vcmp.gt.f32.partialorder %v18412_v15, 0.0  ;;  %v2872_v51 = vld [vmem:[#allocation12 + $0x120] sm:$0xff]  ;;  %v17530_v18 = vcombine.high %v3767_v10, %v3775_v11  ;;  %v3783_v44 = vld [vmem:[#allocation12 + $0x1d98] sm:$0xff] }
 0x5ec   :  { %vm10458_vm2 = vcmp.gt.f32.partialorder %v18413_v27, 0.0  ;;  %v10490_v61 = vmul.f32 0.2, %v18413_v27  ;;  %9566 = vmatpush1.bf16.msra.mxu1 %v17591_v22  ;;  %v10506_v40 = vsel %vm10442_vm0, %v18411_v38, %v10474_v7  ;;  %v16636_v16 = vcombine.high %v2872_v51, %v2880_v9  ;;  %v2896_v38 = vld [vmem:[#allocation12 + $0x1e0] sm:$0xff]  ;;  %v3791_v22 = vld [vmem:[#allocation12 + $0x1dd8] sm:$0xff] }
 0x5ed   :  { %vm10459_vm3 = vcmp.gt.f32.partialorder %v18414_v34, 0.0  ;;  %v10491_v2 = vmul.f32 0.2, %v18414_v34  ;;  %9722 = vmatpush1.bf16.msra.mxu0 %v17465_v26  ;;  %9567 = vmatprep.subr.bf16.mxu1 %v17608_v43  ;;  %v10507_v52 = vsel %vm10443_vm1, %v18412_v15, %v10475_v33  ;;  %v16635_v15 = vcombine.low %v2872_v51, %v2880_v9  ;;  %v2904_v7 = vld [vmem:[#allocation12 + $0x220] sm:$0xff]  ;;  %v3799_v28 = vld [vmem:[#allocation12 + $0x1e18] sm:$0xff] }
 0x5ee   :  { %v10522_v42 = vsel %vm10458_vm2, %v18413_v27, %v10490_v61  ;;  %9723 = vmatprep.subr.bf16.mxu0 %v17482_v29  ;;  %v17529_v23 = vcombine.low %v3767_v10, %v3775_v11  ;;  %v16652_v26 = vcombine.high %v2888_v21, %v2896_v38  ;;  %v17546_v43 = vcombine.high %v3783_v44, %v3791_v22  ;;  %v2912_v27 = vld [vmem:[#allocation12 + $0x260] sm:$0xff]  ;;  %v3807_v29 = vld [vmem:[#allocation12 + $0x1e58] sm:$0xff] }
 0x5ef   :  { %v20607_v46 = vpack.c.bf16 %v10522_v42, %v10506_v40  ;;  %v10523_v57 = vsel %vm10459_vm3, %v18414_v34, %v10491_v2  ;;  %v16651_v30 = vcombine.low %v2888_v21, %v2896_v38  ;;  %v17545_v31 = vcombine.low %v3783_v44, %v3791_v22  ;;  %v3815_v61 = vld [vmem:[#allocation12 + $0x1e98] sm:$0xff]  ;;  %v2936_v42 = vld [vmem:[#allocation12 + $0x320] sm:$0xff] }
 0x5f0   :  { %9568 = vmatpush1.bf16.msra.mxu1 %v17607_v25  ;;  %v20611_v0 = vpack.c.bf16 %v10523_v57, %v10507_v52  ;;  %v16668_v33 = vcombine.high %v2904_v7, %v2912_v27  ;;  %v17562_v34 = vcombine.high %v3799_v28, %v3807_v29  ;;  %v3823_v25 = vld [vmem:[#allocation12 + $0x1ed8] sm:$0xff]  ;;  %v16667_v2 = vcombine.low %v2904_v7, %v2912_v27 }
 0x5f1   :  { %9724 = vmatpush1.bf16.msra.mxu0 %v17481_v36  ;;  %9752 = vmatprep.subr.bf16.mxu1 %v16604_v37  ;;  %v17561_v36 = vcombine.low %v3799_v28, %v3807_v29  ;;  %v16684_v37 = vcombine.high %v2920_v19, %v2928_v20  ;;  %v17578_v40 = vcombine.high %v3815_v61, %v3823_v25  ;;  %v3839_v45 = vld [vmem:[#allocation12 + $0x1f58] sm:$0xff] }
 0x5f2   :  { %9725 = vmatprep.subr.bf16.mxu0 %v17498_v5  ;;  %v2944_v5 = vld [vmem:[#allocation12 + $0x360] sm:$0xff]  ;;  %v16683_v50 = vcombine.low %v2920_v19, %v2928_v20  ;;  %v17577_v12 = vcombine.low %v3815_v61, %v3823_v25  ;;  %v17594_v57 = vcombine.high %v3831_v48, %v3839_v45  ;;  %v17593_v9 = vcombine.low %v3831_v48, %v3839_v45 }
 0x5f3   :  { %9570 = vmatmul.mubr.bf16.vlgmr.msra.gmra.mrb[8].mxu1 %v20565_v39  ;;  %v16700_v52 = vcombine.high %v2936_v42, %v2944_v5  ;;  %v16699_v51 = vcombine.low %v2936_v42, %v2944_v5 }
 0x5f4   :  { %9753 = vmatpush1.bf16.msra.mxu1 %v16603_v58  ;;  %9784 = vmatprep.mubr.bf16.mxu1 %v20486_v35  ;;  %v2952_v58 = vld [vmem:[#allocation12 + $0x3a0] sm:$0xff] }
 0x5f5   :  { %9726 = vmatpush1.bf16.msra.mxu0 %v17497_v1  ;;  %9754 = vmatprep.subr.bf16.mxu1 %v16620_v3  ;;  %v2960_v1 = vld [vmem:[#allocation12 + $0x3e0] sm:$0xff]  ;;  %v3847_v3 = vld [vmem:[#allocation12 + $0x1f98] sm:$0xff] }
 0x5f6   :  { %9727 = vmatprep.subr.bf16.mxu0 %v17514_v4  ;;  %v3855_v4 = vld [vmem:[#allocation12 + $0x1fd8] sm:$0xff]  ;;  %v16716_v10 = vcombine.high %v2952_v58, %v2960_v1  ;;  %v16715_v21 = vcombine.low %v2952_v58, %v2960_v1 }
 0x5f7   :  { %v17610_v11 = vcombine.high %v3847_v3, %v3855_v4  ;;  %v17609_v38 = vcombine.low %v3847_v3, %v3855_v4 }
 0x5f8   :  { %9755 = vmatpush1.bf16.msra.mxu1 %v16619_v13  ;;  %v2968_v13 = vld [vmem:[#allocation12 + $0x420] sm:$0xff] }
 0x5f9   :  { %9728 = vmatpush1.bf16.msra.mxu0 %v17513_v14  ;;  %9756 = vmatprep.subr.bf16.mxu1 %v16636_v16  ;;  %v2976_v14 = vld [vmem:[#allocation12 + $0x460] sm:$0xff]  ;;  %v2841_v16 = vld [vmem:[#allocation12 + $0x28] sm:$0xff] }
 0x5fa   :  { %9729 = vmatprep.subr.bf16.mxu0 %v17530_v18  ;;  %v2849_v18 = vld [vmem:[#allocation12 + $0x68] sm:$0xff]  ;;  %v16732_v44 = vcombine.high %v2968_v13, %v2976_v14  ;;  %v16731_v7 = vcombine.low %v2968_v13, %v2976_v14 }
 0x5fb   :  { %v16606_v22 = vcombine.high %v2841_v16, %v2849_v18  ;;  %v16605_v27 = vcombine.low %v2841_v16, %v2849_v18 }
 0x5fc   :  { %9757 = vmatpush1.bf16.msra.mxu1 %v16635_v15  ;;  %v2984_v15 = vld [vmem:[#allocation12 + $0x4a0] sm:$0xff] }
 0x5fd   :  { %9730 = vmatpush1.bf16.msra.mxu0 %v17529_v23  ;;  %9758 = vmatprep.subr.bf16.mxu1 %v16652_v26  ;;  %v2992_v23 = vld [vmem:[#allocation12 + $0x4e0] sm:$0xff]  ;;  %v2857_v26 = vld [vmem:[#allocation12 + $0xa8] sm:$0xff] }
 0x5fe   :  { %9731 = vmatprep.subr.bf16.mxu0 %v17546_v43  ;;  %v2865_v43 = vld [vmem:[#allocation12 + $0xe8] sm:$0xff]  ;;  %v16748_v28 = vcombine.high %v2984_v15, %v2992_v23  ;;  %v16747_v19 = vcombine.low %v2984_v15, %v2992_v23 }
 0x5ff   :  { %v16622_v29 = vcombine.high %v2857_v26, %v2865_v43  ;;  %v16621_v20 = vcombine.low %v2857_v26, %v2865_v43 }
 0x600   :  { %9759 = vmatpush1.bf16.msra.mxu1 %v16651_v30  ;;  %v3000_v30 = vld [vmem:[#allocation12 + $0x520] sm:$0xff] }
 0x601   :  { %9732 = vmatpush1.bf16.msra.mxu0 %v17545_v31  ;;  %9760 = vmatprep.subr.bf16.mxu1 %v16668_v33  ;;  %v3008_v31 = vld [vmem:[#allocation12 + $0x560] sm:$0xff]  ;;  %v2873_v33 = vld [vmem:[#allocation12 + $0x128] sm:$0xff] }
 0x602   :  { %9733 = vmatprep.subr.bf16.mxu0 %v17562_v34  ;;  %v2881_v34 = vld [vmem:[#allocation12 + $0x168] sm:$0xff]  ;;  %v16764_v61 = vcombine.high %v3000_v30, %v3008_v31  ;;  %v16763_v42 = vcombine.low %v3000_v30, %v3008_v31 }
 0x603   :  { %v16638_v25 = vcombine.high %v2873_v33, %v2881_v34  ;;  %v16637_v5 = vcombine.low %v2873_v33, %v2881_v34 }
 0x604   :  { %9761 = vmatpush1.bf16.msra.mxu1 %v16667_v2  ;;  %v3016_v2 = vld [vmem:[#allocation12 + $0x5a0] sm:$0xff] }
 0x605   :  { %9734 = vmatpush1.bf16.msra.mxu0 %v17561_v36  ;;  %9762 = vmatprep.subr.bf16.mxu1 %v16684_v37  ;;  %v3024_v36 = vld [vmem:[#allocation12 + $0x5e0] sm:$0xff]  ;;  %v2889_v37 = vld [vmem:[#allocation12 + $0x1a8] sm:$0xff] }
 0x606   :  { %9735 = vmatprep.subr.bf16.mxu0 %v17578_v40  ;;  %v2897_v40 = vld [vmem:[#allocation12 + $0x1e8] sm:$0xff]  ;;  %v16780_v48 = vcombine.high %v3016_v2, %v3024_v36  ;;  %v16779_v58 = vcombine.low %v3016_v2, %v3024_v36 }
 0x607   :  { %v16654_v45 = vcombine.high %v2889_v37, %v2897_v40  ;;  %v16653_v1 = vcombine.low %v2889_v37, %v2897_v40 }
 0x608   :  { %9763 = vmatpush1.bf16.msra.mxu1 %v16683_v50  ;;  %v3032_v50 = vld [vmem:[#allocation12 + $0x620] sm:$0xff] }
 0x609   :  { %9736 = vmatpush1.bf16.msra.mxu0 %v17577_v12  ;;  %9764 = vmatprep.subr.bf16.mxu1 %v16700_v52  ;;  %v3040_v12 = vld [vmem:[#allocation12 + $0x660] sm:$0xff]  ;;  %v2905_v52 = vld [vmem:[#allocation12 + $0x228] sm:$0xff] }
 0x60a   :  { %9737 = vmatprep.subr.bf16.mxu0 %v17594_v57  ;;  %v2913_v57 = vld [vmem:[#allocation12 + $0x268] sm:$0xff]  ;;  %v16796_v3 = vcombine.high %v3032_v50, %v3040_v12  ;;  %v16795_v13 = vcombine.low %v3032_v50, %v3040_v12 }
 0x60b   :  { %v16670_v4 = vcombine.high %v2905_v52, %v2913_v57  ;;  %v16669_v14 = vcombine.low %v2905_v52, %v2913_v57 }
 0x60c   :  { %9765 = vmatpush1.bf16.msra.mxu1 %v16699_v51  ;;  %v3048_v51 = vld [vmem:[#allocation12 + $0x6a0] sm:$0xff] }
 0x60d   :  { %9738 = vmatpush1.bf16.msra.mxu0 %v17593_v9  ;;  %9766 = vmatprep.subr.bf16.mxu1 %v16716_v10  ;;  %v3056_v9 = vld [vmem:[#allocation12 + $0x6e0] sm:$0xff]  ;;  %v2921_v10 = vld [vmem:[#allocation12 + $0x2a8] sm:$0xff] }
 0x60e   :  { %9739 = vmatprep.subr.bf16.mxu0 %v17610_v11  ;;  %v2929_v11 = vld [vmem:[#allocation12 + $0x2e8] sm:$0xff]  ;;  %v16812_v16 = vcombine.high %v3048_v51, %v3056_v9  ;;  %v16811_v15 = vcombine.low %v3048_v51, %v3056_v9 }
 0x60f   :  { %v16686_v18 = vcombine.high %v2921_v10, %v2929_v11  ;;  %v16685_v23 = vcombine.low %v2921_v10, %v2929_v11 }
 0x610   :  { %9767 = vmatpush1.bf16.msra.mxu1 %v16715_v21  ;;  %v3064_v21 = vld [vmem:[#allocation12 + $0x720] sm:$0xff] }
 0x611   :  { %9740 = vmatpush1.bf16.msra.mxu0 %v17609_v38  ;;  %9768 = vmatprep.subr.bf16.mxu1 %v16732_v44  ;;  %v3072_v38 = vld [vmem:[#allocation12 + $0x760] sm:$0xff]  ;;  %v2937_v44 = vld [vmem:[#allocation12 + $0x328] sm:$0xff] }
 0x612   :  { %9924 = vmatprep.subr.bf16.mxu0 %v16606_v22  ;;  %v2945_v22 = vld [vmem:[#allocation12 + $0x368] sm:$0xff]  ;;  %v16828_v26 = vcombine.high %v3064_v21, %v3072_v38  ;;  %v16827_v30 = vcombine.low %v3064_v21, %v3072_v38 }
 0x613   :  { %v16702_v43 = vcombine.high %v2937_v44, %v2945_v22  ;;  %v16701_v31 = vcombine.low %v2937_v44, %v2945_v22 }
 0x614   :  { %9769 = vmatpush1.bf16.msra.mxu1 %v16731_v7  ;;  %9742 = vmatmul.mubr.bf16.vlgmr.msra.gmra.mrb[32].mxu0 %v20565_v39  ;;  %v3080_v7 = vld [vmem:[#allocation12 + $0x7a0] sm:$0xff] }
 0x615   :  { %9925 = vmatpush1.bf16.msra.mxu0 %v16605_v27  ;;  %9956 = vmatprep.mubr.bf16.mxu0 %v20486_v35  ;;  %v3088_v27 = vld [vmem:[#allocation12 + $0x7e0] sm:$0xff] }
 0x616   :  { %9770 = vmatprep.subr.bf16.mxu1 %v16748_v28  ;;  %9926 = vmatprep.subr.bf16.mxu0 %v16622_v29  ;;  %v2953_v28 = vld [vmem:[#allocation12 + $0x3a8] sm:$0xff]  ;;  %v16844_v33 = vcombine.high %v3080_v7, %v3088_v27  ;;  %v16843_v2 = vcombine.low %v3080_v7, %v3088_v27 }
 0x617   :  { %v2961_v29 = vld [vmem:[#allocation12 + $0x3e8] sm:$0xff] }
 0x618   :  { %9771 = vmatpush1.bf16.msra.mxu1 %v16747_v19  ;;  %v16718_v34 = vcombine.high %v2953_v28, %v2961_v29  ;;  %v3096_v19 = vld [vmem:[#allocation12 + $0x820] sm:$0xff]  ;;  %v16717_v36 = vcombine.low %v2953_v28, %v2961_v29 }
 0x619   :  { %9927 = vmatpush1.bf16.msra.mxu0 %v16621_v20  ;;  %9772 = vmatprep.subr.bf16.mxu1 %v16764_v61  ;;  %v3104_v20 = vld [vmem:[#allocation12 + $0x860] sm:$0xff]  ;;  %v2969_v61 = vld [vmem:[#allocation12 + $0x428] sm:$0xff] }
 0x61a   :  { %9928 = vmatprep.subr.bf16.mxu0 %v16638_v25  ;;  %v2977_v25 = vld [vmem:[#allocation12 + $0x468] sm:$0xff]  ;;  %v16860_v37 = vcombine.high %v3096_v19, %v3104_v20  ;;  %v16859_v50 = vcombine.low %v3096_v19, %v3104_v20 }
 0x61b   :  { %v16734_v40 = vcombine.high %v2969_v61, %v2977_v25  ;;  %v16733_v12 = vcombine.low %v2969_v61, %v2977_v25 }
 0x61c   :  { %9773 = vmatpush1.bf16.msra.mxu1 %v16763_v42  ;;  %v3112_v42 = vld [vmem:[#allocation12 + $0x8a0] sm:$0xff] }
 0x61d   :  { %9929 = vmatpush1.bf16.msra.mxu0 %v16637_v5  ;;  %9774 = vmatprep.subr.bf16.mxu1 %v16780_v48  ;;  %v3120_v5 = vld [vmem:[#allocation12 + $0x8e0] sm:$0xff]  ;;  %v2985_v48 = vld [vmem:[#allocation12 + $0x4a8] sm:$0xff] }
 0x61e   :  { %9930 = vmatprep.subr.bf16.mxu0 %v16654_v45  ;;  %v2993_v45 = vld [vmem:[#allocation12 + $0x4e8] sm:$0xff]  ;;  %v16876_v52 = vcombine.high %v3112_v42, %v3120_v5  ;;  %v16875_v51 = vcombine.low %v3112_v42, %v3120_v5 }
 0x61f   :  { %v16750_v57 = vcombine.high %v2985_v48, %v2993_v45  ;;  %v16749_v9 = vcombine.low %v2985_v48, %v2993_v45 }
 0x620   :  { %9775 = vmatpush1.bf16.msra.mxu1 %v16779_v58  ;;  %v3128_v58 = vld [vmem:[#allocation12 + $0x920] sm:$0xff] }
 0x621   :  { %9931 = vmatpush1.bf16.msra.mxu0 %v16653_v1  ;;  %9776 = vmatprep.subr.bf16.mxu1 %v16796_v3  ;;  %v3136_v1 = vld [vmem:[#allocation12 + $0x960] sm:$0xff]  ;;  %v3001_v3 = vld [vmem:[#allocation12 + $0x528] sm:$0xff] }
 0x622   :  { %9932 = vmatprep.subr.bf16.mxu0 %v16670_v4  ;;  %v3009_v4 = vld [vmem:[#allocation12 + $0x568] sm:$0xff]  ;;  %v16892_v10 = vcombine.high %v3128_v58, %v3136_v1  ;;  %v16891_v21 = vcombine.low %v3128_v58, %v3136_v1 }
 0x623   :  { %v16766_v11 = vcombine.high %v3001_v3, %v3009_v4  ;;  %v16765_v38 = vcombine.low %v3001_v3, %v3009_v4 }
 0x624   :  { %9777 = vmatpush1.bf16.msra.mxu1 %v16795_v13  ;;  %v3144_v13 = vld [vmem:[#allocation12 + $0x9a0] sm:$0xff] }
 0x625   :  { %9933 = vmatpush1.bf16.msra.mxu0 %v16669_v14  ;;  %9778 = vmatprep.subr.bf16.mxu1 %v16812_v16  ;;  %v3152_v14 = vld [vmem:[#allocation12 + $0x9e0] sm:$0xff]  ;;  %v3017_v16 = vld [vmem:[#allocation12 + $0x5a8] sm:$0xff] }
 0x626   :  { %9934 = vmatprep.subr.bf16.mxu0 %v16686_v18  ;;  %v3025_v18 = vld [vmem:[#allocation12 + $0x5e8] sm:$0xff]  ;;  %v16908_v44 = vcombine.high %v3144_v13, %v3152_v14  ;;  %v16907_v7 = vcombine.low %v3144_v13, %v3152_v14 }
 0x627   :  { %v16782_v22 = vcombine.high %v3017_v16, %v3025_v18  ;;  %v16781_v27 = vcombine.low %v3017_v16, %v3025_v18 }
 0x628   :  { %9779 = vmatpush1.bf16.msra.mxu1 %v16811_v15  ;;  %v3160_v15 = vld [vmem:[#allocation12 + $0xa20] sm:$0xff] }
 0x629   :  { %9935 = vmatpush1.bf16.msra.mxu0 %v16685_v23  ;;  %9780 = vmatprep.subr.bf16.mxu1 %v16828_v26  ;;  %v3168_v23 = vld [vmem:[#allocation12 + $0xa60] sm:$0xff]  ;;  %v3033_v26 = vld [vmem:[#allocation12 + $0x628] sm:$0xff] }
 0x62a   :  { %9936 = vmatprep.subr.bf16.mxu0 %v16702_v43  ;;  %v3041_v43 = vld [vmem:[#allocation12 + $0x668] sm:$0xff]  ;;  %v16924_v28 = vcombine.high %v3160_v15, %v3168_v23  ;;  %v16923_v19 = vcombine.low %v3160_v15, %v3168_v23 }
 0x62b   :  { %v16798_v29 = vcombine.high %v3033_v26, %v3041_v43  ;;  %v16797_v20 = vcombine.low %v3033_v26, %v3041_v43 }
 0x62c   :  { %9781 = vmatpush1.bf16.msra.mxu1 %v16827_v30  ;;  %v3176_v30 = vld [vmem:[#allocation12 + $0xaa0] sm:$0xff] }
 0x62d   :  { %9937 = vmatpush1.bf16.msra.mxu0 %v16701_v31  ;;  %9782 = vmatprep.subr.bf16.mxu1 %v16844_v33  ;;  %v3184_v31 = vld [vmem:[#allocation12 + $0xae0] sm:$0xff]  ;;  %v3049_v33 = vld [vmem:[#allocation12 + $0x6a8] sm:$0xff] }
 0x62e   :  { %9938 = vmatprep.subr.bf16.mxu0 %v16718_v34  ;;  %v3057_v34 = vld [vmem:[#allocation12 + $0x6e8] sm:$0xff]  ;;  %v16940_v61 = vcombine.high %v3176_v30, %v3184_v31  ;;  %v16939_v42 = vcombine.low %v3176_v30, %v3184_v31 }
 0x62f   :  { %v16814_v25 = vcombine.high %v3049_v33, %v3057_v34  ;;  %v16813_v5 = vcombine.low %v3049_v33, %v3057_v34 }
 0x630   :  { %9783 = vmatpush1.bf16.msra.mxu1 %v16843_v2  ;;  %v3192_v2 = vld [vmem:[#allocation12 + $0xb20] sm:$0xff] }
 0x631   :  { %9939 = vmatpush1.bf16.msra.mxu0 %v16717_v36  ;;  %9795 = vmatprep.subr.bf16.mxu1 %v16860_v37  ;;  %v3200_v36 = vld [vmem:[#allocation12 + $0xb60] sm:$0xff]  ;;  %v3065_v37 = vld [vmem:[#allocation12 + $0x728] sm:$0xff] }
 0x632   :  { %9940 = vmatprep.subr.bf16.mxu0 %v16734_v40  ;;  %v3073_v40 = vld [vmem:[#allocation12 + $0x768] sm:$0xff]  ;;  %v16956_v48 = vcombine.high %v3192_v2, %v3200_v36  ;;  %v16955_v58 = vcombine.low %v3192_v2, %v3200_v36 }
 0x633   :  { %9785 = vmatmul.mubr.bf16.vlgmr.msra.gmra.mrb[12].mxu1 %v20484_v32  ;;  %v16830_v45 = vcombine.high %v3065_v37, %v3073_v40  ;;  %v16829_v1 = vcombine.low %v3065_v37, %v3073_v40 }
 0x634   :  { %9796 = vmatpush1.bf16.msra.mxu1 %v16859_v50  ;;  %9827 = vmatprep.mubr.bf16.mxu1 %v20511_v62  ;;  %v3208_v50 = vld [vmem:[#allocation12 + $0xba0] sm:$0xff] }
 0x635   :  { %9941 = vmatpush1.bf16.msra.mxu0 %v16733_v12  ;;  %9797 = vmatprep.subr.bf16.mxu1 %v16876_v52  ;;  %v3216_v12 = vld [vmem:[#allocation12 + $0xbe0] sm:$0xff]  ;;  %v3081_v52 = vld [vmem:[#allocation12 + $0x7a8] sm:$0xff] }
 0x636   :  { %9942 = vmatprep.subr.bf16.mxu0 %v16750_v57  ;;  %v3089_v57 = vld [vmem:[#allocation12 + $0x7e8] sm:$0xff]  ;;  %v16972_v3 = vcombine.high %v3208_v50, %v3216_v12  ;;  %v16971_v13 = vcombine.low %v3208_v50, %v3216_v12 }
 0x637   :  { %v16846_v4 = vcombine.high %v3081_v52, %v3089_v57  ;;  %v16845_v14 = vcombine.low %v3081_v52, %v3089_v57 }
 0x638   :  { %9798 = vmatpush1.bf16.msra.mxu1 %v16875_v51  ;;  %v3224_v51 = vld [vmem:[#allocation12 + $0xc20] sm:$0xff] }
 0x639   :  { %9943 = vmatpush1.bf16.msra.mxu0 %v16749_v9  ;;  %9799 = vmatprep.subr.bf16.mxu1 %v16892_v10  ;;  %v3232_v9 = vld [vmem:[#allocation12 + $0xc60] sm:$0xff]  ;;  %v3097_v10 = vld [vmem:[#allocation12 + $0x828] sm:$0xff] }
 0x63a   :  { %9944 = vmatprep.subr.bf16.mxu0 %v16766_v11  ;;  %v3105_v11 = vld [vmem:[#allocation12 + $0x868] sm:$0xff]  ;;  %v16988_v16 = vcombine.high %v3224_v51, %v3232_v9  ;;  %v16987_v15 = vcombine.low %v3224_v51, %v3232_v9 }
 0x63b   :  { %v16862_v18 = vcombine.high %v3097_v10, %v3105_v11  ;;  %v16861_v23 = vcombine.low %v3097_v10, %v3105_v11 }
 0x63c   :  { %9800 = vmatpush1.bf16.msra.mxu1 %v16891_v21  ;;  %v3240_v21 = vld [vmem:[#allocation12 + $0xca0] sm:$0xff] }
 0x63d   :  { %9945 = vmatpush1.bf16.msra.mxu0 %v16765_v38  ;;  %9801 = vmatprep.subr.bf16.mxu1 %v16908_v44  ;;  %v3248_v38 = vld [vmem:[#allocation12 + $0xce0] sm:$0xff]  ;;  %v3113_v44 = vld [vmem:[#allocation12 + $0x8a8] sm:$0xff] }
 0x63e   :  { %9946 = vmatprep.subr.bf16.mxu0 %v16782_v22  ;;  %v3121_v22 = vld [vmem:[#allocation12 + $0x8e8] sm:$0xff]  ;;  %v17004_v26 = vcombine.high %v3240_v21, %v3248_v38  ;;  %v17003_v30 = vcombine.low %v3240_v21, %v3248_v38 }
 0x63f   :  { %v16878_v43 = vcombine.high %v3113_v44, %v3121_v22  ;;  %v16877_v31 = vcombine.low %v3113_v44, %v3121_v22 }
 0x640   :  { %9802 = vmatpush1.bf16.msra.mxu1 %v16907_v7  ;;  %v3256_v7 = vld [vmem:[#allocation12 + $0xd20] sm:$0xff] }
 0x641   :  { %9947 = vmatpush1.bf16.msra.mxu0 %v16781_v27  ;;  %9803 = vmatprep.subr.bf16.mxu1 %v16924_v28  ;;  %v3264_v27 = vld [vmem:[#allocation12 + $0xd60] sm:$0xff]  ;;  %v3129_v28 = vld [vmem:[#allocation12 + $0x928] sm:$0xff] }
 0x642   :  { %9948 = vmatprep.subr.bf16.mxu0 %v16798_v29  ;;  %v3137_v29 = vld [vmem:[#allocation12 + $0x968] sm:$0xff]  ;;  %v17020_v33 = vcombine.high %v3256_v7, %v3264_v27  ;;  %v17019_v2 = vcombine.low %v3256_v7, %v3264_v27 }
 0x643   :  { %v16894_v34 = vcombine.high %v3129_v28, %v3137_v29  ;;  %v16893_v36 = vcombine.low %v3129_v28, %v3137_v29 }
 0x644   :  { %9804 = vmatpush1.bf16.msra.mxu1 %v16923_v19  ;;  %v3272_v19 = vld [vmem:[#allocation12 + $0xda0] sm:$0xff] }
 0x645   :  { %9949 = vmatpush1.bf16.msra.mxu0 %v16797_v20  ;;  %9805 = vmatprep.subr.bf16.mxu1 %v16940_v61  ;;  %v3280_v20 = vld [vmem:[#allocation12 + $0xde0] sm:$0xff]  ;;  %v3145_v61 = vld [vmem:[#allocation12 + $0x9a8] sm:$0xff] }
 0x646   :  { %9950 = vmatprep.subr.bf16.mxu0 %v16814_v25  ;;  %v3153_v25 = vld [vmem:[#allocation12 + $0x9e8] sm:$0xff]  ;;  %v17036_v37 = vcombine.high %v3272_v19, %v3280_v20  ;;  %v17035_v50 = vcombine.low %v3272_v19, %v3280_v20 }
 0x647   :  { %v16910_v40 = vcombine.high %v3145_v61, %v3153_v25  ;;  %v16909_v12 = vcombine.low %v3145_v61, %v3153_v25 }
 0x648   :  { %9806 = vmatpush1.bf16.msra.mxu1 %v16939_v42  ;;  %v3288_v42 = vld [vmem:[#allocation12 + $0xe20] sm:$0xff] }
 0x649   :  { %9951 = vmatpush1.bf16.msra.mxu0 %v16813_v5  ;;  %9807 = vmatprep.subr.bf16.mxu1 %v16956_v48  ;;  %v3296_v5 = vld [vmem:[#allocation12 + $0xe60] sm:$0xff]  ;;  %v3161_v48 = vld [vmem:[#allocation12 + $0xa28] sm:$0xff] }
 0x64a   :  { %9952 = vmatprep.subr.bf16.mxu0 %v16830_v45  ;;  %v3169_v45 = vld [vmem:[#allocation12 + $0xa68] sm:$0xff]  ;;  %v17052_v52 = vcombine.high %v3288_v42, %v3296_v5  ;;  %v17051_v51 = vcombine.low %v3288_v42, %v3296_v5 }
 0x64b   :  { %v16926_v57 = vcombine.high %v3161_v48, %v3169_v45  ;;  %v16925_v9 = vcombine.low %v3161_v48, %v3169_v45 }
 0x64c   :  { %9808 = vmatpush1.bf16.msra.mxu1 %v16955_v58  ;;  %v3304_v58 = vld [vmem:[#allocation12 + $0xea0] sm:$0xff] }
 0x64d   :  { %9953 = vmatpush1.bf16.msra.mxu0 %v16829_v1  ;;  %9809 = vmatprep.subr.bf16.mxu1 %v16972_v3  ;;  %v3312_v1 = vld [vmem:[#allocation12 + $0xee0] sm:$0xff]  ;;  %v3177_v3 = vld [vmem:[#allocation12 + $0xaa8] sm:$0xff] }
 0x64e   :  { %9954 = vmatprep.subr.bf16.mxu0 %v16846_v4  ;;  %v3185_v4 = vld [vmem:[#allocation12 + $0xae8] sm:$0xff]  ;;  %v17068_v10 = vcombine.high %v3304_v58, %v3312_v1  ;;  %v17067_v21 = vcombine.low %v3304_v58, %v3312_v1 }
 0x64f   :  { %v16942_v11 = vcombine.high %v3177_v3, %v3185_v4  ;;  %v16941_v38 = vcombine.low %v3177_v3, %v3185_v4 }
 0x650   :  { %9810 = vmatpush1.bf16.msra.mxu1 %v16971_v13  ;;  %v3320_v13 = vld [vmem:[#allocation12 + $0xf20] sm:$0xff] }
 0x651   :  { %9955 = vmatpush1.bf16.msra.mxu0 %v16845_v14  ;;  %9811 = vmatprep.subr.bf16.mxu1 %v16988_v16  ;;  %v3328_v14 = vld [vmem:[#allocation12 + $0xf60] sm:$0xff]  ;;  %v3193_v16 = vld [vmem:[#allocation12 + $0xb28] sm:$0xff] }
 0x652   :  { %9967 = vmatprep.subr.bf16.mxu0 %v16862_v18  ;;  %v3201_v18 = vld [vmem:[#allocation12 + $0xb68] sm:$0xff]  ;;  %v17084_v44 = vcombine.high %v3320_v13, %v3328_v14  ;;  %v17083_v7 = vcombine.low %v3320_v13, %v3328_v14 }
 0x653   :  { %v16958_v22 = vcombine.high %v3193_v16, %v3201_v18  ;;  %v16957_v27 = vcombine.low %v3193_v16, %v3201_v18 }
 0x654   :  { %9812 = vmatpush1.bf16.msra.mxu1 %v16987_v15  ;;  %9957 = vmatmul.mubr.bf16.vlgmr.msra.gmra.mrb[36].mxu0 %v20484_v32  ;;  %v3336_v15 = vld [vmem:[#allocation12 + $0xfa0] sm:$0xff] }
 0x655   :  { %9968 = vmatpush1.bf16.msra.mxu0 %v16861_v23  ;;  %9999 = vmatprep.mubr.bf16.mxu0 %v20511_v62  ;;  %v3344_v23 = vld [vmem:[#allocation12 + $0xfe0] sm:$0xff] }
 0x656   :  { %9813 = vmatprep.subr.bf16.mxu1 %v17004_v26  ;;  %9969 = vmatprep.subr.bf16.mxu0 %v16878_v43  ;;  %v3209_v26 = vld [vmem:[#allocation12 + $0xba8] sm:$0xff]  ;;  %v17100_v28 = vcombine.high %v3336_v15, %v3344_v23  ;;  %v17099_v19 = vcombine.low %v3336_v15, %v3344_v23 }
 0x657   :  { %v3217_v43 = vld [vmem:[#allocation12 + $0xbe8] sm:$0xff] }
 0x658   :  { %9814 = vmatpush1.bf16.msra.mxu1 %v17003_v30  ;;  %v16974_v29 = vcombine.high %v3209_v26, %v3217_v43  ;;  %v3352_v30 = vld [vmem:[#allocation12 + $0x1020] sm:$0xff]  ;;  %v16973_v20 = vcombine.low %v3209_v26, %v3217_v43 }
 0x659   :  { %9970 = vmatpush1.bf16.msra.mxu0 %v16877_v31  ;;  %9815 = vmatprep.subr.bf16.mxu1 %v17020_v33  ;;  %v3360_v31 = vld [vmem:[#allocation12 + $0x1060] sm:$0xff]  ;;  %v3225_v33 = vld [vmem:[#allocation12 + $0xc28] sm:$0xff] }
 0x65a   :  { %9971 = vmatprep.subr.bf16.mxu0 %v16894_v34  ;;  %v3233_v34 = vld [vmem:[#allocation12 + $0xc68] sm:$0xff]  ;;  %v17116_v61 = vcombine.high %v3352_v30, %v3360_v31  ;;  %v17115_v42 = vcombine.low %v3352_v30, %v3360_v31 }
 0x65b   :  { %v16990_v25 = vcombine.high %v3225_v33, %v3233_v34  ;;  %v16989_v5 = vcombine.low %v3225_v33, %v3233_v34 }
 0x65c   :  { %9816 = vmatpush1.bf16.msra.mxu1 %v17019_v2  ;;  %v3368_v2 = vld [vmem:[#allocation12 + $0x10a0] sm:$0xff] }
 0x65d   :  { %9972 = vmatpush1.bf16.msra.mxu0 %v16893_v36  ;;  %9817 = vmatprep.subr.bf16.mxu1 %v17036_v37  ;;  %v3376_v36 = vld [vmem:[#allocation12 + $0x10e0] sm:$0xff]  ;;  %v3241_v37 = vld [vmem:[#allocation12 + $0xca8] sm:$0xff] }
 0x65e   :  { %9973 = vmatprep.subr.bf16.mxu0 %v16910_v40  ;;  %v3249_v40 = vld [vmem:[#allocation12 + $0xce8] sm:$0xff]  ;;  %v17132_v48 = vcombine.high %v3368_v2, %v3376_v36  ;;  %v17131_v58 = vcombine.low %v3368_v2, %v3376_v36 }
 0x65f   :  { %v17006_v45 = vcombine.high %v3241_v37, %v3249_v40  ;;  %v17005_v1 = vcombine.low %v3241_v37, %v3249_v40 }
 0x660   :  { %9818 = vmatpush1.bf16.msra.mxu1 %v17035_v50  ;;  %v3384_v50 = vld [vmem:[#allocation12 + $0x1120] sm:$0xff] }
 0x661   :  { %9974 = vmatpush1.bf16.msra.mxu0 %v16909_v12  ;;  %9819 = vmatprep.subr.bf16.mxu1 %v17052_v52  ;;  %v3392_v12 = vld [vmem:[#allocation12 + $0x1160] sm:$0xff]  ;;  %v3257_v52 = vld [vmem:[#allocation12 + $0xd28] sm:$0xff] }
 0x662   :  { %9975 = vmatprep.subr.bf16.mxu0 %v16926_v57  ;;  %v3265_v57 = vld [vmem:[#allocation12 + $0xd68] sm:$0xff]  ;;  %v17148_v3 = vcombine.high %v3384_v50, %v3392_v12  ;;  %v17147_v13 = vcombine.low %v3384_v50, %v3392_v12 }
 0x663   :  { %v17022_v4 = vcombine.high %v3257_v52, %v3265_v57  ;;  %v17021_v14 = vcombine.low %v3257_v52, %v3265_v57 }
 0x664   :  { %9820 = vmatpush1.bf16.msra.mxu1 %v17051_v51  ;;  %v3400_v51 = vld [vmem:[#allocation12 + $0x11a0] sm:$0xff] }
 0x665   :  { %9976 = vmatpush1.bf16.msra.mxu0 %v16925_v9  ;;  %9821 = vmatprep.subr.bf16.mxu1 %v17068_v10  ;;  %v3408_v9 = vld [vmem:[#allocation12 + $0x11e0] sm:$0xff]  ;;  %v3273_v10 = vld [vmem:[#allocation12 + $0xda8] sm:$0xff] }
 0x666   :  { %9977 = vmatprep.subr.bf16.mxu0 %v16942_v11  ;;  %v3281_v11 = vld [vmem:[#allocation12 + $0xde8] sm:$0xff]  ;;  %v17164_v16 = vcombine.high %v3400_v51, %v3408_v9  ;;  %v17163_v15 = vcombine.low %v3400_v51, %v3408_v9 }
 0x667   :  { %v17038_v18 = vcombine.high %v3273_v10, %v3281_v11  ;;  %v17037_v23 = vcombine.low %v3273_v10, %v3281_v11 }
 0x668   :  { %9822 = vmatpush1.bf16.msra.mxu1 %v17067_v21  ;;  %v3416_v21 = vld [vmem:[#allocation12 + $0x1220] sm:$0xff] }
 0x669   :  { %9978 = vmatpush1.bf16.msra.mxu0 %v16941_v38  ;;  %9823 = vmatprep.subr.bf16.mxu1 %v17084_v44  ;;  %v3424_v38 = vld [vmem:[#allocation12 + $0x1260] sm:$0xff]  ;;  %v3289_v44 = vld [vmem:[#allocation12 + $0xe28] sm:$0xff] }
 0x66a   :  { %9979 = vmatprep.subr.bf16.mxu0 %v16958_v22  ;;  %v3297_v22 = vld [vmem:[#allocation12 + $0xe68] sm:$0xff]  ;;  %v17180_v26 = vcombine.high %v3416_v21, %v3424_v38  ;;  %v17179_v30 = vcombine.low %v3416_v21, %v3424_v38 }
 0x66b   :  { %v17054_v43 = vcombine.high %v3289_v44, %v3297_v22  ;;  %v17053_v31 = vcombine.low %v3289_v44, %v3297_v22 }
 0x66c   :  { %9824 = vmatpush1.bf16.msra.mxu1 %v17083_v7  ;;  %v3432_v7 = vld [vmem:[#allocation12 + $0x12a0] sm:$0xff] }
 0x66d   :  { %9980 = vmatpush1.bf16.msra.mxu0 %v16957_v27  ;;  %9825 = vmatprep.subr.bf16.mxu1 %v17100_v28  ;;  %v3440_v27 = vld [vmem:[#allocation12 + $0x12e0] sm:$0xff]  ;;  %v3305_v28 = vld [vmem:[#allocation12 + $0xea8] sm:$0xff] }
 0x66e   :  { %9981 = vmatprep.subr.bf16.mxu0 %v16974_v29  ;;  %v3313_v29 = vld [vmem:[#allocation12 + $0xee8] sm:$0xff]  ;;  %v17196_v33 = vcombine.high %v3432_v7, %v3440_v27  ;;  %v17195_v2 = vcombine.low %v3432_v7, %v3440_v27 }
 0x66f   :  { %v17070_v34 = vcombine.high %v3305_v28, %v3313_v29  ;;  %v17069_v36 = vcombine.low %v3305_v28, %v3313_v29 }
 0x670   :  { %9826 = vmatpush1.bf16.msra.mxu1 %v17099_v19  ;;  %v3448_v19 = vld [vmem:[#allocation12 + $0x1320] sm:$0xff] }
 0x671   :  { %9982 = vmatpush1.bf16.msra.mxu0 %v16973_v20  ;;  %9838 = vmatprep.subr.bf16.mxu1 %v17116_v61  ;;  %v3456_v20 = vld [vmem:[#allocation12 + $0x1360] sm:$0xff]  ;;  %v3321_v61 = vld [vmem:[#allocation12 + $0xf28] sm:$0xff] }
 0x672   :  { %9983 = vmatprep.subr.bf16.mxu0 %v16990_v25  ;;  %v3329_v25 = vld [vmem:[#allocation12 + $0xf68] sm:$0xff]  ;;  %v17212_v37 = vcombine.high %v3448_v19, %v3456_v20  ;;  %v17211_v50 = vcombine.low %v3448_v19, %v3456_v20 }
 0x673   :  { %9828 = vmatmul.mubr.bf16.vlgmr.msra.gmra.mrb[12].mxu1 %v20509_v56  ;;  %v17086_v40 = vcombine.high %v3321_v61, %v3329_v25  ;;  %v17085_v12 = vcombine.low %v3321_v61, %v3329_v25 }
 0x674   :  { %9839 = vmatpush1.bf16.msra.mxu1 %v17115_v42  ;;  %9870 = vmatprep.mubr.bf16.mxu1 %v20546_v49  ;;  %v3464_v42 = vld [vmem:[#allocation12 + $0x13a0] sm:$0xff] }
 0x675   :  { %9984 = vmatpush1.bf16.msra.mxu0 %v16989_v5  ;;  %9840 = vmatprep.subr.bf16.mxu1 %v17132_v48  ;;  %v3472_v5 = vld [vmem:[#allocation12 + $0x13e0] sm:$0xff]  ;;  %v3337_v48 = vld [vmem:[#allocation12 + $0xfa8] sm:$0xff] }
 0x676   :  { %9985 = vmatprep.subr.bf16.mxu0 %v17006_v45  ;;  %v3345_v45 = vld [vmem:[#allocation12 + $0xfe8] sm:$0xff]  ;;  %v17228_v52 = vcombine.high %v3464_v42, %v3472_v5  ;;  %v17227_v51 = vcombine.low %v3464_v42, %v3472_v5 }
 0x677   :  { %v17102_v57 = vcombine.high %v3337_v48, %v3345_v45  ;;  %v17101_v9 = vcombine.low %v3337_v48, %v3345_v45 }
 0x678   :  { %9841 = vmatpush1.bf16.msra.mxu1 %v17131_v58  ;;  %v3480_v58 = vld [vmem:[#allocation12 + $0x1420] sm:$0xff] }
 0x679   :  { %9986 = vmatpush1.bf16.msra.mxu0 %v17005_v1  ;;  %9842 = vmatprep.subr.bf16.mxu1 %v17148_v3  ;;  %v3488_v1 = vld [vmem:[#allocation12 + $0x1460] sm:$0xff]  ;;  %v3353_v3 = vld [vmem:[#allocation12 + $0x1028] sm:$0xff] }
 0x67a   :  { %9987 = vmatprep.subr.bf16.mxu0 %v17022_v4  ;;  %v3361_v4 = vld [vmem:[#allocation12 + $0x1068] sm:$0xff]  ;;  %v17244_v10 = vcombine.high %v3480_v58, %v3488_v1  ;;  %v17243_v21 = vcombine.low %v3480_v58, %v3488_v1 }
 0x67b   :  { %v17118_v11 = vcombine.high %v3353_v3, %v3361_v4  ;;  %v17117_v38 = vcombine.low %v3353_v3, %v3361_v4 }
 0x67c   :  { %9843 = vmatpush1.bf16.msra.mxu1 %v17147_v13  ;;  %v3496_v13 = vld [vmem:[#allocation12 + $0x14a0] sm:$0xff] }
 0x67d   :  { %9988 = vmatpush1.bf16.msra.mxu0 %v17021_v14  ;;  %9844 = vmatprep.subr.bf16.mxu1 %v17164_v16  ;;  %v3504_v14 = vld [vmem:[#allocation12 + $0x14e0] sm:$0xff]  ;;  %v3369_v16 = vld [vmem:[#allocation12 + $0x10a8] sm:$0xff] }
 0x67e   :  { %9989 = vmatprep.subr.bf16.mxu0 %v17038_v18  ;;  %v3377_v18 = vld [vmem:[#allocation12 + $0x10e8] sm:$0xff]  ;;  %v17260_v44 = vcombine.high %v3496_v13, %v3504_v14  ;;  %v17259_v7 = vcombine.low %v3496_v13, %v3504_v14 }
 0x67f   :  { %v17134_v22 = vcombine.high %v3369_v16, %v3377_v18  ;;  %v17133_v27 = vcombine.low %v3369_v16, %v3377_v18 }
 0x680   :  { %9845 = vmatpush1.bf16.msra.mxu1 %v17163_v15  ;;  %v3512_v15 = vld [vmem:[#allocation12 + $0x1520] sm:$0xff] }
 0x681   :  { %9990 = vmatpush1.bf16.msra.mxu0 %v17037_v23  ;;  %9846 = vmatprep.subr.bf16.mxu1 %v17180_v26  ;;  %v3520_v23 = vld [vmem:[#allocation12 + $0x1560] sm:$0xff]  ;;  %v3385_v26 = vld [vmem:[#allocation12 + $0x1128] sm:$0xff] }
 0x682   :  { %9991 = vmatprep.subr.bf16.mxu0 %v17054_v43  ;;  %v3393_v43 = vld [vmem:[#allocation12 + $0x1168] sm:$0xff]  ;;  %v17276_v28 = vcombine.high %v3512_v15, %v3520_v23  ;;  %v17275_v19 = vcombine.low %v3512_v15, %v3520_v23 }
 0x683   :  { %v17150_v29 = vcombine.high %v3385_v26, %v3393_v43  ;;  %v17149_v20 = vcombine.low %v3385_v26, %v3393_v43 }
 0x684   :  { %9847 = vmatpush1.bf16.msra.mxu1 %v17179_v30  ;;  %v3528_v30 = vld [vmem:[#allocation12 + $0x15a0] sm:$0xff] }
 0x685   :  { %9992 = vmatpush1.bf16.msra.mxu0 %v17053_v31  ;;  %9848 = vmatprep.subr.bf16.mxu1 %v17196_v33  ;;  %v3536_v31 = vld [vmem:[#allocation12 + $0x15e0] sm:$0xff]  ;;  %v3401_v33 = vld [vmem:[#allocation12 + $0x11a8] sm:$0xff] }
 0x686   :  { %9993 = vmatprep.subr.bf16.mxu0 %v17070_v34  ;;  %v3409_v34 = vld [vmem:[#allocation12 + $0x11e8] sm:$0xff]  ;;  %v17292_v61 = vcombine.high %v3528_v30, %v3536_v31  ;;  %v17291_v42 = vcombine.low %v3528_v30, %v3536_v31 }
 0x687   :  { %v17166_v25 = vcombine.high %v3401_v33, %v3409_v34  ;;  %v17165_v5 = vcombine.low %v3401_v33, %v3409_v34 }
 0x688   :  { %9849 = vmatpush1.bf16.msra.mxu1 %v17195_v2  ;;  %v3544_v2 = vld [vmem:[#allocation12 + $0x1620] sm:$0xff] }
 0x689   :  { %9994 = vmatpush1.bf16.msra.mxu0 %v17069_v36  ;;  %9850 = vmatprep.subr.bf16.mxu1 %v17212_v37  ;;  %v3552_v36 = vld [vmem:[#allocation12 + $0x1660] sm:$0xff]  ;;  %v3417_v37 = vld [vmem:[#allocation12 + $0x1228] sm:$0xff] }
 0x68a   :  { %9995 = vmatprep.subr.bf16.mxu0 %v17086_v40  ;;  %v3425_v40 = vld [vmem:[#allocation12 + $0x1268] sm:$0xff]  ;;  %v17308_v48 = vcombine.high %v3544_v2, %v3552_v36  ;;  %v17307_v58 = vcombine.low %v3544_v2, %v3552_v36 }
 0x68b   :  { %v17182_v45 = vcombine.high %v3417_v37, %v3425_v40  ;;  %v17181_v1 = vcombine.low %v3417_v37, %v3425_v40 }
 0x68c   :  { %9851 = vmatpush1.bf16.msra.mxu1 %v17211_v50  ;;  %v3560_v50 = vld [vmem:[#allocation12 + $0x16a0] sm:$0xff] }
 0x68d   :  { %9996 = vmatpush1.bf16.msra.mxu0 %v17085_v12  ;;  %9852 = vmatprep.subr.bf16.mxu1 %v17228_v52  ;;  %v3568_v12 = vld [vmem:[#allocation12 + $0x16e0] sm:$0xff]  ;;  %v3433_v52 = vld [vmem:[#allocation12 + $0x12a8] sm:$0xff] }
 0x68e   :  { %9997 = vmatprep.subr.bf16.mxu0 %v17102_v57  ;;  %v3441_v57 = vld [vmem:[#allocation12 + $0x12e8] sm:$0xff]  ;;  %v17324_v3 = vcombine.high %v3560_v50, %v3568_v12  ;;  %v17323_v13 = vcombine.low %v3560_v50, %v3568_v12 }
 0x68f   :  { %v17198_v4 = vcombine.high %v3433_v52, %v3441_v57  ;;  %v17197_v14 = vcombine.low %v3433_v52, %v3441_v57 }
 0x690   :  { %9853 = vmatpush1.bf16.msra.mxu1 %v17227_v51  ;;  %v3576_v51 = vld [vmem:[#allocation12 + $0x1720] sm:$0xff] }
 0x691   :  { %9998 = vmatpush1.bf16.msra.mxu0 %v17101_v9  ;;  %9854 = vmatprep.subr.bf16.mxu1 %v17244_v10  ;;  %v3584_v9 = vld [vmem:[#allocation12 + $0x1760] sm:$0xff]  ;;  %v3449_v10 = vld [vmem:[#allocation12 + $0x1328] sm:$0xff] }
 0x692   :  { %10010 = vmatprep.subr.bf16.mxu0 %v17118_v11  ;;  %v3457_v11 = vld [vmem:[#allocation12 + $0x1368] sm:$0xff]  ;;  %v17340_v16 = vcombine.high %v3576_v51, %v3584_v9  ;;  %v17339_v15 = vcombine.low %v3576_v51, %v3584_v9 }
 0x693   :  { %v17214_v18 = vcombine.high %v3449_v10, %v3457_v11  ;;  %v17213_v23 = vcombine.low %v3449_v10, %v3457_v11 }
 0x694   :  { %9855 = vmatpush1.bf16.msra.mxu1 %v17243_v21  ;;  %10000 = vmatmul.mubr.bf16.vlgmr.msra.gmra.mrb[36].mxu0 %v20509_v56  ;;  %v3592_v21 = vld [vmem:[#allocation12 + $0x17a0] sm:$0xff] }
 0x695   :  { %10011 = vmatpush1.bf16.msra.mxu0 %v17117_v38  ;;  %10042 = vmatprep.mubr.bf16.mxu0 %v20546_v49  ;;  %v3600_v38 = vld [vmem:[#allocation12 + $0x17e0] sm:$0xff] }
 0x696   :  { %9856 = vmatprep.subr.bf16.mxu1 %v17260_v44  ;;  %10012 = vmatprep.subr.bf16.mxu0 %v17134_v22  ;;  %v3465_v44 = vld [vmem:[#allocation12 + $0x13a8] sm:$0xff]  ;;  %v17356_v26 = vcombine.high %v3592_v21, %v3600_v38  ;;  %v17355_v30 = vcombine.low %v3592_v21, %v3600_v38 }
 0x697   :  { %v3473_v22 = vld [vmem:[#allocation12 + $0x13e8] sm:$0xff] }
 0x698   :  { %9857 = vmatpush1.bf16.msra.mxu1 %v17259_v7  ;;  %v17230_v43 = vcombine.high %v3465_v44, %v3473_v22  ;;  %v3608_v7 = vld [vmem:[#allocation12 + $0x1820] sm:$0xff]  ;;  %v17229_v31 = vcombine.low %v3465_v44, %v3473_v22 }
 0x699   :  { %10013 = vmatpush1.bf16.msra.mxu0 %v17133_v27  ;;  %9858 = vmatprep.subr.bf16.mxu1 %v17276_v28  ;;  %v3616_v27 = vld [vmem:[#allocation12 + $0x1860] sm:$0xff]  ;;  %v3481_v28 = vld [vmem:[#allocation12 + $0x1428] sm:$0xff] }
 0x69a   :  { %10014 = vmatprep.subr.bf16.mxu0 %v17150_v29  ;;  %v3489_v29 = vld [vmem:[#allocation12 + $0x1468] sm:$0xff]  ;;  %v17372_v33 = vcombine.high %v3608_v7, %v3616_v27  ;;  %v17371_v2 = vcombine.low %v3608_v7, %v3616_v27 }
 0x69b   :  { %v17246_v34 = vcombine.high %v3481_v28, %v3489_v29  ;;  %v17245_v36 = vcombine.low %v3481_v28, %v3489_v29 }
 0x69c   :  { %9859 = vmatpush1.bf16.msra.mxu1 %v17275_v19  ;;  %v3624_v19 = vld [vmem:[#allocation12 + $0x18a0] sm:$0xff] }
 0x69d   :  { %10015 = vmatpush1.bf16.msra.mxu0 %v17149_v20  ;;  %9860 = vmatprep.subr.bf16.mxu1 %v17292_v61  ;;  %v3632_v20 = vld [vmem:[#allocation12 + $0x18e0] sm:$0xff]  ;;  %v3497_v61 = vld [vmem:[#allocation12 + $0x14a8] sm:$0xff] }
 0x69e   :  { %10016 = vmatprep.subr.bf16.mxu0 %v17166_v25  ;;  %v3505_v25 = vld [vmem:[#allocation12 + $0x14e8] sm:$0xff]  ;;  %v17388_v37 = vcombine.high %v3624_v19, %v3632_v20  ;;  %v17387_v50 = vcombine.low %v3624_v19, %v3632_v20 }
 0x69f   :  { %v17262_v40 = vcombine.high %v3497_v61, %v3505_v25  ;;  %v17261_v12 = vcombine.low %v3497_v61, %v3505_v25  ;;  %v3577_v19 = vld [vmem:[#allocation12 + $0x1728] sm:$0xff] }
 0x6a0   :  { %9861 = vmatpush1.bf16.msra.mxu1 %v17291_v42  ;;  %v3640_v42 = vld [vmem:[#allocation12 + $0x1920] sm:$0xff]  ;;  %v3585_v20 = vld [vmem:[#allocation12 + $0x1768] sm:$0xff] }
 0x6a1   :  { %10017 = vmatpush1.bf16.msra.mxu0 %v17165_v5  ;;  %9862 = vmatprep.subr.bf16.mxu1 %v17308_v48  ;;  %v3648_v5 = vld [vmem:[#allocation12 + $0x1960] sm:$0xff]  ;;  %v3513_v48 = vld [vmem:[#allocation12 + $0x1528] sm:$0xff] }
 0x6a2   :  { %10018 = vmatprep.subr.bf16.mxu0 %v17182_v45  ;;  %v3521_v45 = vld [vmem:[#allocation12 + $0x1568] sm:$0xff]  ;;  %v17404_v52 = vcombine.high %v3640_v42, %v3648_v5  ;;  %v17403_v51 = vcombine.low %v3640_v42, %v3648_v5  ;;  %v3720_v42 = vld [vmem:[#allocation12 + $0x1ba0] sm:$0xff] }
 0x6a3   :  { %v17278_v57 = vcombine.high %v3513_v48, %v3521_v45  ;;  %v17277_v9 = vcombine.low %v3513_v48, %v3521_v45  ;;  %v3728_v5 = vld [vmem:[#allocation12 + $0x1be0] sm:$0xff] }
 0x6a4   :  { %9863 = vmatpush1.bf16.msra.mxu1 %v17307_v58  ;;  %v3656_v58 = vld [vmem:[#allocation12 + $0x19a0] sm:$0xff] }
 0x6a5   :  { %10019 = vmatpush1.bf16.msra.mxu0 %v17181_v1  ;;  %9864 = vmatprep.subr.bf16.mxu1 %v17324_v3  ;;  %v3664_v1 = vld [vmem:[#allocation12 + $0x19e0] sm:$0xff]  ;;  %v3529_v3 = vld [vmem:[#allocation12 + $0x15a8] sm:$0xff] }
 0x6a6   :  { %10020 = vmatprep.subr.bf16.mxu0 %v17198_v4  ;;  %v3537_v4 = vld [vmem:[#allocation12 + $0x15e8] sm:$0xff]  ;;  %v17420_v10 = vcombine.high %v3656_v58, %v3664_v1  ;;  %v17419_v21 = vcombine.low %v3656_v58, %v3664_v1 }
 0x6a7   :  { %v17294_v11 = vcombine.high %v3529_v3, %v3537_v4  ;;  %v17293_v38 = vcombine.low %v3529_v3, %v3537_v4 }
 0x6a8   :  { %9865 = vmatpush1.bf16.msra.mxu1 %v17323_v13  ;;  %v3672_v13 = vld [vmem:[#allocation12 + $0x1a20] sm:$0xff] }
 0x6a9   :  { %10021 = vmatpush1.bf16.msra.mxu0 %v17197_v14  ;;  %9866 = vmatprep.subr.bf16.mxu1 %v17340_v16  ;;  %v3680_v14 = vld [vmem:[#allocation12 + $0x1a60] sm:$0xff]  ;;  %v3545_v16 = vld [vmem:[#allocation12 + $0x1628] sm:$0xff] }
 0x6aa   :  { %10022 = vmatprep.subr.bf16.mxu0 %v17214_v18  ;;  %v3553_v18 = vld [vmem:[#allocation12 + $0x1668] sm:$0xff]  ;;  %v17436_v44 = vcombine.high %v3672_v13, %v3680_v14  ;;  %v17435_v7 = vcombine.low %v3672_v13, %v3680_v14  ;;  %v3736_v14 = vld [vmem:[#allocation12 + $0x1c20] sm:$0xff] }
 0x6ab   :  { %v17310_v22 = vcombine.high %v3545_v16, %v3553_v18  ;;  %v17309_v27 = vcombine.low %v3545_v16, %v3553_v18  ;;  %v3744_v16 = vld [vmem:[#allocation12 + $0x1c60] sm:$0xff] }
 0x6ac   :  { %9867 = vmatpush1.bf16.msra.mxu1 %v17339_v15  ;;  %v3688_v15 = vld [vmem:[#allocation12 + $0x1aa0] sm:$0xff] }
 0x6ad   :  { %10023 = vmatpush1.bf16.msra.mxu0 %v17213_v23  ;;  %9868 = vmatprep.subr.bf16.mxu1 %v17356_v26  ;;  %v3696_v23 = vld [vmem:[#allocation12 + $0x1ae0] sm:$0xff]  ;;  %v3561_v26 = vld [vmem:[#allocation12 + $0x16a8] sm:$0xff] }
 0x6ae   :  { %10024 = vmatprep.subr.bf16.mxu0 %v17230_v43  ;;  %v3569_v43 = vld [vmem:[#allocation12 + $0x16e8] sm:$0xff]  ;;  %v17452_v28 = vcombine.high %v3688_v15, %v3696_v23  ;;  %v17451_v25 = vcombine.low %v3688_v15, %v3696_v23 }
 0x6af   :  { %v17326_v29 = vcombine.high %v3561_v26, %v3569_v43 }
 0x6b0   :  { %9869 = vmatpush1.bf16.msra.mxu1 %v17355_v30  ;;  %v3704_v30 = vld [vmem:[#allocation12 + $0x1b20] sm:$0xff] }
 0x6b1   :  { %10025 = vmatpush1.bf16.msra.mxu0 %v17229_v31  ;;  %9881 = vmatprep.subr.bf16.mxu1 %v17372_v33  ;;  %v3712_v31 = vld [vmem:[#allocation12 + $0x1b60] sm:$0xff] }
 0x6b2   :  { %10026 = vmatprep.subr.bf16.mxu0 %v17246_v34  ;;  %v20627_v33 = vld [vmem:[#allocation13] sm:$0xff]  ;;  %v17467_v58 = vcombine.low %v3704_v30, %v3712_v31 }
 0x6b3   :  { %9871 = vmatmul.mubr.bf16.vlgmr.msra.gmra.mrb[12].mxu1 %v20542_v60  ;;  %v3883_v34 = vrot.slane %v20627_v33, %v20521_v47  ;;  %v3887_v61 = vrot.slane %v20627_v33, %v20524_v53 }
 0x6b4   :  { %9882 = vmatpush1.bf16.msra.mxu1 %v17371_v2  ;;  %9913 = vmatprep.mubr.bf16.mxu1 %v20567_v24  ;;  %v17325_v2 = vcombine.low %v3561_v26, %v3569_v43  ;;  %v17500_v43 = vcombine.high %v3736_v14, %v3744_v16 }
 0x6b5   :  { %10027 = vmatpush1.bf16.msra.mxu0 %v17245_v36  ;;  %9883 = vmatprep.subr.bf16.mxu1 %v17388_v37  ;;  %v17468_v36 = vcombine.high %v3704_v30, %v3712_v31  ;;  %v3760_v31 = vld [vmem:[#allocation12 + $0x1ce0] sm:$0xff] }
 0x6b6   :  { %10028 = vmatprep.subr.bf16.mxu0 %v17262_v40  ;;  %v17342_v40 = vcombine.high %v3577_v19, %v3585_v20 }
 0x6b8   :  { %9884 = vmatpush1.bf16.msra.mxu1 %v17387_v50  ;;  %v3593_v50 = vld [vmem:[#allocation12 + $0x17a8] sm:$0xff] }
 0x6b9   :  { %10029 = vmatpush1.bf16.msra.mxu0 %v17261_v12  ;;  %9885 = vmatprep.subr.bf16.mxu1 %v17404_v52  ;;  %v3601_v12 = vld [vmem:[#allocation12 + $0x17e8] sm:$0xff] }
 0x6ba   :  { %10030 = vmatprep.subr.bf16.mxu0 %v17278_v57  ;;  %v17358_v13 = vcombine.high %v3593_v50, %v3601_v12  ;;  %v17357_v15 = vcombine.low %v3593_v50, %v3601_v12 }
 0x6bc   :  { %9886 = vmatpush1.bf16.msra.mxu1 %v17403_v51  ;;  %v17341_v51 = vcombine.low %v3577_v19, %v3585_v20  ;;  %v3633_v19 = vld [vmem:[#allocation12 + $0x18e8] sm:$0xff] }
 0x6bd   :  { %10031 = vmatpush1.bf16.msra.mxu0 %v17277_v9  ;;  %9887 = vmatprep.subr.bf16.mxu1 %v17420_v10  ;;  %v17484_v9 = vcombine.high %v3720_v42, %v3728_v5 }
 0x6be   :  { %10032 = vmatprep.subr.bf16.mxu0 %v17294_v11 }
 0x6c0   :  { %9888 = vmatpush1.bf16.msra.mxu1 %v17419_v21  ;;  %v3609_v21 = vld [vmem:[#allocation12 + $0x1828] sm:$0xff] }
 0x6c1   :  { %10033 = vmatpush1.bf16.msra.mxu0 %v17293_v38  ;;  %9889 = vmatprep.subr.bf16.mxu1 %v17436_v44  ;;  %v3617_v38 = vld [vmem:[#allocation12 + $0x1868] sm:$0xff] }
 0x6c2   :  { %10034 = vmatprep.subr.bf16.mxu0 %v17310_v22  ;;  %v17483_v22 = vcombine.low %v3720_v42, %v3728_v5  ;;  %v3641_v42 = vld [vmem:[#allocation12 + $0x1928] sm:$0xff] }
 0x6c3   :  { %v3649_v5 = vld [vmem:[#allocation12 + $0x1968] sm:$0xff] }
 0x6c4   :  { %9890 = vmatpush1.bf16.msra.mxu1 %v17435_v7  ;;  %v17406_v12 = vcombine.high %v3641_v42, %v3649_v5 }
 0x6c5   :  { %10035 = vmatpush1.bf16.msra.mxu0 %v17309_v27  ;;  %9891 = vmatprep.subr.bf16.mxu1 %v17452_v28  ;;  %v17374_v27 = vcombine.high %v3609_v21, %v3617_v38  ;;  %v3752_v28 = vld [vmem:[#allocation12 + $0x1ca0] sm:$0xff] }
 0x6c6   :  { %v9571_v37 = vpop.f32.mrb[8].mxu1  ;;  %10036 = vmatprep.subr.bf16.mxu0 %v17326_v29 }
 0x6c7   :  { %v18415_v48 = vadd.f32 %v9571_v37, %v3883_v34  ;;  %v9573_v45 = vpop.f32.mrb[9].mxu1  ;;  %v3768_v37 = vld [vmem:[#allocation12 + $0x1d20] sm:$0xff] }
 0x6c8   :  { %v18416_v52 = vadd.f32 %v9573_v45, %v3887_v61  ;;  %v9575_v57 = vpop.f32.mrb[10].mxu1  ;;  %9892 = vmatpush1.bf16.msra.mxu1 %v17451_v25  ;;  %v17373_v25 = vcombine.low %v3609_v21, %v3617_v38 }
 0x6c9   :  { %v10476_v1 = vmul.f32 0.2, %v18415_v48  ;;  %v18417_v3 = vadd.f32 %v9575_v57, %v3883_v34  ;;  %v9577_v4 = vpop.f32.mrb[11].mxu1  ;;  %10037 = vmatpush1.bf16.msra.mxu0 %v17325_v2  ;;  %9893 = vmatprep.subr.bf16.mxu1 %v17468_v36  ;;  %vm10444_vm4 = vcmp.gt.f32.partialorder %v18415_v48, 0.0  ;;  %v3625_v34 = vld [vmem:[#allocation12 + $0x18a8] sm:$0xff]  ;;  %v17516_v2 = vcombine.high %v3752_v28, %v3760_v31  ;;  %v3792_v57 = vld [vmem:[#allocation12 + $0x1de0] sm:$0xff] }
 0x6ca   :  { %v10477_v10 = vmul.f32 0.2, %v18416_v52  ;;  %v18418_v11 = vadd.f32 %v9577_v4, %v3887_v61  ;;  %10038 = vmatprep.subr.bf16.mxu0 %v17342_v40  ;;  %vm10445_vm5 = vcmp.gt.f32.partialorder %v18416_v52, 0.0  ;;  %v17499_v61 = vcombine.low %v3736_v14, %v3744_v16  ;;  %v3776_v40 = vld [vmem:[#allocation12 + $0x1d60] sm:$0xff]  ;;  %v3681_v14 = vld [vmem:[#allocation12 + $0x1a68] sm:$0xff] }
 0x6cb   :  { %vm10460_vm6 = vcmp.gt.f32.partialorder %v18417_v3, 0.0  ;;  %v10492_v18 = vmul.f32 0.2, %v18417_v3  ;;  %v10508_v23 = vsel %vm10444_vm4, %v18415_v48, %v10476_v1  ;;  %v17390_v36 = vcombine.high %v3625_v34, %v3633_v19  ;;  %v3665_v1 = vld [vmem:[#allocation12 + $0x19e8] sm:$0xff] }
 0x6cc   :  { %vm10461_vm7 = vcmp.gt.f32.partialorder %v18418_v11, 0.0  ;;  %v10493_v44 = vmul.f32 0.2, %v18418_v11  ;;  %9894 = vmatpush1.bf16.msra.mxu1 %v17467_v58  ;;  %v10509_v29 = vsel %vm10445_vm5, %v18416_v52, %v10477_v10  ;;  %v17515_v48 = vcombine.low %v3752_v28, %v3760_v31  ;;  %v3784_v52 = vld [vmem:[#allocation12 + $0x1da0] sm:$0xff]  ;;  %v3657_v58 = vld [vmem:[#allocation12 + $0x19a8] sm:$0xff] }
 0x6cd   :  { %v10524_v26 = vsel %vm10460_vm6, %v18417_v3, %v10492_v18  ;;  %10039 = vmatpush1.bf16.msra.mxu0 %v17341_v51  ;;  %9895 = vmatprep.subr.bf16.mxu1 %v17484_v9  ;;  %v17389_v45 = vcombine.low %v3625_v34, %v3633_v19  ;;  %v17532_v50 = vcombine.high %v3768_v37, %v3776_v40  ;;  %v3800_v10 = vld [vmem:[#allocation12 + $0x1e20] sm:$0xff]  ;;  %v3705_v31 = vld [vmem:[#allocation12 + $0x1b28] sm:$0xff] }
 0x6ce   :  { %v20634_v7 = vpack.c.bf16 %v10524_v26, %v10508_v23  ;;  %10040 = vmatprep.subr.bf16.mxu0 %v17358_v13  ;;  %v10525_v30 = vsel %vm10461_vm7, %v18418_v11, %v10493_v44  ;;  %v17531_v3 = vcombine.low %v3768_v37, %v3776_v40  ;;  %v17405_v4 = vcombine.low %v3641_v42, %v3649_v5  ;;  %v3808_v11 = vld [vmem:[#allocation12 + $0x1e60] sm:$0xff]  ;;  %v3673_v13 = vld [vmem:[#allocation12 + $0x1a28] sm:$0xff] }
 0x6cf   :  { %v20637_v20 = vpack.c.bf16 %v10525_v30, %v10509_v29  ;;  %v17548_v51 = vcombine.high %v3784_v52, %v3792_v57  ;;  %v17422_v9 = vcombine.high %v3657_v58, %v3665_v1  ;;  %v17547_v16 = vcombine.low %v3784_v52, %v3792_v57  ;;  %v3816_v44 = vld [vmem:[#allocation12 + $0x1ea0] sm:$0xff]  ;;  %v3697_v23 = vld [vmem:[#allocation12 + $0x1ae8] sm:$0xff] }
 0x6d0   :  { %9896 = vmatpush1.bf16.msra.mxu1 %v17483_v22  ;;  %v17421_v18 = vcombine.low %v3657_v58, %v3665_v1  ;;  %v17564_v21 = vcombine.high %v3800_v10, %v3808_v11  ;;  %v17438_v38 = vcombine.high %v3673_v13, %v3681_v14  ;;  %v3824_v22 = vld [vmem:[#allocation12 + $0x1ee0] sm:$0xff]  ;;  %v17563_v26 = vcombine.low %v3800_v10, %v3808_v11  ;;  %v3713_v34 = vld [vmem:[#allocation12 + $0x1b68] sm:$0xff]  ;;  %v2842_v10 = vld [vmem:[#allocation12 + $0x30] sm:$0xff] }
 0x6d1   :  { %10041 = vmatpush1.bf16.msra.mxu0 %v17357_v15  ;;  %9897 = vmatprep.subr.bf16.mxu1 %v17500_v43  ;;  %v3689_v15 = vld [vmem:[#allocation12 + $0x1aa8] sm:$0xff]  ;;  %v17437_v43 = vcombine.low %v3673_v13, %v3681_v14  ;;  %v3832_v29 = vld [vmem:[#allocation12 + $0x1f20] sm:$0xff]  ;;  %v17579_v19 = vcombine.low %v3816_v44, %v3824_v22  ;;  %v17470_v37 = vcombine.high %v3705_v31, %v3713_v34  ;;  %v2850_v11 = vld [vmem:[#allocation12 + $0x70] sm:$0xff] }
 0x6d2   :  { %10053 = vmatprep.subr.bf16.mxu0 %v17374_v27  ;;  %v17580_v27 = vcombine.high %v3816_v44, %v3824_v22  ;;  %v17454_v28 = vcombine.high %v3689_v15, %v3697_v23  ;;  %v3840_v30 = vld [vmem:[#allocation12 + $0x1f60] sm:$0xff]  ;;  %v17469_v1 = vcombine.low %v3705_v31, %v3713_v34  ;;  %v3761_v31 = vld [vmem:[#allocation12 + $0x1ce8] sm:$0xff] }
 0x6d3   :  { %v3848_v40 = vld [vmem:[#allocation12 + $0x1fa0] sm:$0xff]  ;;  %v17595_v52 = vcombine.low %v3832_v29, %v3840_v30 }
 0x6d4   :  { %9898 = vmatpush1.bf16.msra.mxu1 %v17499_v61  ;;  %10043 = vmatmul.mubr.bf16.vlgmr.msra.gmra.mrb[36].mxu0 %v20542_v60  ;;  %v3891_v61 = vrot.slane %v20627_v33, %v20556_v59  ;;  %v3856_v42 = vld [vmem:[#allocation12 + $0x1fe0] sm:$0xff] }
 0x6d5   :  { %10054 = vmatpush1.bf16.msra.mxu0 %v17373_v25  ;;  %10085 = vmatprep.mubr.bf16.mxu0 %v20567_v24  ;;  %v3895_v25 = vrot.slane %v20627_v33, %v20559_v17 }
 0x6d6   :  { %9899 = vmatprep.subr.bf16.mxu1 %v17516_v2  ;;  %10055 = vmatprep.subr.bf16.mxu0 %v17390_v36  ;;  %v17453_v2 = vcombine.low %v3689_v15, %v3697_v23  ;;  %v17596_v36 = vcombine.high %v3832_v29, %v3840_v30  ;;  %v16608_v15 = vcombine.high %v2842_v10, %v2850_v11  ;;  %v3753_v30 = vld [vmem:[#allocation12 + $0x1ca8] sm:$0xff] }
 0x6d8   :  { %9900 = vmatpush1.bf16.msra.mxu1 %v17515_v48  ;;  %v3721_v48 = vld [vmem:[#allocation12 + $0x1ba8] sm:$0xff] }
 0x6d9   :  { %10056 = vmatpush1.bf16.msra.mxu0 %v17389_v45  ;;  %9901 = vmatprep.subr.bf16.mxu1 %v17532_v50  ;;  %v3729_v45 = vld [vmem:[#allocation12 + $0x1be8] sm:$0xff] }
 0x6da   :  { %10057 = vmatprep.subr.bf16.mxu0 %v17406_v12  ;;  %v17485_v22 = vcombine.low %v3721_v48, %v3729_v45 }
 0x6dc   :  { %9902 = vmatpush1.bf16.msra.mxu1 %v17531_v3  ;;  %v17612_v3 = vcombine.high %v3848_v40, %v3856_v42 }
 0x6dd   :  { %10058 = vmatpush1.bf16.msra.mxu0 %v17405_v4  ;;  %9903 = vmatprep.subr.bf16.mxu1 %v17548_v51 }
 0x6de   :  { %10059 = vmatprep.subr.bf16.mxu0 %v17422_v9  ;;  %v17486_v9 = vcombine.high %v3721_v48, %v3729_v45  ;;  %v3777_v48 = vld [vmem:[#allocation12 + $0x1d68] sm:$0xff] }
 0x6e0   :  { %9904 = vmatpush1.bf16.msra.mxu1 %v17547_v16  ;;  %v3737_v16 = vld [vmem:[#allocation12 + $0x1c28] sm:$0xff] }
 0x6e1   :  { %10060 = vmatpush1.bf16.msra.mxu0 %v17421_v18  ;;  %9905 = vmatprep.subr.bf16.mxu1 %v17564_v21  ;;  %v3745_v18 = vld [vmem:[#allocation12 + $0x1c68] sm:$0xff] }
 0x6e2   :  { %10061 = vmatprep.subr.bf16.mxu0 %v17438_v38  ;;  %v17611_v38 = vcombine.low %v3848_v40, %v3856_v42  ;;  %v2874_v40 = vld [vmem:[#allocation12 + $0x130] sm:$0xff] }
 0x6e3   :  { %v2882_v42 = vld [vmem:[#allocation12 + $0x170] sm:$0xff] }
 0x6e4   :  { %9906 = vmatpush1.bf16.msra.mxu1 %v17563_v26 }
 0x6e5   :  { %10062 = vmatpush1.bf16.msra.mxu0 %v17437_v43  ;;  %9907 = vmatprep.subr.bf16.mxu1 %v17580_v27  ;;  %v17502_v43 = vcombine.high %v3737_v16, %v3745_v18  ;;  %v2858_v27 = vld [vmem:[#allocation12 + $0xb0] sm:$0xff] }
 0x6e6   :  { %10063 = vmatprep.subr.bf16.mxu0 %v17454_v28  ;;  %v2866_v28 = vld [vmem:[#allocation12 + $0xf0] sm:$0xff] }
 0x6e7   :  { %v9743_v5 = vpop.f32.mrb[32].mxu0  ;;  %v16623_v45 = vcombine.low %v2858_v27, %v2866_v28 }
 0x6e8   :  { %v18419_v50 = vadd.f32 %v9743_v5, %v3891_v61  ;;  %9908 = vmatpush1.bf16.msra.mxu1 %v17579_v19  ;;  %v9745_v12 = vpop.f32.mrb[33].mxu0  ;;  %v3769_v5 = vld [vmem:[#allocation12 + $0x1d28] sm:$0xff] }
 0x6e9   :  { %v18420_v57 = vadd.f32 %v9745_v12, %v3895_v25  ;;  %v9747_v58 = vpop.f32.mrb[34].mxu0  ;;  %10064 = vmatpush1.bf16.msra.mxu0 %v17453_v2  ;;  %9909 = vmatprep.subr.bf16.mxu1 %v17596_v36  ;;  %v17501_v2 = vcombine.low %v3737_v16, %v3745_v18  ;;  %v16624_v36 = vcombine.high %v2858_v27, %v2866_v28 }
 0x6ea   :  { %v10478_v33 = vmul.f32 0.2, %v18419_v50  ;;  %v18421_v4 = vadd.f32 %v9747_v58, %v3891_v61  ;;  %v9749_v51 = vpop.f32.mrb[35].mxu0  ;;  %10065 = vmatprep.subr.bf16.mxu0 %v17470_v37  ;;  %vm10446_vm8 = vcmp.gt.f32.partialorder %v18419_v50, 0.0  ;;  %v16607_v61 = vcombine.low %v2842_v10, %v2850_v11  ;;  %v2898_v58 = vld [vmem:[#allocation12 + $0x1f0] sm:$0xff] }
 0x6eb   :  { %v10479_v13 = vmul.f32 0.2, %v18420_v57  ;;  %v18422_v14 = vadd.f32 %v9749_v51, %v3895_v25  ;;  %vm10447_vm9 = vcmp.gt.f32.partialorder %v18420_v57, 0.0  ;;  %v17518_v37 = vcombine.high %v3753_v30, %v3761_v31  ;;  %v2906_v10 = vld [vmem:[#allocation12 + $0x230] sm:$0xff] }
 0x6ec   :  { %vm10462_vm10 = vcmp.gt.f32.partialorder %v18421_v4, 0.0  ;;  %v10494_v21 = vmul.f32 0.2, %v18421_v4  ;;  %9910 = vmatpush1.bf16.msra.mxu1 %v17595_v52  ;;  %v10510_v23 = vsel %vm10446_vm8, %v18419_v50, %v10478_v33  ;;  %v17517_v50 = vcombine.low %v3753_v30, %v3761_v31  ;;  %v2914_v11 = vld [vmem:[#allocation12 + $0x270] sm:$0xff] }
 0x6ed   :  { %vm10463_vm11 = vcmp.gt.f32.partialorder %v18422_v14, 0.0  ;;  %v10495_v44 = vmul.f32 0.2, %v18422_v14  ;;  %10066 = vmatpush1.bf16.msra.mxu0 %v17469_v1  ;;  %9911 = vmatprep.subr.bf16.mxu1 %v17612_v3  ;;  %v10511_v34 = vsel %vm10447_vm9, %v18420_v57, %v10479_v13  ;;  %v16640_v12 = vcombine.high %v2874_v40, %v2882_v42  ;;  %v2890_v57 = vld [vmem:[#allocation12 + $0x1b0] sm:$0xff]  ;;  %v3785_v1 = vld [vmem:[#allocation12 + $0x1da8] sm:$0xff] }
 0x6ee   :  { %v10526_v26 = vsel %vm10462_vm10, %v18421_v4, %v10494_v21  ;;  %10067 = vmatprep.subr.bf16.mxu0 %v17486_v9  ;;  %v17534_v52 = vcombine.high %v3769_v5, %v3777_v48  ;;  %v3793_v3 = vld [vmem:[#allocation12 + $0x1de8] sm:$0xff]  ;;  %v16639_v33 = vcombine.low %v2874_v40, %v2882_v42  ;;  %v17533_v4 = vcombine.low %v3769_v5, %v3777_v48  ;;  %v2938_v30 = vld [vmem:[#allocation12 + $0x330] sm:$0xff] }
 0x6ef   :  { %v20646_v29 = vpack.c.bf16 %v10526_v26, %v10510_v23  ;;  %v10527_v19 = vsel %vm10463_vm11, %v18422_v14, %v10495_v44  ;;  %v16656_v51 = vcombine.high %v2890_v57, %v2898_v58  ;;  %v17550_v9 = vcombine.high %v3785_v1, %v3793_v3  ;;  %v3801_v13 = vld [vmem:[#allocation12 + $0x1e28] sm:$0xff]  ;;  %v2922_v44 = vld [vmem:[#allocation12 + $0x2b0] sm:$0xff] }
 0x6f0   :  { %9912 = vmatpush1.bf16.msra.mxu1 %v17611_v38  ;;  %v20650_v25 = vpack.c.bf16 %v10527_v19, %v10511_v34  ;;  %v3809_v14 = vld [vmem:[#allocation12 + $0x1e68] sm:$0xff]  ;;  %v16655_v16 = vcombine.low %v2890_v57, %v2898_v58  ;;  %v17549_v18 = vcombine.low %v3785_v1, %v3793_v3  ;;  %v16672_v21 = vcombine.high %v2906_v10, %v2914_v11  ;;  %v2946_v31 = vld [vmem:[#allocation12 + $0x370] sm:$0xff]  ;;  %v2843_v1 = vld [vmem:[#allocation12 + $0x38] sm:$0xff] }
 0x6f1   :  { %10068 = vmatpush1.bf16.msra.mxu0 %v17485_v22  ;;  %10096 = vmatprep.subr.bf16.mxu1 %v16608_v15  ;;  %v17566_v38 = vcombine.high %v3801_v13, %v3809_v14  ;;  %v2930_v22 = vld [vmem:[#allocation12 + $0x2f0] sm:$0xff]  ;;  %v3817_v15 = vld [vmem:[#allocation12 + $0x1ea8] sm:$0xff]  ;;  %v16671_v26 = vcombine.low %v2906_v10, %v2914_v11  ;;  %v2851_v3 = vld [vmem:[#allocation12 + $0x78] sm:$0xff] }
 0x6f2   :  { %10069 = vmatprep.subr.bf16.mxu0 %v17502_v43  ;;  %v3825_v23 = vld [vmem:[#allocation12 + $0x1ee8] sm:$0xff]  ;;  %v17565_v43 = vcombine.low %v3801_v13, %v3809_v14  ;;  %v16688_v27 = vcombine.high %v2922_v44, %v2930_v22  ;;  %v2954_v40 = vld [vmem:[#allocation12 + $0x3b0] sm:$0xff]  ;;  %v2859_v13 = vld [vmem:[#allocation12 + $0xb8] sm:$0xff] }
 0x6f3   :  { %9914 = vmatmul.mubr.bf16.vlgmr.msra.gmra.mrb[12].mxu1 %v20565_v39  ;;  %v17582_v28 = vcombine.high %v3817_v15, %v3825_v23  ;;  %v3833_v34 = vld [vmem:[#allocation12 + $0x1f28] sm:$0xff]  ;;  %v2962_v42 = vld [vmem:[#allocation12 + $0x3f0] sm:$0xff]  ;;  %v2867_v14 = vld [vmem:[#allocation12 + $0xf8] sm:$0xff] }
 0x6f4   :  { %10097 = vmatpush1.bf16.msra.mxu1 %v16607_v61  ;;  %10128 = vmatprep.mubr.bf16.mxu1 %v20486_v35  ;;  %v3841_v19 = vld [vmem:[#allocation12 + $0x1f68] sm:$0xff]  ;;  %v16687_v61 = vcombine.low %v2922_v44, %v2930_v22  ;;  %v2970_v57 = vld [vmem:[#allocation12 + $0x430] sm:$0xff] }
 0x6f5   :  { %10070 = vmatpush1.bf16.msra.mxu0 %v17501_v2  ;;  %10098 = vmatprep.subr.bf16.mxu1 %v16624_v36  ;;  %v17581_v2 = vcombine.low %v3817_v15, %v3825_v23  ;;  %v16704_v36 = vcombine.high %v2938_v30, %v2946_v31  ;;  %v3849_v5 = vld [vmem:[#allocation12 + $0x1fa8] sm:$0xff]  ;;  %v2978_v58 = vld [vmem:[#allocation12 + $0x470] sm:$0xff]  ;;  %v2875_v15 = vld [vmem:[#allocation12 + $0x138] sm:$0xff] }
 0x6f6   :  { %10071 = vmatprep.subr.bf16.mxu0 %v17518_v37  ;;  %v17598_v37 = vcombine.high %v3833_v34, %v3841_v19  ;;  %v3857_v48 = vld [vmem:[#allocation12 + $0x1fe8] sm:$0xff]  ;;  %v2986_v10 = vld [vmem:[#allocation12 + $0x4b0] sm:$0xff]  ;;  %v2883_v23 = vld [vmem:[#allocation12 + $0x178] sm:$0xff] }
 0x6f7   :  { %v2994_v11 = vld [vmem:[#allocation12 + $0x4f0] sm:$0xff] }
 0x6f8   :  { %10099 = vmatpush1.bf16.msra.mxu1 %v16623_v45  ;;  %v16703_v45 = vcombine.low %v2938_v30, %v2946_v31  ;;  %v3002_v44 = vld [vmem:[#allocation12 + $0x530] sm:$0xff] }
 0x6f9   :  { %10072 = vmatpush1.bf16.msra.mxu0 %v17517_v50  ;;  %10100 = vmatprep.subr.bf16.mxu1 %v16640_v12  ;;  %v17597_v50 = vcombine.low %v3833_v34, %v3841_v19  ;;  %v16720_v12 = vcombine.high %v2954_v40, %v2962_v42  ;;  %v3010_v22 = vld [vmem:[#allocation12 + $0x570] sm:$0xff]  ;;  %v2891_v34 = vld [vmem:[#allocation12 + $0x1b8] sm:$0xff] }
 0x6fa   :  { %10073 = vmatprep.subr.bf16.mxu0 %v17534_v52  ;;  %v17614_v52 = vcombine.high %v3849_v5, %v3857_v48  ;;  %v3018_v30 = vld [vmem:[#allocation12 + $0x5b0] sm:$0xff]  ;;  %v2899_v19 = vld [vmem:[#allocation12 + $0x1f8] sm:$0xff] }
 0x6fb   :  { %v3026_v31 = vld [vmem:[#allocation12 + $0x5f0] sm:$0xff] }
 0x6fc   :  { %10101 = vmatpush1.bf16.msra.mxu1 %v16639_v33  ;;  %v16719_v33 = vcombine.low %v2954_v40, %v2962_v42  ;;  %v3034_v40 = vld [vmem:[#allocation12 + $0x630] sm:$0xff] }
 0x6fd   :  { %10074 = vmatpush1.bf16.msra.mxu0 %v17533_v4  ;;  %10102 = vmatprep.subr.bf16.mxu1 %v16656_v51  ;;  %v17613_v4 = vcombine.low %v3849_v5, %v3857_v48  ;;  %v16736_v51 = vcombine.high %v2970_v57, %v2978_v58  ;;  %v3042_v42 = vld [vmem:[#allocation12 + $0x670] sm:$0xff]  ;;  %v2915_v5 = vld [vmem:[#allocation12 + $0x278] sm:$0xff]  ;;  %v16783_v48 = vcombine.low %v3018_v30, %v3026_v31 }
 0x6fe   :  { %10075 = vmatprep.subr.bf16.mxu0 %v17550_v9  ;;  %v16610_v9 = vcombine.high %v2843_v1, %v2851_v3 }
 0x700   :  { %10103 = vmatpush1.bf16.msra.mxu1 %v16655_v16  ;;  %v16735_v16 = vcombine.low %v2970_v57, %v2978_v58  ;;  %v3058_v57 = vld [vmem:[#allocation12 + $0x6f0] sm:$0xff]  ;;  %v2923_v58 = vld [vmem:[#allocation12 + $0x2b8] sm:$0xff] }
 0x701   :  { %10076 = vmatpush1.bf16.msra.mxu0 %v17549_v18  ;;  %10104 = vmatprep.subr.bf16.mxu1 %v16672_v21  ;;  %v16609_v18 = vcombine.low %v2843_v1, %v2851_v3  ;;  %v16752_v21 = vcombine.high %v2986_v10, %v2994_v11  ;;  %v2931_v1 = vld [vmem:[#allocation12 + $0x2f8] sm:$0xff]  ;;  %v16799_v3 = vcombine.low %v3034_v40, %v3042_v42 }
 0x702   :  { %10077 = vmatprep.subr.bf16.mxu0 %v17566_v38  ;;  %v16626_v38 = vcombine.high %v2859_v13, %v2867_v14 }
 0x704   :  { %10105 = vmatpush1.bf16.msra.mxu1 %v16671_v26  ;;  %v16751_v26 = vcombine.low %v2986_v10, %v2994_v11  ;;  %v3074_v10 = vld [vmem:[#allocation12 + $0x770] sm:$0xff]  ;;  %v2939_v11 = vld [vmem:[#allocation12 + $0x338] sm:$0xff] }
 0x705   :  { %10078 = vmatpush1.bf16.msra.mxu0 %v17565_v43  ;;  %10106 = vmatprep.subr.bf16.mxu1 %v16688_v27  ;;  %v16625_v43 = vcombine.low %v2859_v13, %v2867_v14  ;;  %v16768_v27 = vcombine.high %v3002_v44, %v3010_v22  ;;  %v2947_v13 = vld [vmem:[#allocation12 + $0x378] sm:$0xff] }
 0x706   :  { %10079 = vmatprep.subr.bf16.mxu0 %v17582_v28  ;;  %v16642_v28 = vcombine.high %v2875_v15, %v2883_v23 }
 0x708   :  { %10107 = vmatpush1.bf16.msra.mxu1 %v16687_v61  ;;  %v16767_v61 = vcombine.low %v3002_v44, %v3010_v22  ;;  %v3090_v44 = vld [vmem:[#allocation12 + $0x7f0] sm:$0xff]  ;;  %v2955_v22 = vld [vmem:[#allocation12 + $0x3b8] sm:$0xff] }
 0x709   :  { %10080 = vmatpush1.bf16.msra.mxu0 %v17581_v2  ;;  %10108 = vmatprep.subr.bf16.mxu1 %v16704_v36  ;;  %v16641_v2 = vcombine.low %v2875_v15, %v2883_v23  ;;  %v16784_v36 = vcombine.high %v3018_v30, %v3026_v31  ;;  %v2963_v15 = vld [vmem:[#allocation12 + $0x3f8] sm:$0xff]  ;;  %v3106_v30 = vld [vmem:[#allocation12 + $0x870] sm:$0xff] }
 0x70a   :  { %10081 = vmatprep.subr.bf16.mxu0 %v17598_v37  ;;  %v16658_v37 = vcombine.high %v2891_v34, %v2899_v19  ;;  %v2971_v31 = vld [vmem:[#allocation12 + $0x438] sm:$0xff] }
 0x70c   :  { %10109 = vmatpush1.bf16.msra.mxu1 %v16703_v45  ;;  %v16657_v45 = vcombine.low %v2891_v34, %v2899_v19  ;;  %v2979_v34 = vld [vmem:[#allocation12 + $0x478] sm:$0xff] }
 0x70d   :  { %10082 = vmatpush1.bf16.msra.mxu0 %v17597_v50  ;;  %10110 = vmatprep.subr.bf16.mxu1 %v16720_v12  ;;  %v16800_v50 = vcombine.high %v3034_v40, %v3042_v42  ;;  %v3122_v40 = vld [vmem:[#allocation12 + $0x8f0] sm:$0xff]  ;;  %v2987_v42 = vld [vmem:[#allocation12 + $0x4b8] sm:$0xff] }
 0x70e   :  { %10083 = vmatprep.subr.bf16.mxu0 %v17614_v52  ;;  %v3050_v52 = vld [vmem:[#allocation12 + $0x6b0] sm:$0xff] }
 0x70f   :  { %v16815_v14 = vcombine.low %v3050_v52, %v3058_v57 }
 0x710   :  { %10111 = vmatpush1.bf16.msra.mxu1 %v16719_v33 }
 0x711   :  { %10084 = vmatpush1.bf16.msra.mxu0 %v17613_v4  ;;  %10112 = vmatprep.subr.bf16.mxu1 %v16736_v51  ;;  %v16816_v4 = vcombine.high %v3050_v52, %v3058_v57  ;;  %v16690_v51 = vcombine.high %v2923_v58, %v2931_v1  ;;  %v3138_v52 = vld [vmem:[#allocation12 + $0x970] sm:$0xff]  ;;  %v3003_v57 = vld [vmem:[#allocation12 + $0x538] sm:$0xff] }
 0x712   :  { %10268 = vmatprep.subr.bf16.mxu0 %v16610_v9  ;;  %v3066_v9 = vld [vmem:[#allocation12 + $0x730] sm:$0xff] }
 0x713   :  { %v16831_v23 = vcombine.low %v3066_v9, %v3074_v10 }
 0x714   :  { %10113 = vmatpush1.bf16.msra.mxu1 %v16735_v16  ;;  %10086 = vmatmul.mubr.bf16.vlgmr.msra.gmra.mrb[36].mxu0 %v20565_v39  ;;  %v16689_v16 = vcombine.low %v2923_v58, %v2931_v1  ;;  %v3011_v58 = vld [vmem:[#allocation12 + $0x578] sm:$0xff] }
 0x715   :  { %10269 = vmatpush1.bf16.msra.mxu0 %v16609_v18  ;;  %10300 = vmatprep.mubr.bf16.mxu0 %v20486_v35  ;;  %v2907_v35 = vld [vmem:[#allocation12 + $0x238] sm:$0xff]  ;;  %v16832_v18 = vcombine.high %v3066_v9, %v3074_v10  ;;  %v3154_v9 = vld [vmem:[#allocation12 + $0x9f0] sm:$0xff] }
 0x716   :  { %10114 = vmatprep.subr.bf16.mxu1 %v16752_v21  ;;  %10270 = vmatprep.subr.bf16.mxu0 %v16626_v38  ;;  %v16674_v12 = vcombine.high %v2907_v35, %v2915_v5  ;;  %v16673_v33 = vcombine.low %v2907_v35, %v2915_v5  ;;  %v16706_v21 = vcombine.high %v2939_v11, %v2947_v13  ;;  %v3082_v38 = vld [vmem:[#allocation12 + $0x7b0] sm:$0xff]  ;;  %v2995_v35 = vld [vmem:[#allocation12 + $0x4f8] sm:$0xff] }
 0x717   :  { %v16847_v19 = vcombine.low %v3082_v38, %v3090_v44  ;;  %v3019_v10 = vld [vmem:[#allocation12 + $0x5b8] sm:$0xff] }
 0x718   :  { %10115 = vmatpush1.bf16.msra.mxu1 %v16751_v26  ;;  %v16705_v26 = vcombine.low %v2939_v11, %v2947_v13  ;;  %v3027_v11 = vld [vmem:[#allocation12 + $0x5f8] sm:$0xff] }
 0x719   :  { %10271 = vmatpush1.bf16.msra.mxu0 %v16625_v43  ;;  %10116 = vmatprep.subr.bf16.mxu1 %v16768_v27  ;;  %v16848_v43 = vcombine.high %v3082_v38, %v3090_v44  ;;  %v16722_v27 = vcombine.high %v2955_v22, %v2963_v15  ;;  %v3170_v38 = vld [vmem:[#allocation12 + $0xa70] sm:$0xff]  ;;  %v3035_v44 = vld [vmem:[#allocation12 + $0x638] sm:$0xff] }
 0x71a   :  { %10272 = vmatprep.subr.bf16.mxu0 %v16642_v28  ;;  %v3098_v28 = vld [vmem:[#allocation12 + $0x830] sm:$0xff] }
 0x71b   :  { %v16863_v5 = vcombine.low %v3098_v28, %v3106_v30 }
 0x71c   :  { %10117 = vmatpush1.bf16.msra.mxu1 %v16767_v61  ;;  %v16721_v61 = vcombine.low %v2955_v22, %v2963_v15  ;;  %v3043_v22 = vld [vmem:[#allocation12 + $0x678] sm:$0xff] }
 0x71d   :  { %10273 = vmatpush1.bf16.msra.mxu0 %v16641_v2  ;;  %10118 = vmatprep.subr.bf16.mxu1 %v16784_v36  ;;  %v16864_v2 = vcombine.high %v3098_v28, %v3106_v30  ;;  %v16738_v36 = vcombine.high %v2971_v31, %v2979_v34  ;;  %v3186_v28 = vld [vmem:[#allocation12 + $0xaf0] sm:$0xff]  ;;  %v3051_v30 = vld [vmem:[#allocation12 + $0x6b8] sm:$0xff] }
 0x71e   :  { %10274 = vmatprep.subr.bf16.mxu0 %v16658_v37  ;;  %v3114_v37 = vld [vmem:[#allocation12 + $0x8b0] sm:$0xff] }
 0x71f   :  { %v16879_v1 = vcombine.low %v3114_v37, %v3122_v40 }
 0x720   :  { %10119 = vmatpush1.bf16.msra.mxu1 %v16783_v48  ;;  %v16737_v48 = vcombine.low %v2971_v31, %v2979_v34  ;;  %v3059_v31 = vld [vmem:[#allocation12 + $0x6f8] sm:$0xff] }
 0x721   :  { %10275 = vmatpush1.bf16.msra.mxu0 %v16657_v45  ;;  %10120 = vmatprep.subr.bf16.mxu1 %v16800_v50  ;;  %v16880_v45 = vcombine.high %v3114_v37, %v3122_v40  ;;  %v16754_v50 = vcombine.high %v2987_v42, %v2995_v35  ;;  %v3202_v37 = vld [vmem:[#allocation12 + $0xb70] sm:$0xff]  ;;  %v3067_v40 = vld [vmem:[#allocation12 + $0x738] sm:$0xff] }
 0x722   :  { %10276 = vmatprep.subr.bf16.mxu0 %v16674_v12  ;;  %v3130_v12 = vld [vmem:[#allocation12 + $0x930] sm:$0xff] }
 0x723   :  { %v16895_v13 = vcombine.low %v3130_v12, %v3138_v52 }
 0x724   :  { %10121 = vmatpush1.bf16.msra.mxu1 %v16799_v3  ;;  %v16753_v3 = vcombine.low %v2987_v42, %v2995_v35  ;;  %v3075_v42 = vld [vmem:[#allocation12 + $0x778] sm:$0xff] }
 0x725   :  { %10277 = vmatpush1.bf16.msra.mxu0 %v16673_v33  ;;  %10122 = vmatprep.subr.bf16.mxu1 %v16816_v4  ;;  %v16896_v33 = vcombine.high %v3130_v12, %v3138_v52  ;;  %v16770_v4 = vcombine.high %v3003_v57, %v3011_v58  ;;  %v3218_v12 = vld [vmem:[#allocation12 + $0xbf0] sm:$0xff]  ;;  %v3083_v52 = vld [vmem:[#allocation12 + $0x7b8] sm:$0xff] }
 0x726   :  { %10278 = vmatprep.subr.bf16.mxu0 %v16690_v51  ;;  %v3146_v51 = vld [vmem:[#allocation12 + $0x9b0] sm:$0xff] }
 0x727   :  { %v16911_v15 = vcombine.low %v3146_v51, %v3154_v9 }
 0x728   :  { %10123 = vmatpush1.bf16.msra.mxu1 %v16815_v14  ;;  %v16769_v14 = vcombine.low %v3003_v57, %v3011_v58  ;;  %v3091_v57 = vld [vmem:[#allocation12 + $0x7f8] sm:$0xff] }
 0x729   :  { %10279 = vmatpush1.bf16.msra.mxu0 %v16689_v16  ;;  %10124 = vmatprep.subr.bf16.mxu1 %v16832_v18  ;;  %v16912_v16 = vcombine.high %v3146_v51, %v3154_v9  ;;  %v16786_v18 = vcombine.high %v3019_v10, %v3027_v11  ;;  %v3234_v51 = vld [vmem:[#allocation12 + $0xc70] sm:$0xff]  ;;  %v3099_v9 = vld [vmem:[#allocation12 + $0x838] sm:$0xff] }
 0x72a   :  { %10280 = vmatprep.subr.bf16.mxu0 %v16706_v21  ;;  %v3162_v21 = vld [vmem:[#allocation12 + $0xa30] sm:$0xff] }
 0x72b   :  { %v16927_v34 = vcombine.low %v3162_v21, %v3170_v38 }
 0x72c   :  { %10125 = vmatpush1.bf16.msra.mxu1 %v16831_v23  ;;  %v16785_v23 = vcombine.low %v3019_v10, %v3027_v11  ;;  %v3107_v10 = vld [vmem:[#allocation12 + $0x878] sm:$0xff] }
 0x72d   :  { %10281 = vmatpush1.bf16.msra.mxu0 %v16705_v26  ;;  %10126 = vmatprep.subr.bf16.mxu1 %v16848_v43  ;;  %v16928_v26 = vcombine.high %v3162_v21, %v3170_v38  ;;  %v16802_v43 = vcombine.high %v3035_v44, %v3043_v22  ;;  %v3250_v21 = vld [vmem:[#allocation12 + $0xcf0] sm:$0xff]  ;;  %v3115_v38 = vld [vmem:[#allocation12 + $0x8b8] sm:$0xff] }
 0x72e   :  { %10282 = vmatprep.subr.bf16.mxu0 %v16722_v27  ;;  %v3178_v27 = vld [vmem:[#allocation12 + $0xab0] sm:$0xff] }
 0x72f   :  { %v16943_v35 = vcombine.low %v3178_v27, %v3186_v28 }
 0x730   :  { %10127 = vmatpush1.bf16.msra.mxu1 %v16847_v19  ;;  %v16801_v19 = vcombine.low %v3035_v44, %v3043_v22  ;;  %v3123_v44 = vld [vmem:[#allocation12 + $0x8f8] sm:$0xff] }
 0x731   :  { %10283 = vmatpush1.bf16.msra.mxu0 %v16721_v61  ;;  %10139 = vmatprep.subr.bf16.mxu1 %v16864_v2  ;;  %v16944_v61 = vcombine.high %v3178_v27, %v3186_v28  ;;  %v16818_v2 = vcombine.high %v3051_v30, %v3059_v31  ;;  %v3266_v27 = vld [vmem:[#allocation12 + $0xd70] sm:$0xff]  ;;  %v3131_v28 = vld [vmem:[#allocation12 + $0x938] sm:$0xff] }
 0x732   :  { %10284 = vmatprep.subr.bf16.mxu0 %v16738_v36  ;;  %v3194_v36 = vld [vmem:[#allocation12 + $0xb30] sm:$0xff] }
 0x733   :  { %10129 = vmatmul.mubr.bf16.vlgmr.msra.gmra.mrb[16].mxu1 %v20484_v32  ;;  %v16959_v58 = vcombine.low %v3194_v36, %v3202_v37 }
 0x734   :  { %10140 = vmatpush1.bf16.msra.mxu1 %v16863_v5  ;;  %10171 = vmatprep.mubr.bf16.mxu1 %v20511_v62  ;;  %v16817_v5 = vcombine.low %v3051_v30, %v3059_v31  ;;  %v3139_v30 = vld [vmem:[#allocation12 + $0x978] sm:$0xff] }
 0x735   :  { %10285 = vmatpush1.bf16.msra.mxu0 %v16737_v48  ;;  %10141 = vmatprep.subr.bf16.mxu1 %v16880_v45  ;;  %v16960_v48 = vcombine.high %v3194_v36, %v3202_v37  ;;  %v16834_v45 = vcombine.high %v3067_v40, %v3075_v42  ;;  %v3282_v36 = vld [vmem:[#allocation12 + $0xdf0] sm:$0xff]  ;;  %v3147_v37 = vld [vmem:[#allocation12 + $0x9b8] sm:$0xff] }
 0x736   :  { %10286 = vmatprep.subr.bf16.mxu0 %v16754_v50  ;;  %v3210_v50 = vld [vmem:[#allocation12 + $0xbb0] sm:$0xff] }
 0x737   :  { %v16975_v11 = vcombine.low %v3210_v50, %v3218_v12 }
 0x738   :  { %10142 = vmatpush1.bf16.msra.mxu1 %v16879_v1  ;;  %v16833_v1 = vcombine.low %v3067_v40, %v3075_v42  ;;  %v3155_v40 = vld [vmem:[#allocation12 + $0x9f8] sm:$0xff] }
 0x739   :  { %10287 = vmatpush1.bf16.msra.mxu0 %v16753_v3  ;;  %10143 = vmatprep.subr.bf16.mxu1 %v16896_v33  ;;  %v16976_v3 = vcombine.high %v3210_v50, %v3218_v12  ;;  %v16850_v33 = vcombine.high %v3083_v52, %v3091_v57  ;;  %v3171_v50 = vld [vmem:[#allocation12 + $0xa78] sm:$0xff] }
 0x73a   :  { %10288 = vmatprep.subr.bf16.mxu0 %v16770_v4  ;;  %v3226_v4 = vld [vmem:[#allocation12 + $0xc30] sm:$0xff] }
 0x73b   :  { %v16991_v22 = vcombine.low %v3226_v4, %v3234_v51 }
 0x73c   :  { %10144 = vmatpush1.bf16.msra.mxu1 %v16895_v13  ;;  %v16849_v13 = vcombine.low %v3083_v52, %v3091_v57  ;;  %v16913_v52 = vcombine.low %v3147_v37, %v3155_v40 }
 0x73d   :  { %10289 = vmatpush1.bf16.msra.mxu0 %v16769_v14  ;;  %10145 = vmatprep.subr.bf16.mxu1 %v16912_v16  ;;  %v16992_v14 = vcombine.high %v3226_v4, %v3234_v51  ;;  %v16866_v16 = vcombine.high %v3099_v9, %v3107_v10  ;;  %v3187_v4 = vld [vmem:[#allocation12 + $0xaf8] sm:$0xff] }
 0x73e   :  { %10290 = vmatprep.subr.bf16.mxu0 %v16786_v18  ;;  %v3242_v18 = vld [vmem:[#allocation12 + $0xcb0] sm:$0xff] }
 0x73f   :  { %v17007_v31 = vcombine.low %v3242_v18, %v3250_v21 }
 0x740   :  { %10146 = vmatpush1.bf16.msra.mxu1 %v16911_v15  ;;  %v16865_v15 = vcombine.low %v3099_v9, %v3107_v10 }
 0x741   :  { %10291 = vmatpush1.bf16.msra.mxu0 %v16785_v23  ;;  %10147 = vmatprep.subr.bf16.mxu1 %v16928_v26  ;;  %v17008_v23 = vcombine.high %v3242_v18, %v3250_v21  ;;  %v16882_v26 = vcombine.high %v3115_v38, %v3123_v44  ;;  %v3203_v18 = vld [vmem:[#allocation12 + $0xb78] sm:$0xff] }
 0x742   :  { %10292 = vmatprep.subr.bf16.mxu0 %v16802_v43  ;;  %v3258_v43 = vld [vmem:[#allocation12 + $0xd30] sm:$0xff] }
 0x743   :  { %v17023_v42 = vcombine.low %v3258_v43, %v3266_v27 }
 0x744   :  { %10148 = vmatpush1.bf16.msra.mxu1 %v16927_v34  ;;  %v16881_v34 = vcombine.low %v3115_v38, %v3123_v44 }
 0x745   :  { %10293 = vmatpush1.bf16.msra.mxu0 %v16801_v19  ;;  %10149 = vmatprep.subr.bf16.mxu1 %v16944_v61  ;;  %v17024_v19 = vcombine.high %v3258_v43, %v3266_v27  ;;  %v16898_v61 = vcombine.high %v3131_v28, %v3139_v30  ;;  %v3219_v43 = vld [vmem:[#allocation12 + $0xbf8] sm:$0xff] }
 0x746   :  { %10294 = vmatprep.subr.bf16.mxu0 %v16818_v2  ;;  %v3274_v2 = vld [vmem:[#allocation12 + $0xdb0] sm:$0xff] }
 0x747   :  { %v17039_v12 = vcombine.low %v3274_v2, %v3282_v36 }
 0x748   :  { %10150 = vmatpush1.bf16.msra.mxu1 %v16943_v35  ;;  %v16897_v35 = vcombine.low %v3131_v28, %v3139_v30 }
 0x749   :  { %10295 = vmatpush1.bf16.msra.mxu0 %v16817_v5  ;;  %10151 = vmatprep.subr.bf16.mxu1 %v16960_v48  ;;  %v17040_v5 = vcombine.high %v3274_v2, %v3282_v36  ;;  %v3290_v48 = vld [vmem:[#allocation12 + $0xe30] sm:$0xff]  ;;  %v3235_v2 = vld [vmem:[#allocation12 + $0xc78] sm:$0xff] }
 0x74a   :  { %10296 = vmatprep.subr.bf16.mxu0 %v16834_v45  ;;  %v3298_v45 = vld [vmem:[#allocation12 + $0xe70] sm:$0xff] }
 0x74b   :  { %v17056_v57 = vcombine.high %v3290_v48, %v3298_v45  ;;  %v17055_v51 = vcombine.low %v3290_v48, %v3298_v45  ;;  %v3251_v48 = vld [vmem:[#allocation12 + $0xcf8] sm:$0xff] }
 0x74c   :  { %10152 = vmatpush1.bf16.msra.mxu1 %v16959_v58 }
 0x74d   :  { %10297 = vmatpush1.bf16.msra.mxu0 %v16833_v1  ;;  %10153 = vmatprep.subr.bf16.mxu1 %v16976_v3  ;;  %v3306_v1 = vld [vmem:[#allocation12 + $0xeb0] sm:$0xff] }
 0x74e   :  { %10298 = vmatprep.subr.bf16.mxu0 %v16850_v33  ;;  %v3314_v3 = vld [vmem:[#allocation12 + $0xef0] sm:$0xff]  ;;  %v3179_v33 = vld [vmem:[#allocation12 + $0xab8] sm:$0xff] }
 0x74f   :  { %v17072_v10 = vcombine.high %v3306_v1, %v3314_v3  ;;  %v17071_v21 = vcombine.low %v3306_v1, %v3314_v3  ;;  %v16945_v38 = vcombine.low %v3179_v33, %v3187_v4  ;;  %v3267_v1 = vld [vmem:[#allocation12 + $0xd78] sm:$0xff] }
 0x750   :  { %10154 = vmatpush1.bf16.msra.mxu1 %v16975_v11  ;;  %v16946_v11 = vcombine.high %v3179_v33, %v3187_v4 }
 0x751   :  { %10299 = vmatpush1.bf16.msra.mxu0 %v16849_v13  ;;  %10155 = vmatprep.subr.bf16.mxu1 %v16992_v14  ;;  %v3322_v13 = vld [vmem:[#allocation12 + $0xf30] sm:$0xff] }
 0x752   :  { %10311 = vmatprep.subr.bf16.mxu0 %v16866_v16  ;;  %v3330_v14 = vld [vmem:[#allocation12 + $0xf70] sm:$0xff]  ;;  %v3195_v16 = vld [vmem:[#allocation12 + $0xb38] sm:$0xff] }
 0x753   :  { %v17088_v44 = vcombine.high %v3322_v13, %v3330_v14  ;;  %v17087_v27 = vcombine.low %v3322_v13, %v3330_v14  ;;  %v16961_v28 = vcombine.low %v3195_v16, %v3203_v18  ;;  %v3283_v13 = vld [vmem:[#allocation12 + $0xdf8] sm:$0xff] }
 0x754   :  { %10156 = vmatpush1.bf16.msra.mxu1 %v16991_v22  ;;  %10301 = vmatmul.mubr.bf16.vlgmr.msra.gmra.mrb[40].mxu0 %v20484_v32  ;;  %v16914_v32 = vcombine.high %v3147_v37, %v3155_v40  ;;  %v16962_v22 = vcombine.high %v3195_v16, %v3203_v18 }
 0x755   :  { %10312 = vmatpush1.bf16.msra.mxu0 %v16865_v15  ;;  %10343 = vmatprep.mubr.bf16.mxu0 %v20511_v62  ;;  %v3163_v62 = vld [vmem:[#allocation12 + $0xa38] sm:$0xff]  ;;  %v3338_v15 = vld [vmem:[#allocation12 + $0xfb0] sm:$0xff] }
 0x756   :  { %10157 = vmatprep.subr.bf16.mxu1 %v17008_v23  ;;  %10313 = vmatprep.subr.bf16.mxu0 %v16882_v26  ;;  %v16930_v58 = vcombine.high %v3163_v62, %v3171_v50  ;;  %v16929_v9 = vcombine.low %v3163_v62, %v3171_v50  ;;  %v3346_v23 = vld [vmem:[#allocation12 + $0xff0] sm:$0xff]  ;;  %v3211_v26 = vld [vmem:[#allocation12 + $0xbb8] sm:$0xff] }
 0x757   :  { %v17104_v30 = vcombine.high %v3338_v15, %v3346_v23  ;;  %v17103_v36 = vcombine.low %v3338_v15, %v3346_v23  ;;  %v16977_v37 = vcombine.low %v3211_v26, %v3219_v43  ;;  %v3299_v15 = vld [vmem:[#allocation12 + $0xe78] sm:$0xff] }
 0x758   :  { %10158 = vmatpush1.bf16.msra.mxu1 %v17007_v31  ;;  %v16978_v31 = vcombine.high %v3211_v26, %v3219_v43 }
 0x759   :  { %10314 = vmatpush1.bf16.msra.mxu0 %v16881_v34  ;;  %10159 = vmatprep.subr.bf16.mxu1 %v17024_v19  ;;  %v3354_v34 = vld [vmem:[#allocation12 + $0x1030] sm:$0xff] }
 0x75a   :  { %10315 = vmatprep.subr.bf16.mxu0 %v16898_v61  ;;  %v3362_v19 = vld [vmem:[#allocation12 + $0x1070] sm:$0xff]  ;;  %v3227_v61 = vld [vmem:[#allocation12 + $0xc38] sm:$0xff] }
 0x75b   :  { %v17120_v40 = vcombine.high %v3354_v34, %v3362_v19  ;;  %v17119_v45 = vcombine.low %v3354_v34, %v3362_v19  ;;  %v16993_v62 = vcombine.low %v3227_v61, %v3235_v2  ;;  %v3315_v34 = vld [vmem:[#allocation12 + $0xef8] sm:$0xff] }
 0x75c   :  { %10160 = vmatpush1.bf16.msra.mxu1 %v17023_v42  ;;  %v16994_v42 = vcombine.high %v3227_v61, %v3235_v2 }
 0x75d   :  { %10316 = vmatpush1.bf16.msra.mxu0 %v16897_v35  ;;  %10161 = vmatprep.subr.bf16.mxu1 %v17040_v5  ;;  %v3370_v35 = vld [vmem:[#allocation12 + $0x10b0] sm:$0xff] }
 0x75e   :  { %10317 = vmatprep.subr.bf16.mxu0 %v16914_v32  ;;  %v3378_v5 = vld [vmem:[#allocation12 + $0x10f0] sm:$0xff]  ;;  %v3243_v32 = vld [vmem:[#allocation12 + $0xcb8] sm:$0xff] }
 0x75f   :  { %v17136_v50 = vcombine.high %v3370_v35, %v3378_v5  ;;  %v17135_v3 = vcombine.low %v3370_v35, %v3378_v5  ;;  %v17009_v33 = vcombine.low %v3243_v32, %v3251_v48  ;;  %v3331_v35 = vld [vmem:[#allocation12 + $0xf78] sm:$0xff] }
 0x760   :  { %10162 = vmatpush1.bf16.msra.mxu1 %v17039_v12  ;;  %v17010_v12 = vcombine.high %v3243_v32, %v3251_v48 }
 0x761   :  { %10318 = vmatpush1.bf16.msra.mxu0 %v16913_v52  ;;  %10163 = vmatprep.subr.bf16.mxu1 %v17056_v57  ;;  %v3386_v52 = vld [vmem:[#allocation12 + $0x1130] sm:$0xff] }
 0x762   :  { %10319 = vmatprep.subr.bf16.mxu0 %v16930_v58  ;;  %v3394_v57 = vld [vmem:[#allocation12 + $0x1170] sm:$0xff]  ;;  %v3259_v58 = vld [vmem:[#allocation12 + $0xd38] sm:$0xff] }
 0x763   :  { %v17152_v4 = vcombine.high %v3386_v52, %v3394_v57  ;;  %v17151_v14 = vcombine.low %v3386_v52, %v3394_v57  ;;  %v17025_v16 = vcombine.low %v3259_v58, %v3267_v1  ;;  %v3347_v52 = vld [vmem:[#allocation12 + $0xff8] sm:$0xff] }
 0x764   :  { %10164 = vmatpush1.bf16.msra.mxu1 %v17055_v51  ;;  %v17026_v51 = vcombine.high %v3259_v58, %v3267_v1 }
 0x765   :  { %10320 = vmatpush1.bf16.msra.mxu0 %v16929_v9  ;;  %10165 = vmatprep.subr.bf16.mxu1 %v17072_v10  ;;  %v3402_v9 = vld [vmem:[#allocation12 + $0x11b0] sm:$0xff] }
 0x766   :  { %10321 = vmatprep.subr.bf16.mxu0 %v16946_v11  ;;  %v3410_v10 = vld [vmem:[#allocation12 + $0x11f0] sm:$0xff]  ;;  %v3275_v11 = vld [vmem:[#allocation12 + $0xdb8] sm:$0xff] }
 0x767   :  { %v17168_v18 = vcombine.high %v3402_v9, %v3410_v10  ;;  %v17167_v23 = vcombine.low %v3402_v9, %v3410_v10  ;;  %v17041_v26 = vcombine.low %v3275_v11, %v3283_v13  ;;  %v3363_v9 = vld [vmem:[#allocation12 + $0x1078] sm:$0xff] }
 0x768   :  { %10166 = vmatpush1.bf16.msra.mxu1 %v17071_v21  ;;  %v17042_v21 = vcombine.high %v3275_v11, %v3283_v13 }
 0x769   :  { %10322 = vmatpush1.bf16.msra.mxu0 %v16945_v38  ;;  %10167 = vmatprep.subr.bf16.mxu1 %v17088_v44  ;;  %v3418_v38 = vld [vmem:[#allocation12 + $0x1230] sm:$0xff] }
 0x76a   :  { %10323 = vmatprep.subr.bf16.mxu0 %v16962_v22  ;;  %v3426_v44 = vld [vmem:[#allocation12 + $0x1270] sm:$0xff]  ;;  %v3291_v22 = vld [vmem:[#allocation12 + $0xe38] sm:$0xff] }
 0x76b   :  { %v17184_v43 = vcombine.high %v3418_v38, %v3426_v44  ;;  %v17183_v19 = vcombine.low %v3418_v38, %v3426_v44  ;;  %v17057_v61 = vcombine.low %v3291_v22, %v3299_v15  ;;  %v3379_v38 = vld [vmem:[#allocation12 + $0x10f8] sm:$0xff] }
 0x76c   :  { %10168 = vmatpush1.bf16.msra.mxu1 %v17087_v27  ;;  %v17058_v27 = vcombine.high %v3291_v22, %v3299_v15 }
 0x76d   :  { %10324 = vmatpush1.bf16.msra.mxu0 %v16961_v28  ;;  %10169 = vmatprep.subr.bf16.mxu1 %v17104_v30  ;;  %v3434_v28 = vld [vmem:[#allocation12 + $0x12b0] sm:$0xff] }
 0x76e   :  { %10325 = vmatprep.subr.bf16.mxu0 %v16978_v31  ;;  %v3442_v30 = vld [vmem:[#allocation12 + $0x12f0] sm:$0xff]  ;;  %v3307_v31 = vld [vmem:[#allocation12 + $0xeb8] sm:$0xff] }
 0x76f   :  { %v17200_v2 = vcombine.high %v3434_v28, %v3442_v30  ;;  %v17199_v5 = vcombine.low %v3434_v28, %v3442_v30  ;;  %v17073_v32 = vcombine.low %v3307_v31, %v3315_v34  ;;  %v3395_v28 = vld [vmem:[#allocation12 + $0x1178] sm:$0xff] }
 0x770   :  { %10170 = vmatpush1.bf16.msra.mxu1 %v17103_v36  ;;  %v17074_v36 = vcombine.high %v3307_v31, %v3315_v34 }
 0x771   :  { %10326 = vmatpush1.bf16.msra.mxu0 %v16977_v37  ;;  %10182 = vmatprep.subr.bf16.mxu1 %v17120_v40  ;;  %v3450_v37 = vld [vmem:[#allocation12 + $0x1330] sm:$0xff] }
 0x772   :  { %10327 = vmatprep.subr.bf16.mxu0 %v16994_v42  ;;  %v3458_v40 = vld [vmem:[#allocation12 + $0x1370] sm:$0xff]  ;;  %v3323_v42 = vld [vmem:[#allocation12 + $0xf38] sm:$0xff] }
 0x773   :  { %10172 = vmatmul.mubr.bf16.vlgmr.msra.gmra.mrb[16].mxu1 %v20509_v56  ;;  %v17216_v48 = vcombine.high %v3450_v37, %v3458_v40  ;;  %v17215_v57 = vcombine.low %v3450_v37, %v3458_v40  ;;  %v17089_v58 = vcombine.low %v3323_v42, %v3331_v35  ;;  %v3411_v37 = vld [vmem:[#allocation12 + $0x11f8] sm:$0xff] }
 0x774   :  { %10183 = vmatpush1.bf16.msra.mxu1 %v17119_v45  ;;  %10214 = vmatprep.mubr.bf16.mxu1 %v20546_v49  ;;  %v17090_v45 = vcombine.high %v3323_v42, %v3331_v35 }
 0x775   :  { %10328 = vmatpush1.bf16.msra.mxu0 %v16993_v62  ;;  %10184 = vmatprep.subr.bf16.mxu1 %v17136_v50  ;;  %v3466_v62 = vld [vmem:[#allocation12 + $0x13b0] sm:$0xff] }
 0x776   :  { %10329 = vmatprep.subr.bf16.mxu0 %v17010_v12  ;;  %v3474_v50 = vld [vmem:[#allocation12 + $0x13f0] sm:$0xff]  ;;  %v3339_v12 = vld [vmem:[#allocation12 + $0xfb8] sm:$0xff] }
 0x777   :  { %v17232_v1 = vcombine.high %v3466_v62, %v3474_v50  ;;  %v17231_v10 = vcombine.low %v3466_v62, %v3474_v50  ;;  %v17105_v11 = vcombine.low %v3339_v12, %v3347_v52 }
 0x778   :  { %10185 = vmatpush1.bf16.msra.mxu1 %v17135_v3  ;;  %v17106_v3 = vcombine.high %v3339_v12, %v3347_v52  ;;  %v3562_v52 = vld [vmem:[#allocation12 + $0x16b0] sm:$0xff] }
 0x779   :  { %10330 = vmatpush1.bf16.msra.mxu0 %v17009_v33  ;;  %10186 = vmatprep.subr.bf16.mxu1 %v17152_v4  ;;  %v3482_v33 = vld [vmem:[#allocation12 + $0x1430] sm:$0xff] }
 0x77a   :  { %10331 = vmatprep.subr.bf16.mxu0 %v17026_v51  ;;  %v3490_v4 = vld [vmem:[#allocation12 + $0x1470] sm:$0xff]  ;;  %v3355_v51 = vld [vmem:[#allocation12 + $0x1038] sm:$0xff] }
 0x77b   :  { %v17248_v13 = vcombine.high %v3482_v33, %v3490_v4  ;;  %v17247_v44 = vcombine.low %v3482_v33, %v3490_v4  ;;  %v17121_v22 = vcombine.low %v3355_v51, %v3363_v9 }
 0x77c   :  { %10187 = vmatpush1.bf16.msra.mxu1 %v17151_v14  ;;  %v17122_v14 = vcombine.high %v3355_v51, %v3363_v9  ;;  %v3578_v9 = vld [vmem:[#allocation12 + $0x1730] sm:$0xff] }
 0x77d   :  { %10332 = vmatpush1.bf16.msra.mxu0 %v17025_v16  ;;  %10188 = vmatprep.subr.bf16.mxu1 %v17168_v18  ;;  %v3498_v16 = vld [vmem:[#allocation12 + $0x14b0] sm:$0xff] }
 0x77e   :  { %10333 = vmatprep.subr.bf16.mxu0 %v17042_v21  ;;  %v3506_v18 = vld [vmem:[#allocation12 + $0x14f0] sm:$0xff]  ;;  %v3371_v21 = vld [vmem:[#allocation12 + $0x10b8] sm:$0xff] }
 0x77f   :  { %v17264_v15 = vcombine.high %v3498_v16, %v3506_v18  ;;  %v17263_v30 = vcombine.low %v3498_v16, %v3506_v18  ;;  %v17137_v31 = vcombine.low %v3371_v21, %v3379_v38 }
 0x780   :  { %10189 = vmatpush1.bf16.msra.mxu1 %v17167_v23  ;;  %v17138_v23 = vcombine.high %v3371_v21, %v3379_v38  ;;  %v3594_v38 = vld [vmem:[#allocation12 + $0x17b0] sm:$0xff] }
 0x781   :  { %10334 = vmatpush1.bf16.msra.mxu0 %v17041_v26  ;;  %10190 = vmatprep.subr.bf16.mxu1 %v17184_v43  ;;  %v3514_v26 = vld [vmem:[#allocation12 + $0x1530] sm:$0xff] }
 0x782   :  { %10335 = vmatprep.subr.bf16.mxu0 %v17058_v27  ;;  %v3522_v43 = vld [vmem:[#allocation12 + $0x1570] sm:$0xff]  ;;  %v3387_v27 = vld [vmem:[#allocation12 + $0x1138] sm:$0xff] }
 0x783   :  { %v17280_v34 = vcombine.high %v3514_v26, %v3522_v43  ;;  %v17279_v40 = vcombine.low %v3514_v26, %v3522_v43  ;;  %v17153_v42 = vcombine.low %v3387_v27, %v3395_v28 }
 0x784   :  { %10191 = vmatpush1.bf16.msra.mxu1 %v17183_v19  ;;  %v17154_v19 = vcombine.high %v3387_v27, %v3395_v28  ;;  %v3610_v28 = vld [vmem:[#allocation12 + $0x1830] sm:$0xff] }
 0x785   :  { %10336 = vmatpush1.bf16.msra.mxu0 %v17057_v61  ;;  %10192 = vmatprep.subr.bf16.mxu1 %v17200_v2  ;;  %v3530_v61 = vld [vmem:[#allocation12 + $0x15b0] sm:$0xff] }
 0x786   :  { %10337 = vmatprep.subr.bf16.mxu0 %v17074_v36  ;;  %v3538_v2 = vld [vmem:[#allocation12 + $0x15f0] sm:$0xff]  ;;  %v3403_v36 = vld [vmem:[#allocation12 + $0x11b8] sm:$0xff] }
 0x787   :  { %v17296_v35 = vcombine.high %v3530_v61, %v3538_v2  ;;  %v17169_v62 = vcombine.low %v3403_v36, %v3411_v37 }
 0x788   :  { %10193 = vmatpush1.bf16.msra.mxu1 %v17199_v5  ;;  %v3546_v5 = vld [vmem:[#allocation12 + $0x1630] sm:$0xff] }
 0x789   :  { %10338 = vmatpush1.bf16.msra.mxu0 %v17073_v32  ;;  %10194 = vmatprep.subr.bf16.mxu1 %v17216_v48  ;;  %v3554_v32 = vld [vmem:[#allocation12 + $0x1670] sm:$0xff]  ;;  %v3427_v48 = vld [vmem:[#allocation12 + $0x1278] sm:$0xff] }
 0x78a   :  { %10339 = vmatprep.subr.bf16.mxu0 %v17090_v45  ;;  %v17295_v45 = vcombine.low %v3530_v61, %v3538_v2  ;;  %v17312_v50 = vcombine.high %v3546_v5, %v3554_v32 }
 0x78c   :  { %10195 = vmatpush1.bf16.msra.mxu1 %v17215_v57  ;;  %v3570_v57 = vld [vmem:[#allocation12 + $0x16f0] sm:$0xff] }
 0x78d   :  { %10340 = vmatpush1.bf16.msra.mxu0 %v17089_v58  ;;  %10196 = vmatprep.subr.bf16.mxu1 %v17232_v1  ;;  %v3435_v58 = vld [vmem:[#allocation12 + $0x12b8] sm:$0xff]  ;;  %v17328_v4 = vcombine.high %v3562_v52, %v3570_v57 }
 0x78e   :  { %10341 = vmatprep.subr.bf16.mxu0 %v17106_v3  ;;  %v3443_v1 = vld [vmem:[#allocation12 + $0x12f8] sm:$0xff]  ;;  %v17311_v3 = vcombine.low %v3546_v5, %v3554_v32 }
 0x78f   :  { %v17202_v51 = vcombine.high %v3435_v58, %v3443_v1  ;;  %v17201_v16 = vcombine.low %v3435_v58, %v3443_v1  ;;  %v3658_v1 = vld [vmem:[#allocation12 + $0x19b0] sm:$0xff] }
 0x790   :  { %10197 = vmatpush1.bf16.msra.mxu1 %v17231_v10  ;;  %v3586_v10 = vld [vmem:[#allocation12 + $0x1770] sm:$0xff] }
 0x791   :  { %10342 = vmatpush1.bf16.msra.mxu0 %v17105_v11  ;;  %10198 = vmatprep.subr.bf16.mxu1 %v17248_v13  ;;  %v3451_v11 = vld [vmem:[#allocation12 + $0x1338] sm:$0xff]  ;;  %v17344_v18 = vcombine.high %v3578_v9, %v3586_v10 }
 0x792   :  { %10354 = vmatprep.subr.bf16.mxu0 %v17122_v14  ;;  %v3459_v13 = vld [vmem:[#allocation12 + $0x1378] sm:$0xff]  ;;  %v17327_v14 = vcombine.low %v3562_v52, %v3570_v57 }
 0x793   :  { %v17218_v21 = vcombine.high %v3451_v11, %v3459_v13  ;;  %v17217_v26 = vcombine.low %v3451_v11, %v3459_v13  ;;  %v3674_v13 = vld [vmem:[#allocation12 + $0x1a30] sm:$0xff] }
 0x794   :  { %10199 = vmatpush1.bf16.msra.mxu1 %v17247_v44  ;;  %10344 = vmatmul.mubr.bf16.vlgmr.msra.gmra.mrb[40].mxu0 %v20509_v56  ;;  %v17170_v56 = vcombine.high %v3403_v36, %v3411_v37  ;;  %v3602_v44 = vld [vmem:[#allocation12 + $0x17f0] sm:$0xff] }
 0x795   :  { %10355 = vmatpush1.bf16.msra.mxu0 %v17121_v22  ;;  %10386 = vmatprep.mubr.bf16.mxu0 %v20546_v49  ;;  %v3419_v49 = vld [vmem:[#allocation12 + $0x1238] sm:$0xff]  ;;  %v17360_v43 = vcombine.high %v3594_v38, %v3602_v44  ;;  %v3626_v37 = vld [vmem:[#allocation12 + $0x18b0] sm:$0xff] }
 0x796   :  { %10200 = vmatprep.subr.bf16.mxu1 %v17264_v15  ;;  %10356 = vmatprep.subr.bf16.mxu0 %v17138_v23  ;;  %v17186_v12 = vcombine.high %v3419_v49, %v3427_v48  ;;  %v17185_v33 = vcombine.low %v3419_v49, %v3427_v48  ;;  %v3467_v22 = vld [vmem:[#allocation12 + $0x13b8] sm:$0xff]  ;;  %v17343_v23 = vcombine.low %v3578_v9, %v3586_v10  ;;  %v3642_v48 = vld [vmem:[#allocation12 + $0x1930] sm:$0xff] }
 0x797   :  { %v3475_v15 = vld [vmem:[#allocation12 + $0x13f8] sm:$0xff] }
 0x798   :  { %10201 = vmatpush1.bf16.msra.mxu1 %v17263_v30  ;;  %v17234_v27 = vcombine.high %v3467_v22, %v3475_v15  ;;  %v3618_v30 = vld [vmem:[#allocation12 + $0x1870] sm:$0xff]  ;;  %v17233_v61 = vcombine.low %v3467_v22, %v3475_v15 }
 0x799   :  { %10357 = vmatpush1.bf16.msra.mxu0 %v17137_v31  ;;  %10202 = vmatprep.subr.bf16.mxu1 %v17280_v34  ;;  %v3483_v31 = vld [vmem:[#allocation12 + $0x1438] sm:$0xff]  ;;  %v17376_v2 = vcombine.high %v3610_v28, %v3618_v30  ;;  %v3690_v15 = vld [vmem:[#allocation12 + $0x1ab0] sm:$0xff] }
 0x79a   :  { %10358 = vmatprep.subr.bf16.mxu0 %v17154_v19  ;;  %v3491_v34 = vld [vmem:[#allocation12 + $0x1478] sm:$0xff]  ;;  %v17359_v19 = vcombine.low %v3594_v38, %v3602_v44 }
 0x79b   :  { %v17250_v36 = vcombine.high %v3483_v31, %v3491_v34  ;;  %v17249_v5 = vcombine.low %v3483_v31, %v3491_v34 }
 0x79c   :  { %10203 = vmatpush1.bf16.msra.mxu1 %v17279_v40  ;;  %v3634_v40 = vld [vmem:[#allocation12 + $0x18f0] sm:$0xff] }
 0x79d   :  { %10359 = vmatpush1.bf16.msra.mxu0 %v17153_v42  ;;  %10204 = vmatprep.subr.bf16.mxu1 %v17296_v35  ;;  %v3499_v42 = vld [vmem:[#allocation12 + $0x14b8] sm:$0xff]  ;;  %v17392_v32 = vcombine.high %v3626_v37, %v3634_v40 }
 0x79e   :  { %10360 = vmatprep.subr.bf16.mxu0 %v17170_v56  ;;  %v3507_v35 = vld [vmem:[#allocation12 + $0x14f8] sm:$0xff]  ;;  %v17375_v56 = vcombine.low %v3610_v28, %v3618_v30  ;;  %v20666_v28 = vld [vmem:[#allocation13 + $0x8] sm:$0xff] }
 0x79f   :  { %v17266_v49 = vcombine.high %v3499_v42, %v3507_v35  ;;  %v17265_v52 = vcombine.low %v3499_v42, %v3507_v35 }
 0x7a0   :  { %10205 = vmatpush1.bf16.msra.mxu1 %v17295_v45  ;;  %v3650_v45 = vld [vmem:[#allocation12 + $0x1970] sm:$0xff] }
 0x7a1   :  { %10361 = vmatpush1.bf16.msra.mxu0 %v17169_v62  ;;  %10206 = vmatprep.subr.bf16.mxu1 %v17312_v50  ;;  %v3515_v62 = vld [vmem:[#allocation12 + $0x1538] sm:$0xff]  ;;  %v17408_v57 = vcombine.high %v3642_v48, %v3650_v45 }
 0x7a2   :  { %10362 = vmatprep.subr.bf16.mxu0 %v17186_v12  ;;  %v3523_v50 = vld [vmem:[#allocation12 + $0x1578] sm:$0xff]  ;;  %v17391_v12 = vcombine.low %v3626_v37, %v3634_v40  ;;  %v3903_v40 = vrot.slane %v20666_v28, %v20406_v55 }
 0x7a3   :  { %v17282_v58 = vcombine.high %v3515_v62, %v3523_v50  ;;  %v17281_v9 = vcombine.low %v3515_v62, %v3523_v50  ;;  %v3587_v37 = vld [vmem:[#allocation12 + $0x1778] sm:$0xff] }
 0x7a4   :  { %10207 = vmatpush1.bf16.msra.mxu1 %v17311_v3  ;;  %v3666_v3 = vld [vmem:[#allocation12 + $0x19f0] sm:$0xff]  ;;  %v3595_v50 = vld [vmem:[#allocation12 + $0x17b8] sm:$0xff] }
 0x7a5   :  { %10363 = vmatpush1.bf16.msra.mxu0 %v17185_v33  ;;  %10208 = vmatprep.subr.bf16.mxu1 %v17328_v4  ;;  %v3531_v33 = vld [vmem:[#allocation12 + $0x15b8] sm:$0xff]  ;;  %v17424_v10 = vcombine.high %v3658_v1, %v3666_v3 }
 0x7a6   :  { %10364 = vmatprep.subr.bf16.mxu0 %v17202_v51  ;;  %v3539_v4 = vld [vmem:[#allocation12 + $0x15f8] sm:$0xff]  ;;  %v17407_v51 = vcombine.low %v3642_v48, %v3650_v45  ;;  %v3730_v48 = vld [vmem:[#allocation12 + $0x1bf0] sm:$0xff] }
 0x7a7   :  { %v17298_v11 = vcombine.high %v3531_v33, %v3539_v4  ;;  %v17297_v38 = vcombine.low %v3531_v33, %v3539_v4 }
 0x7a8   :  { %10209 = vmatpush1.bf16.msra.mxu1 %v17327_v14  ;;  %v3682_v14 = vld [vmem:[#allocation12 + $0x1a70] sm:$0xff] }
 0x7a9   :  { %10365 = vmatpush1.bf16.msra.mxu0 %v17201_v16  ;;  %10210 = vmatprep.subr.bf16.mxu1 %v17344_v18  ;;  %v3547_v16 = vld [vmem:[#allocation12 + $0x1638] sm:$0xff]  ;;  %v17440_v44 = vcombine.high %v3674_v13, %v3682_v14 }
 0x7aa   :  { %10366 = vmatprep.subr.bf16.mxu0 %v17218_v21  ;;  %v3555_v18 = vld [vmem:[#allocation12 + $0x1678] sm:$0xff]  ;;  %v17423_v21 = vcombine.low %v3658_v1, %v3666_v3 }
 0x7ab   :  { %v17314_v22 = vcombine.high %v3547_v16, %v3555_v18  ;;  %v17313_v30 = vcombine.low %v3547_v16, %v3555_v18  ;;  %v3611_v18 = vld [vmem:[#allocation12 + $0x1838] sm:$0xff] }
 0x7ac   :  { %10211 = vmatpush1.bf16.msra.mxu1 %v17343_v23  ;;  %v3698_v23 = vld [vmem:[#allocation12 + $0x1af0] sm:$0xff] }
 0x7ad   :  { %10367 = vmatpush1.bf16.msra.mxu0 %v17217_v26  ;;  %10212 = vmatprep.subr.bf16.mxu1 %v17360_v43  ;;  %v3563_v26 = vld [vmem:[#allocation12 + $0x16b8] sm:$0xff]  ;;  %v17456_v31 = vcombine.high %v3690_v15, %v3698_v23  ;;  %v17455_v42 = vcombine.low %v3690_v15, %v3698_v23 }
 0x7ae   :  { %10368 = vmatprep.subr.bf16.mxu0 %v17234_v27  ;;  %v3571_v43 = vld [vmem:[#allocation12 + $0x16f8] sm:$0xff]  ;;  %v17439_v27 = vcombine.low %v3674_v13, %v3682_v14  ;;  %v3738_v13 = vld [vmem:[#allocation12 + $0x1c30] sm:$0xff] }
 0x7af   :  { %v17330_v34 = vcombine.high %v3563_v26, %v3571_v43  ;;  %v17329_v35 = vcombine.low %v3563_v26, %v3571_v43  ;;  %v3746_v14 = vld [vmem:[#allocation12 + $0x1c70] sm:$0xff] }
 0x7b0   :  { %10213 = vmatpush1.bf16.msra.mxu1 %v17359_v19  ;;  %v3706_v19 = vld [vmem:[#allocation12 + $0x1b30] sm:$0xff]  ;;  %v17504_v26 = vcombine.high %v3738_v13, %v3746_v14 }
 0x7b1   :  { %10369 = vmatpush1.bf16.msra.mxu0 %v17233_v61  ;;  %10225 = vmatprep.subr.bf16.mxu1 %v17376_v2  ;;  %v3714_v61 = vld [vmem:[#allocation12 + $0x1b70] sm:$0xff]  ;;  %v3899_v2 = vrot.slane %v20666_v28, %v20403_v54 }
 0x7b2   :  { %10370 = vmatprep.subr.bf16.mxu0 %v17250_v36  ;;  %v3579_v36 = vld [vmem:[#allocation12 + $0x1738] sm:$0xff] }
 0x7b3   :  { %10215 = vmatmul.mubr.bf16.vlgmr.msra.gmra.mrb[16].mxu1 %v20542_v60  ;;  %v17345_v4 = vcombine.low %v3579_v36, %v3587_v37 }
 0x7b4   :  { %10226 = vmatpush1.bf16.msra.mxu1 %v17375_v56  ;;  %10257 = vmatprep.mubr.bf16.mxu1 %v20567_v24  ;;  %v17472_v56 = vcombine.high %v3706_v19, %v3714_v61 }
 0x7b5   :  { %10371 = vmatpush1.bf16.msra.mxu0 %v17249_v5  ;;  %10227 = vmatprep.subr.bf16.mxu1 %v17392_v32  ;;  %v17346_v32 = vcombine.high %v3579_v36, %v3587_v37  ;;  %v17503_v37 = vcombine.low %v3738_v13, %v3746_v14 }
 0x7b6   :  { %10372 = vmatprep.subr.bf16.mxu0 %v17266_v49  ;;  %v3722_v49 = vld [vmem:[#allocation12 + $0x1bb0] sm:$0xff] }
 0x7b8   :  { %10228 = vmatpush1.bf16.msra.mxu1 %v17391_v12  ;;  %v3603_v12 = vld [vmem:[#allocation12 + $0x17f8] sm:$0xff] }
 0x7b9   :  { %10373 = vmatpush1.bf16.msra.mxu0 %v17265_v52  ;;  %10229 = vmatprep.subr.bf16.mxu1 %v17408_v57 }
 0x7ba   :  { %10374 = vmatprep.subr.bf16.mxu0 %v17282_v58  ;;  %v17471_v58 = vcombine.low %v3706_v19, %v3714_v61  ;;  %v3762_v19 = vld [vmem:[#allocation12 + $0x1cf0] sm:$0xff]  ;;  %v3627_v61 = vld [vmem:[#allocation12 + $0x18b8] sm:$0xff] }
 0x7bc   :  { %10230 = vmatpush1.bf16.msra.mxu1 %v17407_v51  ;;  %v17488_v51 = vcombine.high %v3722_v49, %v3730_v48 }
 0x7bd   :  { %10375 = vmatpush1.bf16.msra.mxu0 %v17281_v9  ;;  %10231 = vmatprep.subr.bf16.mxu1 %v17424_v10 }
 0x7be   :  { %10376 = vmatprep.subr.bf16.mxu0 %v17298_v11  ;;  %v17362_v11 = vcombine.high %v3595_v50, %v3603_v12 }
 0x7c0   :  { %10232 = vmatpush1.bf16.msra.mxu1 %v17423_v21  ;;  %v3619_v21 = vld [vmem:[#allocation12 + $0x1878] sm:$0xff] }
 0x7c1   :  { %10377 = vmatpush1.bf16.msra.mxu0 %v17297_v38  ;;  %10233 = vmatprep.subr.bf16.mxu1 %v17440_v44  ;;  %v17487_v44 = vcombine.low %v3722_v49, %v3730_v48  ;;  %v3651_v49 = vld [vmem:[#allocation12 + $0x1978] sm:$0xff] }
 0x7c2   :  { %10378 = vmatprep.subr.bf16.mxu0 %v17314_v22  ;;  %v17361_v22 = vcombine.low %v3595_v50, %v3603_v12  ;;  %v3786_v12 = vld [vmem:[#allocation12 + $0x1db0] sm:$0xff] }
 0x7c4   :  { %10234 = vmatpush1.bf16.msra.mxu1 %v17439_v27  ;;  %v17378_v27 = vcombine.high %v3611_v18, %v3619_v21 }
 0x7c5   :  { %10379 = vmatpush1.bf16.msra.mxu0 %v17313_v30  ;;  %10235 = vmatprep.subr.bf16.mxu1 %v17456_v31  ;;  %v3754_v30 = vld [vmem:[#allocation12 + $0x1cb0] sm:$0xff] }
 0x7c6   :  { %v9915_v5 = vpop.f32.mrb[12].mxu1  ;;  %10380 = vmatprep.subr.bf16.mxu0 %v17330_v34  ;;  %v17519_v48 = vcombine.low %v3754_v30, %v3762_v19 }
 0x7c7   :  { %v18423_v45 = vadd.f32 %v9915_v5, %v3899_v2  ;;  %v9917_v62 = vpop.f32.mrb[13].mxu1  ;;  %v3778_v5 = vld [vmem:[#allocation12 + $0x1d70] sm:$0xff] }
 0x7c8   :  { %v18424_v52 = vadd.f32 %v9917_v62, %v3903_v40  ;;  %v9919_v57 = vpop.f32.mrb[14].mxu1  ;;  %10236 = vmatpush1.bf16.msra.mxu1 %v17455_v42  ;;  %v17520_v42 = vcombine.high %v3754_v30, %v3762_v19  ;;  %v3707_v30 = vld [vmem:[#allocation12 + $0x1b38] sm:$0xff]  ;;  %v3907_v19 = vrot.slane %v20666_v28, %v20438_v6 }
 0x7c9   :  { %v10480_v1 = vmul.f32 0.2, %v18423_v45  ;;  %v18425_v3 = vadd.f32 %v9919_v57, %v3899_v2  ;;  %v9921_v33 = vpop.f32.mrb[15].mxu1  ;;  %10381 = vmatpush1.bf16.msra.mxu0 %v17329_v35  ;;  %10237 = vmatprep.subr.bf16.mxu1 %v17472_v56  ;;  %vm10448_vm12 = vcmp.gt.f32.partialorder %v18423_v45, 0.0  ;;  %v3635_v2 = vld [vmem:[#allocation12 + $0x18f8] sm:$0xff]  ;;  %v3770_v56 = vld [vmem:[#allocation12 + $0x1d30] sm:$0xff] }
 0x7ca   :  { %v10481_v9 = vmul.f32 0.2, %v18424_v52  ;;  %v18426_v10 = vadd.f32 %v9921_v33, %v3903_v40  ;;  %10382 = vmatprep.subr.bf16.mxu0 %v17346_v32  ;;  %vm10449_vm13 = vcmp.gt.f32.partialorder %v18424_v52, 0.0  ;;  %v17377_v40 = vcombine.low %v3611_v18, %v3619_v21  ;;  %v3643_v32 = vld [vmem:[#allocation12 + $0x1938] sm:$0xff]  ;;  %v3826_v18 = vld [vmem:[#allocation12 + $0x1ef0] sm:$0xff] }
 0x7cb   :  { %vm10464_vm14 = vcmp.gt.f32.partialorder %v18425_v3, 0.0  ;;  %v10496_v16 = vmul.f32 0.2, %v18425_v3  ;;  %v10512_v15 = vsel %vm10448_vm12, %v18423_v45, %v10480_v1  ;;  %v17394_v35 = vcombine.high %v3627_v61, %v3635_v2  ;;  %v3659_v57 = vld [vmem:[#allocation12 + $0x19b8] sm:$0xff] }
 0x7cc   :  { %vm10465_vm15 = vcmp.gt.f32.partialorder %v18426_v10, 0.0  ;;  %v10497_v38 = vmul.f32 0.2, %v18426_v10  ;;  %10238 = vmatpush1.bf16.msra.mxu1 %v17471_v58  ;;  %v10513_v31 = vsel %vm10449_vm13, %v18424_v52, %v10481_v9  ;;  %v17393_v45 = vcombine.low %v3627_v61, %v3635_v2  ;;  %v3794_v52 = vld [vmem:[#allocation12 + $0x1df0] sm:$0xff]  ;;  %v3667_v58 = vld [vmem:[#allocation12 + $0x19f8] sm:$0xff] }
 0x7cd   :  { %v10528_v23 = vsel %vm10464_vm14, %v18425_v3, %v10496_v16  ;;  %10383 = vmatpush1.bf16.msra.mxu0 %v17345_v4  ;;  %10239 = vmatprep.subr.bf16.mxu1 %v17488_v51  ;;  %v17536_v62 = vcombine.high %v3770_v56, %v3778_v5  ;;  %v17410_v50 = vcombine.high %v3643_v32, %v3651_v49  ;;  %v3802_v4 = vld [vmem:[#allocation12 + $0x1e30] sm:$0xff]  ;;  %v3683_v9 = vld [vmem:[#allocation12 + $0x1a78] sm:$0xff] }
 0x7ce   :  { %v20673_v43 = vpack.c.bf16 %v10528_v23, %v10512_v15  ;;  %10384 = vmatprep.subr.bf16.mxu0 %v17362_v11  ;;  %v10529_v34 = vsel %vm10465_vm15, %v18426_v10, %v10497_v38  ;;  %v17535_v1 = vcombine.low %v3770_v56, %v3778_v5  ;;  %v17409_v3 = vcombine.low %v3643_v32, %v3651_v49  ;;  %v3810_v51 = vld [vmem:[#allocation12 + $0x1e70] sm:$0xff]  ;;  %v3691_v21 = vld [vmem:[#allocation12 + $0x1ab8] sm:$0xff] }
 0x7cf   :  { %v20676_v36 = vpack.c.bf16 %v10529_v34, %v10513_v31  ;;  %v17552_v33 = vcombine.high %v3786_v12, %v3794_v52  ;;  %v17551_v10 = vcombine.low %v3786_v12, %v3794_v52  ;;  %v17425_v11 = vcombine.low %v3659_v57, %v3667_v58  ;;  %v3818_v16 = vld [vmem:[#allocation12 + $0x1eb0] sm:$0xff]  ;;  %v3699_v38 = vld [vmem:[#allocation12 + $0x1af8] sm:$0xff] }
 0x7d0   :  { %10240 = vmatpush1.bf16.msra.mxu1 %v17487_v44  ;;  %v17568_v13 = vcombine.high %v3802_v4, %v3810_v51  ;;  %v17567_v44 = vcombine.low %v3802_v4, %v3810_v51  ;;  %v17584_v15 = vcombine.high %v3818_v16, %v3826_v18  ;;  %v17458_v23 = vcombine.high %v3691_v21, %v3699_v38  ;;  %v3715_v31 = vld [vmem:[#allocation12 + $0x1b78] sm:$0xff] }
 0x7d1   :  { %10385 = vmatpush1.bf16.msra.mxu0 %v17361_v22  ;;  %10241 = vmatprep.subr.bf16.mxu1 %v17504_v26  ;;  %v3834_v26 = vld [vmem:[#allocation12 + $0x1f30] sm:$0xff]  ;;  %v17583_v34 = vcombine.low %v3818_v16, %v3826_v18  ;;  %v3911_v61 = vrot.slane %v20666_v28, %v20441_v8  ;;  %v17457_v2 = vcombine.low %v3691_v21, %v3699_v38  ;;  %v3723_v5 = vld [vmem:[#allocation12 + $0x1bb8] sm:$0xff] }
 0x7d2   :  { %10397 = vmatprep.subr.bf16.mxu0 %v17378_v27  ;;  %v3842_v27 = vld [vmem:[#allocation12 + $0x1f70] sm:$0xff]  ;;  %v3731_v32 = vld [vmem:[#allocation12 + $0x1bf8] sm:$0xff]  ;;  %v17473_v12 = vcombine.low %v3707_v30, %v3715_v31 }
 0x7d3   :  { %v3747_v4 = vld [vmem:[#allocation12 + $0x1c78] sm:$0xff] }
 0x7d4   :  { %10242 = vmatpush1.bf16.msra.mxu1 %v17503_v37  ;;  %10387 = vmatmul.mubr.bf16.vlgmr.msra.gmra.mrb[40].mxu0 %v20542_v60  ;;  %v17426_v60 = vcombine.high %v3659_v57, %v3667_v58  ;;  %v17600_v37 = vcombine.high %v3834_v26, %v3842_v27  ;;  %v3755_v21 = vld [vmem:[#allocation12 + $0x1cb8] sm:$0xff] }
 0x7d5   :  { %10398 = vmatpush1.bf16.msra.mxu0 %v17377_v40  ;;  %10429 = vmatprep.mubr.bf16.mxu0 %v20567_v24  ;;  %v3675_v24 = vld [vmem:[#allocation12 + $0x1a38] sm:$0xff]  ;;  %v17474_v40 = vcombine.high %v3707_v30, %v3715_v31 }
 0x7d6   :  { %10243 = vmatprep.subr.bf16.mxu1 %v17520_v42  ;;  %10399 = vmatprep.subr.bf16.mxu0 %v17394_v35  ;;  %v17442_v14 = vcombine.high %v3675_v24, %v3683_v9  ;;  %v17441_v22 = vcombine.low %v3675_v24, %v3683_v9  ;;  %v3850_v42 = vld [vmem:[#allocation12 + $0x1fb0] sm:$0xff]  ;;  %v3763_v38 = vld [vmem:[#allocation12 + $0x1cf8] sm:$0xff] }
 0x7d7   :  { %v3858_v35 = vld [vmem:[#allocation12 + $0x1ff0] sm:$0xff]  ;;  %v17522_v30 = vcombine.high %v3755_v21, %v3763_v38  ;;  %v3771_v31 = vld [vmem:[#allocation12 + $0x1d38] sm:$0xff] }
 0x7d8   :  { %10244 = vmatpush1.bf16.msra.mxu1 %v17519_v48  ;;  %v17616_v52 = vcombine.high %v3850_v42, %v3858_v35  ;;  %v17615_v24 = vcombine.low %v3850_v42, %v3858_v35  ;;  %v3795_v42 = vld [vmem:[#allocation12 + $0x1df8] sm:$0xff]  ;;  %v18791_v35 = vld [vmem:[#allocation15 + $0x60] ss:$24 sps:$4 sm:$0xff]  }
 0x7d9   :  { %10400 = vmatpush1.bf16.msra.mxu0 %v17393_v45  ;;  %10245 = vmatprep.subr.bf16.mxu1 %v17536_v62  ;;  %v17599_v45 = vcombine.low %v3834_v26, %v3842_v27  ;;  %v18790_v27 = vld [vmem:[#allocation15 + $0x34] ss:$24 sps:$4 sm:$0xff]  }
 0x7da   :  { %10401 = vmatprep.subr.bf16.mxu0 %v17410_v50 }
 0x7dc   :  { %10246 = vmatpush1.bf16.msra.mxu1 %v17535_v1  ;;  %v17490_v1 = vcombine.high %v3723_v5, %v3731_v32 }
 0x7dd   :  { %10402 = vmatpush1.bf16.msra.mxu0 %v17409_v3  ;;  %10247 = vmatprep.subr.bf16.mxu1 %v17552_v33 }
 0x7de   :  { %10403 = vmatprep.subr.bf16.mxu0 %v17426_v60  ;;  %v3739_v60 = vld [vmem:[#allocation12 + $0x1c38] sm:$0xff] }
 0x7df   :  { %v17506_v16 = vcombine.high %v3739_v60, %v3747_v4  ;;  %v17505_v26 = vcombine.low %v3739_v60, %v3747_v4  ;;  %v3843_v60 = vld [vmem:[#allocation12 + $0x1f78] sm:$0xff] }
 0x7e0   :  { %10248 = vmatpush1.bf16.msra.mxu1 %v17551_v10  ;;  %v17489_v10 = vcombine.low %v3723_v5, %v3731_v32  ;;  %v18796_v5 = vld [vmem:[#allocation15 + $0x94] ss:$24 sps:$4 sm:$0xff]   ;;  %v18800_v4 = vld [vmem:[#allocation15 + $0xf0] ss:$24 sps:$4 sm:$0xff]  }
 0x7e1   :  { %10404 = vmatpush1.bf16.msra.mxu0 %v17425_v11  ;;  %10249 = vmatprep.subr.bf16.mxu1 %v17568_v13  ;;  %v18787_v11 = vld [vmem:[#allocation15 + $0x4] ss:$24 sps:$4 sm:$0xff]  }
 0x7e2   :  { %10405 = vmatprep.subr.bf16.mxu0 %v17442_v14 }
 0x7e4   :  { %10250 = vmatpush1.bf16.msra.mxu1 %v17567_v44 }
 0x7e5   :  { %10406 = vmatpush1.bf16.msra.mxu0 %v17441_v22  ;;  %10251 = vmatprep.subr.bf16.mxu1 %v17584_v15  ;;  %v18785_v15 = vld [vmem:[#allocation15] ss:$24 sps:$4 sm:$0xff]  }
 0x7e6   :  { %10407 = vmatprep.subr.bf16.mxu0 %v17458_v23 }
 0x7e7   :  { %v10087_v56 = vpop.f32.mrb[36].mxu0 }
 0x7e8   :  { %v18427_v49 = vadd.f32 %v10087_v56, %v3907_v19  ;;  %10252 = vmatpush1.bf16.msra.mxu1 %v17583_v34  ;;  %v10089_v48 = vpop.f32.mrb[37].mxu0  ;;  %v3779_v34 = vld [vmem:[#allocation12 + $0x1d78] sm:$0xff] }
 0x7e9   :  { %v18428_v62 = vadd.f32 %v10089_v48, %v3911_v61  ;;  %v10091_v50 = vpop.f32.mrb[38].mxu0  ;;  %10408 = vmatpush1.bf16.msra.mxu0 %v17457_v2  ;;  %10253 = vmatprep.subr.bf16.mxu1 %v17600_v37  ;;  %v18793_v2 = vld [vmem:[#allocation15 + $0x64] ss:$24 sps:$4 sm:$0xff]   ;;  %v17538_v37 = vcombine.high %v3771_v31, %v3779_v34  ;;  %v17537_v56 = vcombine.low %v3771_v31, %v3779_v34  ;;  %v3811_v48 = vld [vmem:[#allocation12 + $0x1e78] sm:$0xff] }
 0x7ea   :  { %v10482_v28 = vmul.f32 0.2, %v18427_v49  ;;  %v18429_v57 = vadd.f32 %v10091_v50, %v3907_v19  ;;  %v10093_v58 = vpop.f32.mrb[39].mxu0  ;;  %10409 = vmatprep.subr.bf16.mxu0 %v17474_v40  ;;  %vm10450_vm0 = vcmp.gt.f32.partialorder %v18427_v49, 0.0  ;;  %v18788_v19 = vld [vmem:[#allocation15 + $0x30] ss:$24 sps:$4 sm:$0xff]  }
 0x7eb   :  { %v10483_v3 = vmul.f32 0.2, %v18428_v62  ;;  %v18430_v33 = vadd.f32 %v10093_v58, %v3911_v61  ;;  %vm10451_vm1 = vcmp.gt.f32.partialorder %v18428_v62, 0.0  ;;  %v17521_v61 = vcombine.low %v3755_v21, %v3763_v38  ;;  %v3787_v40 = vld [vmem:[#allocation12 + $0x1db8] sm:$0xff]  ;;  %v18799_v50 = vld [vmem:[#allocation15 + $0xc4] ss:$24 sps:$4 sm:$0xff]  }
 0x7ec   :  { %vm10466_vm2 = vcmp.gt.f32.partialorder %v18429_v57, 0.0  ;;  %v10498_v51 = vmul.f32 0.2, %v18429_v57  ;;  %10254 = vmatpush1.bf16.msra.mxu1 %v17599_v45  ;;  %v10514_v13 = vsel %vm10450_vm0, %v18427_v49, %v10482_v28  ;;  %v17554_v32 = vcombine.high %v3787_v40, %v3795_v42  ;;  %v3803_v49 = vld [vmem:[#allocation12 + $0x1e38] sm:$0xff]  ;;  %v18820_v31 = vld [vmem:[#allocation15 + $0x3c] ss:$24 sps:$4 sm:$0xff]  }
 0x7ed   :  { %vm10467_vm3 = vcmp.gt.f32.partialorder %v18430_v33, 0.0  ;;  %v10499_v9 = vmul.f32 0.2, %v18430_v33  ;;  %10410 = vmatpush1.bf16.msra.mxu0 %v17473_v12  ;;  %10255 = vmatprep.subr.bf16.mxu1 %v17616_v52  ;;  %v10515_v44 = vsel %vm10451_vm1, %v18428_v62, %v10483_v3  ;;  %v18794_v45 = vld [vmem:[#allocation15 + $0x90] ss:$24 sps:$4 sm:$0xff]   ;;  %v17553_v62 = vcombine.low %v3787_v40, %v3795_v42 }
 0x7ee   :  { %v10530_v14 = vsel %vm10466_vm2, %v18429_v57, %v10498_v51  ;;  %10411 = vmatprep.subr.bf16.mxu0 %v17490_v1  ;;  %v17570_v12 = vcombine.high %v3803_v49, %v3811_v48  ;;  %v3819_v52 = vld [vmem:[#allocation12 + $0x1eb8] sm:$0xff]  ;;  %v18797_v57 = vld [vmem:[#allocation15 + $0xc0] ss:$24 sps:$4 sm:$0xff]   ;;  %v17569_v58 = vcombine.low %v3803_v49, %v3811_v48 }
 0x7ef   :  { %v20685_v18 = vpack.c.bf16 %v10530_v14, %v10514_v13  ;;  %v10531_v22 = vsel %vm10467_vm3, %v18430_v33, %v10499_v9  ;;  %v3827_v28 = vld [vmem:[#allocation12 + $0x1ef8] sm:$0xff]  ;;  %v18803_v13 = vld [vmem:[#allocation15 + $0x120] ss:$24 sps:$4 sm:$0xff]  }
 0x7f0   :  { %10256 = vmatpush1.bf16.msra.mxu1 %v17615_v24  ;;  %v20688_v23 = vpack.c.bf16 %v10531_v22, %v10515_v44  ;;  %v18802_v1 = vld [vmem:[#allocation15 + $0xf4] ss:$24 sps:$4 sm:$0xff]   ;;  %v17586_v3 = vcombine.high %v3819_v52, %v3827_v28  ;;  %v17585_v51 = vcombine.low %v3819_v52, %v3827_v28  ;;  %v18805_v24 = vld [vmem:[#allocation15 + $0x124] ss:$24 sps:$4 sm:$0xff]   ;;  %v18806_v38 = vld [vmem:[#allocation15 + $0x150] ss:$24 sps:$4 sm:$0xff]  }
 0x7f1   :  { %10412 = vmatpush1.bf16.msra.mxu0 %v17489_v10  ;;  %15192 = vmatprep.subr.bf16.mxu1 %v18787_v11  ;;  %v3835_v33 = vld [vmem:[#allocation12 + $0x1f38] sm:$0xff]  ;;  %v18811_v22 = vld [vmem:[#allocation15 + $0x184] ss:$24 sps:$4 sm:$0xff]   ;;  %v18833_v49 = vld [vmem:[#allocation15 + $0x240] ss:$24 sps:$4 sm:$0xff]  }
 0x7f2   :  { %10413 = vmatprep.subr.bf16.mxu0 %v17506_v16  ;;  %v17602_v9 = vcombine.high %v3835_v33, %v3843_v60  ;;  %v3851_v10 = vld [vmem:[#allocation12 + $0x1fb8] sm:$0xff]  ;;  %v17601_v14 = vcombine.low %v3835_v33, %v3843_v60  ;;  %v18847_v52 = vld [vmem:[#allocation15 + $0x2a4] ss:$24 sps:$4 sm:$0xff]   ;;  %v18854_v60 = vld [vmem:[#allocation15 + $0x158] ss:$24 sps:$4 sm:$0xff]  }
 0x7f3   :  { %10258 = vmatmul.mubr.bf16.vlgmr.msra.gmra.mrb[16].mxu1 %v20565_v39  ;;  %v3859_v11 = vld [vmem:[#allocation12 + $0x1ff8] sm:$0xff] }
 0x7f4   :  { %15193 = vmatpush1.bf16.msra.mxu1 %v18785_v15  ;;  %15224 = vmatprep.mubr.bf16.mxu1 %v20598_v41  ;;  %v18808_v16 = vld [vmem:[#allocation15 + $0x154] ss:$24 sps:$4 sm:$0xff]   ;;  %v17618_v21 = vcombine.high %v3851_v10, %v3859_v11  ;;  %v17617_v44 = vcombine.low %v3851_v10, %v3859_v11  ;;  %v18815_v34 = vld [vmem:[#allocation15 + $0x1b0] ss:$24 sps:$4 sm:$0xff]  }
 0x7f5   :  { %10414 = vmatpush1.bf16.msra.mxu0 %v17505_v26  ;;  %15194 = vmatprep.subr.bf16.mxu1 %v18790_v27  ;;  %v18814_v15 = vld [vmem:[#allocation15 + $0xc] ss:$24 sps:$4 sm:$0xff]   ;;  %v18809_v26 = vld [vmem:[#allocation15 + $0x180] ss:$24 sps:$4 sm:$0xff]   ;;  %v18851_v33 = vld [vmem:[#allocation15 + $0x2d0] ss:$24 sps:$4 sm:$0xff]  }
 0x7f6   :  { %10415 = vmatprep.subr.bf16.mxu0 %v17522_v30  ;;  %v18812_v27 = vld [vmem:[#allocation15 + $0x8] ss:$24 sps:$4 sm:$0xff]   ;;  %v18817_v30 = vld [vmem:[#allocation15 + $0x1b4] ss:$24 sps:$4 sm:$0xff]  }
 0x7f7   :  { %v18824_v40 = vld [vmem:[#allocation15 + $0x68] ss:$24 sps:$4 sm:$0xff]   ;;  %v18829_v42 = vld [vmem:[#allocation15 + $0x214] ss:$24 sps:$4 sm:$0xff]  }
 0x7f8   :  { %15195 = vmatpush1.bf16.msra.mxu1 %v18788_v19  ;;  %v18818_v19 = vld [vmem:[#allocation15 + $0x38] ss:$24 sps:$4 sm:$0xff]   ;;  %v18836_v48 = vld [vmem:[#allocation15 + $0xc8] ss:$24 sps:$4 sm:$0xff]   ;;  %v18850_v28 = vld [vmem:[#allocation15 + $0x12c] ss:$24 sps:$4 sm:$0xff]  }
 0x7f9   :  { %10416 = vmatpush1.bf16.msra.mxu0 %v17521_v61  ;;  %15196 = vmatprep.subr.bf16.mxu1 %v18793_v2  ;;  %v18823_v61 = vld [vmem:[#allocation15 + $0x1e4] ss:$24 sps:$4 sm:$0xff]   ;;  %v18865_v10 = vld [vmem:[#allocation15 + $0x334] ss:$24 sps:$4 sm:$0xff]  }
 0x7fa   :  { %10417 = vmatprep.subr.bf16.mxu0 %v17538_v37  ;;  %v18826_v2 = vld [vmem:[#allocation15 + $0x6c] ss:$24 sps:$4 sm:$0xff]   ;;  %v18821_v37 = vld [vmem:[#allocation15 + $0x1e0] ss:$24 sps:$4 sm:$0xff]   ;;  %v18868_v11 = vld [vmem:[#allocation15 + $0x1bc] ss:$24 sps:$4 sm:$0xff]  }
 0x7fc   :  { %15197 = vmatpush1.bf16.msra.mxu1 %v18791_v35  ;;  %v18832_v35 = vld [vmem:[#allocation15 + $0x9c] ss:$24 sps:$4 sm:$0xff]  }
 0x7fd   :  { %10418 = vmatpush1.bf16.msra.mxu0 %v17537_v56  ;;  %15198 = vmatprep.subr.bf16.mxu1 %v18796_v5  ;;  %v18827_v56 = vld [vmem:[#allocation15 + $0x210] ss:$24 sps:$4 sm:$0xff]   ;;  %v18835_v5 = vld [vmem:[#allocation15 + $0x244] ss:$24 sps:$4 sm:$0xff]  }
 0x7fe   :  { %10419 = vmatprep.subr.bf16.mxu0 %v17554_v32  ;;  %v18838_v32 = vld [vmem:[#allocation15 + $0xcc] ss:$24 sps:$4 sm:$0xff]  }
 0x800   :  { %15199 = vmatpush1.bf16.msra.mxu1 %v18794_v45  ;;  %v18841_v45 = vld [vmem:[#allocation15 + $0x274] ss:$24 sps:$4 sm:$0xff]  }
 0x801   :  { %10420 = vmatpush1.bf16.msra.mxu0 %v17553_v62  ;;  %15200 = vmatprep.subr.bf16.mxu1 %v18799_v50  ;;  %v18844_v62 = vld [vmem:[#allocation15 + $0xfc] ss:$24 sps:$4 sm:$0xff]   ;;  %v18839_v50 = vld [vmem:[#allocation15 + $0x270] ss:$24 sps:$4 sm:$0xff]  }
 0x802   :  { %10421 = vmatprep.subr.bf16.mxu0 %v17570_v12  ;;  %v18842_v12 = vld [vmem:[#allocation15 + $0xf8] ss:$24 sps:$4 sm:$0xff]  }
 0x804   :  { %15201 = vmatpush1.bf16.msra.mxu1 %v18797_v57  ;;  %v18845_v57 = vld [vmem:[#allocation15 + $0x2a0] ss:$24 sps:$4 sm:$0xff]  }
 0x805   :  { %10422 = vmatpush1.bf16.msra.mxu0 %v17569_v58  ;;  %15202 = vmatprep.subr.bf16.mxu1 %v18802_v1  ;;  %v18848_v58 = vld [vmem:[#allocation15 + $0x128] ss:$24 sps:$4 sm:$0xff]   ;;  %v18853_v1 = vld [vmem:[#allocation15 + $0x2d4] ss:$24 sps:$4 sm:$0xff]  }
 0x806   :  { %10423 = vmatprep.subr.bf16.mxu0 %v17586_v3  ;;  %v18856_v3 = vld [vmem:[#allocation15 + $0x15c] ss:$24 sps:$4 sm:$0xff]  }
 0x808   :  { %15203 = vmatpush1.bf16.msra.mxu1 %v18800_v4  ;;  %v18859_v4 = vld [vmem:[#allocation15 + $0x304] ss:$24 sps:$4 sm:$0xff]  }
 0x809   :  { %10424 = vmatpush1.bf16.msra.mxu0 %v17585_v51  ;;  %15204 = vmatprep.subr.bf16.mxu1 %v18805_v24  ;;  %v18862_v51 = vld [vmem:[#allocation15 + $0x18c] ss:$24 sps:$4 sm:$0xff]   ;;  %v18857_v24 = vld [vmem:[#allocation15 + $0x300] ss:$24 sps:$4 sm:$0xff]  }
 0x80a   :  { %10425 = vmatprep.subr.bf16.mxu0 %v17602_v9  ;;  %v18860_v9 = vld [vmem:[#allocation15 + $0x188] ss:$24 sps:$4 sm:$0xff]  }
 0x80c   :  { %15205 = vmatpush1.bf16.msra.mxu1 %v18803_v13  ;;  %v18863_v13 = vld [vmem:[#allocation15 + $0x330] ss:$24 sps:$4 sm:$0xff]  }
 0x80d   :  { %10426 = vmatpush1.bf16.msra.mxu0 %v17601_v14  ;;  %15206 = vmatprep.subr.bf16.mxu1 %v18808_v16  ;;  %v18866_v14 = vld [vmem:[#allocation15 + $0x1b8] ss:$24 sps:$4 sm:$0xff]   ;;  %v18871_v16 = vld [vmem:[#allocation15 + $0x364] ss:$24 sps:$4 sm:$0xff]  }
 0x80e   :  { %10427 = vmatprep.subr.bf16.mxu0 %v17618_v21  ;;  %v18874_v21 = vld [vmem:[#allocation15 + $0x1ec] ss:$24 sps:$4 sm:$0xff]  }
 0x810   :  { %15207 = vmatpush1.bf16.msra.mxu1 %v18806_v38  ;;  %v18869_v38 = vld [vmem:[#allocation15 + $0x360] ss:$24 sps:$4 sm:$0xff]  }
 0x811   :  { %10428 = vmatpush1.bf16.msra.mxu0 %v17617_v44  ;;  %15208 = vmatprep.subr.bf16.mxu1 %v18811_v22  ;;  %v18872_v44 = vld [vmem:[#allocation15 + $0x1e8] ss:$24 sps:$4 sm:$0xff]   ;;  %v18877_v22 = vld [vmem:[#allocation15 + $0x394] ss:$24 sps:$4 sm:$0xff]  }
 0x812   :  { %15536 = vmatprep.subr.bf16.mxu0 %v18814_v15  ;;  %v18880_v15 = vld [vmem:[#allocation15 + $0x21c] ss:$24 sps:$4 sm:$0xff]  }
 0x814   :  { %15209 = vmatpush1.bf16.msra.mxu1 %v18809_v26  ;;  %10430 = vmatmul.mubr.bf16.vlgmr.msra.gmra.mrb[40].mxu0 %v20565_v39  ;;  %v18830_v39 = vld [vmem:[#allocation15 + $0x98] ss:$24 sps:$4 sm:$0xff]  }
 0x815   :  { %15537 = vmatpush1.bf16.msra.mxu0 %v18812_v27  ;;  %15568 = vmatprep.mubr.bf16.mxu0 %v20598_v41  ;;  %v18875_v26 = vld [vmem:[#allocation15 + $0x390] ss:$24 sps:$4 sm:$0xff]  }
 0x816   :  { %15210 = vmatprep.subr.bf16.mxu1 %v18817_v30  ;;  %15538 = vmatprep.subr.bf16.mxu0 %v18820_v31  ;;  %v18878_v27 = vld [vmem:[#allocation15 + $0x218] ss:$24 sps:$4 sm:$0xff]   ;;  %v18883_v30 = vld [vmem:[#allocation15 + $0x3c4] ss:$24 sps:$4 sm:$0xff]  }
 0x817   :  { %v18886_v31 = vld [vmem:[#allocation15 + $0x24c] ss:$24 sps:$4 sm:$0xff]  }
 0x818   :  { %15211 = vmatpush1.bf16.msra.mxu1 %v18815_v34  ;;  %v18881_v34 = vld [vmem:[#allocation15 + $0x3c0] ss:$24 sps:$4 sm:$0xff]  }
 0x819   :  { %15539 = vmatpush1.bf16.msra.mxu0 %v18818_v19  ;;  %15212 = vmatprep.subr.bf16.mxu1 %v18823_v61  ;;  %v18884_v19 = vld [vmem:[#allocation15 + $0x248] ss:$24 sps:$4 sm:$0xff]   ;;  %v18889_v61 = vld [vmem:[#allocation15 + $0x3f4] ss:$24 sps:$4 sm:$0xff]  }
 0x81a   :  { %15540 = vmatprep.subr.bf16.mxu0 %v18826_v2  ;;  %v18892_v2 = vld [vmem:[#allocation15 + $0x27c] ss:$24 sps:$4 sm:$0xff]  }
 0x81c   :  { %15213 = vmatpush1.bf16.msra.mxu1 %v18821_v37  ;;  %v18887_v37 = vld [vmem:[#allocation15 + $0x3f0] ss:$24 sps:$4 sm:$0xff]  }
 0x81d   :  { %15541 = vmatpush1.bf16.msra.mxu0 %v18824_v40  ;;  %15214 = vmatprep.subr.bf16.mxu1 %v18829_v42  ;;  %v18890_v40 = vld [vmem:[#allocation15 + $0x278] ss:$24 sps:$4 sm:$0xff]   ;;  %v18895_v42 = vld [vmem:[#allocation15 + $0x424] ss:$24 sps:$4 sm:$0xff]  }
 0x81e   :  { %15542 = vmatprep.subr.bf16.mxu0 %v18832_v35  ;;  %v18898_v35 = vld [vmem:[#allocation15 + $0x2ac] ss:$24 sps:$4 sm:$0xff]  }
 0x820   :  { %15215 = vmatpush1.bf16.msra.mxu1 %v18827_v56  ;;  %v18893_v56 = vld [vmem:[#allocation15 + $0x420] ss:$24 sps:$4 sm:$0xff]  }
 0x821   :  { %15543 = vmatpush1.bf16.msra.mxu0 %v18830_v39  ;;  %15216 = vmatprep.subr.bf16.mxu1 %v18835_v5  ;;  %v18896_v39 = vld [vmem:[#allocation15 + $0x2a8] ss:$24 sps:$4 sm:$0xff]   ;;  %v18901_v5 = vld [vmem:[#allocation15 + $0x454] ss:$24 sps:$4 sm:$0xff]  }
 0x822   :  { %15544 = vmatprep.subr.bf16.mxu0 %v18838_v32  ;;  %v18904_v32 = vld [vmem:[#allocation15 + $0x2dc] ss:$24 sps:$4 sm:$0xff]  }
 0x824   :  { %15217 = vmatpush1.bf16.msra.mxu1 %v18833_v49  ;;  %v18899_v49 = vld [vmem:[#allocation15 + $0x450] ss:$24 sps:$4 sm:$0xff]  }
 0x825   :  { %15545 = vmatpush1.bf16.msra.mxu0 %v18836_v48  ;;  %15218 = vmatprep.subr.bf16.mxu1 %v18841_v45  ;;  %v18902_v48 = vld [vmem:[#allocation15 + $0x2d8] ss:$24 sps:$4 sm:$0xff]   ;;  %v18907_v45 = vld [vmem:[#allocation15 + $0x484] ss:$24 sps:$4 sm:$0xff]  }
 0x826   :  { %15546 = vmatprep.subr.bf16.mxu0 %v18844_v62  ;;  %v18910_v62 = vld [vmem:[#allocation15 + $0x30c] ss:$24 sps:$4 sm:$0xff]  }
 0x828   :  { %15219 = vmatpush1.bf16.msra.mxu1 %v18839_v50  ;;  %v18905_v50 = vld [vmem:[#allocation15 + $0x480] ss:$24 sps:$4 sm:$0xff]  }
 0x829   :  { %15547 = vmatpush1.bf16.msra.mxu0 %v18842_v12  ;;  %15220 = vmatprep.subr.bf16.mxu1 %v18847_v52  ;;  %v18908_v12 = vld [vmem:[#allocation15 + $0x308] ss:$24 sps:$4 sm:$0xff]   ;;  %v18913_v52 = vld [vmem:[#allocation15 + $0x4b4] ss:$24 sps:$4 sm:$0xff]  }
 0x82a   :  { %15548 = vmatprep.subr.bf16.mxu0 %v18850_v28  ;;  %v18916_v28 = vld [vmem:[#allocation15 + $0x33c] ss:$24 sps:$4 sm:$0xff]  }
 0x82c   :  { %15221 = vmatpush1.bf16.msra.mxu1 %v18845_v57  ;;  %v18911_v57 = vld [vmem:[#allocation15 + $0x4b0] ss:$24 sps:$4 sm:$0xff]  }
 0x82d   :  { %15549 = vmatpush1.bf16.msra.mxu0 %v18848_v58  ;;  %15222 = vmatprep.subr.bf16.mxu1 %v18853_v1  ;;  %v18914_v58 = vld [vmem:[#allocation15 + $0x338] ss:$24 sps:$4 sm:$0xff]   ;;  %v18919_v1 = vld [vmem:[#allocation15 + $0x4e4] ss:$24 sps:$4 sm:$0xff]  }
 0x82e   :  { %15550 = vmatprep.subr.bf16.mxu0 %v18856_v3  ;;  %v18922_v3 = vld [vmem:[#allocation15 + $0x36c] ss:$24 sps:$4 sm:$0xff]  }
 0x830   :  { %15223 = vmatpush1.bf16.msra.mxu1 %v18851_v33  ;;  %v18917_v33 = vld [vmem:[#allocation15 + $0x4e0] ss:$24 sps:$4 sm:$0xff]  }
 0x831   :  { %15551 = vmatpush1.bf16.msra.mxu0 %v18854_v60  ;;  %15235 = vmatprep.subr.bf16.mxu1 %v18859_v4  ;;  %v18920_v60 = vld [vmem:[#allocation15 + $0x368] ss:$24 sps:$4 sm:$0xff]   ;;  %v18925_v4 = vld [vmem:[#allocation15 + $0x514] ss:$24 sps:$4 sm:$0xff]  }
 0x832   :  { %15552 = vmatprep.subr.bf16.mxu0 %v18862_v51  ;;  %v18928_v51 = vld [vmem:[#allocation15 + $0x39c] ss:$24 sps:$4 sm:$0xff]  }
 0x833   :  { %15225 = vmatmul.mubr.bf16.vlgmr.msra.gmra.mrb[20].mxu1 %v20595_v63 }
 0x834   :  { %15236 = vmatpush1.bf16.msra.mxu1 %v18857_v24  ;;  %15267 = vmatprep.mubr.bf16.mxu1 %v20611_v0  ;;  %v18923_v24 = vld [vmem:[#allocation15 + $0x510] ss:$24 sps:$4 sm:$0xff]  }
 0x835   :  { %15553 = vmatpush1.bf16.msra.mxu0 %v18860_v9  ;;  %15237 = vmatprep.subr.bf16.mxu1 %v18865_v10  ;;  %v18926_v9 = vld [vmem:[#allocation15 + $0x398] ss:$24 sps:$4 sm:$0xff]   ;;  %v18931_v10 = vld [vmem:[#allocation15 + $0x544] ss:$24 sps:$4 sm:$0xff]  }
 0x836   :  { %15554 = vmatprep.subr.bf16.mxu0 %v18868_v11  ;;  %v18934_v11 = vld [vmem:[#allocation15 + $0x3cc] ss:$24 sps:$4 sm:$0xff]  }
 0x838   :  { %15238 = vmatpush1.bf16.msra.mxu1 %v18863_v13  ;;  %v18929_v13 = vld [vmem:[#allocation15 + $0x540] ss:$24 sps:$4 sm:$0xff]  }
 0x839   :  { %15555 = vmatpush1.bf16.msra.mxu0 %v18866_v14  ;;  %15239 = vmatprep.subr.bf16.mxu1 %v18871_v16  ;;  %v18932_v14 = vld [vmem:[#allocation15 + $0x3c8] ss:$24 sps:$4 sm:$0xff]   ;;  %v18937_v16 = vld [vmem:[#allocation15 + $0x574] ss:$24 sps:$4 sm:$0xff]  }
 0x83a   :  { %15556 = vmatprep.subr.bf16.mxu0 %v18874_v21  ;;  %v18940_v21 = vld [vmem:[#allocation15 + $0x3fc] ss:$24 sps:$4 sm:$0xff]  }
 0x83c   :  { %15240 = vmatpush1.bf16.msra.mxu1 %v18869_v38  ;;  %v18935_v38 = vld [vmem:[#allocation15 + $0x570] ss:$24 sps:$4 sm:$0xff]  }
 0x83d   :  { %15557 = vmatpush1.bf16.msra.mxu0 %v18872_v44  ;;  %15241 = vmatprep.subr.bf16.mxu1 %v18877_v22  ;;  %v18938_v44 = vld [vmem:[#allocation15 + $0x3f8] ss:$24 sps:$4 sm:$0xff]   ;;  %v18943_v22 = vld [vmem:[#allocation15 + $0x5a4] ss:$24 sps:$4 sm:$0xff]  }
 0x83e   :  { %15558 = vmatprep.subr.bf16.mxu0 %v18880_v15  ;;  %v18946_v15 = vld [vmem:[#allocation15 + $0x42c] ss:$24 sps:$4 sm:$0xff]  }
 0x840   :  { %15242 = vmatpush1.bf16.msra.mxu1 %v18875_v26  ;;  %v18941_v26 = vld [vmem:[#allocation15 + $0x5a0] ss:$24 sps:$4 sm:$0xff]  }
 0x841   :  { %15559 = vmatpush1.bf16.msra.mxu0 %v18878_v27  ;;  %15243 = vmatprep.subr.bf16.mxu1 %v18883_v30  ;;  %v18944_v27 = vld [vmem:[#allocation15 + $0x428] ss:$24 sps:$4 sm:$0xff]   ;;  %v18949_v30 = vld [vmem:[#allocation15 + $0x5d4] ss:$24 sps:$4 sm:$0xff]  }
 0x842   :  { %15560 = vmatprep.subr.bf16.mxu0 %v18886_v31  ;;  %v18952_v31 = vld [vmem:[#allocation15 + $0x45c] ss:$24 sps:$4 sm:$0xff]  }
 0x844   :  { %15244 = vmatpush1.bf16.msra.mxu1 %v18881_v34  ;;  %v18947_v34 = vld [vmem:[#allocation15 + $0x5d0] ss:$24 sps:$4 sm:$0xff]  }
 0x845   :  { %15561 = vmatpush1.bf16.msra.mxu0 %v18884_v19  ;;  %15245 = vmatprep.subr.bf16.mxu1 %v18889_v61  ;;  %v18950_v19 = vld [vmem:[#allocation15 + $0x458] ss:$24 sps:$4 sm:$0xff]   ;;  %v18955_v61 = vld [vmem:[#allocation15 + $0x604] ss:$24 sps:$4 sm:$0xff]  }
 0x846   :  { %15562 = vmatprep.subr.bf16.mxu0 %v18892_v2  ;;  %v18958_v2 = vld [vmem:[#allocation15 + $0x48c] ss:$24 sps:$4 sm:$0xff]  }
 0x848   :  { %15246 = vmatpush1.bf16.msra.mxu1 %v18887_v37  ;;  %v18953_v37 = vld [vmem:[#allocation15 + $0x600] ss:$24 sps:$4 sm:$0xff]  }
 0x849   :  { %15563 = vmatpush1.bf16.msra.mxu0 %v18890_v40  ;;  %15247 = vmatprep.subr.bf16.mxu1 %v18895_v42  ;;  %v18956_v40 = vld [vmem:[#allocation15 + $0x488] ss:$24 sps:$4 sm:$0xff]   ;;  %v18961_v42 = vld [vmem:[#allocation15 + $0x634] ss:$24 sps:$4 sm:$0xff]  }
 0x84a   :  { %15564 = vmatprep.subr.bf16.mxu0 %v18898_v35  ;;  %v18964_v35 = vld [vmem:[#allocation15 + $0x4bc] ss:$24 sps:$4 sm:$0xff]  }
 0x84c   :  { %15248 = vmatpush1.bf16.msra.mxu1 %v18893_v56  ;;  %v18959_v56 = vld [vmem:[#allocation15 + $0x630] ss:$24 sps:$4 sm:$0xff]  }
 0x84d   :  { %15565 = vmatpush1.bf16.msra.mxu0 %v18896_v39  ;;  %15249 = vmatprep.subr.bf16.mxu1 %v18901_v5  ;;  %v18962_v39 = vld [vmem:[#allocation15 + $0x4b8] ss:$24 sps:$4 sm:$0xff]   ;;  %v18967_v5 = vld [vmem:[#allocation15 + $0x664] ss:$24 sps:$4 sm:$0xff]  }
 0x84e   :  { %15566 = vmatprep.subr.bf16.mxu0 %v18904_v32  ;;  %v18970_v32 = vld [vmem:[#allocation15 + $0x4ec] ss:$24 sps:$4 sm:$0xff]  }
 0x850   :  { %15250 = vmatpush1.bf16.msra.mxu1 %v18899_v49  ;;  %v18965_v49 = vld [vmem:[#allocation15 + $0x660] ss:$24 sps:$4 sm:$0xff]  }
 0x851   :  { %15567 = vmatpush1.bf16.msra.mxu0 %v18902_v48  ;;  %15251 = vmatprep.subr.bf16.mxu1 %v18907_v45  ;;  %v18968_v48 = vld [vmem:[#allocation15 + $0x4e8] ss:$24 sps:$4 sm:$0xff]   ;;  %v18973_v45 = vld [vmem:[#allocation15 + $0x694] ss:$24 sps:$4 sm:$0xff]  }
 0x852   :  { %15579 = vmatprep.subr.bf16.mxu0 %v18910_v62  ;;  %v18976_v62 = vld [vmem:[#allocation15 + $0x51c] ss:$24 sps:$4 sm:$0xff]  }
 0x854   :  { %15252 = vmatpush1.bf16.msra.mxu1 %v18905_v50  ;;  %15569 = vmatmul.mubr.bf16.vlgmr.msra.gmra.mrb[44].mxu0 %v20595_v63  ;;  %v18971_v50 = vld [vmem:[#allocation15 + $0x690] ss:$24 sps:$4 sm:$0xff]  }
 0x855   :  { %15580 = vmatpush1.bf16.msra.mxu0 %v18908_v12  ;;  %15611 = vmatprep.mubr.bf16.mxu0 %v20611_v0  ;;  %v18974_v12 = vld [vmem:[#allocation15 + $0x518] ss:$24 sps:$4 sm:$0xff]  }
 0x856   :  { %15253 = vmatprep.subr.bf16.mxu1 %v18913_v52  ;;  %15581 = vmatprep.subr.bf16.mxu0 %v18916_v28  ;;  %v18979_v52 = vld [vmem:[#allocation15 + $0x6c4] ss:$24 sps:$4 sm:$0xff]  }
 0x857   :  { %v18982_v28 = vld [vmem:[#allocation15 + $0x54c] ss:$24 sps:$4 sm:$0xff]  }
 0x858   :  { %15254 = vmatpush1.bf16.msra.mxu1 %v18911_v57  ;;  %v18977_v57 = vld [vmem:[#allocation15 + $0x6c0] ss:$24 sps:$4 sm:$0xff]  }
 0x859   :  { %15582 = vmatpush1.bf16.msra.mxu0 %v18914_v58  ;;  %15255 = vmatprep.subr.bf16.mxu1 %v18919_v1  ;;  %v18980_v58 = vld [vmem:[#allocation15 + $0x548] ss:$24 sps:$4 sm:$0xff]   ;;  %v18985_v1 = vld [vmem:[#allocation15 + $0x6f4] ss:$24 sps:$4 sm:$0xff]  }
 0x85a   :  { %15583 = vmatprep.subr.bf16.mxu0 %v18922_v3  ;;  %v18988_v3 = vld [vmem:[#allocation15 + $0x57c] ss:$24 sps:$4 sm:$0xff]  }
 0x85c   :  { %15256 = vmatpush1.bf16.msra.mxu1 %v18917_v33  ;;  %v18983_v33 = vld [vmem:[#allocation15 + $0x6f0] ss:$24 sps:$4 sm:$0xff]  }
 0x85d   :  { %15584 = vmatpush1.bf16.msra.mxu0 %v18920_v60  ;;  %15257 = vmatprep.subr.bf16.mxu1 %v18925_v4  ;;  %v18986_v60 = vld [vmem:[#allocation15 + $0x578] ss:$24 sps:$4 sm:$0xff]   ;;  %v18991_v4 = vld [vmem:[#allocation15 + $0x724] ss:$24 sps:$4 sm:$0xff]  }
 0x85e   :  { %15585 = vmatprep.subr.bf16.mxu0 %v18928_v51  ;;  %v18994_v51 = vld [vmem:[#allocation15 + $0x5ac] ss:$24 sps:$4 sm:$0xff]  }
 0x860   :  { %15258 = vmatpush1.bf16.msra.mxu1 %v18923_v24  ;;  %v18989_v24 = vld [vmem:[#allocation15 + $0x720] ss:$24 sps:$4 sm:$0xff]  }
 0x861   :  { %15586 = vmatpush1.bf16.msra.mxu0 %v18926_v9  ;;  %15259 = vmatprep.subr.bf16.mxu1 %v18931_v10  ;;  %v18992_v9 = vld [vmem:[#allocation15 + $0x5a8] ss:$24 sps:$4 sm:$0xff]   ;;  %v18997_v10 = vld [vmem:[#allocation15 + $0x754] ss:$24 sps:$4 sm:$0xff]  }
 0x862   :  { %15587 = vmatprep.subr.bf16.mxu0 %v18934_v11  ;;  %v19000_v11 = vld [vmem:[#allocation15 + $0x5dc] ss:$24 sps:$4 sm:$0xff]  }
 0x864   :  { %15260 = vmatpush1.bf16.msra.mxu1 %v18929_v13  ;;  %v18995_v13 = vld [vmem:[#allocation15 + $0x750] ss:$24 sps:$4 sm:$0xff]  }
 0x865   :  { %15588 = vmatpush1.bf16.msra.mxu0 %v18932_v14  ;;  %15261 = vmatprep.subr.bf16.mxu1 %v18937_v16  ;;  %v18998_v14 = vld [vmem:[#allocation15 + $0x5d8] ss:$24 sps:$4 sm:$0xff]   ;;  %v19003_v16 = vld [vmem:[#allocation15 + $0x784] ss:$24 sps:$4 sm:$0xff]  }
 0x866   :  { %15589 = vmatprep.subr.bf16.mxu0 %v18940_v21  ;;  %v19006_v21 = vld [vmem:[#allocation15 + $0x60c] ss:$24 sps:$4 sm:$0xff]  }
 0x868   :  { %15262 = vmatpush1.bf16.msra.mxu1 %v18935_v38  ;;  %v19001_v38 = vld [vmem:[#allocation15 + $0x780] ss:$24 sps:$4 sm:$0xff]  }
 0x869   :  { %15590 = vmatpush1.bf16.msra.mxu0 %v18938_v44  ;;  %15263 = vmatprep.subr.bf16.mxu1 %v18943_v22  ;;  %v19004_v44 = vld [vmem:[#allocation15 + $0x608] ss:$24 sps:$4 sm:$0xff]   ;;  %v19009_v22 = vld [vmem:[#allocation15 + $0x7b4] ss:$24 sps:$4 sm:$0xff]  }
 0x86a   :  { %15591 = vmatprep.subr.bf16.mxu0 %v18946_v15  ;;  %v19012_v15 = vld [vmem:[#allocation15 + $0x63c] ss:$24 sps:$4 sm:$0xff]  }
 0x86c   :  { %15264 = vmatpush1.bf16.msra.mxu1 %v18941_v26  ;;  %v19007_v26 = vld [vmem:[#allocation15 + $0x7b0] ss:$24 sps:$4 sm:$0xff]  }
 0x86d   :  { %15592 = vmatpush1.bf16.msra.mxu0 %v18944_v27  ;;  %15265 = vmatprep.subr.bf16.mxu1 %v18949_v30  ;;  %v19010_v27 = vld [vmem:[#allocation15 + $0x638] ss:$24 sps:$4 sm:$0xff]   ;;  %v19015_v30 = vld [vmem:[#allocation15 + $0x7e4] ss:$24 sps:$4 sm:$0xff]  }
 0x86e   :  { %15593 = vmatprep.subr.bf16.mxu0 %v18952_v31  ;;  %v19018_v31 = vld [vmem:[#allocation15 + $0x66c] ss:$24 sps:$4 sm:$0xff]  }
 0x870   :  { %15266 = vmatpush1.bf16.msra.mxu1 %v18947_v34  ;;  %v19013_v34 = vld [vmem:[#allocation15 + $0x7e0] ss:$24 sps:$4 sm:$0xff]  }
 0x871   :  { %15594 = vmatpush1.bf16.msra.mxu0 %v18950_v19  ;;  %15278 = vmatprep.subr.bf16.mxu1 %v18955_v61  ;;  %v19016_v19 = vld [vmem:[#allocation15 + $0x668] ss:$24 sps:$4 sm:$0xff]   ;;  %v19021_v61 = vld [vmem:[#allocation15 + $0x814] ss:$24 sps:$4 sm:$0xff]  }
 0x872   :  { %15595 = vmatprep.subr.bf16.mxu0 %v18958_v2  ;;  %v19024_v2 = vld [vmem:[#allocation15 + $0x69c] ss:$24 sps:$4 sm:$0xff]  }
 0x873   :  { %15268 = vmatmul.mubr.bf16.vlgmr.msra.gmra.mrb[20].mxu1 %v20607_v46 }
 0x874   :  { %15279 = vmatpush1.bf16.msra.mxu1 %v18953_v37  ;;  %15310 = vmatprep.mubr.bf16.mxu1 %v20637_v20  ;;  %v19019_v37 = vld [vmem:[#allocation15 + $0x810] ss:$24 sps:$4 sm:$0xff]  }
 0x875   :  { %15596 = vmatpush1.bf16.msra.mxu0 %v18956_v40  ;;  %15280 = vmatprep.subr.bf16.mxu1 %v18961_v42  ;;  %v19022_v40 = vld [vmem:[#allocation15 + $0x698] ss:$24 sps:$4 sm:$0xff]   ;;  %v19027_v42 = vld [vmem:[#allocation15 + $0x844] ss:$24 sps:$4 sm:$0xff]  }
 0x876   :  { %15597 = vmatprep.subr.bf16.mxu0 %v18964_v35  ;;  %v19030_v35 = vld [vmem:[#allocation15 + $0x6cc] ss:$24 sps:$4 sm:$0xff]  }
 0x878   :  { %15281 = vmatpush1.bf16.msra.mxu1 %v18959_v56  ;;  %v19025_v56 = vld [vmem:[#allocation15 + $0x840] ss:$24 sps:$4 sm:$0xff]  }
 0x879   :  { %15598 = vmatpush1.bf16.msra.mxu0 %v18962_v39  ;;  %15282 = vmatprep.subr.bf16.mxu1 %v18967_v5  ;;  %v19028_v39 = vld [vmem:[#allocation15 + $0x6c8] ss:$24 sps:$4 sm:$0xff]   ;;  %v19033_v5 = vld [vmem:[#allocation15 + $0x874] ss:$24 sps:$4 sm:$0xff]  }
 0x87a   :  { %15599 = vmatprep.subr.bf16.mxu0 %v18970_v32  ;;  %v19036_v32 = vld [vmem:[#allocation15 + $0x6fc] ss:$24 sps:$4 sm:$0xff]  }
 0x87c   :  { %15283 = vmatpush1.bf16.msra.mxu1 %v18965_v49  ;;  %v19031_v49 = vld [vmem:[#allocation15 + $0x870] ss:$24 sps:$4 sm:$0xff]  }
 0x87d   :  { %15600 = vmatpush1.bf16.msra.mxu0 %v18968_v48  ;;  %15284 = vmatprep.subr.bf16.mxu1 %v18973_v45  ;;  %v19034_v48 = vld [vmem:[#allocation15 + $0x6f8] ss:$24 sps:$4 sm:$0xff]   ;;  %v19039_v45 = vld [vmem:[#allocation15 + $0x8a4] ss:$24 sps:$4 sm:$0xff]  }
 0x87e   :  { %15601 = vmatprep.subr.bf16.mxu0 %v18976_v62  ;;  %v19042_v62 = vld [vmem:[#allocation15 + $0x72c] ss:$24 sps:$4 sm:$0xff]  }
 0x880   :  { %15285 = vmatpush1.bf16.msra.mxu1 %v18971_v50  ;;  %v19037_v50 = vld [vmem:[#allocation15 + $0x8a0] ss:$24 sps:$4 sm:$0xff]  }
 0x881   :  { %15602 = vmatpush1.bf16.msra.mxu0 %v18974_v12  ;;  %15286 = vmatprep.subr.bf16.mxu1 %v18979_v52  ;;  %v19040_v12 = vld [vmem:[#allocation15 + $0x728] ss:$24 sps:$4 sm:$0xff]   ;;  %v19045_v52 = vld [vmem:[#allocation15 + $0x8d4] ss:$24 sps:$4 sm:$0xff]  }
 0x882   :  { %15603 = vmatprep.subr.bf16.mxu0 %v18982_v28  ;;  %v19048_v28 = vld [vmem:[#allocation15 + $0x75c] ss:$24 sps:$4 sm:$0xff]  }
 0x884   :  { %15287 = vmatpush1.bf16.msra.mxu1 %v18977_v57  ;;  %v19043_v57 = vld [vmem:[#allocation15 + $0x8d0] ss:$24 sps:$4 sm:$0xff]  }
 0x885   :  { %15604 = vmatpush1.bf16.msra.mxu0 %v18980_v58  ;;  %15288 = vmatprep.subr.bf16.mxu1 %v18985_v1  ;;  %v19046_v58 = vld [vmem:[#allocation15 + $0x758] ss:$24 sps:$4 sm:$0xff]   ;;  %v19051_v1 = vld [vmem:[#allocation15 + $0x904] ss:$24 sps:$4 sm:$0xff]  }
 0x886   :  { %15605 = vmatprep.subr.bf16.mxu0 %v18988_v3  ;;  %v19054_v3 = vld [vmem:[#allocation15 + $0x78c] ss:$24 sps:$4 sm:$0xff]  }
 0x888   :  { %15289 = vmatpush1.bf16.msra.mxu1 %v18983_v33  ;;  %v19049_v33 = vld [vmem:[#allocation15 + $0x900] ss:$24 sps:$4 sm:$0xff]  }
 0x889   :  { %15606 = vmatpush1.bf16.msra.mxu0 %v18986_v60  ;;  %15290 = vmatprep.subr.bf16.mxu1 %v18991_v4  ;;  %v19052_v60 = vld [vmem:[#allocation15 + $0x788] ss:$24 sps:$4 sm:$0xff]   ;;  %v19057_v4 = vld [vmem:[#allocation15 + $0x934] ss:$24 sps:$4 sm:$0xff]  }
 0x88a   :  { %15607 = vmatprep.subr.bf16.mxu0 %v18994_v51  ;;  %v19060_v51 = vld [vmem:[#allocation15 + $0x7bc] ss:$24 sps:$4 sm:$0xff]  }
 0x88c   :  { %15291 = vmatpush1.bf16.msra.mxu1 %v18989_v24  ;;  %v19055_v24 = vld [vmem:[#allocation15 + $0x930] ss:$24 sps:$4 sm:$0xff]  }
 0x88d   :  { %15608 = vmatpush1.bf16.msra.mxu0 %v18992_v9  ;;  %15292 = vmatprep.subr.bf16.mxu1 %v18997_v10  ;;  %v19058_v9 = vld [vmem:[#allocation15 + $0x7b8] ss:$24 sps:$4 sm:$0xff]   ;;  %v19063_v10 = vld [vmem:[#allocation15 + $0x964] ss:$24 sps:$4 sm:$0xff]  }
 0x88e   :  { %15609 = vmatprep.subr.bf16.mxu0 %v19000_v11  ;;  %v19066_v11 = vld [vmem:[#allocation15 + $0x7ec] ss:$24 sps:$4 sm:$0xff]  }
 0x890   :  { %15293 = vmatpush1.bf16.msra.mxu1 %v18995_v13  ;;  %v19061_v13 = vld [vmem:[#allocation15 + $0x960] ss:$24 sps:$4 sm:$0xff]  }
 0x891   :  { %15610 = vmatpush1.bf16.msra.mxu0 %v18998_v14  ;;  %15294 = vmatprep.subr.bf16.mxu1 %v19003_v16  ;;  %v19064_v14 = vld [vmem:[#allocation15 + $0x7e8] ss:$24 sps:$4 sm:$0xff]   ;;  %v19069_v16 = vld [vmem:[#allocation15 + $0x994] ss:$24 sps:$4 sm:$0xff]  }
 0x892   :  { %15622 = vmatprep.subr.bf16.mxu0 %v19006_v21  ;;  %v19072_v21 = vld [vmem:[#allocation15 + $0x81c] ss:$24 sps:$4 sm:$0xff]  }
 0x894   :  { %15295 = vmatpush1.bf16.msra.mxu1 %v19001_v38  ;;  %15612 = vmatmul.mubr.bf16.vlgmr.msra.gmra.mrb[44].mxu0 %v20607_v46  ;;  %v19067_v38 = vld [vmem:[#allocation15 + $0x990] ss:$24 sps:$4 sm:$0xff]  }
 0x895   :  { %15623 = vmatpush1.bf16.msra.mxu0 %v19004_v44  ;;  %15654 = vmatprep.mubr.bf16.mxu0 %v20637_v20  ;;  %v19070_v44 = vld [vmem:[#allocation15 + $0x818] ss:$24 sps:$4 sm:$0xff]  }
 0x896   :  { %15296 = vmatprep.subr.bf16.mxu1 %v19009_v22  ;;  %15624 = vmatprep.subr.bf16.mxu0 %v19012_v15  ;;  %v19075_v22 = vld [vmem:[#allocation15 + $0x9c4] ss:$24 sps:$4 sm:$0xff]  }
 0x897   :  { %v19078_v15 = vld [vmem:[#allocation15 + $0x84c] ss:$24 sps:$4 sm:$0xff]  }
 0x898   :  { %15297 = vmatpush1.bf16.msra.mxu1 %v19007_v26  ;;  %v19073_v26 = vld [vmem:[#allocation15 + $0x9c0] ss:$24 sps:$4 sm:$0xff]  }
 0x899   :  { %15625 = vmatpush1.bf16.msra.mxu0 %v19010_v27  ;;  %15298 = vmatprep.subr.bf16.mxu1 %v19015_v30  ;;  %v19076_v27 = vld [vmem:[#allocation15 + $0x848] ss:$24 sps:$4 sm:$0xff]   ;;  %v19081_v30 = vld [vmem:[#allocation15 + $0x9f4] ss:$24 sps:$4 sm:$0xff]  }
 0x89a   :  { %15626 = vmatprep.subr.bf16.mxu0 %v19018_v31  ;;  %v19084_v31 = vld [vmem:[#allocation15 + $0x87c] ss:$24 sps:$4 sm:$0xff]  }
 0x89c   :  { %15299 = vmatpush1.bf16.msra.mxu1 %v19013_v34  ;;  %v20704_v34 = vld [vmem:[#allocation13 + $0x8] sm:$0xff] }
 0x89d   :  { %15627 = vmatpush1.bf16.msra.mxu0 %v19016_v19  ;;  %15300 = vmatprep.subr.bf16.mxu1 %v19021_v61  ;;  %v3915_v19 = vrot.slane %v20704_v34, %v20521_v47  ;;  %v3919_v61 = vrot.slane %v20704_v34, %v20524_v53 }
 0x89e   :  { %15628 = vmatprep.subr.bf16.mxu0 %v19024_v2  ;;  %v19079_v2 = vld [vmem:[#allocation15 + $0x9f0] ss:$24 sps:$4 sm:$0xff]  }
 0x8a0   :  { %15301 = vmatpush1.bf16.msra.mxu1 %v19019_v37  ;;  %v19082_v37 = vld [vmem:[#allocation15 + $0x878] ss:$24 sps:$4 sm:$0xff]  }
 0x8a1   :  { %15629 = vmatpush1.bf16.msra.mxu0 %v19022_v40  ;;  %15302 = vmatprep.subr.bf16.mxu1 %v19027_v42  ;;  %v19087_v40 = vld [vmem:[#allocation15 + $0xa24] ss:$24 sps:$4 sm:$0xff]  }
 0x8a2   :  { %15630 = vmatprep.subr.bf16.mxu0 %v19030_v35  ;;  %v19090_v35 = vld [vmem:[#allocation15 + $0x8ac] ss:$24 sps:$4 sm:$0xff]  }
 0x8a4   :  { %15303 = vmatpush1.bf16.msra.mxu1 %v19025_v56 }
 0x8a5   :  { %15631 = vmatpush1.bf16.msra.mxu0 %v19028_v39  ;;  %15304 = vmatprep.subr.bf16.mxu1 %v19033_v5 }
 0x8a6   :  { %15632 = vmatprep.subr.bf16.mxu0 %v19036_v32 }
 0x8a8   :  { %15305 = vmatpush1.bf16.msra.mxu1 %v19031_v49  ;;  %v19085_v49 = vld [vmem:[#allocation15 + $0xa20] ss:$24 sps:$4 sm:$0xff]  }
 0x8a9   :  { %15633 = vmatpush1.bf16.msra.mxu0 %v19034_v48  ;;  %15306 = vmatprep.subr.bf16.mxu1 %v19039_v45  ;;  %v19088_v48 = vld [vmem:[#allocation15 + $0x8a8] ss:$24 sps:$4 sm:$0xff]  }
 0x8aa   :  { %15634 = vmatprep.subr.bf16.mxu0 %v19042_v62 }
 0x8ac   :  { %15307 = vmatpush1.bf16.msra.mxu1 %v19037_v50 }
 0x8ad   :  { %15635 = vmatpush1.bf16.msra.mxu0 %v19040_v12  ;;  %15308 = vmatprep.subr.bf16.mxu1 %v19045_v52  ;;  %v19093_v12 = vld [vmem:[#allocation15 + $0xa54] ss:$24 sps:$4 sm:$0xff]  }
 0x8ae   :  { %15636 = vmatprep.subr.bf16.mxu0 %v19048_v28 }
 0x8b0   :  { %15309 = vmatpush1.bf16.msra.mxu1 %v19043_v57  ;;  %v19096_v57 = vld [vmem:[#allocation15 + $0x8dc] ss:$24 sps:$4 sm:$0xff]  }
 0x8b1   :  { %15637 = vmatpush1.bf16.msra.mxu0 %v19046_v58  ;;  %15321 = vmatprep.subr.bf16.mxu1 %v19051_v1 }
 0x8b2   :  { %15638 = vmatprep.subr.bf16.mxu0 %v19054_v3  ;;  %v19091_v3 = vld [vmem:[#allocation15 + $0xa50] ss:$24 sps:$4 sm:$0xff]  }
 0x8b3   :  { %15311 = vmatmul.mubr.bf16.vlgmr.msra.gmra.mrb[20].mxu1 %v20634_v7 }
 0x8b4   :  { %15322 = vmatpush1.bf16.msra.mxu1 %v19049_v33  ;;  %15353 = vmatprep.mubr.bf16.mxu1 %v20650_v25 }
 0x8b5   :  { %15639 = vmatpush1.bf16.msra.mxu0 %v19052_v60  ;;  %15323 = vmatprep.subr.bf16.mxu1 %v19057_v4  ;;  %v19094_v4 = vld [vmem:[#allocation15 + $0x8d8] ss:$24 sps:$4 sm:$0xff]  }
 0x8b6   :  { %15640 = vmatprep.subr.bf16.mxu0 %v19060_v51  ;;  %v19099_v51 = vld [vmem:[#allocation15 + $0xa84] ss:$24 sps:$4 sm:$0xff]  }
 0x8b8   :  { %15324 = vmatpush1.bf16.msra.mxu1 %v19055_v24 }
 0x8b9   :  { %15641 = vmatpush1.bf16.msra.mxu0 %v19058_v9  ;;  %15325 = vmatprep.subr.bf16.mxu1 %v19063_v10  ;;  %v19102_v9 = vld [vmem:[#allocation15 + $0x90c] ss:$24 sps:$4 sm:$0xff]  }
 0x8ba   :  { %15642 = vmatprep.subr.bf16.mxu0 %v19066_v11 }
 0x8bc   :  { %15326 = vmatpush1.bf16.msra.mxu1 %v19061_v13 }
 0x8bd   :  { %15643 = vmatpush1.bf16.msra.mxu0 %v19064_v14  ;;  %15327 = vmatprep.subr.bf16.mxu1 %v19069_v16  ;;  %v19097_v14 = vld [vmem:[#allocation15 + $0xa80] ss:$24 sps:$4 sm:$0xff]  }
 0x8be   :  { %15644 = vmatprep.subr.bf16.mxu0 %v19072_v21  ;;  %v19100_v16 = vld [vmem:[#allocation15 + $0x908] ss:$24 sps:$4 sm:$0xff]   ;;  %v19105_v21 = vld [vmem:[#allocation15 + $0xab4] ss:$24 sps:$4 sm:$0xff]  }
 0x8c0   :  { %15328 = vmatpush1.bf16.msra.mxu1 %v19067_v38  ;;  %v19108_v38 = vld [vmem:[#allocation15 + $0x93c] ss:$24 sps:$4 sm:$0xff]  }
 0x8c1   :  { %15645 = vmatpush1.bf16.msra.mxu0 %v19070_v44  ;;  %15329 = vmatprep.subr.bf16.mxu1 %v19075_v22  ;;  %v19103_v44 = vld [vmem:[#allocation15 + $0xab0] ss:$24 sps:$4 sm:$0xff]  }
 0x8c2   :  { %15646 = vmatprep.subr.bf16.mxu0 %v19078_v15  ;;  %v19106_v22 = vld [vmem:[#allocation15 + $0x938] ss:$24 sps:$4 sm:$0xff]   ;;  %v19111_v15 = vld [vmem:[#allocation15 + $0xae4] ss:$24 sps:$4 sm:$0xff]  }
 0x8c4   :  { %15330 = vmatpush1.bf16.msra.mxu1 %v19073_v26  ;;  %v19114_v26 = vld [vmem:[#allocation15 + $0x96c] ss:$24 sps:$4 sm:$0xff]  }
 0x8c5   :  { %15647 = vmatpush1.bf16.msra.mxu0 %v19076_v27  ;;  %15331 = vmatprep.subr.bf16.mxu1 %v19081_v30  ;;  %v19109_v27 = vld [vmem:[#allocation15 + $0xae0] ss:$24 sps:$4 sm:$0xff]  }
 0x8c6   :  { %v10259_v42 = vpop.f32.mrb[16].mxu1  ;;  %15648 = vmatprep.subr.bf16.mxu0 %v19084_v31  ;;  %v19112_v30 = vld [vmem:[#allocation15 + $0x968] ss:$24 sps:$4 sm:$0xff]   ;;  %v19117_v31 = vld [vmem:[#allocation15 + $0xb14] ss:$24 sps:$4 sm:$0xff]  }
 0x8c7   :  { %v18431_v56 = vadd.f32 %v10259_v42, %v3915_v19  ;;  %v10261_v39 = vpop.f32.mrb[17].mxu1  ;;  %v19121_v42 = vld [vmem:[#allocation15 + $0xb40] ss:$24 sps:$4 sm:$0xff]  }
 0x8c8   :  { %v18432_v5 = vadd.f32 %v10261_v39, %v3919_v61  ;;  %v10263_v32 = vpop.f32.mrb[18].mxu1  ;;  %15332 = vmatpush1.bf16.msra.mxu1 %v19079_v2  ;;  %v19118_v2 = vld [vmem:[#allocation15 + $0x998] ss:$24 sps:$4 sm:$0xff]   ;;  %v19132_v39 = vld [vmem:[#allocation15 + $0x9fc] ss:$24 sps:$4 sm:$0xff]  }
 0x8c9   :  { %v10484_v45 = vmul.f32 0.2, %v18431_v56  ;;  %v18433_v62 = vadd.f32 %v10263_v32, %v3915_v19  ;;  %v10265_v50 = vpop.f32.mrb[19].mxu1  ;;  %15649 = vmatpush1.bf16.msra.mxu0 %v19082_v37  ;;  %15333 = vmatprep.subr.bf16.mxu1 %v19087_v40  ;;  %vm10452_vm4 = vcmp.gt.f32.partialorder %v18431_v56, 0.0  ;;  %v19120_v19 = vld [vmem:[#allocation15 + $0x99c] ss:$24 sps:$4 sm:$0xff]   ;;  %v3923_v32 = vrot.slane %v20704_v34, %v20556_v59 }
 0x8ca   :  { %v10485_v52 = vmul.f32 0.2, %v18432_v5  ;;  %v18434_v28 = vadd.f32 %v10265_v50, %v3919_v61  ;;  %15650 = vmatprep.subr.bf16.mxu0 %v19090_v35  ;;  %vm10453_vm5 = vcmp.gt.f32.partialorder %v18432_v5, 0.0  ;;  %v19115_v61 = vld [vmem:[#allocation15 + $0xb10] ss:$24 sps:$4 sm:$0xff]  }
 0x8cb   :  { %vm10468_vm6 = vcmp.gt.f32.partialorder %v18433_v62, 0.0  ;;  %v10500_v58 = vmul.f32 0.2, %v18433_v62  ;;  %v10516_v33 = vsel %vm10452_vm4, %v18431_v56, %v10484_v45  ;;  %v19123_v37 = vld [vmem:[#allocation15 + $0xb44] ss:$24 sps:$4 sm:$0xff]  }
 0x8cc   :  { %vm10469_vm7 = vcmp.gt.f32.partialorder %v18434_v28, 0.0  ;;  %v10501_v1 = vmul.f32 0.2, %v18434_v28  ;;  %15334 = vmatpush1.bf16.msra.mxu1 %v19085_v49  ;;  %v10517_v10 = vsel %vm10453_vm5, %v18432_v5, %v10485_v52  ;;  %v19126_v40 = vld [vmem:[#allocation15 + $0x9cc] ss:$24 sps:$4 sm:$0xff]   ;;  %v3927_v49 = vrot.slane %v20704_v34, %v20559_v17 }
 0x8cd   :  { %v10532_v60 = vsel %vm10468_vm6, %v18433_v62, %v10500_v58  ;;  %15651 = vmatpush1.bf16.msra.mxu0 %v19088_v48  ;;  %15335 = vmatprep.subr.bf16.mxu1 %v19093_v12  ;;  %v19124_v35 = vld [vmem:[#allocation15 + $0x9c8] ss:$24 sps:$4 sm:$0xff]   ;;  %v19129_v56 = vld [vmem:[#allocation15 + $0xb74] ss:$24 sps:$4 sm:$0xff]   ;;  %v19130_v48 = vld [vmem:[#allocation15 + $0x9f8] ss:$24 sps:$4 sm:$0xff]  }
 0x8ce   :  { %v20710_v24 = vpack.c.bf16 %v10532_v60, %v10516_v33  ;;  %15652 = vmatprep.subr.bf16.mxu0 %v19096_v57  ;;  %v10533_v11 = vsel %vm10469_vm7, %v18434_v28, %v10501_v1  ;;  %v19127_v5 = vld [vmem:[#allocation15 + $0xb70] ss:$24 sps:$4 sm:$0xff]   ;;  %v19135_v45 = vld [vmem:[#allocation15 + $0xba4] ss:$24 sps:$4 sm:$0xff]   ;;  %v19133_v28 = vld [vmem:[#allocation15 + $0xba0] ss:$24 sps:$4 sm:$0xff]  }
 0x8cf   :  { %v20713_v13 = vpack.c.bf16 %v10533_v11, %v10517_v10  ;;  %v19138_v62 = vld [vmem:[#allocation15 + $0xa2c] ss:$24 sps:$4 sm:$0xff]   ;;  %v19136_v1 = vld [vmem:[#allocation15 + $0xa28] ss:$24 sps:$4 sm:$0xff]   ;;  %v19144_v17 = vld [vmem:[#allocation15 + $0xa5c] ss:$24 sps:$4 sm:$0xff]  }
 0x8d0   :  { %15336 = vmatpush1.bf16.msra.mxu1 %v19091_v3  ;;  %v19141_v59 = vld [vmem:[#allocation15 + $0xbd4] ss:$24 sps:$4 sm:$0xff]   ;;  %v19142_v10 = vld [vmem:[#allocation15 + $0xa58] ss:$24 sps:$4 sm:$0xff]  }
 0x8d1   :  { %15653 = vmatpush1.bf16.msra.mxu0 %v19094_v4  ;;  %15337 = vmatprep.subr.bf16.mxu1 %v19099_v51  ;;  %v19139_v51 = vld [vmem:[#allocation15 + $0xbd0] ss:$24 sps:$4 sm:$0xff]  }
 0x8d2   :  { %15665 = vmatprep.subr.bf16.mxu0 %v19102_v9 }
 0x8d4   :  { %15338 = vmatpush1.bf16.msra.mxu1 %v19097_v14  ;;  %15655 = vmatmul.mubr.bf16.vlgmr.msra.gmra.mrb[44].mxu0 %v20634_v7  ;;  %v19147_v14 = vld [vmem:[#allocation15 + $0xc04] ss:$24 sps:$4 sm:$0xff]  }
 0x8d5   :  { %15666 = vmatpush1.bf16.msra.mxu0 %v19100_v16  ;;  %15697 = vmatprep.mubr.bf16.mxu0 %v20650_v25 }
 0x8d6   :  { %15339 = vmatprep.subr.bf16.mxu1 %v19105_v21  ;;  %15667 = vmatprep.subr.bf16.mxu0 %v19108_v38  ;;  %v19150_v38 = vld [vmem:[#allocation15 + $0xa8c] ss:$24 sps:$4 sm:$0xff]  }
 0x8d8   :  { %15340 = vmatpush1.bf16.msra.mxu1 %v19103_v44 }
 0x8d9   :  { %15668 = vmatpush1.bf16.msra.mxu0 %v19106_v22  ;;  %15341 = vmatprep.subr.bf16.mxu1 %v19111_v15 }
 0x8da   :  { %15669 = vmatprep.subr.bf16.mxu0 %v19114_v26  ;;  %v19145_v26 = vld [vmem:[#allocation15 + $0xc00] ss:$24 sps:$4 sm:$0xff]  }
 0x8dc   :  { %15342 = vmatpush1.bf16.msra.mxu1 %v19109_v27 }
 0x8dd   :  { %15670 = vmatpush1.bf16.msra.mxu0 %v19112_v30  ;;  %15343 = vmatprep.subr.bf16.mxu1 %v19117_v31  ;;  %v19148_v30 = vld [vmem:[#allocation15 + $0xa88] ss:$24 sps:$4 sm:$0xff]   ;;  %v19153_v31 = vld [vmem:[#allocation15 + $0xc34] ss:$24 sps:$4 sm:$0xff]  }
 0x8de   :  { %15671 = vmatprep.subr.bf16.mxu0 %v19120_v19  ;;  %v19156_v19 = vld [vmem:[#allocation15 + $0xabc] ss:$24 sps:$4 sm:$0xff]  }
 0x8e0   :  { %15344 = vmatpush1.bf16.msra.mxu1 %v19115_v61  ;;  %v19151_v61 = vld [vmem:[#allocation15 + $0xc30] ss:$24 sps:$4 sm:$0xff]  }
 0x8e1   :  { %15672 = vmatpush1.bf16.msra.mxu0 %v19118_v2  ;;  %15345 = vmatprep.subr.bf16.mxu1 %v19123_v37  ;;  %v19154_v2 = vld [vmem:[#allocation15 + $0xab8] ss:$24 sps:$4 sm:$0xff]   ;;  %v19159_v37 = vld [vmem:[#allocation15 + $0xc64] ss:$24 sps:$4 sm:$0xff]  }
 0x8e2   :  { %15673 = vmatprep.subr.bf16.mxu0 %v19126_v40  ;;  %v19162_v40 = vld [vmem:[#allocation15 + $0xaec] ss:$24 sps:$4 sm:$0xff]  }
 0x8e4   :  { %15346 = vmatpush1.bf16.msra.mxu1 %v19121_v42  ;;  %v19157_v42 = vld [vmem:[#allocation15 + $0xc60] ss:$24 sps:$4 sm:$0xff]  }
 0x8e5   :  { %15674 = vmatpush1.bf16.msra.mxu0 %v19124_v35  ;;  %15347 = vmatprep.subr.bf16.mxu1 %v19129_v56  ;;  %v19160_v35 = vld [vmem:[#allocation15 + $0xae8] ss:$24 sps:$4 sm:$0xff]   ;;  %v19165_v56 = vld [vmem:[#allocation15 + $0xc94] ss:$24 sps:$4 sm:$0xff]  }
 0x8e6   :  { %15675 = vmatprep.subr.bf16.mxu0 %v19132_v39  ;;  %v19168_v39 = vld [vmem:[#allocation15 + $0xb1c] ss:$24 sps:$4 sm:$0xff]  }
 0x8e7   :  { %v10431_v50 = vpop.f32.mrb[40].mxu0 }
 0x8e8   :  { %v18435_v12 = vadd.f32 %v10431_v50, %v3923_v32  ;;  %15348 = vmatpush1.bf16.msra.mxu1 %v19127_v5  ;;  %v10433_v52 = vpop.f32.mrb[41].mxu0  ;;  %v19163_v5 = vld [vmem:[#allocation15 + $0xc90] ss:$24 sps:$4 sm:$0xff]   ;;  %v19177_v50 = vld [vmem:[#allocation15 + $0xcf4] ss:$24 sps:$4 sm:$0xff]  }
 0x8e9   :  { %v18436_v57 = vadd.f32 %v10433_v52, %v3927_v49  ;;  %v10435_v58 = vpop.f32.mrb[42].mxu0  ;;  %15676 = vmatpush1.bf16.msra.mxu0 %v19130_v48  ;;  %15349 = vmatprep.subr.bf16.mxu1 %v19135_v45  ;;  %v19174_v48 = vld [vmem:[#allocation15 + $0xb4c] ss:$24 sps:$4 sm:$0xff]   ;;  %v19169_v45 = vld [vmem:[#allocation15 + $0xcc0] ss:$24 sps:$4 sm:$0xff]  }
 0x8ea   :  { %v10486_v3 = vmul.f32 0.2, %v18435_v12  ;;  %v18437_v33 = vadd.f32 %v10435_v58, %v3923_v32  ;;  %v10437_v60 = vpop.f32.mrb[43].mxu0  ;;  %15677 = vmatprep.subr.bf16.mxu0 %v19138_v62  ;;  %vm10454_vm8 = vcmp.gt.f32.partialorder %v18435_v12, 0.0  ;;  %v19166_v32 = vld [vmem:[#allocation15 + $0xb18] ss:$24 sps:$4 sm:$0xff]  }
 0x8eb   :  { %v10487_v34 = vmul.f32 0.2, %v18436_v57  ;;  %v18438_v4 = vadd.f32 %v10437_v60, %v3927_v49  ;;  %vm10455_vm9 = vcmp.gt.f32.partialorder %v18436_v57, 0.0  ;;  %v19171_v49 = vld [vmem:[#allocation15 + $0xcc4] ss:$24 sps:$4 sm:$0xff]  }
 0x8ec   :  { %vm10470_vm10 = vcmp.gt.f32.partialorder %v18437_v33, 0.0  ;;  %v10502_v9 = vmul.f32 0.2, %v18437_v33  ;;  %15350 = vmatpush1.bf16.msra.mxu1 %v19133_v28  ;;  %v10518_v16 = vsel %vm10454_vm8, %v18435_v12, %v10486_v3  ;;  %v19172_v62 = vld [vmem:[#allocation15 + $0xb48] ss:$24 sps:$4 sm:$0xff]  }
 0x8ed   :  { %vm10471_vm11 = vcmp.gt.f32.partialorder %v18438_v4, 0.0  ;;  %v10503_v11 = vmul.f32 0.2, %v18438_v4  ;;  %15678 = vmatpush1.bf16.msra.mxu0 %v19136_v1  ;;  %15351 = vmatprep.subr.bf16.mxu1 %v19141_v59  ;;  %v10519_v22 = vsel %vm10455_vm9, %v18436_v57, %v10487_v34  ;;  %v19180_v12 = vld [vmem:[#allocation15 + $0xb7c] ss:$24 sps:$4 sm:$0xff]  }
 0x8ee   :  { %v10534_v21 = vsel %vm10470_vm10, %v18437_v33, %v10502_v9  ;;  %15679 = vmatprep.subr.bf16.mxu0 %v19144_v17  ;;  %v19175_v52 = vld [vmem:[#allocation15 + $0xcf0] ss:$24 sps:$4 sm:$0xff]   ;;  %v19183_v57 = vld [vmem:[#allocation15 + $0xd24] ss:$24 sps:$4 sm:$0xff]   ;;  %v19181_v1 = vld [vmem:[#allocation15 + $0xd20] ss:$24 sps:$4 sm:$0xff]  }
 0x8ef   :  { %v20721_v44 = vpack.c.bf16 %v10534_v21, %v10518_v16  ;;  %v10535_v15 = vsel %vm10471_vm11, %v18438_v4, %v10503_v11  ;;  %v19178_v28 = vld [vmem:[#allocation15 + $0xb78] ss:$24 sps:$4 sm:$0xff]   ;;  %v19186_v58 = vld [vmem:[#allocation15 + $0xbac] ss:$24 sps:$4 sm:$0xff]   ;;  %v19184_v59 = vld [vmem:[#allocation15 + $0xba8] ss:$24 sps:$4 sm:$0xff]  }
 0x8f0   :  { %15352 = vmatpush1.bf16.msra.mxu1 %v19139_v51  ;;  %v20723_v27 = vpack.c.bf16 %v10535_v15, %v10519_v22  ;;  %v19189_v3 = vld [vmem:[#allocation15 + $0xd54] ss:$24 sps:$4 sm:$0xff]   ;;  %v19187_v60 = vld [vmem:[#allocation15 + $0xd50] ss:$24 sps:$4 sm:$0xff]   ;;  %v19195_v34 = vld [vmem:[#allocation15 + $0xd84] ss:$24 sps:$4 sm:$0xff]  }
 0x8f1   :  { %15680 = vmatpush1.bf16.msra.mxu0 %v19142_v10  ;;  %15364 = vmatprep.subr.bf16.mxu1 %v19147_v14  ;;  %v19192_v33 = vld [vmem:[#allocation15 + $0xbdc] ss:$24 sps:$4 sm:$0xff]   ;;  %v19190_v17 = vld [vmem:[#allocation15 + $0xbd8] ss:$24 sps:$4 sm:$0xff]   ;;  %v19198_v4 = vld [vmem:[#allocation15 + $0xc0c] ss:$24 sps:$4 sm:$0xff]  }
 0x8f2   :  { %15681 = vmatprep.subr.bf16.mxu0 %v19150_v38  ;;  %v19193_v51 = vld [vmem:[#allocation15 + $0xd80] ss:$24 sps:$4 sm:$0xff]   ;;  %v19201_v10 = vld [vmem:[#allocation15 + $0xdb4] ss:$24 sps:$4 sm:$0xff]   ;;  %v19199_v14 = vld [vmem:[#allocation15 + $0xdb0] ss:$24 sps:$4 sm:$0xff]  }
 0x8f3   :  { %15354 = vmatmul.mubr.bf16.vlgmr.msra.gmra.mrb[20].mxu1 %v20646_v29  ;;  %v19196_v9 = vld [vmem:[#allocation15 + $0xc08] ss:$24 sps:$4 sm:$0xff]   ;;  %v19204_v11 = vld [vmem:[#allocation15 + $0xc3c] ss:$24 sps:$4 sm:$0xff]   ;;  %v19202_v16 = vld [vmem:[#allocation15 + $0xc38] ss:$24 sps:$4 sm:$0xff]  }
 0x8f4   :  { %15365 = vmatpush1.bf16.msra.mxu1 %v19145_v26  ;;  %15396 = vmatprep.mubr.bf16.mxu1 %v20676_v36  ;;  %v19207_v21 = vld [vmem:[#allocation15 + $0xde4] ss:$24 sps:$4 sm:$0xff]   ;;  %v19205_v22 = vld [vmem:[#allocation15 + $0xde0] ss:$24 sps:$4 sm:$0xff]   ;;  %v19213_v26 = vld [vmem:[#allocation15 + $0xe14] ss:$24 sps:$4 sm:$0xff]  }
 0x8f5   :  { %15682 = vmatpush1.bf16.msra.mxu0 %v19148_v30  ;;  %15366 = vmatprep.subr.bf16.mxu1 %v19153_v31  ;;  %v19210_v38 = vld [vmem:[#allocation15 + $0xc6c] ss:$24 sps:$4 sm:$0xff]   ;;  %v19208_v15 = vld [vmem:[#allocation15 + $0xc68] ss:$24 sps:$4 sm:$0xff]   ;;  %v19216_v30 = vld [vmem:[#allocation15 + $0xc9c] ss:$24 sps:$4 sm:$0xff]  }
 0x8f6   :  { %15683 = vmatprep.subr.bf16.mxu0 %v19156_v19  ;;  %v19211_v31 = vld [vmem:[#allocation15 + $0xe10] ss:$24 sps:$4 sm:$0xff]  }
 0x8f7   :  { %v19214_v19 = vld [vmem:[#allocation15 + $0xc98] ss:$24 sps:$4 sm:$0xff]  }
 0x8f8   :  { %15367 = vmatpush1.bf16.msra.mxu1 %v19151_v61  ;;  %v19219_v61 = vld [vmem:[#allocation15 + $0xe44] ss:$24 sps:$4 sm:$0xff]  }
 0x8f9   :  { %15684 = vmatpush1.bf16.msra.mxu0 %v19154_v2  ;;  %15368 = vmatprep.subr.bf16.mxu1 %v19159_v37  ;;  %v19222_v2 = vld [vmem:[#allocation15 + $0xccc] ss:$24 sps:$4 sm:$0xff]   ;;  %v19217_v37 = vld [vmem:[#allocation15 + $0xe40] ss:$24 sps:$4 sm:$0xff]  }
 0x8fa   :  { %15685 = vmatprep.subr.bf16.mxu0 %v19162_v40  ;;  %v19220_v40 = vld [vmem:[#allocation15 + $0xcc8] ss:$24 sps:$4 sm:$0xff]  }
 0x8fc   :  { %15369 = vmatpush1.bf16.msra.mxu1 %v19157_v42  ;;  %v19225_v42 = vld [vmem:[#allocation15 + $0xe74] ss:$24 sps:$4 sm:$0xff]  }
 0x8fd   :  { %15686 = vmatpush1.bf16.msra.mxu0 %v19160_v35  ;;  %15370 = vmatprep.subr.bf16.mxu1 %v19165_v56  ;;  %v19228_v35 = vld [vmem:[#allocation15 + $0xcfc] ss:$24 sps:$4 sm:$0xff]   ;;  %v19223_v56 = vld [vmem:[#allocation15 + $0xe70] ss:$24 sps:$4 sm:$0xff]  }
 0x8fe   :  { %15687 = vmatprep.subr.bf16.mxu0 %v19168_v39  ;;  %v19226_v39 = vld [vmem:[#allocation15 + $0xcf8] ss:$24 sps:$4 sm:$0xff]  }
 0x900   :  { %15371 = vmatpush1.bf16.msra.mxu1 %v19163_v5  ;;  %v19231_v5 = vld [vmem:[#allocation15 + $0xea4] ss:$24 sps:$4 sm:$0xff]  }
 0x901   :  { %15688 = vmatpush1.bf16.msra.mxu0 %v19166_v32  ;;  %15372 = vmatprep.subr.bf16.mxu1 %v19171_v49  ;;  %v19234_v32 = vld [vmem:[#allocation15 + $0xd2c] ss:$24 sps:$4 sm:$0xff]   ;;  %v19229_v49 = vld [vmem:[#allocation15 + $0xea0] ss:$24 sps:$4 sm:$0xff]  }
 0x902   :  { %15689 = vmatprep.subr.bf16.mxu0 %v19174_v48  ;;  %v19232_v48 = vld [vmem:[#allocation15 + $0xd28] ss:$24 sps:$4 sm:$0xff]  }
 0x904   :  { %15373 = vmatpush1.bf16.msra.mxu1 %v19169_v45  ;;  %v19237_v45 = vld [vmem:[#allocation15 + $0xed4] ss:$24 sps:$4 sm:$0xff]  }
 0x905   :  { %15690 = vmatpush1.bf16.msra.mxu0 %v19172_v62  ;;  %15374 = vmatprep.subr.bf16.mxu1 %v19177_v50  ;;  %v19240_v62 = vld [vmem:[#allocation15 + $0xd5c] ss:$24 sps:$4 sm:$0xff]   ;;  %v19235_v50 = vld [vmem:[#allocation15 + $0xed0] ss:$24 sps:$4 sm:$0xff]  }
 0x906   :  { %15691 = vmatprep.subr.bf16.mxu0 %v19180_v12  ;;  %v19238_v12 = vld [vmem:[#allocation15 + $0xd58] ss:$24 sps:$4 sm:$0xff]  }
 0x908   :  { %15375 = vmatpush1.bf16.msra.mxu1 %v19175_v52  ;;  %v19243_v52 = vld [vmem:[#allocation15 + $0xf04] ss:$24 sps:$4 sm:$0xff]  }
 0x909   :  { %15692 = vmatpush1.bf16.msra.mxu0 %v19178_v28  ;;  %15376 = vmatprep.subr.bf16.mxu1 %v19183_v57  ;;  %v19246_v28 = vld [vmem:[#allocation15 + $0xd8c] ss:$24 sps:$4 sm:$0xff]   ;;  %v19241_v57 = vld [vmem:[#allocation15 + $0xf00] ss:$24 sps:$4 sm:$0xff]  }
 0x90a   :  { %15693 = vmatprep.subr.bf16.mxu0 %v19186_v58  ;;  %v19244_v58 = vld [vmem:[#allocation15 + $0xd88] ss:$24 sps:$4 sm:$0xff]  }
 0x90c   :  { %15377 = vmatpush1.bf16.msra.mxu1 %v19181_v1  ;;  %v19249_v1 = vld [vmem:[#allocation15 + $0xf34] ss:$24 sps:$4 sm:$0xff]  }
 0x90d   :  { %15694 = vmatpush1.bf16.msra.mxu0 %v19184_v59  ;;  %15378 = vmatprep.subr.bf16.mxu1 %v19189_v3  ;;  %v19252_v59 = vld [vmem:[#allocation15 + $0xdbc] ss:$24 sps:$4 sm:$0xff]   ;;  %v19247_v3 = vld [vmem:[#allocation15 + $0xf30] ss:$24 sps:$4 sm:$0xff]  }
 0x90e   :  { %15695 = vmatprep.subr.bf16.mxu0 %v19192_v33  ;;  %v19250_v33 = vld [vmem:[#allocation15 + $0xdb8] ss:$24 sps:$4 sm:$0xff]  }
 0x910   :  { %15379 = vmatpush1.bf16.msra.mxu1 %v19187_v60  ;;  %v19255_v60 = vld [vmem:[#allocation15 + $0xf64] ss:$24 sps:$4 sm:$0xff]  }
 0x911   :  { %15696 = vmatpush1.bf16.msra.mxu0 %v19190_v17  ;;  %15380 = vmatprep.subr.bf16.mxu1 %v19195_v34  ;;  %v19258_v17 = vld [vmem:[#allocation15 + $0xdec] ss:$24 sps:$4 sm:$0xff]   ;;  %v19253_v34 = vld [vmem:[#allocation15 + $0xf60] ss:$24 sps:$4 sm:$0xff]  }
 0x912   :  { %15708 = vmatprep.subr.bf16.mxu0 %v19198_v4  ;;  %v19256_v4 = vld [vmem:[#allocation15 + $0xde8] ss:$24 sps:$4 sm:$0xff]  }
 0x914   :  { %15381 = vmatpush1.bf16.msra.mxu1 %v19193_v51  ;;  %15698 = vmatmul.mubr.bf16.vlgmr.msra.gmra.mrb[44].mxu0 %v20646_v29  ;;  %v19261_v51 = vld [vmem:[#allocation15 + $0xf94] ss:$24 sps:$4 sm:$0xff]  }
 0x915   :  { %15709 = vmatpush1.bf16.msra.mxu0 %v19196_v9  ;;  %15740 = vmatprep.mubr.bf16.mxu0 %v20676_v36  ;;  %v19264_v9 = vld [vmem:[#allocation15 + $0xe1c] ss:$24 sps:$4 sm:$0xff]  }
 0x916   :  { %15382 = vmatprep.subr.bf16.mxu1 %v19201_v10  ;;  %15710 = vmatprep.subr.bf16.mxu0 %v19204_v11  ;;  %v19259_v10 = vld [vmem:[#allocation15 + $0xf90] ss:$24 sps:$4 sm:$0xff]  }
 0x917   :  { %v19262_v11 = vld [vmem:[#allocation15 + $0xe18] ss:$24 sps:$4 sm:$0xff]  }
 0x918   :  { %15383 = vmatpush1.bf16.msra.mxu1 %v19199_v14  ;;  %v19267_v14 = vld [vmem:[#allocation15 + $0xfc4] ss:$24 sps:$4 sm:$0xff]  }
 0x919   :  { %15711 = vmatpush1.bf16.msra.mxu0 %v19202_v16  ;;  %15384 = vmatprep.subr.bf16.mxu1 %v19207_v21  ;;  %v19270_v16 = vld [vmem:[#allocation15 + $0xe4c] ss:$24 sps:$4 sm:$0xff]   ;;  %v19265_v21 = vld [vmem:[#allocation15 + $0xfc0] ss:$24 sps:$4 sm:$0xff]  }
 0x91a   :  { %15712 = vmatprep.subr.bf16.mxu0 %v19210_v38  ;;  %v19268_v38 = vld [vmem:[#allocation15 + $0xe48] ss:$24 sps:$4 sm:$0xff]  }
 0x91c   :  { %15385 = vmatpush1.bf16.msra.mxu1 %v19205_v22  ;;  %v19273_v22 = vld [vmem:[#allocation15 + $0xff4] ss:$24 sps:$4 sm:$0xff]  }
 0x91d   :  { %15713 = vmatpush1.bf16.msra.mxu0 %v19208_v15  ;;  %15386 = vmatprep.subr.bf16.mxu1 %v19213_v26  ;;  %v19276_v15 = vld [vmem:[#allocation15 + $0xe7c] ss:$24 sps:$4 sm:$0xff]   ;;  %v19271_v26 = vld [vmem:[#allocation15 + $0xff0] ss:$24 sps:$4 sm:$0xff]  }
 0x91e   :  { %15714 = vmatprep.subr.bf16.mxu0 %v19216_v30  ;;  %v19274_v30 = vld [vmem:[#allocation15 + $0xe78] ss:$24 sps:$4 sm:$0xff]  }
 0x920   :  { %15387 = vmatpush1.bf16.msra.mxu1 %v19211_v31  ;;  %v19279_v31 = vld [vmem:[#allocation15 + $0x1024] ss:$24 sps:$4 sm:$0xff]  }
 0x921   :  { %15715 = vmatpush1.bf16.msra.mxu0 %v19214_v19  ;;  %15388 = vmatprep.subr.bf16.mxu1 %v19219_v61  ;;  %v19282_v19 = vld [vmem:[#allocation15 + $0xeac] ss:$24 sps:$4 sm:$0xff]   ;;  %v19277_v61 = vld [vmem:[#allocation15 + $0x1020] ss:$24 sps:$4 sm:$0xff]  }
 0x922   :  { %15716 = vmatprep.subr.bf16.mxu0 %v19222_v2  ;;  %v19280_v2 = vld [vmem:[#allocation15 + $0xea8] ss:$24 sps:$4 sm:$0xff]  }
 0x924   :  { %15389 = vmatpush1.bf16.msra.mxu1 %v19217_v37  ;;  %v19285_v37 = vld [vmem:[#allocation15 + $0x1054] ss:$24 sps:$4 sm:$0xff]  }
 0x925   :  { %15717 = vmatpush1.bf16.msra.mxu0 %v19220_v40  ;;  %15390 = vmatprep.subr.bf16.mxu1 %v19225_v42  ;;  %v19288_v40 = vld [vmem:[#allocation15 + $0xedc] ss:$24 sps:$4 sm:$0xff]   ;;  %v19283_v42 = vld [vmem:[#allocation15 + $0x1050] ss:$24 sps:$4 sm:$0xff]  }
 0x926   :  { %15718 = vmatprep.subr.bf16.mxu0 %v19228_v35  ;;  %v19286_v35 = vld [vmem:[#allocation15 + $0xed8] ss:$24 sps:$4 sm:$0xff]  }
 0x928   :  { %15391 = vmatpush1.bf16.msra.mxu1 %v19223_v56  ;;  %v19291_v56 = vld [vmem:[#allocation15 + $0x1084] ss:$24 sps:$4 sm:$0xff]  }
 0x929   :  { %15719 = vmatpush1.bf16.msra.mxu0 %v19226_v39  ;;  %15392 = vmatprep.subr.bf16.mxu1 %v19231_v5  ;;  %v19294_v39 = vld [vmem:[#allocation15 + $0xf0c] ss:$24 sps:$4 sm:$0xff]   ;;  %v19289_v5 = vld [vmem:[#allocation15 + $0x1080] ss:$24 sps:$4 sm:$0xff]  }
 0x92a   :  { %15720 = vmatprep.subr.bf16.mxu0 %v19234_v32  ;;  %v19292_v32 = vld [vmem:[#allocation15 + $0xf08] ss:$24 sps:$4 sm:$0xff]  }
 0x92c   :  { %15393 = vmatpush1.bf16.msra.mxu1 %v19229_v49  ;;  %v19297_v49 = vld [vmem:[#allocation15 + $0x10b4] ss:$24 sps:$4 sm:$0xff]  }
 0x92d   :  { %15721 = vmatpush1.bf16.msra.mxu0 %v19232_v48  ;;  %15394 = vmatprep.subr.bf16.mxu1 %v19237_v45  ;;  %v19300_v48 = vld [vmem:[#allocation15 + $0xf3c] ss:$24 sps:$4 sm:$0xff]   ;;  %v19295_v45 = vld [vmem:[#allocation15 + $0x10b0] ss:$24 sps:$4 sm:$0xff]  }
 0x92e   :  { %15722 = vmatprep.subr.bf16.mxu0 %v19240_v62  ;;  %v19298_v62 = vld [vmem:[#allocation15 + $0xf38] ss:$24 sps:$4 sm:$0xff]  }
 0x930   :  { %15395 = vmatpush1.bf16.msra.mxu1 %v19235_v50  ;;  %v19303_v50 = vld [vmem:[#allocation15 + $0x10e4] ss:$24 sps:$4 sm:$0xff]  }
 0x931   :  { %15723 = vmatpush1.bf16.msra.mxu0 %v19238_v12  ;;  %15407 = vmatprep.subr.bf16.mxu1 %v19243_v52  ;;  %v19306_v12 = vld [vmem:[#allocation15 + $0xf6c] ss:$24 sps:$4 sm:$0xff]   ;;  %v19301_v52 = vld [vmem:[#allocation15 + $0x10e0] ss:$24 sps:$4 sm:$0xff]  }
 0x932   :  { %15724 = vmatprep.subr.bf16.mxu0 %v19246_v28  ;;  %v19304_v28 = vld [vmem:[#allocation15 + $0xf68] ss:$24 sps:$4 sm:$0xff]  }
 0x933   :  { %15397 = vmatmul.mubr.bf16.vlgmr.msra.gmra.mrb[20].mxu1 %v20673_v43 }
 0x934   :  { %15408 = vmatpush1.bf16.msra.mxu1 %v19241_v57  ;;  %15439 = vmatprep.mubr.bf16.mxu1 %v20688_v23  ;;  %v19309_v57 = vld [vmem:[#allocation15 + $0x1114] ss:$24 sps:$4 sm:$0xff]  }
 0x935   :  { %15725 = vmatpush1.bf16.msra.mxu0 %v19244_v58  ;;  %15409 = vmatprep.subr.bf16.mxu1 %v19249_v1  ;;  %v19312_v58 = vld [vmem:[#allocation15 + $0xf9c] ss:$24 sps:$4 sm:$0xff]   ;;  %v19307_v1 = vld [vmem:[#allocation15 + $0x1110] ss:$24 sps:$4 sm:$0xff]  }
 0x936   :  { %15726 = vmatprep.subr.bf16.mxu0 %v19252_v59  ;;  %v19310_v59 = vld [vmem:[#allocation15 + $0xf98] ss:$24 sps:$4 sm:$0xff]  }
 0x938   :  { %15410 = vmatpush1.bf16.msra.mxu1 %v19247_v3  ;;  %v19315_v3 = vld [vmem:[#allocation15 + $0x1144] ss:$24 sps:$4 sm:$0xff]  }
 0x939   :  { %15727 = vmatpush1.bf16.msra.mxu0 %v19250_v33  ;;  %15411 = vmatprep.subr.bf16.mxu1 %v19255_v60  ;;  %v19318_v33 = vld [vmem:[#allocation15 + $0xfcc] ss:$24 sps:$4 sm:$0xff]   ;;  %v19313_v60 = vld [vmem:[#allocation15 + $0x1140] ss:$24 sps:$4 sm:$0xff]  }
 0x93a   :  { %15728 = vmatprep.subr.bf16.mxu0 %v19258_v17  ;;  %v19316_v17 = vld [vmem:[#allocation15 + $0xfc8] ss:$24 sps:$4 sm:$0xff]  }
 0x93c   :  { %15412 = vmatpush1.bf16.msra.mxu1 %v19253_v34  ;;  %v19321_v34 = vld [vmem:[#allocation15 + $0x1174] ss:$24 sps:$4 sm:$0xff]  }
 0x93d   :  { %15729 = vmatpush1.bf16.msra.mxu0 %v19256_v4  ;;  %15413 = vmatprep.subr.bf16.mxu1 %v19261_v51  ;;  %v19324_v4 = vld [vmem:[#allocation15 + $0xffc] ss:$24 sps:$4 sm:$0xff]   ;;  %v19319_v51 = vld [vmem:[#allocation15 + $0x1170] ss:$24 sps:$4 sm:$0xff]  }
 0x93e   :  { %15730 = vmatprep.subr.bf16.mxu0 %v19264_v9  ;;  %v19322_v9 = vld [vmem:[#allocation15 + $0xff8] ss:$24 sps:$4 sm:$0xff]  }
 0x940   :  { %15414 = vmatpush1.bf16.msra.mxu1 %v19259_v10  ;;  %v19327_v10 = vld [vmem:[#allocation15 + $0x11a4] ss:$24 sps:$4 sm:$0xff]  }
 0x941   :  { %15731 = vmatpush1.bf16.msra.mxu0 %v19262_v11  ;;  %15415 = vmatprep.subr.bf16.mxu1 %v19267_v14  ;;  %v19330_v11 = vld [vmem:[#allocation15 + $0x102c] ss:$24 sps:$4 sm:$0xff]   ;;  %v19325_v14 = vld [vmem:[#allocation15 + $0x11a0] ss:$24 sps:$4 sm:$0xff]  }
 0x942   :  { %15732 = vmatprep.subr.bf16.mxu0 %v19270_v16  ;;  %v19328_v16 = vld [vmem:[#allocation15 + $0x1028] ss:$24 sps:$4 sm:$0xff]  }
 0x944   :  { %15416 = vmatpush1.bf16.msra.mxu1 %v19265_v21  ;;  %v19333_v21 = vld [vmem:[#allocation15 + $0x11d4] ss:$24 sps:$4 sm:$0xff]  }
 0x945   :  { %15733 = vmatpush1.bf16.msra.mxu0 %v19268_v38  ;;  %15417 = vmatprep.subr.bf16.mxu1 %v19273_v22  ;;  %v19336_v38 = vld [vmem:[#allocation15 + $0x105c] ss:$24 sps:$4 sm:$0xff]   ;;  %v19331_v22 = vld [vmem:[#allocation15 + $0x11d0] ss:$24 sps:$4 sm:$0xff]  }
 0x946   :  { %15734 = vmatprep.subr.bf16.mxu0 %v19276_v15  ;;  %v19334_v15 = vld [vmem:[#allocation15 + $0x1058] ss:$24 sps:$4 sm:$0xff]  }
 0x948   :  { %15418 = vmatpush1.bf16.msra.mxu1 %v19271_v26  ;;  %v19339_v26 = vld [vmem:[#allocation15 + $0x1204] ss:$24 sps:$4 sm:$0xff]  }
 0x949   :  { %15735 = vmatpush1.bf16.msra.mxu0 %v19274_v30  ;;  %15419 = vmatprep.subr.bf16.mxu1 %v19279_v31  ;;  %v19342_v30 = vld [vmem:[#allocation15 + $0x108c] ss:$24 sps:$4 sm:$0xff]   ;;  %v19337_v31 = vld [vmem:[#allocation15 + $0x1200] ss:$24 sps:$4 sm:$0xff]  }
 0x94a   :  { %15736 = vmatprep.subr.bf16.mxu0 %v19282_v19  ;;  %v19340_v19 = vld [vmem:[#allocation15 + $0x1088] ss:$24 sps:$4 sm:$0xff]  }
 0x94c   :  { %15420 = vmatpush1.bf16.msra.mxu1 %v19277_v61  ;;  %v19345_v61 = vld [vmem:[#allocation15 + $0x1234] ss:$24 sps:$4 sm:$0xff]  }
 0x94d   :  { %15737 = vmatpush1.bf16.msra.mxu0 %v19280_v2  ;;  %15421 = vmatprep.subr.bf16.mxu1 %v19285_v37  ;;  %v19348_v2 = vld [vmem:[#allocation15 + $0x10bc] ss:$24 sps:$4 sm:$0xff]   ;;  %v19343_v37 = vld [vmem:[#allocation15 + $0x1230] ss:$24 sps:$4 sm:$0xff]  }
 0x94e   :  { %15738 = vmatprep.subr.bf16.mxu0 %v19288_v40  ;;  %v19346_v40 = vld [vmem:[#allocation15 + $0x10b8] ss:$24 sps:$4 sm:$0xff]  }
 0x950   :  { %15422 = vmatpush1.bf16.msra.mxu1 %v19283_v42  ;;  %v19351_v42 = vld [vmem:[#allocation15 + $0x1264] ss:$24 sps:$4 sm:$0xff]  }
 0x951   :  { %15739 = vmatpush1.bf16.msra.mxu0 %v19286_v35  ;;  %15423 = vmatprep.subr.bf16.mxu1 %v19291_v56  ;;  %v19354_v35 = vld [vmem:[#allocation15 + $0x10ec] ss:$24 sps:$4 sm:$0xff]   ;;  %v19349_v56 = vld [vmem:[#allocation15 + $0x1260] ss:$24 sps:$4 sm:$0xff]  }
 0x952   :  { %15751 = vmatprep.subr.bf16.mxu0 %v19294_v39  ;;  %v19352_v39 = vld [vmem:[#allocation15 + $0x10e8] ss:$24 sps:$4 sm:$0xff]  }
 0x954   :  { %15424 = vmatpush1.bf16.msra.mxu1 %v19289_v5  ;;  %15741 = vmatmul.mubr.bf16.vlgmr.msra.gmra.mrb[44].mxu0 %v20673_v43  ;;  %v19357_v5 = vld [vmem:[#allocation15 + $0x1294] ss:$24 sps:$4 sm:$0xff]  }
 0x955   :  { %15752 = vmatpush1.bf16.msra.mxu0 %v19292_v32  ;;  %15783 = vmatprep.mubr.bf16.mxu0 %v20688_v23  ;;  %v19360_v32 = vld [vmem:[#allocation15 + $0x111c] ss:$24 sps:$4 sm:$0xff]  }
 0x956   :  { %15425 = vmatprep.subr.bf16.mxu1 %v19297_v49  ;;  %15753 = vmatprep.subr.bf16.mxu0 %v19300_v48  ;;  %v19355_v49 = vld [vmem:[#allocation15 + $0x1290] ss:$24 sps:$4 sm:$0xff]  }
 0x957   :  { %v19358_v48 = vld [vmem:[#allocation15 + $0x1118] ss:$24 sps:$4 sm:$0xff]  }
 0x958   :  { %15426 = vmatpush1.bf16.msra.mxu1 %v19295_v45  ;;  %v19363_v45 = vld [vmem:[#allocation15 + $0x12c4] ss:$24 sps:$4 sm:$0xff]  }
 0x959   :  { %15754 = vmatpush1.bf16.msra.mxu0 %v19298_v62  ;;  %15427 = vmatprep.subr.bf16.mxu1 %v19303_v50  ;;  %v19366_v62 = vld [vmem:[#allocation15 + $0x114c] ss:$24 sps:$4 sm:$0xff]   ;;  %v19361_v50 = vld [vmem:[#allocation15 + $0x12c0] ss:$24 sps:$4 sm:$0xff]  }
 0x95a   :  { %15755 = vmatprep.subr.bf16.mxu0 %v19306_v12  ;;  %v19364_v12 = vld [vmem:[#allocation15 + $0x1148] ss:$24 sps:$4 sm:$0xff]  }
 0x95c   :  { %15428 = vmatpush1.bf16.msra.mxu1 %v19301_v52  ;;  %v19369_v52 = vld [vmem:[#allocation15 + $0x12f4] ss:$24 sps:$4 sm:$0xff]  }
 0x95d   :  { %15756 = vmatpush1.bf16.msra.mxu0 %v19304_v28  ;;  %15429 = vmatprep.subr.bf16.mxu1 %v19309_v57  ;;  %v19372_v28 = vld [vmem:[#allocation15 + $0x117c] ss:$24 sps:$4 sm:$0xff]   ;;  %v19367_v57 = vld [vmem:[#allocation15 + $0x12f0] ss:$24 sps:$4 sm:$0xff]  }
 0x95e   :  { %15757 = vmatprep.subr.bf16.mxu0 %v19312_v58  ;;  %v19370_v58 = vld [vmem:[#allocation15 + $0x1178] ss:$24 sps:$4 sm:$0xff]  }
 0x960   :  { %15430 = vmatpush1.bf16.msra.mxu1 %v19307_v1  ;;  %v19375_v1 = vld [vmem:[#allocation15 + $0x1324] ss:$24 sps:$4 sm:$0xff]  }
 0x961   :  { %15758 = vmatpush1.bf16.msra.mxu0 %v19310_v59  ;;  %15431 = vmatprep.subr.bf16.mxu1 %v19315_v3  ;;  %v19378_v59 = vld [vmem:[#allocation15 + $0x11ac] ss:$24 sps:$4 sm:$0xff]   ;;  %v19373_v3 = vld [vmem:[#allocation15 + $0x1320] ss:$24 sps:$4 sm:$0xff]  }
 0x962   :  { %15759 = vmatprep.subr.bf16.mxu0 %v19318_v33  ;;  %v19376_v33 = vld [vmem:[#allocation15 + $0x11a8] ss:$24 sps:$4 sm:$0xff]  }
 0x964   :  { %15432 = vmatpush1.bf16.msra.mxu1 %v19313_v60  ;;  %v19381_v60 = vld [vmem:[#allocation15 + $0x1354] ss:$24 sps:$4 sm:$0xff]  }
 0x965   :  { %15760 = vmatpush1.bf16.msra.mxu0 %v19316_v17  ;;  %15433 = vmatprep.subr.bf16.mxu1 %v19321_v34  ;;  %v19384_v17 = vld [vmem:[#allocation15 + $0x11dc] ss:$24 sps:$4 sm:$0xff]   ;;  %v19379_v34 = vld [vmem:[#allocation15 + $0x1350] ss:$24 sps:$4 sm:$0xff]  }
 0x966   :  { %15761 = vmatprep.subr.bf16.mxu0 %v19324_v4  ;;  %v19382_v4 = vld [vmem:[#allocation15 + $0x11d8] ss:$24 sps:$4 sm:$0xff]  }
 0x968   :  { %15434 = vmatpush1.bf16.msra.mxu1 %v19319_v51  ;;  %v19387_v51 = vld [vmem:[#allocation15 + $0x1384] ss:$24 sps:$4 sm:$0xff]  }
 0x969   :  { %15762 = vmatpush1.bf16.msra.mxu0 %v19322_v9  ;;  %15435 = vmatprep.subr.bf16.mxu1 %v19327_v10  ;;  %v19390_v9 = vld [vmem:[#allocation15 + $0x120c] ss:$24 sps:$4 sm:$0xff]   ;;  %v19385_v10 = vld [vmem:[#allocation15 + $0x1380] ss:$24 sps:$4 sm:$0xff]  }
 0x96a   :  { %15763 = vmatprep.subr.bf16.mxu0 %v19330_v11  ;;  %v19388_v11 = vld [vmem:[#allocation15 + $0x1208] ss:$24 sps:$4 sm:$0xff]  }
 0x96c   :  { %15436 = vmatpush1.bf16.msra.mxu1 %v19325_v14  ;;  %v19393_v14 = vld [vmem:[#allocation15 + $0x13b4] ss:$24 sps:$4 sm:$0xff]  }
 0x96d   :  { %15764 = vmatpush1.bf16.msra.mxu0 %v19328_v16  ;;  %15437 = vmatprep.subr.bf16.mxu1 %v19333_v21  ;;  %v19396_v16 = vld [vmem:[#allocation15 + $0x123c] ss:$24 sps:$4 sm:$0xff]   ;;  %v19391_v21 = vld [vmem:[#allocation15 + $0x13b0] ss:$24 sps:$4 sm:$0xff]  }
 0x96e   :  { %15765 = vmatprep.subr.bf16.mxu0 %v19336_v38  ;;  %v19394_v38 = vld [vmem:[#allocation15 + $0x1238] ss:$24 sps:$4 sm:$0xff]  }
 0x970   :  { %15438 = vmatpush1.bf16.msra.mxu1 %v19331_v22  ;;  %v19399_v22 = vld [vmem:[#allocation15 + $0x13e4] ss:$24 sps:$4 sm:$0xff]  }
 0x971   :  { %15766 = vmatpush1.bf16.msra.mxu0 %v19334_v15  ;;  %15450 = vmatprep.subr.bf16.mxu1 %v19339_v26  ;;  %v19402_v15 = vld [vmem:[#allocation15 + $0x126c] ss:$24 sps:$4 sm:$0xff]   ;;  %v19397_v26 = vld [vmem:[#allocation15 + $0x13e0] ss:$24 sps:$4 sm:$0xff]  }
 0x972   :  { %15767 = vmatprep.subr.bf16.mxu0 %v19342_v30  ;;  %v19400_v30 = vld [vmem:[#allocation15 + $0x1268] ss:$24 sps:$4 sm:$0xff]  }
 0x973   :  { %15440 = vmatmul.mubr.bf16.vlgmr.msra.gmra.mrb[20].mxu1 %v20685_v18 }
 0x974   :  { %15451 = vmatpush1.bf16.msra.mxu1 %v19337_v31  ;;  %15482 = vmatprep.mubr.bf16.mxu1 %v20713_v13  ;;  %v19405_v31 = vld [vmem:[#allocation15 + $0x1414] ss:$24 sps:$4 sm:$0xff]  }
 0x975   :  { %15768 = vmatpush1.bf16.msra.mxu0 %v19340_v19  ;;  %15452 = vmatprep.subr.bf16.mxu1 %v19345_v61  ;;  %v19408_v19 = vld [vmem:[#allocation15 + $0x129c] ss:$24 sps:$4 sm:$0xff]   ;;  %v19403_v61 = vld [vmem:[#allocation15 + $0x1410] ss:$24 sps:$4 sm:$0xff]  }
 0x976   :  { %15769 = vmatprep.subr.bf16.mxu0 %v19348_v2  ;;  %v19406_v2 = vld [vmem:[#allocation15 + $0x1298] ss:$24 sps:$4 sm:$0xff]  }
 0x978   :  { %15453 = vmatpush1.bf16.msra.mxu1 %v19343_v37  ;;  %v19411_v37 = vld [vmem:[#allocation15 + $0x1444] ss:$24 sps:$4 sm:$0xff]  }
 0x979   :  { %15770 = vmatpush1.bf16.msra.mxu0 %v19346_v40  ;;  %15454 = vmatprep.subr.bf16.mxu1 %v19351_v42  ;;  %v19414_v40 = vld [vmem:[#allocation15 + $0x12cc] ss:$24 sps:$4 sm:$0xff]   ;;  %v19409_v42 = vld [vmem:[#allocation15 + $0x1440] ss:$24 sps:$4 sm:$0xff]  }
 0x97a   :  { %15771 = vmatprep.subr.bf16.mxu0 %v19354_v35  ;;  %v19412_v35 = vld [vmem:[#allocation15 + $0x12c8] ss:$24 sps:$4 sm:$0xff]  }
 0x97c   :  { %15455 = vmatpush1.bf16.msra.mxu1 %v19349_v56  ;;  %v19417_v56 = vld [vmem:[#allocation15 + $0x1474] ss:$24 sps:$4 sm:$0xff]  }
 0x97d   :  { %15772 = vmatpush1.bf16.msra.mxu0 %v19352_v39  ;;  %15456 = vmatprep.subr.bf16.mxu1 %v19357_v5  ;;  %v19420_v39 = vld [vmem:[#allocation15 + $0x12fc] ss:$24 sps:$4 sm:$0xff]   ;;  %v19415_v5 = vld [vmem:[#allocation15 + $0x1470] ss:$24 sps:$4 sm:$0xff]  }
 0x97e   :  { %15773 = vmatprep.subr.bf16.mxu0 %v19360_v32  ;;  %v19418_v32 = vld [vmem:[#allocation15 + $0x12f8] ss:$24 sps:$4 sm:$0xff]  }
 0x980   :  { %15457 = vmatpush1.bf16.msra.mxu1 %v19355_v49  ;;  %v19423_v49 = vld [vmem:[#allocation15 + $0x14a4] ss:$24 sps:$4 sm:$0xff]  }
 0x981   :  { %15774 = vmatpush1.bf16.msra.mxu0 %v19358_v48  ;;  %15458 = vmatprep.subr.bf16.mxu1 %v19363_v45  ;;  %v19426_v48 = vld [vmem:[#allocation15 + $0x132c] ss:$24 sps:$4 sm:$0xff]   ;;  %v19421_v45 = vld [vmem:[#allocation15 + $0x14a0] ss:$24 sps:$4 sm:$0xff]  }
 0x982   :  { %15775 = vmatprep.subr.bf16.mxu0 %v19366_v62  ;;  %v19424_v62 = vld [vmem:[#allocation15 + $0x1328] ss:$24 sps:$4 sm:$0xff]  }
 0x984   :  { %15459 = vmatpush1.bf16.msra.mxu1 %v19361_v50  ;;  %v19429_v50 = vld [vmem:[#allocation15 + $0x14d4] ss:$24 sps:$4 sm:$0xff]  }
 0x985   :  { %15776 = vmatpush1.bf16.msra.mxu0 %v19364_v12  ;;  %15460 = vmatprep.subr.bf16.mxu1 %v19369_v52  ;;  %v19432_v12 = vld [vmem:[#allocation15 + $0x135c] ss:$24 sps:$4 sm:$0xff]   ;;  %v19427_v52 = vld [vmem:[#allocation15 + $0x14d0] ss:$24 sps:$4 sm:$0xff]  }
 0x986   :  { %15777 = vmatprep.subr.bf16.mxu0 %v19372_v28  ;;  %v19430_v28 = vld [vmem:[#allocation15 + $0x1358] ss:$24 sps:$4 sm:$0xff]  }
 0x988   :  { %15461 = vmatpush1.bf16.msra.mxu1 %v19367_v57  ;;  %v19435_v57 = vld [vmem:[#allocation15 + $0x1504] ss:$24 sps:$4 sm:$0xff]  }
 0x989   :  { %15778 = vmatpush1.bf16.msra.mxu0 %v19370_v58  ;;  %15462 = vmatprep.subr.bf16.mxu1 %v19375_v1  ;;  %v19438_v58 = vld [vmem:[#allocation15 + $0x138c] ss:$24 sps:$4 sm:$0xff]   ;;  %v19433_v1 = vld [vmem:[#allocation15 + $0x1500] ss:$24 sps:$4 sm:$0xff]  }
 0x98a   :  { %15779 = vmatprep.subr.bf16.mxu0 %v19378_v59  ;;  %v19436_v59 = vld [vmem:[#allocation15 + $0x1388] ss:$24 sps:$4 sm:$0xff]  }
 0x98c   :  { %15463 = vmatpush1.bf16.msra.mxu1 %v19373_v3  ;;  %v19441_v3 = vld [vmem:[#allocation15 + $0x1534] ss:$24 sps:$4 sm:$0xff]  }
 0x98d   :  { %15780 = vmatpush1.bf16.msra.mxu0 %v19376_v33  ;;  %15464 = vmatprep.subr.bf16.mxu1 %v19381_v60  ;;  %v19444_v33 = vld [vmem:[#allocation15 + $0x13bc] ss:$24 sps:$4 sm:$0xff]   ;;  %v19439_v60 = vld [vmem:[#allocation15 + $0x1530] ss:$24 sps:$4 sm:$0xff]  }
 0x98e   :  { %15781 = vmatprep.subr.bf16.mxu0 %v19384_v17  ;;  %v19442_v17 = vld [vmem:[#allocation15 + $0x13b8] ss:$24 sps:$4 sm:$0xff]  }
 0x990   :  { %15465 = vmatpush1.bf16.msra.mxu1 %v19379_v34  ;;  %v19447_v34 = vld [vmem:[#allocation15 + $0x1564] ss:$24 sps:$4 sm:$0xff]  }
 0x991   :  { %15782 = vmatpush1.bf16.msra.mxu0 %v19382_v4  ;;  %15466 = vmatprep.subr.bf16.mxu1 %v19387_v51  ;;  %v19450_v4 = vld [vmem:[#allocation15 + $0x13ec] ss:$24 sps:$4 sm:$0xff]   ;;  %v19445_v51 = vld [vmem:[#allocation15 + $0x1560] ss:$24 sps:$4 sm:$0xff]  }
 0x992   :  { %15794 = vmatprep.subr.bf16.mxu0 %v19390_v9  ;;  %v19448_v9 = vld [vmem:[#allocation15 + $0x13e8] ss:$24 sps:$4 sm:$0xff]  }
 0x994   :  { %15467 = vmatpush1.bf16.msra.mxu1 %v19385_v10  ;;  %15784 = vmatmul.mubr.bf16.vlgmr.msra.gmra.mrb[44].mxu0 %v20685_v18  ;;  %v19453_v10 = vld [vmem:[#allocation15 + $0x1594] ss:$24 sps:$4 sm:$0xff]  }
 0x995   :  { %15795 = vmatpush1.bf16.msra.mxu0 %v19388_v11  ;;  %15826 = vmatprep.mubr.bf16.mxu0 %v20713_v13  ;;  %v19456_v11 = vld [vmem:[#allocation15 + $0x141c] ss:$24 sps:$4 sm:$0xff]  }
 0x996   :  { %15468 = vmatprep.subr.bf16.mxu1 %v19393_v14  ;;  %15796 = vmatprep.subr.bf16.mxu0 %v19396_v16  ;;  %v19451_v14 = vld [vmem:[#allocation15 + $0x1590] ss:$24 sps:$4 sm:$0xff]  }
 0x997   :  { %v19454_v16 = vld [vmem:[#allocation15 + $0x1418] ss:$24 sps:$4 sm:$0xff]  }
 0x998   :  { %15469 = vmatpush1.bf16.msra.mxu1 %v19391_v21  ;;  %v19459_v21 = vld [vmem:[#allocation15 + $0x15c4] ss:$24 sps:$4 sm:$0xff]  }
 0x999   :  { %15797 = vmatpush1.bf16.msra.mxu0 %v19394_v38  ;;  %15470 = vmatprep.subr.bf16.mxu1 %v19399_v22  ;;  %v19462_v38 = vld [vmem:[#allocation15 + $0x144c] ss:$24 sps:$4 sm:$0xff]   ;;  %v19457_v22 = vld [vmem:[#allocation15 + $0x15c0] ss:$24 sps:$4 sm:$0xff]  }
 0x99a   :  { %15798 = vmatprep.subr.bf16.mxu0 %v19402_v15  ;;  %v19460_v15 = vld [vmem:[#allocation15 + $0x1448] ss:$24 sps:$4 sm:$0xff]  }
 0x99c   :  { %15471 = vmatpush1.bf16.msra.mxu1 %v19397_v26  ;;  %v19465_v26 = vld [vmem:[#allocation15 + $0x15f4] ss:$24 sps:$4 sm:$0xff]  }
 0x99d   :  { %15799 = vmatpush1.bf16.msra.mxu0 %v19400_v30  ;;  %15472 = vmatprep.subr.bf16.mxu1 %v19405_v31  ;;  %v19468_v30 = vld [vmem:[#allocation15 + $0x147c] ss:$24 sps:$4 sm:$0xff]   ;;  %v19463_v31 = vld [vmem:[#allocation15 + $0x15f0] ss:$24 sps:$4 sm:$0xff]  }
 0x99e   :  { %15800 = vmatprep.subr.bf16.mxu0 %v19408_v19  ;;  %v19466_v19 = vld [vmem:[#allocation15 + $0x1478] ss:$24 sps:$4 sm:$0xff]  }
 0x9a0   :  { %15473 = vmatpush1.bf16.msra.mxu1 %v19403_v61  ;;  %v19471_v61 = vld [vmem:[#allocation15 + $0x1624] ss:$24 sps:$4 sm:$0xff]  }
 0x9a1   :  { %15801 = vmatpush1.bf16.msra.mxu0 %v19406_v2  ;;  %15474 = vmatprep.subr.bf16.mxu1 %v19411_v37  ;;  %v19474_v2 = vld [vmem:[#allocation15 + $0x14ac] ss:$24 sps:$4 sm:$0xff]   ;;  %v19469_v37 = vld [vmem:[#allocation15 + $0x1620] ss:$24 sps:$4 sm:$0xff]  }
 0x9a2   :  { %15802 = vmatprep.subr.bf16.mxu0 %v19414_v40  ;;  %v19472_v40 = vld [vmem:[#allocation15 + $0x14a8] ss:$24 sps:$4 sm:$0xff]  }
 0x9a4   :  { %15475 = vmatpush1.bf16.msra.mxu1 %v19409_v42  ;;  %v19477_v42 = vld [vmem:[#allocation15 + $0x1654] ss:$24 sps:$4 sm:$0xff]  }
 0x9a5   :  { %15803 = vmatpush1.bf16.msra.mxu0 %v19412_v35  ;;  %15476 = vmatprep.subr.bf16.mxu1 %v19417_v56  ;;  %v19480_v35 = vld [vmem:[#allocation15 + $0x14dc] ss:$24 sps:$4 sm:$0xff]   ;;  %v19475_v56 = vld [vmem:[#allocation15 + $0x1650] ss:$24 sps:$4 sm:$0xff]  }
 0x9a6   :  { %15804 = vmatprep.subr.bf16.mxu0 %v19420_v39  ;;  %v19478_v39 = vld [vmem:[#allocation15 + $0x14d8] ss:$24 sps:$4 sm:$0xff]  }
 0x9a8   :  { %15477 = vmatpush1.bf16.msra.mxu1 %v19415_v5  ;;  %v19483_v5 = vld [vmem:[#allocation15 + $0x1684] ss:$24 sps:$4 sm:$0xff]  }
 0x9a9   :  { %15805 = vmatpush1.bf16.msra.mxu0 %v19418_v32  ;;  %15478 = vmatprep.subr.bf16.mxu1 %v19423_v49  ;;  %v19486_v32 = vld [vmem:[#allocation15 + $0x150c] ss:$24 sps:$4 sm:$0xff]   ;;  %v19481_v49 = vld [vmem:[#allocation15 + $0x1680] ss:$24 sps:$4 sm:$0xff]  }
 0x9aa   :  { %15806 = vmatprep.subr.bf16.mxu0 %v19426_v48  ;;  %v19484_v48 = vld [vmem:[#allocation15 + $0x1508] ss:$24 sps:$4 sm:$0xff]  }
 0x9ac   :  { %15479 = vmatpush1.bf16.msra.mxu1 %v19421_v45  ;;  %v19489_v45 = vld [vmem:[#allocation15 + $0x16b4] ss:$24 sps:$4 sm:$0xff]  }
 0x9ad   :  { %15807 = vmatpush1.bf16.msra.mxu0 %v19424_v62  ;;  %15480 = vmatprep.subr.bf16.mxu1 %v19429_v50  ;;  %v19492_v62 = vld [vmem:[#allocation15 + $0x153c] ss:$24 sps:$4 sm:$0xff]   ;;  %v19487_v50 = vld [vmem:[#allocation15 + $0x16b0] ss:$24 sps:$4 sm:$0xff]  }
 0x9ae   :  { %15808 = vmatprep.subr.bf16.mxu0 %v19432_v12  ;;  %v19490_v12 = vld [vmem:[#allocation15 + $0x1538] ss:$24 sps:$4 sm:$0xff]  }
 0x9b0   :  { %15481 = vmatpush1.bf16.msra.mxu1 %v19427_v52  ;;  %v19495_v52 = vld [vmem:[#allocation15 + $0x16e4] ss:$24 sps:$4 sm:$0xff]  }
 0x9b1   :  { %15809 = vmatpush1.bf16.msra.mxu0 %v19430_v28  ;;  %15493 = vmatprep.subr.bf16.mxu1 %v19435_v57  ;;  %v19498_v28 = vld [vmem:[#allocation15 + $0x156c] ss:$24 sps:$4 sm:$0xff]   ;;  %v19493_v57 = vld [vmem:[#allocation15 + $0x16e0] ss:$24 sps:$4 sm:$0xff]  }
 0x9b2   :  { %15810 = vmatprep.subr.bf16.mxu0 %v19438_v58  ;;  %v19496_v58 = vld [vmem:[#allocation15 + $0x1568] ss:$24 sps:$4 sm:$0xff]  }
 0x9b3   :  { %15483 = vmatmul.mubr.bf16.vlgmr.msra.gmra.mrb[20].mxu1 %v20710_v24 }
 0x9b4   :  { %15494 = vmatpush1.bf16.msra.mxu1 %v19433_v1  ;;  %15525 = vmatprep.mubr.bf16.mxu1 %v20723_v27  ;;  %v19501_v1 = vld [vmem:[#allocation15 + $0x1714] ss:$24 sps:$4 sm:$0xff]  }
 0x9b5   :  { %15811 = vmatpush1.bf16.msra.mxu0 %v19436_v59  ;;  %15495 = vmatprep.subr.bf16.mxu1 %v19441_v3  ;;  %v19504_v59 = vld [vmem:[#allocation15 + $0x159c] ss:$24 sps:$4 sm:$0xff]   ;;  %v19499_v3 = vld [vmem:[#allocation15 + $0x1710] ss:$24 sps:$4 sm:$0xff]  }
 0x9b6   :  { %15812 = vmatprep.subr.bf16.mxu0 %v19444_v33  ;;  %v19502_v33 = vld [vmem:[#allocation15 + $0x1598] ss:$24 sps:$4 sm:$0xff]  }
 0x9b8   :  { %15496 = vmatpush1.bf16.msra.mxu1 %v19439_v60  ;;  %v19507_v60 = vld [vmem:[#allocation15 + $0x1744] ss:$24 sps:$4 sm:$0xff]  }
 0x9b9   :  { %15813 = vmatpush1.bf16.msra.mxu0 %v19442_v17  ;;  %15497 = vmatprep.subr.bf16.mxu1 %v19447_v34  ;;  %v19510_v17 = vld [vmem:[#allocation15 + $0x15cc] ss:$24 sps:$4 sm:$0xff]   ;;  %v19505_v34 = vld [vmem:[#allocation15 + $0x1740] ss:$24 sps:$4 sm:$0xff]  }
 0x9ba   :  { %15814 = vmatprep.subr.bf16.mxu0 %v19450_v4  ;;  %v19508_v4 = vld [vmem:[#allocation15 + $0x15c8] ss:$24 sps:$4 sm:$0xff]  }
 0x9bc   :  { %15498 = vmatpush1.bf16.msra.mxu1 %v19445_v51  ;;  %v19513_v51 = vld [vmem:[#allocation15 + $0x1774] ss:$24 sps:$4 sm:$0xff]  }
 0x9bd   :  { %15815 = vmatpush1.bf16.msra.mxu0 %v19448_v9  ;;  %15499 = vmatprep.subr.bf16.mxu1 %v19453_v10  ;;  %v19516_v9 = vld [vmem:[#allocation15 + $0x15fc] ss:$24 sps:$4 sm:$0xff]   ;;  %v19511_v10 = vld [vmem:[#allocation15 + $0x1770] ss:$24 sps:$4 sm:$0xff]  }
 0x9be   :  { %15816 = vmatprep.subr.bf16.mxu0 %v19456_v11  ;;  %v19514_v11 = vld [vmem:[#allocation15 + $0x15f8] ss:$24 sps:$4 sm:$0xff]  }
 0x9c0   :  { %15500 = vmatpush1.bf16.msra.mxu1 %v19451_v14  ;;  %v19519_v14 = vld [vmem:[#allocation15 + $0x17a4] ss:$24 sps:$4 sm:$0xff]  }
 0x9c1   :  { %15817 = vmatpush1.bf16.msra.mxu0 %v19454_v16  ;;  %15501 = vmatprep.subr.bf16.mxu1 %v19459_v21  ;;  %v19522_v16 = vld [vmem:[#allocation15 + $0x162c] ss:$24 sps:$4 sm:$0xff]   ;;  %v19517_v21 = vld [vmem:[#allocation15 + $0x17a0] ss:$24 sps:$4 sm:$0xff]  }
 0x9c2   :  { %15818 = vmatprep.subr.bf16.mxu0 %v19462_v38  ;;  %v19520_v38 = vld [vmem:[#allocation15 + $0x1628] ss:$24 sps:$4 sm:$0xff]  }
 0x9c4   :  { %15502 = vmatpush1.bf16.msra.mxu1 %v19457_v22  ;;  %v19525_v22 = vld [vmem:[#allocation15 + $0x17d4] ss:$24 sps:$4 sm:$0xff]  }
 0x9c5   :  { %15819 = vmatpush1.bf16.msra.mxu0 %v19460_v15  ;;  %15503 = vmatprep.subr.bf16.mxu1 %v19465_v26  ;;  %v19528_v15 = vld [vmem:[#allocation15 + $0x165c] ss:$24 sps:$4 sm:$0xff]   ;;  %v19523_v26 = vld [vmem:[#allocation15 + $0x17d0] ss:$24 sps:$4 sm:$0xff]  }
 0x9c6   :  { %15820 = vmatprep.subr.bf16.mxu0 %v19468_v30  ;;  %v19526_v30 = vld [vmem:[#allocation15 + $0x1658] ss:$24 sps:$4 sm:$0xff]  }
 0x9c8   :  { %15504 = vmatpush1.bf16.msra.mxu1 %v19463_v31  ;;  %v19531_v31 = vld [vmem:[#allocation15 + $0x14] ss:$24 sps:$4 sm:$0xff]  }
 0x9c9   :  { %15821 = vmatpush1.bf16.msra.mxu0 %v19466_v19  ;;  %15505 = vmatprep.subr.bf16.mxu1 %v19471_v61  ;;  %v19534_v19 = vld [vmem:[#allocation15 + $0x168c] ss:$24 sps:$4 sm:$0xff]   ;;  %v19529_v61 = vld [vmem:[#allocation15 + $0x10] ss:$24 sps:$4 sm:$0xff]  }
 0x9ca   :  { %15822 = vmatprep.subr.bf16.mxu0 %v19474_v2  ;;  %v19532_v2 = vld [vmem:[#allocation15 + $0x1688] ss:$24 sps:$4 sm:$0xff]  }
 0x9cc   :  { %15506 = vmatpush1.bf16.msra.mxu1 %v19469_v37  ;;  %v19537_v37 = vld [vmem:[#allocation15 + $0x44] ss:$24 sps:$4 sm:$0xff]  }
 0x9cd   :  { %15823 = vmatpush1.bf16.msra.mxu0 %v19472_v40  ;;  %15507 = vmatprep.subr.bf16.mxu1 %v19477_v42  ;;  %v19540_v40 = vld [vmem:[#allocation15 + $0x16bc] ss:$24 sps:$4 sm:$0xff]   ;;  %v19535_v42 = vld [vmem:[#allocation15 + $0x40] ss:$24 sps:$4 sm:$0xff]  }
 0x9ce   :  { %15824 = vmatprep.subr.bf16.mxu0 %v19480_v35  ;;  %v19538_v35 = vld [vmem:[#allocation15 + $0x16b8] ss:$24 sps:$4 sm:$0xff]  }
 0x9d0   :  { %15508 = vmatpush1.bf16.msra.mxu1 %v19475_v56  ;;  %v19543_v56 = vld [vmem:[#allocation15 + $0x74] ss:$24 sps:$4 sm:$0xff]  }
 0x9d1   :  { %15825 = vmatpush1.bf16.msra.mxu0 %v19478_v39  ;;  %15509 = vmatprep.subr.bf16.mxu1 %v19483_v5  ;;  %v19546_v39 = vld [vmem:[#allocation15 + $0x16ec] ss:$24 sps:$4 sm:$0xff]   ;;  %v19541_v5 = vld [vmem:[#allocation15 + $0x70] ss:$24 sps:$4 sm:$0xff]  }
 0x9d2   :  { %15837 = vmatprep.subr.bf16.mxu0 %v19486_v32  ;;  %v19544_v32 = vld [vmem:[#allocation15 + $0x16e8] ss:$24 sps:$4 sm:$0xff]  }
 0x9d4   :  { %15510 = vmatpush1.bf16.msra.mxu1 %v19481_v49  ;;  %15827 = vmatmul.mubr.bf16.vlgmr.msra.gmra.mrb[44].mxu0 %v20710_v24  ;;  %v19549_v49 = vld [vmem:[#allocation15 + $0xa4] ss:$24 sps:$4 sm:$0xff]  }
 0x9d5   :  { %15838 = vmatpush1.bf16.msra.mxu0 %v19484_v48  ;;  %15869 = vmatprep.mubr.bf16.mxu0 %v20723_v27  ;;  %v19552_v48 = vld [vmem:[#allocation15 + $0x171c] ss:$24 sps:$4 sm:$0xff]  }
 0x9d6   :  { %15511 = vmatprep.subr.bf16.mxu1 %v19489_v45  ;;  %15839 = vmatprep.subr.bf16.mxu0 %v19492_v62  ;;  %v19547_v45 = vld [vmem:[#allocation15 + $0xa0] ss:$24 sps:$4 sm:$0xff]   ;;  %v19555_v62 = vld [vmem:[#allocation15 + $0xd4] ss:$24 sps:$4 sm:$0xff]  }
 0x9d8   :  { %15512 = vmatpush1.bf16.msra.mxu1 %v19487_v50  ;;  %v19558_v50 = vld [vmem:[#allocation15 + $0x174c] ss:$24 sps:$4 sm:$0xff]  }
 0x9d9   :  { %15840 = vmatpush1.bf16.msra.mxu0 %v19490_v12  ;;  %15513 = vmatprep.subr.bf16.mxu1 %v19495_v52  ;;  %v19553_v12 = vld [vmem:[#allocation15 + $0xd0] ss:$24 sps:$4 sm:$0xff]  }
 0x9da   :  { %15841 = vmatprep.subr.bf16.mxu0 %v19498_v28  ;;  %v19556_v52 = vld [vmem:[#allocation15 + $0x1748] ss:$24 sps:$4 sm:$0xff]   ;;  %v19561_v28 = vld [vmem:[#allocation15 + $0x104] ss:$24 sps:$4 sm:$0xff]  }
 0x9dc   :  { %15514 = vmatpush1.bf16.msra.mxu1 %v19493_v57  ;;  %v19564_v57 = vld [vmem:[#allocation15 + $0x177c] ss:$24 sps:$4 sm:$0xff]  }
 0x9dd   :  { %15842 = vmatpush1.bf16.msra.mxu0 %v19496_v58  ;;  %15515 = vmatprep.subr.bf16.mxu1 %v19501_v1  ;;  %v19559_v58 = vld [vmem:[#allocation15 + $0x100] ss:$24 sps:$4 sm:$0xff]  }
 0x9de   :  { %15843 = vmatprep.subr.bf16.mxu0 %v19504_v59  ;;  %v19562_v1 = vld [vmem:[#allocation15 + $0x1778] ss:$24 sps:$4 sm:$0xff]   ;;  %v19567_v59 = vld [vmem:[#allocation15 + $0x134] ss:$24 sps:$4 sm:$0xff]  }
 0x9e0   :  { %15516 = vmatpush1.bf16.msra.mxu1 %v19499_v3  ;;  %v19570_v3 = vld [vmem:[#allocation15 + $0x17ac] ss:$24 sps:$4 sm:$0xff]  }
 0x9e1   :  { %15844 = vmatpush1.bf16.msra.mxu0 %v19502_v33  ;;  %15517 = vmatprep.subr.bf16.mxu1 %v19507_v60  ;;  %v19565_v33 = vld [vmem:[#allocation15 + $0x130] ss:$24 sps:$4 sm:$0xff]  }
 0x9e2   :  { %15845 = vmatprep.subr.bf16.mxu0 %v19510_v17  ;;  %v19568_v60 = vld [vmem:[#allocation15 + $0x17a8] ss:$24 sps:$4 sm:$0xff]   ;;  %v19573_v17 = vld [vmem:[#allocation15 + $0x164] ss:$24 sps:$4 sm:$0xff]  }
 0x9e4   :  { %15518 = vmatpush1.bf16.msra.mxu1 %v19505_v34  ;;  %v19576_v34 = vld [vmem:[#allocation15 + $0x17dc] ss:$24 sps:$4 sm:$0xff]  }
 0x9e5   :  { %15846 = vmatpush1.bf16.msra.mxu0 %v19508_v4  ;;  %15519 = vmatprep.subr.bf16.mxu1 %v19513_v51  ;;  %v19571_v4 = vld [vmem:[#allocation15 + $0x160] ss:$24 sps:$4 sm:$0xff]  }
 0x9e6   :  { %15847 = vmatprep.subr.bf16.mxu0 %v19516_v9  ;;  %v19574_v51 = vld [vmem:[#allocation15 + $0x17d8] ss:$24 sps:$4 sm:$0xff]   ;;  %v19579_v9 = vld [vmem:[#allocation15 + $0x194] ss:$24 sps:$4 sm:$0xff]  }
 0x9e8   :  { %15520 = vmatpush1.bf16.msra.mxu1 %v19511_v10  ;;  %v19577_v10 = vld [vmem:[#allocation15 + $0x190] ss:$24 sps:$4 sm:$0xff]  }
 0x9e9   :  { %15848 = vmatpush1.bf16.msra.mxu0 %v19514_v11  ;;  %15521 = vmatprep.subr.bf16.mxu1 %v19519_v14  ;;  %v19582_v11 = vld [vmem:[#allocation15 + $0x1c4] ss:$24 sps:$4 sm:$0xff]   ;;  %v19580_v14 = vld [vmem:[#allocation15 + $0x1c0] ss:$24 sps:$4 sm:$0xff]  }
 0x9ea   :  { %15849 = vmatprep.subr.bf16.mxu0 %v19522_v16  ;;  %v19585_v16 = vld [vmem:[#allocation15 + $0x1f4] ss:$24 sps:$4 sm:$0xff]  }
 0x9ec   :  { %15522 = vmatpush1.bf16.msra.mxu1 %v19517_v21  ;;  %v19583_v21 = vld [vmem:[#allocation15 + $0x1f0] ss:$24 sps:$4 sm:$0xff]  }
 0x9ed   :  { %15850 = vmatpush1.bf16.msra.mxu0 %v19520_v38  ;;  %15523 = vmatprep.subr.bf16.mxu1 %v19525_v22  ;;  %v19588_v38 = vld [vmem:[#allocation15 + $0x224] ss:$24 sps:$4 sm:$0xff]   ;;  %v19586_v22 = vld [vmem:[#allocation15 + $0x220] ss:$24 sps:$4 sm:$0xff]  }
 0x9ee   :  { %15851 = vmatprep.subr.bf16.mxu0 %v19528_v15  ;;  %v19591_v15 = vld [vmem:[#allocation15 + $0x254] ss:$24 sps:$4 sm:$0xff]  }
 0x9f0   :  { %15524 = vmatpush1.bf16.msra.mxu1 %v19523_v26  ;;  %v19589_v26 = vld [vmem:[#allocation15 + $0x250] ss:$24 sps:$4 sm:$0xff]  }
 0x9f1   :  { %15852 = vmatpush1.bf16.msra.mxu0 %v19526_v30  ;;  %15880 = vmatprep.subr.bf16.mxu1 %v19531_v31  ;;  %v19594_v30 = vld [vmem:[#allocation15 + $0x284] ss:$24 sps:$4 sm:$0xff]   ;;  %v19592_v31 = vld [vmem:[#allocation15 + $0x280] ss:$24 sps:$4 sm:$0xff]  }
 0x9f2   :  { %15853 = vmatprep.subr.bf16.mxu0 %v19534_v19  ;;  %v19597_v19 = vld [vmem:[#allocation15 + $0x2b4] ss:$24 sps:$4 sm:$0xff]  }
 0x9f3   :  { %15526 = vmatmul.mubr.bf16.vlgmr.msra.gmra.mrb[20].mxu1 %v20721_v44 }
 0x9f4   :  { %15881 = vmatpush1.bf16.msra.mxu1 %v19529_v61  ;;  %15912 = vmatprep.mubr.bf16.mxu1 %v20598_v41  ;;  %v19550_v41 = vld [vmem:[#allocation15 + $0x1718] ss:$24 sps:$4 sm:$0xff]  }
 0x9f5   :  { %15854 = vmatpush1.bf16.msra.mxu0 %v19532_v2  ;;  %15882 = vmatprep.subr.bf16.mxu1 %v19537_v37  ;;  %v19595_v61 = vld [vmem:[#allocation15 + $0x2b0] ss:$24 sps:$4 sm:$0xff]   ;;  %v19600_v2 = vld [vmem:[#allocation15 + $0x2e4] ss:$24 sps:$4 sm:$0xff]   ;;  %v19598_v37 = vld [vmem:[#allocation15 + $0x2e0] ss:$24 sps:$4 sm:$0xff]  }
 0x9f6   :  { %15855 = vmatprep.subr.bf16.mxu0 %v19540_v40  ;;  %v19603_v40 = vld [vmem:[#allocation15 + $0x314] ss:$24 sps:$4 sm:$0xff]  }
 0x9f8   :  { %15883 = vmatpush1.bf16.msra.mxu1 %v19535_v42  ;;  %v19601_v42 = vld [vmem:[#allocation15 + $0x310] ss:$24 sps:$4 sm:$0xff]  }
 0x9f9   :  { %15856 = vmatpush1.bf16.msra.mxu0 %v19538_v35  ;;  %15884 = vmatprep.subr.bf16.mxu1 %v19543_v56  ;;  %v19606_v35 = vld [vmem:[#allocation15 + $0x344] ss:$24 sps:$4 sm:$0xff]   ;;  %v19604_v56 = vld [vmem:[#allocation15 + $0x340] ss:$24 sps:$4 sm:$0xff]  }
 0x9fa   :  { %15857 = vmatprep.subr.bf16.mxu0 %v19546_v39  ;;  %v19609_v39 = vld [vmem:[#allocation15 + $0x374] ss:$24 sps:$4 sm:$0xff]  }
 0x9fc   :  { %15885 = vmatpush1.bf16.msra.mxu1 %v19541_v5  ;;  %v19607_v5 = vld [vmem:[#allocation15 + $0x370] ss:$24 sps:$4 sm:$0xff]  }
 0x9fd   :  { %15858 = vmatpush1.bf16.msra.mxu0 %v19544_v32  ;;  %15886 = vmatprep.subr.bf16.mxu1 %v19549_v49  ;;  %v19612_v32 = vld [vmem:[#allocation15 + $0x3a4] ss:$24 sps:$4 sm:$0xff]   ;;  %v19610_v49 = vld [vmem:[#allocation15 + $0x3a0] ss:$24 sps:$4 sm:$0xff]  }
 0x9fe   :  { %15859 = vmatprep.subr.bf16.mxu0 %v19552_v48  ;;  %v19615_v48 = vld [vmem:[#allocation15 + $0x3d4] ss:$24 sps:$4 sm:$0xff]  }
 0xa00   :  { %15887 = vmatpush1.bf16.msra.mxu1 %v19547_v45  ;;  %v19613_v45 = vld [vmem:[#allocation15 + $0x3d0] ss:$24 sps:$4 sm:$0xff]  }
 0xa01   :  { %15860 = vmatpush1.bf16.msra.mxu0 %v19550_v41  ;;  %15888 = vmatprep.subr.bf16.mxu1 %v19555_v62  ;;  %v19618_v41 = vld [vmem:[#allocation15 + $0x404] ss:$24 sps:$4 sm:$0xff]   ;;  %v19621_v62 = vld [vmem:[#allocation15 + $0x434] ss:$24 sps:$4 sm:$0xff]  }
 0xa02   :  { %15861 = vmatprep.subr.bf16.mxu0 %v19558_v50  ;;  %v19624_v50 = vld [vmem:[#allocation15 + $0x464] ss:$24 sps:$4 sm:$0xff]  }
 0xa04   :  { %15889 = vmatpush1.bf16.msra.mxu1 %v19553_v12  ;;  %v19622_v12 = vld [vmem:[#allocation15 + $0x460] ss:$24 sps:$4 sm:$0xff]  }
 0xa05   :  { %15862 = vmatpush1.bf16.msra.mxu0 %v19556_v52  ;;  %15890 = vmatprep.subr.bf16.mxu1 %v19561_v28  ;;  %v19627_v52 = vld [vmem:[#allocation15 + $0x494] ss:$24 sps:$4 sm:$0xff]   ;;  %v19625_v28 = vld [vmem:[#allocation15 + $0x490] ss:$24 sps:$4 sm:$0xff]  }
 0xa06   :  { %15863 = vmatprep.subr.bf16.mxu0 %v19564_v57  ;;  %v19630_v57 = vld [vmem:[#allocation15 + $0x4c4] ss:$24 sps:$4 sm:$0xff]  }
 0xa08   :  { %15891 = vmatpush1.bf16.msra.mxu1 %v19559_v58  ;;  %v19628_v58 = vld [vmem:[#allocation15 + $0x4c0] ss:$24 sps:$4 sm:$0xff]  }
 0xa09   :  { %15864 = vmatpush1.bf16.msra.mxu0 %v19562_v1  ;;  %15892 = vmatprep.subr.bf16.mxu1 %v19567_v59  ;;  %v19633_v1 = vld [vmem:[#allocation15 + $0x4f4] ss:$24 sps:$4 sm:$0xff]   ;;  %v19631_v59 = vld [vmem:[#allocation15 + $0x4f0] ss:$24 sps:$4 sm:$0xff]  }
 0xa0a   :  { %15865 = vmatprep.subr.bf16.mxu0 %v19570_v3  ;;  %v19636_v3 = vld [vmem:[#allocation15 + $0x524] ss:$24 sps:$4 sm:$0xff]  }
 0xa0c   :  { %15893 = vmatpush1.bf16.msra.mxu1 %v19565_v33  ;;  %v19634_v33 = vld [vmem:[#allocation15 + $0x520] ss:$24 sps:$4 sm:$0xff]  }
 0xa0d   :  { %15866 = vmatpush1.bf16.msra.mxu0 %v19568_v60  ;;  %15894 = vmatprep.subr.bf16.mxu1 %v19573_v17  ;;  %v19639_v60 = vld [vmem:[#allocation15 + $0x554] ss:$24 sps:$4 sm:$0xff]   ;;  %v19637_v17 = vld [vmem:[#allocation15 + $0x550] ss:$24 sps:$4 sm:$0xff]  }
 0xa0e   :  { %15867 = vmatprep.subr.bf16.mxu0 %v19576_v34  ;;  %v19642_v34 = vld [vmem:[#allocation15 + $0x584] ss:$24 sps:$4 sm:$0xff]  }
 0xa10   :  { %15895 = vmatpush1.bf16.msra.mxu1 %v19571_v4  ;;  %v19640_v4 = vld [vmem:[#allocation15 + $0x580] ss:$24 sps:$4 sm:$0xff]  }
 0xa11   :  { %15868 = vmatpush1.bf16.msra.mxu0 %v19574_v51  ;;  %15896 = vmatprep.subr.bf16.mxu1 %v19579_v9  ;;  %v19645_v51 = vld [vmem:[#allocation15 + $0x5b4] ss:$24 sps:$4 sm:$0xff]   ;;  %v19643_v9 = vld [vmem:[#allocation15 + $0x5b0] ss:$24 sps:$4 sm:$0xff]  }
 0xa14   :  { %15897 = vmatpush1.bf16.msra.mxu1 %v19577_v10  ;;  %15870 = vmatmul.mubr.bf16.vlgmr.msra.gmra.mrb[44].mxu0 %v20721_v44  ;;  %v19648_v10 = vld [vmem:[#allocation15 + $0x5e4] ss:$24 sps:$4 sm:$0xff]  }
 0xa15   :  { %15898 = vmatprep.subr.bf16.mxu1 %v19582_v11  ;;  %v19646_v11 = vld [vmem:[#allocation15 + $0x5e0] ss:$24 sps:$4 sm:$0xff]  }
 0xa18   :  { %15899 = vmatpush1.bf16.msra.mxu1 %v19580_v14  ;;  %v19651_v14 = vld [vmem:[#allocation15 + $0x614] ss:$24 sps:$4 sm:$0xff]  }
 0xa19   :  { %15900 = vmatprep.subr.bf16.mxu1 %v19585_v16  ;;  %v19649_v16 = vld [vmem:[#allocation15 + $0x610] ss:$24 sps:$4 sm:$0xff]  }
 0xa1c   :  { %15901 = vmatpush1.bf16.msra.mxu1 %v19583_v21  ;;  %v19654_v21 = vld [vmem:[#allocation15 + $0x644] ss:$24 sps:$4 sm:$0xff]  }
 0xa1d   :  { %15902 = vmatprep.subr.bf16.mxu1 %v19588_v38  ;;  %v19652_v38 = vld [vmem:[#allocation15 + $0x640] ss:$24 sps:$4 sm:$0xff]  }
 0xa20   :  { %15903 = vmatpush1.bf16.msra.mxu1 %v19586_v22  ;;  %v19657_v22 = vld [vmem:[#allocation15 + $0x674] ss:$24 sps:$4 sm:$0xff]  }
 0xa21   :  { %15904 = vmatprep.subr.bf16.mxu1 %v19591_v15  ;;  %v19655_v15 = vld [vmem:[#allocation15 + $0x670] ss:$24 sps:$4 sm:$0xff]  }
 0xa24   :  { %15905 = vmatpush1.bf16.msra.mxu1 %v19589_v26  ;;  %v19660_v26 = vld [vmem:[#allocation15 + $0x6a4] ss:$24 sps:$4 sm:$0xff]  }
 0xa25   :  { %15906 = vmatprep.subr.bf16.mxu1 %v19594_v30  ;;  %v19658_v30 = vld [vmem:[#allocation15 + $0x6a0] ss:$24 sps:$4 sm:$0xff]  }
 0xa28   :  { %15907 = vmatpush1.bf16.msra.mxu1 %v19592_v31  ;;  %v19663_v31 = vld [vmem:[#allocation15 + $0x6d4] ss:$24 sps:$4 sm:$0xff]  }
 0xa29   :  { %15908 = vmatprep.subr.bf16.mxu1 %v19597_v19  ;;  %v19661_v19 = vld [vmem:[#allocation15 + $0x6d0] ss:$24 sps:$4 sm:$0xff]  }
 0xa2c   :  { %15909 = vmatpush1.bf16.msra.mxu1 %v19595_v61  ;;  %v19666_v61 = vld [vmem:[#allocation15 + $0x704] ss:$24 sps:$4 sm:$0xff]  }
 0xa2d   :  { %15910 = vmatprep.subr.bf16.mxu1 %v19600_v2  ;;  %v19669_v2 = vld [vmem:[#allocation15 + $0x734] ss:$24 sps:$4 sm:$0xff]  }
 0xa30   :  { %15911 = vmatpush1.bf16.msra.mxu1 %v19598_v37  ;;  %v19672_v37 = vld [vmem:[#allocation15 + $0x764] ss:$24 sps:$4 sm:$0xff]  }
 0xa31   :  { %15923 = vmatprep.subr.bf16.mxu1 %v19603_v40  ;;  %v19670_v40 = vld [vmem:[#allocation15 + $0x760] ss:$24 sps:$4 sm:$0xff]  }
 0xa33   :  { %15913 = vmatmul.mubr.bf16.vlgmr.msra.gmra.mrb[24].mxu1 %v20595_v63  ;;  %v19616_v63 = vld [vmem:[#allocation15 + $0x400] ss:$24 sps:$4 sm:$0xff]  }
 0xa34   :  { %15924 = vmatpush1.bf16.msra.mxu1 %v19601_v42  ;;  %15955 = vmatprep.mubr.bf16.mxu1 %v20611_v0  ;;  %v19619_v0 = vld [vmem:[#allocation15 + $0x430] ss:$24 sps:$4 sm:$0xff]   ;;  %v19675_v42 = vld [vmem:[#allocation15 + $0x794] ss:$24 sps:$4 sm:$0xff]  }
 0xa35   :  { %15925 = vmatprep.subr.bf16.mxu1 %v19606_v35  ;;  %v19673_v35 = vld [vmem:[#allocation15 + $0x790] ss:$24 sps:$4 sm:$0xff]  }
 0xa38   :  { %15926 = vmatpush1.bf16.msra.mxu1 %v19604_v56  ;;  %v19678_v56 = vld [vmem:[#allocation15 + $0x7c4] ss:$24 sps:$4 sm:$0xff]  }
 0xa39   :  { %15927 = vmatprep.subr.bf16.mxu1 %v19609_v39  ;;  %v19676_v39 = vld [vmem:[#allocation15 + $0x7c0] ss:$24 sps:$4 sm:$0xff]  }
 0xa3c   :  { %15928 = vmatpush1.bf16.msra.mxu1 %v19607_v5  ;;  %v19681_v5 = vld [vmem:[#allocation15 + $0x7f4] ss:$24 sps:$4 sm:$0xff]  }
 0xa3d   :  { %15929 = vmatprep.subr.bf16.mxu1 %v19612_v32  ;;  %v19679_v32 = vld [vmem:[#allocation15 + $0x7f0] ss:$24 sps:$4 sm:$0xff]  }
 0xa40   :  { %15930 = vmatpush1.bf16.msra.mxu1 %v19610_v49  ;;  %v19684_v49 = vld [vmem:[#allocation15 + $0x824] ss:$24 sps:$4 sm:$0xff]  }
 0xa41   :  { %15931 = vmatprep.subr.bf16.mxu1 %v19615_v48  ;;  %v19682_v48 = vld [vmem:[#allocation15 + $0x820] ss:$24 sps:$4 sm:$0xff]  }
 0xa44   :  { %15932 = vmatpush1.bf16.msra.mxu1 %v19613_v45  ;;  %v19687_v45 = vld [vmem:[#allocation15 + $0x854] ss:$24 sps:$4 sm:$0xff]  }
 0xa45   :  { %15933 = vmatprep.subr.bf16.mxu1 %v19618_v41  ;;  %v19685_v41 = vld [vmem:[#allocation15 + $0x850] ss:$24 sps:$4 sm:$0xff]  }
 0xa48   :  { %15934 = vmatpush1.bf16.msra.mxu1 %v19616_v63  ;;  %v19690_v63 = vld [vmem:[#allocation15 + $0x884] ss:$24 sps:$4 sm:$0xff]  }
 0xa49   :  { %15935 = vmatprep.subr.bf16.mxu1 %v19621_v62  ;;  %v19688_v62 = vld [vmem:[#allocation15 + $0x880] ss:$24 sps:$4 sm:$0xff]  }
 0xa4c   :  { %15936 = vmatpush1.bf16.msra.mxu1 %v19619_v0  ;;  %v19693_v0 = vld [vmem:[#allocation15 + $0x8b4] ss:$24 sps:$4 sm:$0xff]  }
 0xa4d   :  { %15937 = vmatprep.subr.bf16.mxu1 %v19624_v50  ;;  %v19691_v50 = vld [vmem:[#allocation15 + $0x8b0] ss:$24 sps:$4 sm:$0xff]  }
 0xa50   :  { %15938 = vmatpush1.bf16.msra.mxu1 %v19622_v12  ;;  %v19696_v12 = vld [vmem:[#allocation15 + $0x8e4] ss:$24 sps:$4 sm:$0xff]  }
 0xa51   :  { %15939 = vmatprep.subr.bf16.mxu1 %v19627_v52  ;;  %v19694_v52 = vld [vmem:[#allocation15 + $0x8e0] ss:$24 sps:$4 sm:$0xff]  }
 0xa54   :  { %15940 = vmatpush1.bf16.msra.mxu1 %v19625_v28  ;;  %v19699_v28 = vld [vmem:[#allocation15 + $0x914] ss:$24 sps:$4 sm:$0xff]  }
 0xa55   :  { %15941 = vmatprep.subr.bf16.mxu1 %v19630_v57  ;;  %v19697_v57 = vld [vmem:[#allocation15 + $0x910] ss:$24 sps:$4 sm:$0xff]  }
 0xa58   :  { %15942 = vmatpush1.bf16.msra.mxu1 %v19628_v58  ;;  %v19702_v58 = vld [vmem:[#allocation15 + $0x944] ss:$24 sps:$4 sm:$0xff]  }
 0xa59   :  { %15943 = vmatprep.subr.bf16.mxu1 %v19633_v1  ;;  %v19700_v1 = vld [vmem:[#allocation15 + $0x940] ss:$24 sps:$4 sm:$0xff]  }
 0xa5c   :  { %15944 = vmatpush1.bf16.msra.mxu1 %v19631_v59  ;;  %v19705_v59 = vld [vmem:[#allocation15 + $0x974] ss:$24 sps:$4 sm:$0xff]  }
 0xa5d   :  { %15945 = vmatprep.subr.bf16.mxu1 %v19636_v3  ;;  %v19703_v3 = vld [vmem:[#allocation15 + $0x970] ss:$24 sps:$4 sm:$0xff]  }
 0xa60   :  { %15946 = vmatpush1.bf16.msra.mxu1 %v19634_v33  ;;  %v19708_v33 = vld [vmem:[#allocation15 + $0x9a4] ss:$24 sps:$4 sm:$0xff]  }
 0xa61   :  { %15947 = vmatprep.subr.bf16.mxu1 %v19639_v60  ;;  %v19706_v60 = vld [vmem:[#allocation15 + $0x9a0] ss:$24 sps:$4 sm:$0xff]  }
 0xa64   :  { %15948 = vmatpush1.bf16.msra.mxu1 %v19637_v17  ;;  %v19711_v17 = vld [vmem:[#allocation15 + $0x9d4] ss:$24 sps:$4 sm:$0xff]  }
 0xa65   :  { %15949 = vmatprep.subr.bf16.mxu1 %v19642_v34  ;;  %v19709_v34 = vld [vmem:[#allocation15 + $0x9d0] ss:$24 sps:$4 sm:$0xff]  }
 0xa68   :  { %15950 = vmatpush1.bf16.msra.mxu1 %v19640_v4  ;;  %v20750_v4 = vld [vmem:[#allocation16] sm:$0x3f] }
 0xa69   :  { %15951 = vmatprep.subr.bf16.mxu1 %v19645_v51  ;;  %v11329_v51 = vrot.slane %v20750_v4, %v20406_v55  ;;  %v19718_v55 = vld [vmem:[#allocation15 + $0xa60] ss:$24 sps:$4 sm:$0xff]  }
 0xa6c   :  { %15952 = vmatpush1.bf16.msra.mxu1 %v19643_v9  ;;  %v19712_v9 = vld [vmem:[#allocation15 + $0xa00] ss:$24 sps:$4 sm:$0xff]  }
 0xa6d   :  { %15953 = vmatprep.subr.bf16.mxu1 %v19648_v10  ;;  %v19717_v10 = vld [vmem:[#allocation15 + $0xa34] ss:$24 sps:$4 sm:$0xff]  }
 0xa70   :  { %15954 = vmatpush1.bf16.msra.mxu1 %v19646_v11 }
 0xa71   :  { %15966 = vmatprep.subr.bf16.mxu1 %v19651_v14 }
 0xa73   :  { %15956 = vmatmul.mubr.bf16.vlgmr.msra.gmra.mrb[24].mxu1 %v20607_v46  ;;  %v19664_v46 = vld [vmem:[#allocation15 + $0x700] ss:$24 sps:$4 sm:$0xff]  }
 0xa74   :  { %15967 = vmatpush1.bf16.msra.mxu1 %v19649_v16  ;;  %15998 = vmatprep.mubr.bf16.mxu1 %v20637_v20  ;;  %v19667_v20 = vld [vmem:[#allocation15 + $0x730] ss:$24 sps:$4 sm:$0xff]  }
 0xa75   :  { %15968 = vmatprep.subr.bf16.mxu1 %v19654_v21 }
 0xa78   :  { %15969 = vmatpush1.bf16.msra.mxu1 %v19652_v38 }
 0xa79   :  { %15970 = vmatprep.subr.bf16.mxu1 %v19657_v22  ;;  %v19715_v22 = vld [vmem:[#allocation15 + $0xa30] ss:$24 sps:$4 sm:$0xff]  }
 0xa7c   :  { %15971 = vmatpush1.bf16.msra.mxu1 %v19655_v15 }
 0xa7d   :  { %15972 = vmatprep.subr.bf16.mxu1 %v19660_v26 }
 0xa80   :  { %15973 = vmatpush1.bf16.msra.mxu1 %v19658_v30  ;;  %v19720_v30 = vld [vmem:[#allocation15 + $0xa64] ss:$24 sps:$4 sm:$0xff]  }
 0xa81   :  { %15974 = vmatprep.subr.bf16.mxu1 %v19663_v31  ;;  %v19723_v31 = vld [vmem:[#allocation15 + $0xa94] ss:$24 sps:$4 sm:$0xff]  }
 0xa84   :  { %15975 = vmatpush1.bf16.msra.mxu1 %v19661_v19  ;;  %v19721_v19 = vld [vmem:[#allocation15 + $0xa90] ss:$24 sps:$4 sm:$0xff]  }
 0xa85   :  { %15976 = vmatprep.subr.bf16.mxu1 %v19666_v61  ;;  %v19726_v61 = vld [vmem:[#allocation15 + $0xac4] ss:$24 sps:$4 sm:$0xff]  }
 0xa88   :  { %15977 = vmatpush1.bf16.msra.mxu1 %v19664_v46 }
 0xa89   :  { %15978 = vmatprep.subr.bf16.mxu1 %v19669_v2 }
 0xa8c   :  { %15979 = vmatpush1.bf16.msra.mxu1 %v19667_v20  ;;  %v19724_v20 = vld [vmem:[#allocation15 + $0xac0] ss:$24 sps:$4 sm:$0xff]  }
 0xa8d   :  { %15980 = vmatprep.subr.bf16.mxu1 %v19672_v37 }
 0xa90   :  { %15981 = vmatpush1.bf16.msra.mxu1 %v19670_v40  ;;  %v19729_v40 = vld [vmem:[#allocation15 + $0xaf4] ss:$24 sps:$4 sm:$0xff]  }
 0xa91   :  { %15982 = vmatprep.subr.bf16.mxu1 %v19675_v42 }
 0xa94   :  { %15983 = vmatpush1.bf16.msra.mxu1 %v19673_v35  ;;  %v19727_v35 = vld [vmem:[#allocation15 + $0xaf0] ss:$24 sps:$4 sm:$0xff]  }
 0xa95   :  { %15984 = vmatprep.subr.bf16.mxu1 %v19678_v56  ;;  %v19732_v56 = vld [vmem:[#allocation15 + $0xb24] ss:$24 sps:$4 sm:$0xff]  }
 0xa98   :  { %15985 = vmatpush1.bf16.msra.mxu1 %v19676_v39  ;;  %v19730_v39 = vld [vmem:[#allocation15 + $0xb20] ss:$24 sps:$4 sm:$0xff]  }
 0xa99   :  { %15986 = vmatprep.subr.bf16.mxu1 %v19681_v5  ;;  %v19735_v5 = vld [vmem:[#allocation15 + $0xb54] ss:$24 sps:$4 sm:$0xff]  }
 0xa9c   :  { %15987 = vmatpush1.bf16.msra.mxu1 %v19679_v32  ;;  %v19733_v32 = vld [vmem:[#allocation15 + $0xb50] ss:$24 sps:$4 sm:$0xff]  }
 0xa9d   :  { %15988 = vmatprep.subr.bf16.mxu1 %v19684_v49  ;;  %v19738_v49 = vld [vmem:[#allocation15 + $0xb84] ss:$24 sps:$4 sm:$0xff]  }
 0xaa0   :  { %15989 = vmatpush1.bf16.msra.mxu1 %v19682_v48  ;;  %v19736_v48 = vld [vmem:[#allocation15 + $0xb80] ss:$24 sps:$4 sm:$0xff]  }
 0xaa1   :  { %15990 = vmatprep.subr.bf16.mxu1 %v19687_v45  ;;  %v11333_v45 = vrot.slane %v20750_v4, %v20438_v6  ;;  %v19742_v6 = vld [vmem:[#allocation15 + $0xbe0] ss:$24 sps:$4 sm:$0xff]  }
 0xaa4   :  { %15991 = vmatpush1.bf16.msra.mxu1 %v19685_v41  ;;  %v11337_v41 = vrot.slane %v20750_v4, %v20441_v8  ;;  %v19747_v8 = vld [vmem:[#allocation15 + $0xc14] ss:$24 sps:$4 sm:$0xff]  }
 0xaa5   :  { %15992 = vmatprep.subr.bf16.mxu1 %v19690_v63  ;;  %v19741_v63 = vld [vmem:[#allocation15 + $0xbb4] ss:$24 sps:$4 sm:$0xff]  }
 0xaa8   :  { %15993 = vmatpush1.bf16.msra.mxu1 %v19688_v62 }
 0xaa9   :  { %15994 = vmatprep.subr.bf16.mxu1 %v19693_v0 }
 0xaac   :  { %15995 = vmatpush1.bf16.msra.mxu1 %v19691_v50 }
 0xaad   :  { %15996 = vmatprep.subr.bf16.mxu1 %v19696_v12  ;;  %v19739_v12 = vld [vmem:[#allocation15 + $0xbb0] ss:$24 sps:$4 sm:$0xff]  }
 0xab0   :  { %15997 = vmatpush1.bf16.msra.mxu1 %v19694_v52 }
 0xab1   :  { %16009 = vmatprep.subr.bf16.mxu1 %v19699_v28 }
 0xab3   :  { %15999 = vmatmul.mubr.bf16.vlgmr.msra.gmra.mrb[24].mxu1 %v20634_v7  ;;  %v19714_v7 = vld [vmem:[#allocation15 + $0xa04] ss:$24 sps:$4 sm:$0xff]  }
 0xab4   :  { %16010 = vmatpush1.bf16.msra.mxu1 %v19697_v57  ;;  %16041 = vmatprep.mubr.bf16.mxu1 %v20650_v25  ;;  %v11325_v25 = vrot.slane %v20750_v4, %v20403_v54  ;;  %v19744_v57 = vld [vmem:[#allocation15 + $0xbe4] ss:$24 sps:$4 sm:$0xff]  }
 0xab5   :  { %16011 = vmatprep.subr.bf16.mxu1 %v19702_v58 }
 0xab8   :  { %16012 = vmatpush1.bf16.msra.mxu1 %v19700_v1 }
 0xab9   :  { %16013 = vmatprep.subr.bf16.mxu1 %v19705_v59 }
 0xabc   :  { %16014 = vmatpush1.bf16.msra.mxu1 %v19703_v3  ;;  %v19745_v3 = vld [vmem:[#allocation15 + $0xc10] ss:$24 sps:$4 sm:$0xff]  }
 0xabd   :  { %16015 = vmatprep.subr.bf16.mxu1 %v19708_v33  ;;  %v19750_v33 = vld [vmem:[#allocation15 + $0xc44] ss:$24 sps:$4 sm:$0xff]  }
 0xac0   :  { %16016 = vmatpush1.bf16.msra.mxu1 %v19706_v60 }
 0xac1   :  { %16017 = vmatprep.subr.bf16.mxu1 %v19711_v17  ;;  %v19748_v17 = vld [vmem:[#allocation15 + $0xc40] ss:$24 sps:$4 sm:$0xff]  }
 0xac4   :  { %16018 = vmatpush1.bf16.msra.mxu1 %v19709_v34 }
 0xac5   :  { %16019 = vmatprep.subr.bf16.mxu1 %v19714_v7  ;;  %v19753_v7 = vld [vmem:[#allocation15 + $0xc74] ss:$24 sps:$4 sm:$0xff]  }
 0xac6   :  { %v15527_v11 = vpop.f32.mrb[20].mxu1 }
 0xac7   :  { %v18439_v14 = vadd.f32 %v15527_v11, %v11325_v25  ;;  %v15529_v16 = vpop.f32.mrb[21].mxu1  ;;  %v19757_v11 = vld [vmem:[#allocation15 + $0xcd0] ss:$24 sps:$4 sm:$0xff]  }
 0xac8   :  { %v18440_v21 = vadd.f32 %v15529_v16, %v11329_v51  ;;  %v15531_v38 = vpop.f32.mrb[22].mxu1  ;;  %16020 = vmatpush1.bf16.msra.mxu1 %v19712_v9  ;;  %v19754_v9 = vld [vmem:[#allocation15 + $0xca0] ss:$24 sps:$4 sm:$0xff]  }
 0xac9   :  { %19937 = vtanh.f32 %v18439_v14  ;;  %v18441_v15 = vadd.f32 %v15531_v38, %v11325_v25  ;;  %v15533_v26 = vpop.f32.mrb[23].mxu1  ;;  %16021 = vmatprep.subr.bf16.mxu1 %v19717_v10  ;;  %v19759_v10 = vld [vmem:[#allocation15 + $0xcd4] ss:$24 sps:$4 sm:$0xff]   ;;  %v19762_v14 = vld [vmem:[#allocation15 + $0xd04] ss:$24 sps:$4 sm:$0xff]  }
 0xaca   :  { %19939 = vtanh.f32 %v18440_v21  ;;  %v18442_v54 = vadd.f32 %v15533_v26, %v11329_v51  ;;  %v19760_v16 = vld [vmem:[#allocation15 + $0xd00] ss:$24 sps:$4 sm:$0xff]   ;;  %v19765_v21 = vld [vmem:[#allocation15 + $0xd34] ss:$24 sps:$4 sm:$0xff]   ;;  %v19763_v38 = vld [vmem:[#allocation15 + $0xd30] ss:$24 sps:$4 sm:$0xff]  }
 0xacb   :  { %19941 = vtanh.f32 %v18441_v15  ;;  %v19766_v15 = vld [vmem:[#allocation15 + $0xd60] ss:$24 sps:$4 sm:$0xff]   ;;  %v19771_v26 = vld [vmem:[#allocation15 + $0xd94] ss:$24 sps:$4 sm:$0xff]  }
 0xacc   :  { %19943 = vtanh.f32 %v18442_v54  ;;  %16022 = vmatpush1.bf16.msra.mxu1 %v19715_v22  ;;  %v19768_v22 = vld [vmem:[#allocation15 + $0xd64] ss:$24 sps:$4 sm:$0xff]  }
 0xacd   :  { %16023 = vmatprep.subr.bf16.mxu1 %v19720_v30  ;;  %v19769_v30 = vld [vmem:[#allocation15 + $0xd90] ss:$24 sps:$4 sm:$0xff]   ;;  %v19774_v54 = vld [vmem:[#allocation15 + $0xdc4] ss:$24 sps:$4 sm:$0xff]  }
 0xad0   :  { %16024 = vmatpush1.bf16.msra.mxu1 %v19718_v55  ;;  %v19772_v55 = vld [vmem:[#allocation15 + $0xdc0] ss:$24 sps:$4 sm:$0xff]  }
 0xad1   :  { %16025 = vmatprep.subr.bf16.mxu1 %v19723_v31  ;;  %v19777_v31 = vld [vmem:[#allocation15 + $0xdf4] ss:$24 sps:$4 sm:$0xff]  }
 0xad3   :  { %v19938_v46 = vpop.eup %19937 }
 0xad4   :  { %v19940_v2 = vpop.eup %19939  ;;  %16236 = vst [vmem:[%s20820_s11] sm:$0xff] %v19938_v46  ;;  %16026 = vmatpush1.bf16.msra.mxu1 %v19721_v19  ;;  %v19775_v19 = vld [vmem:[#allocation15 + $0xdf0] ss:$24 sps:$4 sm:$0xff]   ;;  %v19778_v46 = vld [vmem:[#allocation15 + $0xe20] ss:$24 sps:$4 sm:$0xff]  }
 0xad5   :  { %v19942_v37 = vpop.eup %19941  ;;  %16237 = vst [vmem:[%s20820_s11 + $0x8] sm:$0xff] %v19940_v2  ;;  %16027 = vmatprep.subr.bf16.mxu1 %v19726_v61  ;;  %v19780_v61 = vld [vmem:[#allocation15 + $0xe24] ss:$24 sps:$4 sm:$0xff]   ;;  %v19783_v2 = vld [vmem:[#allocation15 + $0xe54] ss:$24 sps:$4 sm:$0xff]  }
 0xad6   :  { %v19944_v42 = vpop.eup %19943  ;;  %16242 = vst [vmem:[%s20820_s11 + $0x30] sm:$0xff] %v19942_v37  ;;  %v19786_v37 = vld [vmem:[#allocation15 + $0xe84] ss:$24 sps:$4 sm:$0xff]  }
 0xad7   :  { %16243 = vst [vmem:[%s20820_s11 + $0x38] sm:$0xff] %v19944_v42  ;;  %v19789_v42 = vld [vmem:[#allocation15 + $0xeb4] ss:$24 sps:$4 sm:$0xff]  }
 0xad8   :  { %16028 = vmatpush1.bf16.msra.mxu1 %v19724_v20  ;;  %v19781_v20 = vld [vmem:[#allocation15 + $0xe50] ss:$24 sps:$4 sm:$0xff]  }
 0xad9   :  { %16029 = vmatprep.subr.bf16.mxu1 %v19729_v40  ;;  %v19784_v40 = vld [vmem:[#allocation15 + $0xe80] ss:$24 sps:$4 sm:$0xff]  }
 0xadc   :  { %16030 = vmatpush1.bf16.msra.mxu1 %v19727_v35  ;;  %v19787_v35 = vld [vmem:[#allocation15 + $0xeb0] ss:$24 sps:$4 sm:$0xff]  }
 0xadd   :  { %16031 = vmatprep.subr.bf16.mxu1 %v19732_v56  ;;  %v19792_v56 = vld [vmem:[#allocation15 + $0xee4] ss:$24 sps:$4 sm:$0xff]  }
 0xae0   :  { %16032 = vmatpush1.bf16.msra.mxu1 %v19730_v39  ;;  %v19790_v39 = vld [vmem:[#allocation15 + $0xee0] ss:$24 sps:$4 sm:$0xff]  }
 0xae1   :  { %16033 = vmatprep.subr.bf16.mxu1 %v19735_v5  ;;  %v19795_v5 = vld [vmem:[#allocation15 + $0xf14] ss:$24 sps:$4 sm:$0xff]  }
 0xae4   :  { %16034 = vmatpush1.bf16.msra.mxu1 %v19733_v32  ;;  %v19793_v32 = vld [vmem:[#allocation15 + $0xf10] ss:$24 sps:$4 sm:$0xff]  }
 0xae5   :  { %16035 = vmatprep.subr.bf16.mxu1 %v19738_v49  ;;  %v19798_v49 = vld [vmem:[#allocation15 + $0xf44] ss:$24 sps:$4 sm:$0xff]  }
 0xae7   :  { %v15871_v62 = vpop.f32.mrb[44].mxu0 }
 0xae8   :  { %v18443_v0 = vadd.f32 %v15871_v62, %v11333_v45  ;;  %16036 = vmatpush1.bf16.msra.mxu1 %v19736_v48  ;;  %v15873_v50 = vpop.f32.mrb[45].mxu0  ;;  %v19796_v48 = vld [vmem:[#allocation15 + $0xf40] ss:$24 sps:$4 sm:$0xff]  }
 0xae9   :  { %v18444_v52 = vadd.f32 %v15873_v50, %v11337_v41  ;;  %v15875_v28 = vpop.f32.mrb[46].mxu0  ;;  %16037 = vmatprep.subr.bf16.mxu1 %v19741_v63  ;;  %v19804_v63 = vld [vmem:[#allocation15 + $0xfa4] ss:$24 sps:$4 sm:$0xff]   ;;  %v19802_v62 = vld [vmem:[#allocation15 + $0xfa0] ss:$24 sps:$4 sm:$0xff]  }
 0xaea   :  { %19945 = vtanh.f32 %v18443_v0  ;;  %v18445_v58 = vadd.f32 %v15875_v28, %v11333_v45  ;;  %v15877_v1 = vpop.f32.mrb[47].mxu0  ;;  %v19801_v45 = vld [vmem:[#allocation15 + $0xf74] ss:$24 sps:$4 sm:$0xff]   ;;  %v19805_v50 = vld [vmem:[#allocation15 + $0xfd0] ss:$24 sps:$4 sm:$0xff]  }
 0xaeb   :  { %19947 = vtanh.f32 %v18444_v52  ;;  %v18446_v59 = vadd.f32 %v15877_v1, %v11337_v41  ;;  %v19799_v41 = vld [vmem:[#allocation15 + $0xf70] ss:$24 sps:$4 sm:$0xff]   ;;  %v19807_v0 = vld [vmem:[#allocation15 + $0xfd4] ss:$24 sps:$4 sm:$0xff]   ;;  %v19816_v28 = vld [vmem:[#allocation15 + $0x1064] ss:$24 sps:$4 sm:$0xff]  }
 0xaec   :  { %19949 = vtanh.f32 %v18445_v58  ;;  %16038 = vmatpush1.bf16.msra.mxu1 %v19739_v12  ;;  %v19810_v12 = vld [vmem:[#allocation15 + $0x1004] ss:$24 sps:$4 sm:$0xff]   ;;  %v19813_v52 = vld [vmem:[#allocation15 + $0x1034] ss:$24 sps:$4 sm:$0xff]   ;;  %v19817_v1 = vld [vmem:[#allocation15 + $0x1090] ss:$24 sps:$4 sm:$0xff]  }
 0xaed   :  { %19951 = vtanh.f32 %v18446_v59  ;;  %16039 = vmatprep.subr.bf16.mxu1 %v19744_v57  ;;  %v19814_v57 = vld [vmem:[#allocation15 + $0x1060] ss:$24 sps:$4 sm:$0xff]   ;;  %v19819_v58 = vld [vmem:[#allocation15 + $0x1094] ss:$24 sps:$4 sm:$0xff]   ;;  %v19822_v59 = vld [vmem:[#allocation15 + $0x10c4] ss:$24 sps:$4 sm:$0xff]  }
 0xaf0   :  { %16040 = vmatpush1.bf16.msra.mxu1 %v19742_v6  ;;  %v19820_v6 = vld [vmem:[#allocation15 + $0x10c0] ss:$24 sps:$4 sm:$0xff]  }
 0xaf1   :  { %16052 = vmatprep.subr.bf16.mxu1 %v19747_v8  ;;  %v19825_v8 = vld [vmem:[#allocation15 + $0x10f4] ss:$24 sps:$4 sm:$0xff]  }
 0xaf3   :  { %16042 = vmatmul.mubr.bf16.vlgmr.msra.gmra.mrb[24].mxu1 %v20646_v29  ;;  %v19751_v29 = vld [vmem:[#allocation15 + $0xc70] ss:$24 sps:$4 sm:$0xff]  }
 0xaf4   :  { %v19946_v60 = vpop.eup %19945  ;;  %16053 = vmatpush1.bf16.msra.mxu1 %v19745_v3  ;;  %16084 = vmatprep.mubr.bf16.mxu1 %v20676_v36  ;;  %v19756_v36 = vld [vmem:[#allocation15 + $0xca4] ss:$24 sps:$4 sm:$0xff]   ;;  %v19823_v3 = vld [vmem:[#allocation15 + $0x10f0] ss:$24 sps:$4 sm:$0xff]  }
 0xaf5   :  { %v19948_v34 = vpop.eup %19947  ;;  %16238 = vst [vmem:[%s20820_s11 + $0x10] sm:$0xff] %v19946_v60  ;;  %16054 = vmatprep.subr.bf16.mxu1 %v19750_v33  ;;  %v19828_v33 = vld [vmem:[#allocation15 + $0x1124] ss:$24 sps:$4 sm:$0xff]   ;;  %v19826_v60 = vld [vmem:[#allocation15 + $0x1120] ss:$24 sps:$4 sm:$0xff]  }
 0xaf6   :  { %v19950_v25 = vpop.eup %19949  ;;  %16239 = vst [vmem:[%s20820_s11 + $0x18] sm:$0xff] %v19948_v34  ;;  %v19829_v34 = vld [vmem:[#allocation15 + $0x1150] ss:$24 sps:$4 sm:$0xff]  }
 0xaf7   :  { %v19952_v51 = vpop.eup %19951  ;;  %16244 = vst [vmem:[%s20820_s11 + $0x40] sm:$0xff] %v19950_v25  ;;  %v19832_v25 = vld [vmem:[#allocation15 + $0x1180] ss:$24 sps:$4 sm:$0xff]  }
 0xaf8   :  { %16245 = vst [vmem:[%s20820_s11 + $0x48] sm:$0xff] %v19952_v51  ;;  %16055 = vmatpush1.bf16.msra.mxu1 %v19748_v17  ;;  %v19831_v17 = vld [vmem:[#allocation15 + $0x1154] ss:$24 sps:$4 sm:$0xff]  }
 0xaf9   :  { %16056 = vmatprep.subr.bf16.mxu1 %v19753_v7  ;;  %v19834_v7 = vld [vmem:[#allocation15 + $0x1184] ss:$24 sps:$4 sm:$0xff]   ;;  %v19837_v51 = vld [vmem:[#allocation15 + $0x11b4] ss:$24 sps:$4 sm:$0xff]  }
 0xafc   :  { %16057 = vmatpush1.bf16.msra.mxu1 %v19751_v29  ;;  %v19835_v29 = vld [vmem:[#allocation15 + $0x11b0] ss:$24 sps:$4 sm:$0xff]  }
 0xafd   :  { %16058 = vmatprep.subr.bf16.mxu1 %v19756_v36  ;;  %v19840_v36 = vld [vmem:[#allocation15 + $0x11e4] ss:$24 sps:$4 sm:$0xff]  }
 0xb00   :  { %16059 = vmatpush1.bf16.msra.mxu1 %v19754_v9  ;;  %v19838_v9 = vld [vmem:[#allocation15 + $0x11e0] ss:$24 sps:$4 sm:$0xff]  }
 0xb01   :  { %16060 = vmatprep.subr.bf16.mxu1 %v19759_v10  ;;  %v19843_v10 = vld [vmem:[#allocation15 + $0x1214] ss:$24 sps:$4 sm:$0xff]  }
 0xb04   :  { %16061 = vmatpush1.bf16.msra.mxu1 %v19757_v11  ;;  %v19841_v11 = vld [vmem:[#allocation15 + $0x1210] ss:$24 sps:$4 sm:$0xff]  }
 0xb05   :  { %16062 = vmatprep.subr.bf16.mxu1 %v19762_v14  ;;  %v19846_v14 = vld [vmem:[#allocation15 + $0x1244] ss:$24 sps:$4 sm:$0xff]  }
 0xb08   :  { %16063 = vmatpush1.bf16.msra.mxu1 %v19760_v16  ;;  %v19844_v16 = vld [vmem:[#allocation15 + $0x1240] ss:$24 sps:$4 sm:$0xff]  }
 0xb09   :  { %16064 = vmatprep.subr.bf16.mxu1 %v19765_v21  ;;  %v19849_v21 = vld [vmem:[#allocation15 + $0x1274] ss:$24 sps:$4 sm:$0xff]  }
 0xb0c   :  { %16065 = vmatpush1.bf16.msra.mxu1 %v19763_v38  ;;  %v19847_v38 = vld [vmem:[#allocation15 + $0x1270] ss:$24 sps:$4 sm:$0xff]  }
 0xb0d   :  { %16066 = vmatprep.subr.bf16.mxu1 %v19768_v22  ;;  %v19852_v22 = vld [vmem:[#allocation15 + $0x12a4] ss:$24 sps:$4 sm:$0xff]  }
 0xb10   :  { %16067 = vmatpush1.bf16.msra.mxu1 %v19766_v15  ;;  %v19850_v15 = vld [vmem:[#allocation15 + $0x12a0] ss:$24 sps:$4 sm:$0xff]  }
 0xb11   :  { %16068 = vmatprep.subr.bf16.mxu1 %v19771_v26  ;;  %v19855_v26 = vld [vmem:[#allocation15 + $0x12d4] ss:$24 sps:$4 sm:$0xff]  }
 0xb14   :  { %16069 = vmatpush1.bf16.msra.mxu1 %v19769_v30  ;;  %v19853_v30 = vld [vmem:[#allocation15 + $0x12d0] ss:$24 sps:$4 sm:$0xff]  }
 0xb15   :  { %16070 = vmatprep.subr.bf16.mxu1 %v19774_v54  ;;  %v19858_v54 = vld [vmem:[#allocation15 + $0x1304] ss:$24 sps:$4 sm:$0xff]  }
 0xb18   :  { %16071 = vmatpush1.bf16.msra.mxu1 %v19772_v55  ;;  %v19861_v55 = vld [vmem:[#allocation15 + $0x1334] ss:$24 sps:$4 sm:$0xff]  }
 0xb19   :  { %16072 = vmatprep.subr.bf16.mxu1 %v19777_v31  ;;  %v19864_v31 = vld [vmem:[#allocation15 + $0x1364] ss:$24 sps:$4 sm:$0xff]  }
 0xb1c   :  { %16073 = vmatpush1.bf16.msra.mxu1 %v19775_v19  ;;  %v19862_v19 = vld [vmem:[#allocation15 + $0x1360] ss:$24 sps:$4 sm:$0xff]  }
 0xb1d   :  { %16074 = vmatprep.subr.bf16.mxu1 %v19780_v61  ;;  %v19867_v61 = vld [vmem:[#allocation15 + $0x1394] ss:$24 sps:$4 sm:$0xff]  }
 0xb20   :  { %16075 = vmatpush1.bf16.msra.mxu1 %v19778_v46  ;;  %v19865_v46 = vld [vmem:[#allocation15 + $0x1390] ss:$24 sps:$4 sm:$0xff]  }
 0xb21   :  { %16076 = vmatprep.subr.bf16.mxu1 %v19783_v2  ;;  %v19870_v2 = vld [vmem:[#allocation15 + $0x13c4] ss:$24 sps:$4 sm:$0xff]  }
 0xb24   :  { %16077 = vmatpush1.bf16.msra.mxu1 %v19781_v20  ;;  %v19868_v20 = vld [vmem:[#allocation15 + $0x13c0] ss:$24 sps:$4 sm:$0xff]  }
 0xb25   :  { %16078 = vmatprep.subr.bf16.mxu1 %v19786_v37  ;;  %v19873_v37 = vld [vmem:[#allocation15 + $0x13f4] ss:$24 sps:$4 sm:$0xff]  }
 0xb28   :  { %16079 = vmatpush1.bf16.msra.mxu1 %v19784_v40  ;;  %v19871_v40 = vld [vmem:[#allocation15 + $0x13f0] ss:$24 sps:$4 sm:$0xff]  }
 0xb29   :  { %16080 = vmatprep.subr.bf16.mxu1 %v19789_v42  ;;  %v19876_v42 = vld [vmem:[#allocation15 + $0x1424] ss:$24 sps:$4 sm:$0xff]  }
 0xb2c   :  { %16081 = vmatpush1.bf16.msra.mxu1 %v19787_v35  ;;  %v19874_v35 = vld [vmem:[#allocation15 + $0x1420] ss:$24 sps:$4 sm:$0xff]  }
 0xb2d   :  { %16082 = vmatprep.subr.bf16.mxu1 %v19792_v56  ;;  %v19879_v56 = vld [vmem:[#allocation15 + $0x1454] ss:$24 sps:$4 sm:$0xff]  }
 0xb30   :  { %16083 = vmatpush1.bf16.msra.mxu1 %v19790_v39  ;;  %v19877_v39 = vld [vmem:[#allocation15 + $0x1450] ss:$24 sps:$4 sm:$0xff]  }
 0xb31   :  { %16095 = vmatprep.subr.bf16.mxu1 %v19795_v5  ;;  %v19882_v5 = vld [vmem:[#allocation15 + $0x1484] ss:$24 sps:$4 sm:$0xff]  }
 0xb33   :  { %16085 = vmatmul.mubr.bf16.vlgmr.msra.gmra.mrb[24].mxu1 %v20673_v43  ;;  %v19808_v43 = vld [vmem:[#allocation15 + $0x1000] ss:$24 sps:$4 sm:$0xff]  }
 0xb34   :  { %16096 = vmatpush1.bf16.msra.mxu1 %v19793_v32  ;;  %16127 = vmatprep.mubr.bf16.mxu1 %v20688_v23  ;;  %v19811_v23 = vld [vmem:[#allocation15 + $0x1030] ss:$24 sps:$4 sm:$0xff]   ;;  %v19880_v32 = vld [vmem:[#allocation15 + $0x1480] ss:$24 sps:$4 sm:$0xff]  }
 0xb35   :  { %16097 = vmatprep.subr.bf16.mxu1 %v19798_v49  ;;  %v19885_v49 = vld [vmem:[#allocation15 + $0x14b4] ss:$24 sps:$4 sm:$0xff]  }
 0xb38   :  { %16098 = vmatpush1.bf16.msra.mxu1 %v19796_v48  ;;  %v19883_v48 = vld [vmem:[#allocation15 + $0x14b0] ss:$24 sps:$4 sm:$0xff]  }
 0xb39   :  { %16099 = vmatprep.subr.bf16.mxu1 %v19801_v45  ;;  %v19888_v45 = vld [vmem:[#allocation15 + $0x14e4] ss:$24 sps:$4 sm:$0xff]  }
 0xb3c   :  { %16100 = vmatpush1.bf16.msra.mxu1 %v19799_v41  ;;  %v19886_v41 = vld [vmem:[#allocation15 + $0x14e0] ss:$24 sps:$4 sm:$0xff]  }
 0xb3d   :  { %16101 = vmatprep.subr.bf16.mxu1 %v19804_v63  ;;  %v19891_v63 = vld [vmem:[#allocation15 + $0x1514] ss:$24 sps:$4 sm:$0xff]  }
 0xb40   :  { %16102 = vmatpush1.bf16.msra.mxu1 %v19802_v62  ;;  %v19889_v62 = vld [vmem:[#allocation15 + $0x1510] ss:$24 sps:$4 sm:$0xff]  }
 0xb41   :  { %16103 = vmatprep.subr.bf16.mxu1 %v19807_v0  ;;  %v19894_v0 = vld [vmem:[#allocation15 + $0x1544] ss:$24 sps:$4 sm:$0xff]  }
 0xb44   :  { %16104 = vmatpush1.bf16.msra.mxu1 %v19805_v50  ;;  %v19892_v50 = vld [vmem:[#allocation15 + $0x1540] ss:$24 sps:$4 sm:$0xff]  }
 0xb45   :  { %16105 = vmatprep.subr.bf16.mxu1 %v19810_v12  ;;  %v19897_v12 = vld [vmem:[#allocation15 + $0x1574] ss:$24 sps:$4 sm:$0xff]  }
 0xb48   :  { %16106 = vmatpush1.bf16.msra.mxu1 %v19808_v43  ;;  %v19895_v43 = vld [vmem:[#allocation15 + $0x1570] ss:$24 sps:$4 sm:$0xff]  }
 0xb49   :  { %16107 = vmatprep.subr.bf16.mxu1 %v19813_v52  ;;  %v19900_v52 = vld [vmem:[#allocation15 + $0x15a4] ss:$24 sps:$4 sm:$0xff]  }
 0xb4c   :  { %16108 = vmatpush1.bf16.msra.mxu1 %v19811_v23  ;;  %v19898_v23 = vld [vmem:[#allocation15 + $0x15a0] ss:$24 sps:$4 sm:$0xff]  }
 0xb4d   :  { %16109 = vmatprep.subr.bf16.mxu1 %v19816_v28  ;;  %v19903_v28 = vld [vmem:[#allocation15 + $0x15d4] ss:$24 sps:$4 sm:$0xff]  }
 0xb50   :  { %16110 = vmatpush1.bf16.msra.mxu1 %v19814_v57  ;;  %v19901_v57 = vld [vmem:[#allocation15 + $0x15d0] ss:$24 sps:$4 sm:$0xff]  }
 0xb51   :  { %16111 = vmatprep.subr.bf16.mxu1 %v19819_v58  ;;  %v19906_v58 = vld [vmem:[#allocation15 + $0x1604] ss:$24 sps:$4 sm:$0xff]  }
 0xb54   :  { %16112 = vmatpush1.bf16.msra.mxu1 %v19817_v1  ;;  %v19909_v1 = vld [vmem:[#allocation15 + $0x1634] ss:$24 sps:$4 sm:$0xff]  }
 0xb55   :  { %16113 = vmatprep.subr.bf16.mxu1 %v19822_v59  ;;  %v19912_v59 = vld [vmem:[#allocation15 + $0x1664] ss:$24 sps:$4 sm:$0xff]  }
 0xb58   :  { %16114 = vmatpush1.bf16.msra.mxu1 %v19820_v6  ;;  %v19910_v6 = vld [vmem:[#allocation15 + $0x1660] ss:$24 sps:$4 sm:$0xff]  }
 0xb59   :  { %16115 = vmatprep.subr.bf16.mxu1 %v19825_v8  ;;  %v19915_v8 = vld [vmem:[#allocation15 + $0x1694] ss:$24 sps:$4 sm:$0xff]  }
 0xb5c   :  { %16116 = vmatpush1.bf16.msra.mxu1 %v19823_v3  ;;  %v19913_v3 = vld [vmem:[#allocation15 + $0x1690] ss:$24 sps:$4 sm:$0xff]  }
 0xb5d   :  { %16117 = vmatprep.subr.bf16.mxu1 %v19828_v33  ;;  %v19918_v33 = vld [vmem:[#allocation15 + $0x16c4] ss:$24 sps:$4 sm:$0xff]  }
 0xb60   :  { %16118 = vmatpush1.bf16.msra.mxu1 %v19826_v60  ;;  %v19916_v60 = vld [vmem:[#allocation15 + $0x16c0] ss:$24 sps:$4 sm:$0xff]  }
 0xb61   :  { %16119 = vmatprep.subr.bf16.mxu1 %v19831_v17  ;;  %v19921_v17 = vld [vmem:[#allocation15 + $0x16f4] ss:$24 sps:$4 sm:$0xff]  }
 0xb64   :  { %16120 = vmatpush1.bf16.msra.mxu1 %v19829_v34  ;;  %v19919_v34 = vld [vmem:[#allocation15 + $0x16f0] ss:$24 sps:$4 sm:$0xff]  }
 0xb65   :  { %16121 = vmatprep.subr.bf16.mxu1 %v19834_v7  ;;  %v19924_v7 = vld [vmem:[#allocation15 + $0x1724] ss:$24 sps:$4 sm:$0xff]  }
 0xb68   :  { %16122 = vmatpush1.bf16.msra.mxu1 %v19832_v25  ;;  %v19922_v25 = vld [vmem:[#allocation15 + $0x1720] ss:$24 sps:$4 sm:$0xff]  }
 0xb69   :  { %16123 = vmatprep.subr.bf16.mxu1 %v19837_v51  ;;  %v19927_v51 = vld [vmem:[#allocation15 + $0x1754] ss:$24 sps:$4 sm:$0xff]  }
 0xb6c   :  { %16124 = vmatpush1.bf16.msra.mxu1 %v19835_v29  ;;  %v19925_v29 = vld [vmem:[#allocation15 + $0x1750] ss:$24 sps:$4 sm:$0xff]  }
 0xb6d   :  { %16125 = vmatprep.subr.bf16.mxu1 %v19840_v36  ;;  %v19930_v36 = vld [vmem:[#allocation15 + $0x1784] ss:$24 sps:$4 sm:$0xff]  }
 0xb70   :  { %16126 = vmatpush1.bf16.msra.mxu1 %v19838_v9  ;;  %v19928_v9 = vld [vmem:[#allocation15 + $0x1780] ss:$24 sps:$4 sm:$0xff]  }
 0xb71   :  { %16138 = vmatprep.subr.bf16.mxu1 %v19843_v10  ;;  %v19933_v10 = vld [vmem:[#allocation15 + $0x17b4] ss:$24 sps:$4 sm:$0xff]  }
 0xb73   :  { %16128 = vmatmul.mubr.bf16.vlgmr.msra.gmra.mrb[24].mxu1 %v20685_v18  ;;  %v19856_v18 = vld [vmem:[#allocation15 + $0x1300] ss:$24 sps:$4 sm:$0xff]  }
 0xb74   :  { %16139 = vmatpush1.bf16.msra.mxu1 %v19841_v11  ;;  %16170 = vmatprep.mubr.bf16.mxu1 %v20713_v13  ;;  %v19859_v13 = vld [vmem:[#allocation15 + $0x1330] ss:$24 sps:$4 sm:$0xff]  }
 0xb75   :  { %16140 = vmatprep.subr.bf16.mxu1 %v19846_v14  ;;  %v19931_v11 = vld [vmem:[#allocation15 + $0x17b0] ss:$24 sps:$4 sm:$0xff]   ;;  %v19936_v14 = vld [vmem:[#allocation15 + $0x17e4] ss:$24 sps:$4 sm:$0xff]  }
 0xb78   :  { %16141 = vmatpush1.bf16.msra.mxu1 %v19844_v16  ;;  %v19934_v16 = vld [vmem:[#allocation15 + $0x17e0] ss:$24 sps:$4 sm:$0xff]  }
 0xb79   :  { %16142 = vmatprep.subr.bf16.mxu1 %v19849_v21  ;;  %v11341_v21 = vrot.slane %v20750_v4, %v20521_v47 }
 0xb7c   :  { %16143 = vmatpush1.bf16.msra.mxu1 %v19847_v38  ;;  %v11345_v38 = vrot.slane %v20750_v4, %v20524_v53 }
 0xb7d   :  { %16144 = vmatprep.subr.bf16.mxu1 %v19852_v22 }
 0xb80   :  { %16145 = vmatpush1.bf16.msra.mxu1 %v19850_v15 }
 0xb81   :  { %16146 = vmatprep.subr.bf16.mxu1 %v19855_v26 }
 0xb84   :  { %16147 = vmatpush1.bf16.msra.mxu1 %v19853_v30 }
 0xb85   :  { %16148 = vmatprep.subr.bf16.mxu1 %v19858_v54 }
 0xb88   :  { %16149 = vmatpush1.bf16.msra.mxu1 %v19856_v18 }
 0xb89   :  { %16150 = vmatprep.subr.bf16.mxu1 %v19861_v55 }
 0xb8c   :  { %16151 = vmatpush1.bf16.msra.mxu1 %v19859_v13 }
 0xb8d   :  { %16152 = vmatprep.subr.bf16.mxu1 %v19864_v31 }
 0xb90   :  { %16153 = vmatpush1.bf16.msra.mxu1 %v19862_v19 }
 0xb91   :  { %16154 = vmatprep.subr.bf16.mxu1 %v19867_v61 }
 0xb94   :  { %16155 = vmatpush1.bf16.msra.mxu1 %v19865_v46 }
 0xb95   :  { %16156 = vmatprep.subr.bf16.mxu1 %v19870_v2 }
 0xb98   :  { %16157 = vmatpush1.bf16.msra.mxu1 %v19868_v20 }
 0xb99   :  { %16158 = vmatprep.subr.bf16.mxu1 %v19873_v37 }
 0xb9c   :  { %16159 = vmatpush1.bf16.msra.mxu1 %v19871_v40 }
 0xb9d   :  { %16160 = vmatprep.subr.bf16.mxu1 %v19876_v42 }
 0xba0   :  { %16161 = vmatpush1.bf16.msra.mxu1 %v19874_v35 }
 0xba1   :  { %16162 = vmatprep.subr.bf16.mxu1 %v19879_v56 }
 0xba4   :  { %16163 = vmatpush1.bf16.msra.mxu1 %v19877_v39 }
 0xba5   :  { %16164 = vmatprep.subr.bf16.mxu1 %v19882_v5 }
 0xba8   :  { %16165 = vmatpush1.bf16.msra.mxu1 %v19880_v32 }
 0xba9   :  { %16166 = vmatprep.subr.bf16.mxu1 %v19885_v49 }
 0xbac   :  { %16167 = vmatpush1.bf16.msra.mxu1 %v19883_v48 }
 0xbad   :  { %16168 = vmatprep.subr.bf16.mxu1 %v19888_v45 }
 0xbb0   :  { %16169 = vmatpush1.bf16.msra.mxu1 %v19886_v41 }
 0xbb1   :  { %16181 = vmatprep.subr.bf16.mxu1 %v19891_v63 }
 0xbb3   :  { %16171 = vmatmul.mubr.bf16.vlgmr.msra.gmra.mrb[24].mxu1 %v20710_v24  ;;  %v19904_v24 = vld [vmem:[#allocation15 + $0x1600] ss:$24 sps:$4 sm:$0xff]  }
 0xbb4   :  { %16182 = vmatpush1.bf16.msra.mxu1 %v19889_v62  ;;  %16213 = vmatprep.mubr.bf16.mxu1 %v20723_v27  ;;  %v19907_v27 = vld [vmem:[#allocation15 + $0x1630] ss:$24 sps:$4 sm:$0xff]  }
 0xbb5   :  { %16183 = vmatprep.subr.bf16.mxu1 %v19894_v0 }
 0xbb8   :  { %16184 = vmatpush1.bf16.msra.mxu1 %v19892_v50 }
 0xbb9   :  { %16185 = vmatprep.subr.bf16.mxu1 %v19897_v12 }
 0xbbc   :  { %16186 = vmatpush1.bf16.msra.mxu1 %v19895_v43 }
 0xbbd   :  { %16187 = vmatprep.subr.bf16.mxu1 %v19900_v52 }
 0xbc0   :  { %16188 = vmatpush1.bf16.msra.mxu1 %v19898_v23 }
 0xbc1   :  { %16189 = vmatprep.subr.bf16.mxu1 %v19903_v28 }
 0xbc4   :  { %16190 = vmatpush1.bf16.msra.mxu1 %v19901_v57 }
 0xbc5   :  { %16191 = vmatprep.subr.bf16.mxu1 %v19906_v58 }
 0xbc8   :  { %16192 = vmatpush1.bf16.msra.mxu1 %v19904_v24 }
 0xbc9   :  { %16193 = vmatprep.subr.bf16.mxu1 %v19909_v1 }
 0xbcc   :  { %16194 = vmatpush1.bf16.msra.mxu1 %v19907_v27 }
 0xbcd   :  { %16195 = vmatprep.subr.bf16.mxu1 %v19912_v59 }
 0xbd0   :  { %16196 = vmatpush1.bf16.msra.mxu1 %v19910_v6 }
 0xbd1   :  { %16197 = vmatprep.subr.bf16.mxu1 %v19915_v8 }
 0xbd4   :  { %16198 = vmatpush1.bf16.msra.mxu1 %v19913_v3 }
 0xbd5   :  { %16199 = vmatprep.subr.bf16.mxu1 %v19918_v33 }
 0xbd8   :  { %16200 = vmatpush1.bf16.msra.mxu1 %v19916_v60 }
 0xbd9   :  { %16201 = vmatprep.subr.bf16.mxu1 %v19921_v17 }
 0xbdc   :  { %16202 = vmatpush1.bf16.msra.mxu1 %v19919_v34 }
 0xbdd   :  { %16203 = vmatprep.subr.bf16.mxu1 %v19924_v7 }
 0xbe0   :  { %16204 = vmatpush1.bf16.msra.mxu1 %v19922_v25 }
 0xbe1   :  { %16205 = vmatprep.subr.bf16.mxu1 %v19927_v51 }
 0xbe4   :  { %16206 = vmatpush1.bf16.msra.mxu1 %v19925_v29 }
 0xbe5   :  { %16207 = vmatprep.subr.bf16.mxu1 %v19930_v36 }
 0xbe8   :  { %16208 = vmatpush1.bf16.msra.mxu1 %v19928_v9 }
 0xbe9   :  { %16209 = vmatprep.subr.bf16.mxu1 %v19933_v10 }
 0xbec   :  { %16210 = vmatpush1.bf16.msra.mxu1 %v19931_v11 }
 0xbed   :  { %16211 = vmatprep.subr.bf16.mxu1 %v19936_v14 }
 0xbf0   :  { %16212 = vmatpush1.bf16.msra.mxu1 %v19934_v16 }
 0xbf3   :  { %16214 = vmatmul.mubr.bf16.vlgmr.msra.gmra.mrb[24].mxu1 %v20721_v44 }
 0xcc6   :  { %v16215_v22 = vpop.f32.mrb[24].mxu1 }
 0xcc7   :  { %v18447_v15 = vadd.f32 %v16215_v22, %v11341_v21  ;;  %v16217_v26 = vpop.f32.mrb[25].mxu1 }
 0xcc8   :  { %v18448_v30 = vadd.f32 %v16217_v26, %v11345_v38  ;;  %v16219_v54 = vpop.f32.mrb[26].mxu1 }
 0xcc9   :  { %19953 = vtanh.f32 %v18447_v15  ;;  %v18449_v18 = vadd.f32 %v16219_v54, %v11341_v21  ;;  %v16221_v55 = vpop.f32.mrb[27].mxu1 }
 0xcca   :  { %19955 = vtanh.f32 %v18448_v30  ;;  %v18450_v13 = vadd.f32 %v16221_v55, %v11345_v38 }
 0xccb   :  { %19957 = vtanh.f32 %v18449_v18 }
 0xccc   :  { %19959 = vtanh.f32 %v18450_v13 }
 0xcd3   :  { %v19954_v31 = vpop.eup %19953 }
 0xcd4   :  { %v19956_v44 = vpop.eup %19955  ;;  %16240 = vst [vmem:[%s20820_s11 + $0x20] sm:$0xff] %v19954_v31 }
 0xcd5   :  { %v19958_v47 = vpop.eup %19957  ;;  %16241 = vst [vmem:[%s20820_s11 + $0x28] sm:$0xff] %v19956_v44 }
 0xcd6   :  { %v19960_v53 = vpop.eup %19959  ;;  %16246 = vst [vmem:[%s20820_s11 + $0x50] sm:$0xff] %v19958_v47 }
 0xcd7   :  { %16247 = vst [vmem:[%s20820_s11 + $0x58] sm:$0xff] %v19960_v53 }
 0xcd8   :  { %16252 = vsyncpa [#allocation3], 1 }
 0xcd9   :  { %16253 = vsyncpa [#allocation5], 1 }
 0xcda   :  { %16254 = vsyncpa [#allocation8], 1 }
 0xcdb   :  { %16255 = vsyncpa [#allocation11], 1 }
 0xcdc   :  { %16256 = vsyncpa [#allocation14], 1 }
 0xcdd   :  { %16257 = vsyncpa [#allocation17], 1 }

</bundles_post_ra>
